<compile_context>
chip_gen: v5e
topology: v5e:2x2
jax: 0.10.0
libtpu: 0.0.40
codegen_flags: <defaults>
</compile_context>

<pallas_src>
import functools

import jax
import jax.numpy as jnp
import numpy as np
from jax.experimental import pallas as pl
from jax.experimental.pallas import tpu as pltpu

# ---- model hyper-parameters ---------------------------------------------------
BATCH = 2
SEQ = 300          # input length (forced by fc1 in_features=280 -> 8*35)
CIN = 5            # input channels
C1, K1 = 32, 7     # conv1 (padding='same')
C2, K2 = 8, 4      # conv2
C3, K3 = 8, 3      # conv3
OUT = 2            # out_size
FC1 = 32
PAD1 = (K1 - 1) // 2   # 3 -- 'same' padding for the odd kernel

L1 = SEQ                 # 300 after conv1 ('same')
P1 = L1 // 2             # 150 after pool_1
L2 = P1 - K2 + 1         # 147 after conv2
P2 = L2 // 2             # 73  after pool_2
L3 = P2 - K3 + 1         # 71  after conv3
P3 = L3 // 2             # 35  after pool_3
assert C3 * P3 == 280    # flatten size == fc1 in_features

K1C = K1 * CIN           # 35 : conv1 im2col contraction
K1C_PAD = 48             # padded to a bf16 sublane multiple of 16


# ------------------------------ Pallas kernel ----------------------------------
def edeepvpp_kernel(nb,
                    x_ref, w1_ref, b1_ref, w2_ref, b2_ref, w3_ref, b3_ref,
                    wf1_ref, bf1_ref, wf2_ref, bf2_ref,
                    out_ref, xp_ref, h1_ref, h2_ref, h3_ref):
    # Zero the 'same'-padding halo rows of the conv1 input scratch once per step.
    xp_ref[pl.ds(0, PAD1), :] = jnp.zeros((PAD1, CIN), jnp.float32)
    xp_ref[pl.ds(PAD1 + SEQ, PAD1), :] = jnp.zeros((PAD1, CIN), jnp.float32)

    for b in range(nb):                                   # static loop over batch elems
        # ---- conv1: in-kernel zero-pad + im2col -> one bf16 MXU matmul -----------
        xp_ref[pl.ds(PAD1, SEQ), :] = x_ref[b]            # (300, 5) into padded scratch
        taps = [xp_ref[pl.ds(t, L1), :] for t in range(K1)]           # 7 x (300, 5)
        slab1 = jnp.concatenate(
            taps + [jnp.zeros((L1, K1C_PAD - K1C), jnp.float32)], axis=1)   # (300, 48)
        h1 = jnp.dot(slab1.astype(jnp.bfloat16), w1_ref[...],
                     preferred_element_type=jnp.float32)
        h1_ref[...] = jnp.maximum(h1 + b1_ref[...], 0.0)              # (300, 32) f32

        # pool_1 fused as stride-2 max reads of the conv1 epilogue buffer
        p1 = jnp.maximum(h1_ref[pl.ds(0, P1, stride=2), :],
                         h1_ref[pl.ds(1, P1, stride=2), :])           # (150, 32)

        # ---- conv2: im2col (4 x 32 lanes -> K=128) -> one matmul ------------------
        slab2 = jnp.concatenate([p1[t:t + L2, :] for t in range(K2)], axis=1)
        h2 = jnp.dot(slab2.astype(jnp.bfloat16), w2_ref[...],
                     preferred_element_type=jnp.float32)
        h2_ref[...] = jnp.maximum(h2 + b2_ref[...], 0.0)              # (147, 8)

        p2 = jnp.maximum(h2_ref[pl.ds(0, P2, stride=2), :],
                         h2_ref[pl.ds(1, P2, stride=2), :])           # (73, 8)

        # ---- conv3: im2col (3 x 8 lanes) -> one matmul ----------------------------
        slab3 = jnp.concatenate([p2[t:t + L3, :] for t in range(K3)], axis=1)
        h3 = jnp.dot(slab3.astype(jnp.bfloat16), w3_ref[...],
                     preferred_element_type=jnp.float32)
        h3_ref[...] = jnp.maximum(h3 + b3_ref[...], 0.0)              # (71, 8)

        p3 = jnp.maximum(h3_ref[pl.ds(0, P3, stride=2), :],
                         h3_ref[pl.ds(1, P3, stride=2), :])           # (35, 8)

        # ---- flatten (PyTorch channel-major order) + fc1 as ONE lane-dense matmul -
        # flat[0, c*35 + l] = p3[l, c]  ==  torch.flatten of the (8, 35) feature map,
        # so the fc1 weight is just fc1_w.T (280, 32) with no permutation.
        p3t = p3.T                                                    # (8, 35)
        flat = jnp.concatenate([p3t[c:c + 1, :] for c in range(C3)], axis=1)  # (1, 280)
        y1 = jnp.dot(flat.astype(jnp.bfloat16), wf1_ref[...],
                     preferred_element_type=jnp.float32) + bf1_ref[...]
        y1 = jnp.maximum(y1, 0.0)                                     # (1, 32)

        # ---- fc2 (lane-major output row) ------------------------------------------
        y = jnp.dot(y1.astype(jnp.bfloat16), wf2_ref[...],
                    preferred_element_type=jnp.float32) + bf2_ref[...]
        out_ref[b] = y                                                # (1, OUT)


# ------------------------------ wrapper -----------------------------------------
def _default_batch_per_step():
    # v7x has two TensorCores per chip: keep one batch element per grid step so the
    # "parallel" grid axis is split across cores.  Single-TC v5e/v6e: fold the whole
    # batch into one grid step to avoid the ~0.35us per-step pipeline overhead.
    try:
        kind = jax.devices()[0].device_kind.lower()
    except Exception:
        kind = ""
    return 1 if "v7" in kind else BATCH


def make_forward(kernel_params, batch_per_step=None):
    weights = list(kernel_params)
    nb = _default_batch_per_step() if batch_per_step is None else batch_per_step
    assert BATCH % nb == 0
    grid = (BATCH // nb,)

    def _wspec(a):
        nd = a.ndim
        return pl.BlockSpec(a.shape, lambda i, _n=nd: (0,) * _n)   # VMEM-resident weight

    grid_spec = pltpu.PrefetchScalarGridSpec(
        num_scalar_prefetch=0,
        grid=grid,
        in_specs=[pl.BlockSpec((nb, SEQ, CIN), lambda i: (i, 0, 0))]   # raw f32 input
                 + [_wspec(a) for a in weights],
        out_specs=pl.BlockSpec((nb, 1, OUT), lambda i: (i, 0, 0)),
        scratch_shapes=[
            pltpu.VMEM((SEQ + 2 * PAD1, CIN), jnp.float32),  # zero-padded conv1 input
            pltpu.VMEM((L1, C1), jnp.float32),               # conv1 ReLU output
            pltpu.VMEM((L2, C2), jnp.float32),               # conv2 ReLU output
            pltpu.VMEM((L3, C3), jnp.float32),               # conv3 ReLU output
        ],
    )

    call = pl.pallas_call(
        functools.partial(edeepvpp_kernel, nb),
        out_shape=jax.ShapeDtypeStruct((BATCH, 1, OUT), jnp.float32),
        grid_spec=grid_spec,
        compiler_params=pltpu.CompilerParams(dimension_semantics=("parallel",)),
    )

    @jax.jit
    def forward(x):                                   # x: (B, SEQ, CIN) f32 -- raw input
        return call(x, *weights).reshape(BATCH, OUT)

    return forward


# ------------------------------ parameters --------------------------------------
def init_params(key):
    ks = iter(jax.random.split(key, 16))

    def rnd(shape, scale=0.1):
        return (scale * jax.random.normal(next(ks), shape)).astype(jnp.float32)

    # PyTorch-convention parameter tensors
    c1_w, c1_b = rnd((C1, CIN, K1)), rnd((C1,))
    c2_w, c2_b = rnd((C2, C1, K2)), rnd((C2,))
    c3_w, c3_b = rnd((C3, C2, K3)), rnd((C3,))
    fc1_w, fc1_b = rnd((FC1, C3 * P3)), rnd((FC1,))
    fc2_w, fc2_b = rnd((OUT, FC1)), rnd((OUT,))

    torch_params = dict(c1_w=c1_w, c1_b=c1_b, c2_w=c2_w, c2_b=c2_b,
                        c3_w=c3_w, c3_b=c3_b, fc1_w=fc1_w, fc1_b=fc1_b,
                        fc2_w=fc2_w, fc2_b=fc2_b)

    def conv_w(w):   # (Cout, Cin, K) -> (K*Cin, Cout), row index t*Cin + c (im2col)
        k, cin, cout = w.shape[2], w.shape[1], w.shape[0]
        return jnp.transpose(w, (2, 1, 0)).reshape(k * cin, cout)

    # conv1 weight zero-padded from 35 -> 48 contraction rows (bf16 sublane multiple)
    w1 = jnp.concatenate(
        [conv_w(c1_w), jnp.zeros((K1C_PAD - K1C, C1), jnp.float32)], axis=0)

    kernel_params = (
        w1.astype(jnp.bfloat16),                   # (48, 32)
        c1_b.reshape(1, C1),                       # (1, 32) f32
        conv_w(c2_w).astype(jnp.bfloat16),         # (128, 8)
        c2_b.reshape(1, C2),                       # (1, 8)
        conv_w(c3_w).astype(jnp.bfloat16),         # (24, 8)
        c3_b.reshape(1, C3),                       # (1, 8)
        fc1_w.T.astype(jnp.bfloat16),              # (280, 32): rows c*35+l = torch flatten
        fc1_b.reshape(1, FC1),                     # (1, 32)
        fc2_w.T.astype(jnp.bfloat16),              # (32, 2)
        fc2_b.reshape(1, OUT),                     # (1, 2)
    )
    return torch_params, kernel_params


# ------------------------------ pure-JAX reference ------------------------------
def reference_forward(x, p):
    def conv_relu(h, w, b, pad=0):                 # h: (B, L, Cin), w: (Cout, Cin, K)
        if pad:
            h = jnp.pad(h, ((0, 0), (pad, pad), (0, 0)))
        k = w.shape[2]
        lo = h.shape[1] - k + 1
        acc = b[None, None, :]
        for t in range(k):
            acc = acc + jnp.einsum('blc,oc->blo', h[:, t:t + lo, :], w[:, :, t])
        return jax.nn.relu(acc)

    def pool(h):
        lp = h.shape[1] // 2
        return jnp.maximum(h[:, 0:2 * lp:2, :], h[:, 1:2 * lp:2, :])

    h = pool(conv_relu(x, p['c1_w'], p['c1_b'], pad=PAD1))   # (B, 150, 32)
    h = pool(conv_relu(h, p['c2_w'], p['c2_b']))             # (B, 73, 8)
    h = pool(conv_relu(h, p['c3_w'], p['c3_b']))             # (B, 35, 8)
    flat = jnp.swapaxes(h, 1, 2).reshape(h.shape[0], -1)     # channel-major flatten
    y1 = jax.nn.relu(flat @ p['fc1_w'].T + p['fc1_b'])
    return y1 @ p['fc2_w'].T + p['fc2_b']                    # (B, OUT)


# ------------------------------ main ---------------------------------------------
if __name__ == "__main__":
    key = jax.random.PRNGKey(0)
    pkey, xkey = jax.random.split(key)
    torch_params, kernel_params = init_params(pkey)

    x = jax.random.normal(xkey, (BATCH, SEQ, CIN), dtype=jnp.float32)

    forward = make_forward(kernel_params)
    y = jax.block_until_ready(forward(x))                 # (B, OUT)

    y_ref = reference_forward(x, torch_params)
    assert y.shape == (BATCH, OUT)
    np.testing.assert_allclose(np.asarray(y), np.asarray(y_ref), rtol=2e-2, atol=2e-2)
    print("KERNEL_OK")
</pallas_src>

<mosaic_0001>
module attributes {stable_mosaic.version = 11 : i64} {
  func.func @edeepvpp_kernel(%arg0: i32, %arg1: memref<2x300x5xf32, #tpu.memory_space<vmem>>, %arg2: memref<48x32xbf16, #tpu.memory_space<vmem>>, %arg3: memref<1x32xf32, #tpu.memory_space<vmem>>, %arg4: memref<128x8xbf16, #tpu.memory_space<vmem>>, %arg5: memref<1x8xf32, #tpu.memory_space<vmem>>, %arg6: memref<24x8xbf16, #tpu.memory_space<vmem>>, %arg7: memref<1x8xf32, #tpu.memory_space<vmem>>, %arg8: memref<280x32xbf16, #tpu.memory_space<vmem>>, %arg9: memref<1x32xf32, #tpu.memory_space<vmem>>, %arg10: memref<32x2xbf16, #tpu.memory_space<vmem>>, %arg11: memref<1x2xf32, #tpu.memory_space<vmem>>, %arg12: memref<2x1x2xf32, #tpu.memory_space<vmem>>, %arg13: memref<306x5xf32, #tpu.memory_space<vmem>>, %arg14: memref<300x32xf32, #tpu.memory_space<vmem>>, %arg15: memref<147x8xf32, #tpu.memory_space<vmem>>, %arg16: memref<71x8xf32, #tpu.memory_space<vmem>>) attributes {dimension_semantics = [#tpu.dimension_semantics<parallel>], iteration_bounds = array<i64: 1>, scalar_prefetch = 0 : i64, scratch_operands = 4 : i64, tpu.core_type = #tpu.core_type<tc>, window_params = [{transform_indices = @transform_0, window_bounds = array<i64: 2, 300, 5>}, {pipeline_mode = #tpu.pipeline_mode<synchronous>, transform_indices = @transform_1, window_bounds = array<i64: 48, 32>}, {pipeline_mode = #tpu.pipeline_mode<synchronous>, transform_indices = @transform_2, window_bounds = array<i64: 1, 32>}, {pipeline_mode = #tpu.pipeline_mode<synchronous>, transform_indices = @transform_3, window_bounds = array<i64: 128, 8>}, {pipeline_mode = #tpu.pipeline_mode<synchronous>, transform_indices = @transform_4, window_bounds = array<i64: 1, 8>}, {pipeline_mode = #tpu.pipeline_mode<synchronous>, transform_indices = @transform_5, window_bounds = array<i64: 24, 8>}, {pipeline_mode = #tpu.pipeline_mode<synchronous>, transform_indices = @transform_6, window_bounds = array<i64: 1, 8>}, {pipeline_mode = #tpu.pipeline_mode<synchronous>, transform_indices = @transform_7, window_bounds = array<i64: 280, 32>}, {pipeline_mode = #tpu.pipeline_mode<synchronous>, transform_indices = @transform_8, window_bounds = array<i64: 1, 32>}, {pipeline_mode = #tpu.pipeline_mode<synchronous>, transform_indices = @transform_9, window_bounds = array<i64: 32, 2>}, {pipeline_mode = #tpu.pipeline_mode<synchronous>, transform_indices = @transform_10, window_bounds = array<i64: 1, 2>}, {transform_indices = @transform_11, window_bounds = array<i64: 2, 1, 2>}]} {
    %cst = arith.constant 0.000000e+00 : f32
    %0 = vector.broadcast %cst : f32 to vector<3x5xf32>
    %c0 = arith.constant 0 : index
    %c0_0 = arith.constant 0 : index
    %1 = vector.load %arg13[%c0, %c0_0] : memref<306x5xf32, #tpu.memory_space<vmem>>, vector<3x5xf32>
    tpu.vector_store %arg13[%c0, %c0_0], %0 {strides = array<i32>} : memref<306x5xf32, #tpu.memory_space<vmem>>, vector<3x5xf32>,
    %cst_1 = arith.constant 0.000000e+00 : f32
    %2 = vector.broadcast %cst_1 : f32 to vector<3x5xf32>
    %c303 = arith.constant 303 : index
    %c0_2 = arith.constant 0 : index
    %3 = vector.load %arg13[%c303, %c0_2] : memref<306x5xf32, #tpu.memory_space<vmem>>, vector<3x5xf32>
    tpu.vector_store %arg13[%c303, %c0_2], %2 {strides = array<i32>} : memref<306x5xf32, #tpu.memory_space<vmem>>, vector<3x5xf32>,
    %c0_3 = arith.constant 0 : index
    %c0_4 = arith.constant 0 : index
    %c0_5 = arith.constant 0 : index
    %4 = vector.load %arg1[%c0_3, %c0_4, %c0_5] : memref<2x300x5xf32, #tpu.memory_space<vmem>>, vector<1x300x5xf32>
    %5 = vector.shape_cast %4 : vector<1x300x5xf32> to vector<300x5xf32>
    %c3 = arith.constant 3 : index
    %c0_6 = arith.constant 0 : index
    %6 = vector.load %arg13[%c3, %c0_6] : memref<306x5xf32, #tpu.memory_space<vmem>>, vector<300x5xf32>
    tpu.vector_store %arg13[%c3, %c0_6], %5 {strides = array<i32>} : memref<306x5xf32, #tpu.memory_space<vmem>>, vector<300x5xf32>,
    %c0_7 = arith.constant 0 : index
    %c0_8 = arith.constant 0 : index
    %7 = vector.load %arg13[%c0_7, %c0_8] : memref<306x5xf32, #tpu.memory_space<vmem>>, vector<300x5xf32>
    %c1 = arith.constant 1 : index
    %c0_9 = arith.constant 0 : index
    %8 = vector.load %arg13[%c1, %c0_9] : memref<306x5xf32, #tpu.memory_space<vmem>>, vector<300x5xf32>
    %c2 = arith.constant 2 : index
    %c0_10 = arith.constant 0 : index
    %9 = vector.load %arg13[%c2, %c0_10] : memref<306x5xf32, #tpu.memory_space<vmem>>, vector<300x5xf32>
    %c3_11 = arith.constant 3 : index
    %c0_12 = arith.constant 0 : index
    %10 = vector.load %arg13[%c3_11, %c0_12] : memref<306x5xf32, #tpu.memory_space<vmem>>, vector<300x5xf32>
    %c4 = arith.constant 4 : index
    %c0_13 = arith.constant 0 : index
    %11 = vector.load %arg13[%c4, %c0_13] : memref<306x5xf32, #tpu.memory_space<vmem>>, vector<300x5xf32>
    %c5 = arith.constant 5 : index
    %c0_14 = arith.constant 0 : index
    %12 = vector.load %arg13[%c5, %c0_14] : memref<306x5xf32, #tpu.memory_space<vmem>>, vector<300x5xf32>
    %c6 = arith.constant 6 : index
    %c0_15 = arith.constant 0 : index
    %13 = vector.load %arg13[%c6, %c0_15] : memref<306x5xf32, #tpu.memory_space<vmem>>, vector<300x5xf32>
    %cst_16 = arith.constant 0.000000e+00 : f32
    %14 = vector.broadcast %cst_16 : f32 to vector<300x13xf32>
    %15 = tpu.concatenate %7, %8, %9, %10, %11, %12, %13, %14 in 1 : vector<300x5xf32>, vector<300x5xf32>, vector<300x5xf32>, vector<300x5xf32>, vector<300x5xf32>, vector<300x5xf32>, vector<300x5xf32>, vector<300x13xf32> -> vector<300x48xf32>
    %16 = arith.truncf %15 : vector<300x48xf32> to vector<300x48xbf16>
    %c0_17 = arith.constant 0 : index
    %c0_18 = arith.constant 0 : index
    %17 = vector.load %arg2[%c0_17, %c0_18] : memref<48x32xbf16, #tpu.memory_space<vmem>>, vector<48x32xbf16>
    %cst_19 = arith.constant dense<0.000000e+00> : vector<300x32xf32>
    %18 = tpu.matmul %16, %17, %cst_19 {dimension_numbers = #tpu.dot_dimension_numbers<[1], [0], [0], [1], [0, 0, 1, 1], [], []>} : vector<300x48xbf16>, vector<48x32xbf16>, vector<300x32xf32> -> vector<300x32xf32>
    %c0_20 = arith.constant 0 : index
    %c0_21 = arith.constant 0 : index
    %19 = vector.load %arg3[%c0_20, %c0_21] : memref<1x32xf32, #tpu.memory_space<vmem>>, vector<1x32xf32>
    %20 = vector.broadcast %19 : vector<1x32xf32> to vector<300x32xf32>
    %21 = arith.addf %18, %20 : vector<300x32xf32>
    %cst_22 = arith.constant 0.000000e+00 : f32
    %22 = vector.broadcast %cst_22 : f32 to vector<300x32xf32>
    %23 = arith.maximumf %21, %22 : vector<300x32xf32>
    %c0_23 = arith.constant 0 : index
    %c0_24 = arith.constant 0 : index
    %24 = vector.load %arg14[%c0_23, %c0_24] : memref<300x32xf32, #tpu.memory_space<vmem>>, vector<300x32xf32>
    tpu.vector_store %arg14[%c0_23, %c0_24], %23 {strides = array<i32>} : memref<300x32xf32, #tpu.memory_space<vmem>>, vector<300x32xf32>,
    %c0_25 = arith.constant 0 : index
    %c0_26 = arith.constant 0 : index
    %25 = tpu.strided_load %arg14[%c0_25, %c0_26] {strides = array<i32: 2, 1>} : memref<300x32xf32, #tpu.memory_space<vmem>>, vector<150x32xf32>
    %c1_27 = arith.constant 1 : index
    %c0_28 = arith.constant 0 : index
    %26 = tpu.strided_load %arg14[%c1_27, %c0_28] {strides = array<i32: 2, 1>} : memref<300x32xf32, #tpu.memory_space<vmem>>, vector<150x32xf32>
    %27 = arith.maximumf %25, %26 : vector<150x32xf32>
    %28 = vector.extract_strided_slice %27 {offsets = [0, 0], sizes = [147, 32], strides = [1, 1]} : vector<150x32xf32> to vector<147x32xf32>
    %29 = vector.extract_strided_slice %27 {offsets = [1, 0], sizes = [147, 32], strides = [1, 1]} : vector<150x32xf32> to vector<147x32xf32>
    %30 = vector.extract_strided_slice %27 {offsets = [2, 0], sizes = [147, 32], strides = [1, 1]} : vector<150x32xf32> to vector<147x32xf32>
    %31 = vector.extract_strided_slice %27 {offsets = [3, 0], sizes = [147, 32], strides = [1, 1]} : vector<150x32xf32> to vector<147x32xf32>
    %32 = tpu.concatenate %28, %29, %30, %31 in 1 : vector<147x32xf32>, vector<147x32xf32>, vector<147x32xf32>, vector<147x32xf32> -> vector<147x128xf32>
    %33 = arith.truncf %32 : vector<147x128xf32> to vector<147x128xbf16>
    %c0_29 = arith.constant 0 : index
    %c0_30 = arith.constant 0 : index
    %34 = vector.load %arg4[%c0_29, %c0_30] : memref<128x8xbf16, #tpu.memory_space<vmem>>, vector<128x8xbf16>
    %cst_31 = arith.constant dense<0.000000e+00> : vector<147x8xf32>
    %35 = tpu.matmul %33, %34, %cst_31 {dimension_numbers = #tpu.dot_dimension_numbers<[1], [0], [0], [1], [0, 0, 1, 1], [], []>} : vector<147x128xbf16>, vector<128x8xbf16>, vector<147x8xf32> -> vector<147x8xf32>
    %c0_32 = arith.constant 0 : index
    %c0_33 = arith.constant 0 : index
    %36 = vector.load %arg5[%c0_32, %c0_33] : memref<1x8xf32, #tpu.memory_space<vmem>>, vector<1x8xf32>
    %37 = vector.broadcast %36 : vector<1x8xf32> to vector<147x8xf32>
    %38 = arith.addf %35, %37 : vector<147x8xf32>
    %cst_34 = arith.constant 0.000000e+00 : f32
    %39 = vector.broadcast %cst_34 : f32 to vector<147x8xf32>
    %40 = arith.maximumf %38, %39 : vector<147x8xf32>
    %c0_35 = arith.constant 0 : index
    %c0_36 = arith.constant 0 : index
    %41 = vector.load %arg15[%c0_35, %c0_36] : memref<147x8xf32, #tpu.memory_space<vmem>>, vector<147x8xf32>
    tpu.vector_store %arg15[%c0_35, %c0_36], %40 {strides = array<i32>} : memref<147x8xf32, #tpu.memory_space<vmem>>, vector<147x8xf32>,
    %c0_37 = arith.constant 0 : index
    %c0_38 = arith.constant 0 : index
    %42 = tpu.strided_load %arg15[%c0_37, %c0_38] {strides = array<i32: 2, 1>} : memref<147x8xf32, #tpu.memory_space<vmem>>, vector<73x8xf32>
    %c1_39 = arith.constant 1 : index
    %c0_40 = arith.constant 0 : index
    %43 = tpu.strided_load %arg15[%c1_39, %c0_40] {strides = array<i32: 2, 1>} : memref<147x8xf32, #tpu.memory_space<vmem>>, vector<73x8xf32>
    %44 = arith.maximumf %42, %43 : vector<73x8xf32>
    %45 = vector.extract_strided_slice %44 {offsets = [0, 0], sizes = [71, 8], strides = [1, 1]} : vector<73x8xf32> to vector<71x8xf32>
    %46 = vector.extract_strided_slice %44 {offsets = [1, 0], sizes = [71, 8], strides = [1, 1]} : vector<73x8xf32> to vector<71x8xf32>
    %47 = vector.extract_strided_slice %44 {offsets = [2, 0], sizes = [71, 8], strides = [1, 1]} : vector<73x8xf32> to vector<71x8xf32>
    %48 = tpu.concatenate %45, %46, %47 in 1 : vector<71x8xf32>, vector<71x8xf32>, vector<71x8xf32> -> vector<71x24xf32>
    %49 = arith.truncf %48 : vector<71x24xf32> to vector<71x24xbf16>
    %c0_41 = arith.constant 0 : index
    %c0_42 = arith.constant 0 : index
    %50 = vector.load %arg6[%c0_41, %c0_42] : memref<24x8xbf16, #tpu.memory_space<vmem>>, vector<24x8xbf16>
    %cst_43 = arith.constant dense<0.000000e+00> : vector<71x8xf32>
    %51 = tpu.matmul %49, %50, %cst_43 {dimension_numbers = #tpu.dot_dimension_numbers<[1], [0], [0], [1], [0, 0, 1, 1], [], []>} : vector<71x24xbf16>, vector<24x8xbf16>, vector<71x8xf32> -> vector<71x8xf32>
    %c0_44 = arith.constant 0 : index
    %c0_45 = arith.constant 0 : index
    %52 = vector.load %arg7[%c0_44, %c0_45] : memref<1x8xf32, #tpu.memory_space<vmem>>, vector<1x8xf32>
    %53 = vector.broadcast %52 : vector<1x8xf32> to vector<71x8xf32>
    %54 = arith.addf %51, %53 : vector<71x8xf32>
    %cst_46 = arith.constant 0.000000e+00 : f32
    %55 = vector.broadcast %cst_46 : f32 to vector<71x8xf32>
    %56 = arith.maximumf %54, %55 : vector<71x8xf32>
    %c0_47 = arith.constant 0 : index
    %c0_48 = arith.constant 0 : index
    %57 = vector.load %arg16[%c0_47, %c0_48] : memref<71x8xf32, #tpu.memory_space<vmem>>, vector<71x8xf32>
    tpu.vector_store %arg16[%c0_47, %c0_48], %56 {strides = array<i32>} : memref<71x8xf32, #tpu.memory_space<vmem>>, vector<71x8xf32>,
    %c0_49 = arith.constant 0 : index
    %c0_50 = arith.constant 0 : index
    %58 = tpu.strided_load %arg16[%c0_49, %c0_50] {strides = array<i32: 2, 1>} : memref<71x8xf32, #tpu.memory_space<vmem>>, vector<35x8xf32>
    %c1_51 = arith.constant 1 : index
    %c0_52 = arith.constant 0 : index
    %59 = tpu.strided_load %arg16[%c1_51, %c0_52] {strides = array<i32: 2, 1>} : memref<71x8xf32, #tpu.memory_space<vmem>>, vector<35x8xf32>
    %60 = arith.maximumf %58, %59 : vector<35x8xf32>
    %61 = tpu.transpose %60, [1, 0] : vector<35x8xf32> -> vector<8x35xf32>
    %62 = vector.extract_strided_slice %61 {offsets = [0, 0], sizes = [1, 35], strides = [1, 1]} : vector<8x35xf32> to vector<1x35xf32>
    %63 = vector.extract_strided_slice %61 {offsets = [1, 0], sizes = [1, 35], strides = [1, 1]} : vector<8x35xf32> to vector<1x35xf32>
    %64 = vector.extract_strided_slice %61 {offsets = [2, 0], sizes = [1, 35], strides = [1, 1]} : vector<8x35xf32> to vector<1x35xf32>
    %65 = vector.extract_strided_slice %61 {offsets = [3, 0], sizes = [1, 35], strides = [1, 1]} : vector<8x35xf32> to vector<1x35xf32>
    %66 = vector.extract_strided_slice %61 {offsets = [4, 0], sizes = [1, 35], strides = [1, 1]} : vector<8x35xf32> to vector<1x35xf32>
    %67 = vector.extract_strided_slice %61 {offsets = [5, 0], sizes = [1, 35], strides = [1, 1]} : vector<8x35xf32> to vector<1x35xf32>
    %68 = vector.extract_strided_slice %61 {offsets = [6, 0], sizes = [1, 35], strides = [1, 1]} : vector<8x35xf32> to vector<1x35xf32>
    %69 = vector.extract_strided_slice %61 {offsets = [7, 0], sizes = [1, 35], strides = [1, 1]} : vector<8x35xf32> to vector<1x35xf32>
    %70 = tpu.concatenate %62, %63, %64, %65, %66, %67, %68, %69 in 1 : vector<1x35xf32>, vector<1x35xf32>, vector<1x35xf32>, vector<1x35xf32>, vector<1x35xf32>, vector<1x35xf32>, vector<1x35xf32>, vector<1x35xf32> -> vector<1x280xf32>
    %71 = arith.truncf %70 : vector<1x280xf32> to vector<1x280xbf16>
    %c0_53 = arith.constant 0 : index
    %c0_54 = arith.constant 0 : index
    %72 = vector.load %arg8[%c0_53, %c0_54] : memref<280x32xbf16, #tpu.memory_space<vmem>>, vector<280x32xbf16>
    %cst_55 = arith.constant dense<0.000000e+00> : vector<1x32xf32>
    %73 = tpu.matmul %71, %72, %cst_55 {dimension_numbers = #tpu.dot_dimension_numbers<[1], [0], [0], [1], [0, 0, 1, 1], [], []>} : vector<1x280xbf16>, vector<280x32xbf16>, vector<1x32xf32> -> vector<1x32xf32>
    %c0_56 = arith.constant 0 : index
    %c0_57 = arith.constant 0 : index
    %74 = vector.load %arg9[%c0_56, %c0_57] : memref<1x32xf32, #tpu.memory_space<vmem>>, vector<1x32xf32>
    %75 = arith.addf %73, %74 : vector<1x32xf32>
    %cst_58 = arith.constant 0.000000e+00 : f32
    %76 = vector.broadcast %cst_58 : f32 to vector<1x32xf32>
    %77 = arith.maximumf %75, %76 : vector<1x32xf32>
    %78 = arith.truncf %77 : vector<1x32xf32> to vector<1x32xbf16>
    %c0_59 = arith.constant 0 : index
    %c0_60 = arith.constant 0 : index
    %79 = vector.load %arg10[%c0_59, %c0_60] : memref<32x2xbf16, #tpu.memory_space<vmem>>, vector<32x2xbf16>
    %cst_61 = arith.constant dense<0.000000e+00> : vector<1x2xf32>
    %80 = tpu.matmul %78, %79, %cst_61 {dimension_numbers = #tpu.dot_dimension_numbers<[1], [0], [0], [1], [0, 0, 1, 1], [], []>} : vector<1x32xbf16>, vector<32x2xbf16>, vector<1x2xf32> -> vector<1x2xf32>
    %c0_62 = arith.constant 0 : index
    %c0_63 = arith.constant 0 : index
    %81 = vector.load %arg11[%c0_62, %c0_63] : memref<1x2xf32, #tpu.memory_space<vmem>>, vector<1x2xf32>
    %82 = arith.addf %80, %81 : vector<1x2xf32>
    %c0_64 = arith.constant 0 : index
    %c0_65 = arith.constant 0 : index
    %c0_66 = arith.constant 0 : index
    %83 = vector.load %arg12[%c0_64, %c0_65, %c0_66] : memref<2x1x2xf32, #tpu.memory_space<vmem>>, vector<1x1x2xf32>
    %84 = vector.shape_cast %83 : vector<1x1x2xf32> to vector<1x2xf32>
    %85 = vector.shape_cast %82 : vector<1x2xf32> to vector<1x1x2xf32>
    tpu.vector_store %arg12[%c0_64, %c0_65, %c0_66], %85 {strides = array<i32>} : memref<2x1x2xf32, #tpu.memory_space<vmem>>, vector<1x1x2xf32>,
    %c1_67 = arith.constant 1 : index
    %c0_68 = arith.constant 0 : index
    %c0_69 = arith.constant 0 : index
    %86 = vector.load %arg1[%c1_67, %c0_68, %c0_69] : memref<2x300x5xf32, #tpu.memory_space<vmem>>, vector<1x300x5xf32>
    %87 = vector.shape_cast %86 : vector<1x300x5xf32> to vector<300x5xf32>
    %c3_70 = arith.constant 3 : index
    %c0_71 = arith.constant 0 : index
    %88 = vector.load %arg13[%c3_70, %c0_71] : memref<306x5xf32, #tpu.memory_space<vmem>>, vector<300x5xf32>
    tpu.vector_store %arg13[%c3_70, %c0_71], %87 {strides = array<i32>} : memref<306x5xf32, #tpu.memory_space<vmem>>, vector<300x5xf32>,
    %c0_72 = arith.constant 0 : index
    %c0_73 = arith.constant 0 : index
    %89 = vector.load %arg13[%c0_72, %c0_73] : memref<306x5xf32, #tpu.memory_space<vmem>>, vector<300x5xf32>
    %c1_74 = arith.constant 1 : index
    %c0_75 = arith.constant 0 : index
    %90 = vector.load %arg13[%c1_74, %c0_75] : memref<306x5xf32, #tpu.memory_space<vmem>>, vector<300x5xf32>
    %c2_76 = arith.constant 2 : index
    %c0_77 = arith.constant 0 : index
    %91 = vector.load %arg13[%c2_76, %c0_77] : memref<306x5xf32, #tpu.memory_space<vmem>>, vector<300x5xf32>
    %c3_78 = arith.constant 3 : index
    %c0_79 = arith.constant 0 : index
    %92 = vector.load %arg13[%c3_78, %c0_79] : memref<306x5xf32, #tpu.memory_space<vmem>>, vector<300x5xf32>
    %c4_80 = arith.constant 4 : index
    %c0_81 = arith.constant 0 : index
    %93 = vector.load %arg13[%c4_80, %c0_81] : memref<306x5xf32, #tpu.memory_space<vmem>>, vector<300x5xf32>
    %c5_82 = arith.constant 5 : index
    %c0_83 = arith.constant 0 : index
    %94 = vector.load %arg13[%c5_82, %c0_83] : memref<306x5xf32, #tpu.memory_space<vmem>>, vector<300x5xf32>
    %c6_84 = arith.constant 6 : index
    %c0_85 = arith.constant 0 : index
    %95 = vector.load %arg13[%c6_84, %c0_85] : memref<306x5xf32, #tpu.memory_space<vmem>>, vector<300x5xf32>
    %cst_86 = arith.constant 0.000000e+00 : f32
    %96 = vector.broadcast %cst_86 : f32 to vector<300x13xf32>
    %97 = tpu.concatenate %89, %90, %91, %92, %93, %94, %95, %96 in 1 : vector<300x5xf32>, vector<300x5xf32>, vector<300x5xf32>, vector<300x5xf32>, vector<300x5xf32>, vector<300x5xf32>, vector<300x5xf32>, vector<300x13xf32> -> vector<300x48xf32>
    %98 = arith.truncf %97 : vector<300x48xf32> to vector<300x48xbf16>
    %c0_87 = arith.constant 0 : index
    %c0_88 = arith.constant 0 : index
    %99 = vector.load %arg2[%c0_87, %c0_88] : memref<48x32xbf16, #tpu.memory_space<vmem>>, vector<48x32xbf16>
    %cst_89 = arith.constant dense<0.000000e+00> : vector<300x32xf32>
    %100 = tpu.matmul %98, %99, %cst_89 {dimension_numbers = #tpu.dot_dimension_numbers<[1], [0], [0], [1], [0, 0, 1, 1], [], []>} : vector<300x48xbf16>, vector<48x32xbf16>, vector<300x32xf32> -> vector<300x32xf32>
    %c0_90 = arith.constant 0 : index
    %c0_91 = arith.constant 0 : index
    %101 = vector.load %arg3[%c0_90, %c0_91] : memref<1x32xf32, #tpu.memory_space<vmem>>, vector<1x32xf32>
    %102 = vector.broadcast %101 : vector<1x32xf32> to vector<300x32xf32>
    %103 = arith.addf %100, %102 : vector<300x32xf32>
    %cst_92 = arith.constant 0.000000e+00 : f32
    %104 = vector.broadcast %cst_92 : f32 to vector<300x32xf32>
    %105 = arith.maximumf %103, %104 : vector<300x32xf32>
    %c0_93 = arith.constant 0 : index
    %c0_94 = arith.constant 0 : index
    %106 = vector.load %arg14[%c0_93, %c0_94] : memref<300x32xf32, #tpu.memory_space<vmem>>, vector<300x32xf32>
    tpu.vector_store %arg14[%c0_93, %c0_94], %105 {strides = array<i32>} : memref<300x32xf32, #tpu.memory_space<vmem>>, vector<300x32xf32>,
    %c0_95 = arith.constant 0 : index
    %c0_96 = arith.constant 0 : index
    %107 = tpu.strided_load %arg14[%c0_95, %c0_96] {strides = array<i32: 2, 1>} : memref<300x32xf32, #tpu.memory_space<vmem>>, vector<150x32xf32>
    %c1_97 = arith.constant 1 : index
    %c0_98 = arith.constant 0 : index
    %108 = tpu.strided_load %arg14[%c1_97, %c0_98] {strides = array<i32: 2, 1>} : memref<300x32xf32, #tpu.memory_space<vmem>>, vector<150x32xf32>
    %109 = arith.maximumf %107, %108 : vector<150x32xf32>
    %110 = vector.extract_strided_slice %109 {offsets = [0, 0], sizes = [147, 32], strides = [1, 1]} : vector<150x32xf32> to vector<147x32xf32>
    %111 = vector.extract_strided_slice %109 {offsets = [1, 0], sizes = [147, 32], strides = [1, 1]} : vector<150x32xf32> to vector<147x32xf32>
    %112 = vector.extract_strided_slice %109 {offsets = [2, 0], sizes = [147, 32], strides = [1, 1]} : vector<150x32xf32> to vector<147x32xf32>
    %113 = vector.extract_strided_slice %109 {offsets = [3, 0], sizes = [147, 32], strides = [1, 1]} : vector<150x32xf32> to vector<147x32xf32>
    %114 = tpu.concatenate %110, %111, %112, %113 in 1 : vector<147x32xf32>, vector<147x32xf32>, vector<147x32xf32>, vector<147x32xf32> -> vector<147x128xf32>
    %115 = arith.truncf %114 : vector<147x128xf32> to vector<147x128xbf16>
    %c0_99 = arith.constant 0 : index
    %c0_100 = arith.constant 0 : index
    %116 = vector.load %arg4[%c0_99, %c0_100] : memref<128x8xbf16, #tpu.memory_space<vmem>>, vector<128x8xbf16>
    %cst_101 = arith.constant dense<0.000000e+00> : vector<147x8xf32>
    %117 = tpu.matmul %115, %116, %cst_101 {dimension_numbers = #tpu.dot_dimension_numbers<[1], [0], [0], [1], [0, 0, 1, 1], [], []>} : vector<147x128xbf16>, vector<128x8xbf16>, vector<147x8xf32> -> vector<147x8xf32>
    %c0_102 = arith.constant 0 : index
    %c0_103 = arith.constant 0 : index
    %118 = vector.load %arg5[%c0_102, %c0_103] : memref<1x8xf32, #tpu.memory_space<vmem>>, vector<1x8xf32>
    %119 = vector.broadcast %118 : vector<1x8xf32> to vector<147x8xf32>
    %120 = arith.addf %117, %119 : vector<147x8xf32>
    %cst_104 = arith.constant 0.000000e+00 : f32
    %121 = vector.broadcast %cst_104 : f32 to vector<147x8xf32>
    %122 = arith.maximumf %120, %121 : vector<147x8xf32>
    %c0_105 = arith.constant 0 : index
    %c0_106 = arith.constant 0 : index
    %123 = vector.load %arg15[%c0_105, %c0_106] : memref<147x8xf32, #tpu.memory_space<vmem>>, vector<147x8xf32>
    tpu.vector_store %arg15[%c0_105, %c0_106], %122 {strides = array<i32>} : memref<147x8xf32, #tpu.memory_space<vmem>>, vector<147x8xf32>,
    %c0_107 = arith.constant 0 : index
    %c0_108 = arith.constant 0 : index
    %124 = tpu.strided_load %arg15[%c0_107, %c0_108] {strides = array<i32: 2, 1>} : memref<147x8xf32, #tpu.memory_space<vmem>>, vector<73x8xf32>
    %c1_109 = arith.constant 1 : index
    %c0_110 = arith.constant 0 : index
    %125 = tpu.strided_load %arg15[%c1_109, %c0_110] {strides = array<i32: 2, 1>} : memref<147x8xf32, #tpu.memory_space<vmem>>, vector<73x8xf32>
    %126 = arith.maximumf %124, %125 : vector<73x8xf32>
    %127 = vector.extract_strided_slice %126 {offsets = [0, 0], sizes = [71, 8], strides = [1, 1]} : vector<73x8xf32> to vector<71x8xf32>
    %128 = vector.extract_strided_slice %126 {offsets = [1, 0], sizes = [71, 8], strides = [1, 1]} : vector<73x8xf32> to vector<71x8xf32>
    %129 = vector.extract_strided_slice %126 {offsets = [2, 0], sizes = [71, 8], strides = [1, 1]} : vector<73x8xf32> to vector<71x8xf32>
    %130 = tpu.concatenate %127, %128, %129 in 1 : vector<71x8xf32>, vector<71x8xf32>, vector<71x8xf32> -> vector<71x24xf32>
    %131 = arith.truncf %130 : vector<71x24xf32> to vector<71x24xbf16>
    %c0_111 = arith.constant 0 : index
    %c0_112 = arith.constant 0 : index
    %132 = vector.load %arg6[%c0_111, %c0_112] : memref<24x8xbf16, #tpu.memory_space<vmem>>, vector<24x8xbf16>
    %cst_113 = arith.constant dense<0.000000e+00> : vector<71x8xf32>
    %133 = tpu.matmul %131, %132, %cst_113 {dimension_numbers = #tpu.dot_dimension_numbers<[1], [0], [0], [1], [0, 0, 1, 1], [], []>} : vector<71x24xbf16>, vector<24x8xbf16>, vector<71x8xf32> -> vector<71x8xf32>
    %c0_114 = arith.constant 0 : index
    %c0_115 = arith.constant 0 : index
    %134 = vector.load %arg7[%c0_114, %c0_115] : memref<1x8xf32, #tpu.memory_space<vmem>>, vector<1x8xf32>
    %135 = vector.broadcast %134 : vector<1x8xf32> to vector<71x8xf32>
    %136 = arith.addf %133, %135 : vector<71x8xf32>
    %cst_116 = arith.constant 0.000000e+00 : f32
    %137 = vector.broadcast %cst_116 : f32 to vector<71x8xf32>
    %138 = arith.maximumf %136, %137 : vector<71x8xf32>
    %c0_117 = arith.constant 0 : index
    %c0_118 = arith.constant 0 : index
    %139 = vector.load %arg16[%c0_117, %c0_118] : memref<71x8xf32, #tpu.memory_space<vmem>>, vector<71x8xf32>
    tpu.vector_store %arg16[%c0_117, %c0_118], %138 {strides = array<i32>} : memref<71x8xf32, #tpu.memory_space<vmem>>, vector<71x8xf32>,
    %c0_119 = arith.constant 0 : index
    %c0_120 = arith.constant 0 : index
    %140 = tpu.strided_load %arg16[%c0_119, %c0_120] {strides = array<i32: 2, 1>} : memref<71x8xf32, #tpu.memory_space<vmem>>, vector<35x8xf32>
    %c1_121 = arith.constant 1 : index
    %c0_122 = arith.constant 0 : index
    %141 = tpu.strided_load %arg16[%c1_121, %c0_122] {strides = array<i32: 2, 1>} : memref<71x8xf32, #tpu.memory_space<vmem>>, vector<35x8xf32>
    %142 = arith.maximumf %140, %141 : vector<35x8xf32>
    %143 = tpu.transpose %142, [1, 0] : vector<35x8xf32> -> vector<8x35xf32>
    %144 = vector.extract_strided_slice %143 {offsets = [0, 0], sizes = [1, 35], strides = [1, 1]} : vector<8x35xf32> to vector<1x35xf32>
    %145 = vector.extract_strided_slice %143 {offsets = [1, 0], sizes = [1, 35], strides = [1, 1]} : vector<8x35xf32> to vector<1x35xf32>
    %146 = vector.extract_strided_slice %143 {offsets = [2, 0], sizes = [1, 35], strides = [1, 1]} : vector<8x35xf32> to vector<1x35xf32>
    %147 = vector.extract_strided_slice %143 {offsets = [3, 0], sizes = [1, 35], strides = [1, 1]} : vector<8x35xf32> to vector<1x35xf32>
    %148 = vector.extract_strided_slice %143 {offsets = [4, 0], sizes = [1, 35], strides = [1, 1]} : vector<8x35xf32> to vector<1x35xf32>
    %149 = vector.extract_strided_slice %143 {offsets = [5, 0], sizes = [1, 35], strides = [1, 1]} : vector<8x35xf32> to vector<1x35xf32>
    %150 = vector.extract_strided_slice %143 {offsets = [6, 0], sizes = [1, 35], strides = [1, 1]} : vector<8x35xf32> to vector<1x35xf32>
    %151 = vector.extract_strided_slice %143 {offsets = [7, 0], sizes = [1, 35], strides = [1, 1]} : vector<8x35xf32> to vector<1x35xf32>
    %152 = tpu.concatenate %144, %145, %146, %147, %148, %149, %150, %151 in 1 : vector<1x35xf32>, vector<1x35xf32>, vector<1x35xf32>, vector<1x35xf32>, vector<1x35xf32>, vector<1x35xf32>, vector<1x35xf32>, vector<1x35xf32> -> vector<1x280xf32>
    %153 = arith.truncf %152 : vector<1x280xf32> to vector<1x280xbf16>
    %c0_123 = arith.constant 0 : index
    %c0_124 = arith.constant 0 : index
    %154 = vector.load %arg8[%c0_123, %c0_124] : memref<280x32xbf16, #tpu.memory_space<vmem>>, vector<280x32xbf16>
    %cst_125 = arith.constant dense<0.000000e+00> : vector<1x32xf32>
    %155 = tpu.matmul %153, %154, %cst_125 {dimension_numbers = #tpu.dot_dimension_numbers<[1], [0], [0], [1], [0, 0, 1, 1], [], []>} : vector<1x280xbf16>, vector<280x32xbf16>, vector<1x32xf32> -> vector<1x32xf32>
    %c0_126 = arith.constant 0 : index
    %c0_127 = arith.constant 0 : index
    %156 = vector.load %arg9[%c0_126, %c0_127] : memref<1x32xf32, #tpu.memory_space<vmem>>, vector<1x32xf32>
    %157 = arith.addf %155, %156 : vector<1x32xf32>
    %cst_128 = arith.constant 0.000000e+00 : f32
    %158 = vector.broadcast %cst_128 : f32 to vector<1x32xf32>
    %159 = arith.maximumf %157, %158 : vector<1x32xf32>
    %160 = arith.truncf %159 : vector<1x32xf32> to vector<1x32xbf16>
    %c0_129 = arith.constant 0 : index
    %c0_130 = arith.constant 0 : index
    %161 = vector.load %arg10[%c0_129, %c0_130] : memref<32x2xbf16, #tpu.memory_space<vmem>>, vector<32x2xbf16>
    %cst_131 = arith.constant dense<0.000000e+00> : vector<1x2xf32>
    %162 = tpu.matmul %160, %161, %cst_131 {dimension_numbers = #tpu.dot_dimension_numbers<[1], [0], [0], [1], [0, 0, 1, 1], [], []>} : vector<1x32xbf16>, vector<32x2xbf16>, vector<1x2xf32> -> vector<1x2xf32>
    %c0_132 = arith.constant 0 : index
    %c0_133 = arith.constant 0 : index
    %163 = vector.load %arg11[%c0_132, %c0_133] : memref<1x2xf32, #tpu.memory_space<vmem>>, vector<1x2xf32>
    %164 = arith.addf %162, %163 : vector<1x2xf32>
    %c1_134 = arith.constant 1 : index
    %c0_135 = arith.constant 0 : index
    %c0_136 = arith.constant 0 : index
    %165 = vector.load %arg12[%c1_134, %c0_135, %c0_136] : memref<2x1x2xf32, #tpu.memory_space<vmem>>, vector<1x1x2xf32>
    %166 = vector.shape_cast %165 : vector<1x1x2xf32> to vector<1x2xf32>
    %167 = vector.shape_cast %164 : vector<1x2xf32> to vector<1x1x2xf32>
    tpu.vector_store %arg12[%c1_134, %c0_135, %c0_136], %167 {strides = array<i32>} : memref<2x1x2xf32, #tpu.memory_space<vmem>>, vector<1x1x2xf32>,
    return
  }
  func.func @transform_0(%arg0: i32) -> (i32, i32, i32) {
    %c0_i32 = arith.constant 0 : i32
    %c0_i32_0 = arith.constant 0 : i32
    %c0_i32_1 = arith.constant 0 : i32
    return %arg0, %c0_i32, %c0_i32_0 : i32, i32, i32
  }
  func.func @transform_1(%arg0: i32) -> (i32, i32) {
    %c0_i32 = arith.constant 0 : i32
    %c0_i32_0 = arith.constant 0 : i32
    %c0_i32_1 = arith.constant 0 : i32
    return %c0_i32, %c0_i32_0 : i32, i32
  }
  func.func @transform_2(%arg0: i32) -> (i32, i32) {
    %c0_i32 = arith.constant 0 : i32
    %c0_i32_0 = arith.constant 0 : i32
    %c0_i32_1 = arith.constant 0 : i32
    return %c0_i32, %c0_i32_0 : i32, i32
  }
  func.func @transform_3(%arg0: i32) -> (i32, i32) {
    %c0_i32 = arith.constant 0 : i32
    %c0_i32_0 = arith.constant 0 : i32
    %c0_i32_1 = arith.constant 0 : i32
    return %c0_i32, %c0_i32_0 : i32, i32
  }
  func.func @transform_4(%arg0: i32) -> (i32, i32) {
    %c0_i32 = arith.constant 0 : i32
    %c0_i32_0 = arith.constant 0 : i32
    %c0_i32_1 = arith.constant 0 : i32
    return %c0_i32, %c0_i32_0 : i32, i32
  }
  func.func @transform_5(%arg0: i32) -> (i32, i32) {
    %c0_i32 = arith.constant 0 : i32
    %c0_i32_0 = arith.constant 0 : i32
    %c0_i32_1 = arith.constant 0 : i32
    return %c0_i32, %c0_i32_0 : i32, i32
  }
  func.func @transform_6(%arg0: i32) -> (i32, i32) {
    %c0_i32 = arith.constant 0 : i32
    %c0_i32_0 = arith.constant 0 : i32
    %c0_i32_1 = arith.constant 0 : i32
    return %c0_i32, %c0_i32_0 : i32, i32
  }
  func.func @transform_7(%arg0: i32) -> (i32, i32) {
    %c0_i32 = arith.constant 0 : i32
    %c0_i32_0 = arith.constant 0 : i32
    %c0_i32_1 = arith.constant 0 : i32
    return %c0_i32, %c0_i32_0 : i32, i32
  }
  func.func @transform_8(%arg0: i32) -> (i32, i32) {
    %c0_i32 = arith.constant 0 : i32
    %c0_i32_0 = arith.constant 0 : i32
    %c0_i32_1 = arith.constant 0 : i32
    return %c0_i32, %c0_i32_0 : i32, i32
  }
  func.func @transform_9(%arg0: i32) -> (i32, i32) {
    %c0_i32 = arith.constant 0 : i32
    %c0_i32_0 = arith.constant 0 : i32
    %c0_i32_1 = arith.constant 0 : i32
    return %c0_i32, %c0_i32_0 : i32, i32
  }
  func.func @transform_10(%arg0: i32) -> (i32, i32) {
    %c0_i32 = arith.constant 0 : i32
    %c0_i32_0 = arith.constant 0 : i32
    %c0_i32_1 = arith.constant 0 : i32
    return %c0_i32, %c0_i32_0 : i32, i32
  }
  func.func @transform_11(%arg0: i32) -> (i32, i32, i32) {
    %c0_i32 = arith.constant 0 : i32
    %c0_i32_0 = arith.constant 0 : i32
    %c0_i32_1 = arith.constant 0 : i32
    return %arg0, %c0_i32, %c0_i32_0 : i32, i32, i32
  }
}

</mosaic_0001>

<bundles_post_ra>
// kernel: forward.1
= control target key start
LH: loop header
LB: loop body
LE: loop exit
PB: predicated region body
PF: predicated region fallthrough
CT: control target
= control target key end

     0   :  { %vm40_vm0 = vcmask 34816   ;;  %vm81_vm1 = vcmask 39936   ;;  %v7980_v1 = vmov 0.0   ;;  %s11090_s0 = inlined_call_operand.vmem [shape: f32[2,300,5], index: 0, kind: input, shape index: {}]   ;;  %s11091_s1 = inlined_call_operand.vmem [shape: bf16[48,32], index: 1, kind: input, shape index: {}]   ;;  %s11092_s2 = inlined_call_operand.vmem [shape: f32[1,32], index: 2, kind: input, shape index: {}]   ;;  %s11093_s3 = inlined_call_operand.vmem [shape: bf16[128,8], index: 3, kind: input, shape index: {}]   ;;  %s11094_s4 = inlined_call_operand.vmem [shape: f32[1,8], index: 4, kind: input, shape index: {}]   ;;  %s11095_s5 = inlined_call_operand.vmem [shape: bf16[24,8], index: 5, kind: input, shape index: {}]   ;;  %s11096_s6 = inlined_call_operand.vmem [shape: f32[1,8], index: 6, kind: input, shape index: {}]   ;;  %s11097_s7 = inlined_call_operand.vmem [shape: bf16[280,32], index: 7, kind: input, shape index: {}]   ;;  %s11098_s8 = inlined_call_operand.vmem [shape: f32[1,32], index: 8, kind: input, shape index: {}]   ;;  %s11099_s9 = inlined_call_operand.vmem [shape: bf16[32,2], index: 9, kind: input, shape index: {}]   ;;  %s11100_s10 = inlined_call_operand.vmem [shape: f32[1,2], index: 10, kind: input, shape index: {}]   ;;  %s11101_s11 = inlined_call_operand.hbm [shape: f32[2,1,2], index: 11, kind: output, shape index: {}]  }
   0x1   :  { %v43_v0 = vld [vmem:[%s11090_s0] sm:$0xff]  ;;  %41 = vst.msk [vmem:[#allocation2] sm:$0x7] %vm40_vm0, %v7980_v1  ;;  %v44_v2 = vld [vmem:[%s11090_s0 + $0x8] sm:$0xff]  ;;  %v45_v3 = vld [vmem:[%s11090_s0 + $0x10] sm:$0xff] }
   0x2   :  { %42 = vst.msk [vmem:[#allocation2 + $0x12f] sm:$0x7] %vm40_vm0, %v7980_v1  ;;  %v46_v4 = vld [vmem:[%s11090_s0 + $0x18] sm:$0xff]  ;;  %v47_v5 = vld [vmem:[%s11090_s0 + $0x20] sm:$0xff]  ;;  %v48_v6 = vld [vmem:[%s11090_s0 + $0x28] sm:$0xff] }
   0x3   :  { %82 = vst.msk [vmem:[#allocation2 + $0x3] sm:$0xff] %vm81_vm1, %v43_v0 }
   0x4   :  { %83 = vst.msk [vmem:[#allocation2 + $0xb] sm:$0xff] %vm81_vm1, %v44_v2 }
   0x5   :  { %84 = vst.msk [vmem:[#allocation2 + $0x13] sm:$0xff] %vm81_vm1, %v45_v3 }
   0x6   :  { %85 = vst.msk [vmem:[#allocation2 + $0x1b] sm:$0xff] %vm81_vm1, %v46_v4 }
   0x7   :  { %16 = vsyncpa [#allocation7], 0  ;;  %86 = vst.msk [vmem:[#allocation2 + $0x23] sm:$0xff] %vm81_vm1, %v47_v5  ;;  %s7981_s29 = smov 5   ;;  %s7982_s30 = smov 15   ;;  %v49_v24 = vld [vmem:[%s11090_s0 + $0x30] sm:$0xff] }
   0x8   :  { %87 = vst.msk [vmem:[#allocation2 + $0x2b] sm:$0xff] %vm81_vm1, %v48_v6  ;;  %s7983_s12 = smov 25   ;;  %v50_v26 = vld [vmem:[%s11090_s0 + $0x38] sm:$0xff]  ;;  %s7984_s17 = smov 10   ;;  %v51_v36 = vld [vmem:[%s11090_s0 + $0x40] sm:$0xff]  ;;  %v52_v45 = vld [vmem:[%s11090_s0 + $0x48] sm:$0xff] }
   0x9   :  { %88 = vst.msk [vmem:[#allocation2 + $0x33] sm:$0xff] %vm81_vm1, %v49_v24  ;;  %s7985_s18 = smov 20   ;;  %s7986_s19 = smov 30   ;;  %v53_v55 = vld [vmem:[%s11090_s0 + $0x50] sm:$0xff]  ;;  %v54_v1 = vld [vmem:[%s11090_s0 + $0x58] sm:$0xff]  ;;  %vm1337_vm2 = vcmask 80896  }
   0xa   :  { %v159_v7 = vld [vmem:[#allocation2 + $0x1] sm:$0xff]  ;;  %89 = vst.msk [vmem:[#allocation2 + $0x3b] sm:$0xff] %vm81_vm1, %v50_v26  ;;  %vm1376_vm3 = vcmask 121856   ;;  %vm1415_vm4 = vcmask 162816   ;;  %vm1454_vm5 = vcmask 203776   ;;  %vm1493_vm6 = vcmask 244736  }
   0xb   :  { %v235_v8 = vld [vmem:[#allocation2 + $0x3] sm:$0xff]  ;;  %v236_v10 = vld [vmem:[#allocation2 + $0xb] sm:$0xff]  ;;  %90 = vst.msk [vmem:[#allocation2 + $0x43] sm:$0xff] %vm81_vm1, %v51_v36  ;;  %vm1532_vm7 = vcmask 285696   ;;  %vm1618_vm8 = vcmask 392192   ;;  %vm119_vm9 = vcmask 35840  }
   0xc   :  { %v160_v9 = vld [vmem:[#allocation2 + $0x9] sm:$0xff]  ;;  %v6466_v12 = vpack.i.bf16 %v236_v10, %v235_v8  ;;  %v161_v27 = vld [vmem:[#allocation2 + $0x11] sm:$0xff]  ;;  %91 = vst.msk [vmem:[#allocation2 + $0x4b] sm:$0xff] %vm81_vm1, %v52_v45  ;;  %vm11106_vm10 = vcmask 261120   ;;  %vm11105_vm11 = vcmask 1044480   ;;  %vm2066_vm12 = vcmask 1045504  }
   0xd   :  { %v6456_v11 = vpack.i.bf16 %v160_v9, %v159_v7  ;;  %v311_v13 = vld [vmem:[#allocation2 + $0x5] sm:$0xff]  ;;  %v312_v14 = vld [vmem:[#allocation2 + $0xd] sm:$0xff]  ;;  %v162_v28 = vld [vmem:[#allocation2 + $0x19] sm:$0xff]  ;;  %92 = vst.msk [vmem:[#allocation2 + $0x53] sm:$0xff] %vm81_vm1, %v53_v55  ;;  %vm1971_vm13 = vcmask 1046528   ;;  %s7987_s23 = smov 96  }
   0xe   :  { %6467 = vrot.lane.b32.xlu1 %v6466_v12, %s7982_s30  ;;  %v197_v15 = vld [vmem:[#allocation2 + $0x2] sm:$0xff]  ;;  %v6476_v16 = vpack.i.bf16 %v312_v14, %v311_v13  ;;  %v198_v17 = vld [vmem:[#allocation2 + $0xa] sm:$0xff]  ;;  %v199_v29 = vld [vmem:[#allocation2 + $0x12] sm:$0xff]  ;;  %v6486_v33 = vpack.i.bf16 %v162_v28, %v161_v27  ;;  %93 = vst.msk [vmem:[#allocation2 + $0x5b] sm:$0xff] %vm81_vm1, %v54_v1  ;;  %s7988_s24 = smov 64   ;;  %s7989_s25 = smov 32  }
   0xf   :  { %6457 = vrot.lane.b32.xlu0 %v6456_v11, %s7981_s29  ;;  %v273_v18 = vld [vmem:[#allocation2 + $0x4] sm:$0xff]  ;;  %v274_v19 = vld [vmem:[#allocation2 + $0xc] sm:$0xff]  ;;  %v6461_v22 = vpack.i.bf16 %v198_v17, %v197_v15  ;;  %v200_v30 = vld [vmem:[#allocation2 + $0x1a] sm:$0xff]  ;;  %vm11104_vm14 = vcmask 523264   ;;  %vm11103_vm15 = vcmask 785408   ;;  %vm11102_vm0 = vcmask 257024  }
  0x10   :  { %6477 = vrot.lane.b32.xlu2 %v6476_v16, %s7983_s12  ;;  %v349_v20 = vld [vmem:[#allocation2 + $0x6] sm:$0xff]  ;;  %v350_v21 = vld [vmem:[#allocation2 + $0xe] sm:$0xff]  ;;  %v6471_v23 = vpack.i.bf16 %v274_v19, %v273_v18  ;;  %v238_v32 = vld [vmem:[#allocation2 + $0x1b] sm:$0xff]  ;;  %v6491_v34 = vpack.i.bf16 %v200_v30, %v199_v29  ;;  %s7990_s26 = smov 16   ;;  %s7991_s27 = smov 8  }
  0x11   :  { %v6481_v25 = vpack.i.bf16 %v350_v21, %v349_v20  ;;  %v237_v31 = vld [vmem:[#allocation2 + $0x13] sm:$0xff]  ;;  %v276_v38 = vld [vmem:[#allocation2 + $0x1c] sm:$0xff]  ;;  %v164_v48 = vld [vmem:[#allocation2 + $0x29] sm:$0xff]  ;;  %s11108_s28 = smov 117   ;;  %s7993_s13 = smov 82  }
  0x12   :  { %v6496_v35 = vpack.i.bf16 %v238_v32, %v237_v31  ;;  %v275_v37 = vld [vmem:[#allocation2 + $0x14] sm:$0xff]  ;;  %v314_v40 = vld [vmem:[#allocation2 + $0x1d] sm:$0xff]  ;;  %v202_v50 = vld [vmem:[#allocation2 + $0x2a] sm:$0xff]  ;;  %s7994_s14 = smov 70   ;;  %s7995_s15 = smov 12  }
  0x13   :  { %v313_v39 = vld [vmem:[#allocation2 + $0x15] sm:$0xff]  ;;  %v352_v42 = vld [vmem:[#allocation2 + $0x1e] sm:$0xff]  ;;  %v6501_v43 = vpack.i.bf16 %v276_v38, %v275_v37  ;;  %v240_v52 = vld [vmem:[#allocation2 + $0x2b] sm:$0xff]  ;;  %s7997_s16 = smov 47   ;;  %s7998_s22 = smov 35  }
  0x14   :  { %v351_v41 = vld [vmem:[#allocation2 + $0x16] sm:$0xff]  ;;  %v6506_v44 = vpack.i.bf16 %v314_v40, %v313_v39  ;;  %v163_v47 = vld [vmem:[#allocation2 + $0x21] sm:$0xff]  ;;  %v278_v58 = vld [vmem:[#allocation2 + $0x2c] sm:$0xff] }
  0x15   :  { %v6511_v46 = vpack.i.bf16 %v352_v42, %v351_v41  ;;  %v201_v49 = vld [vmem:[#allocation2 + $0x22] sm:$0xff]  ;;  %v6516_v53 = vpack.i.bf16 %v164_v48, %v163_v47  ;;  %v316_v60 = vld [vmem:[#allocation2 + $0x2d] sm:$0xff]  ;;  %v166_v4 = vld [vmem:[#allocation2 + $0x39] sm:$0xff] }
  0x16   :  { %6472 = vrot.lane.b32.xlu1 %v6471_v23, %s7985_s18  ;;  %v239_v51 = vld [vmem:[#allocation2 + $0x23] sm:$0xff]  ;;  %v6521_v54 = vpack.i.bf16 %v202_v50, %v201_v49  ;;  %v354_v62 = vld [vmem:[#allocation2 + $0x2e] sm:$0xff]  ;;  %v204_v6 = vld [vmem:[#allocation2 + $0x3a] sm:$0xff] }
  0x17   :  { %6462 = vrot.lane.b32.xlu0 %v6461_v22, %s7984_s17  ;;  %v6526_v56 = vpack.i.bf16 %v240_v52, %v239_v51  ;;  %v277_v57 = vld [vmem:[#allocation2 + $0x24] sm:$0xff]  ;;  %v165_v3 = vld [vmem:[#allocation2 + $0x31] sm:$0xff]  ;;  %v242_v8 = vld [vmem:[#allocation2 + $0x3b] sm:$0xff] }
  0x18   :  { %6482 = vrot.lane.b32.xlu2 %v6481_v25, %s7986_s19  ;;  %v315_v59 = vld [vmem:[#allocation2 + $0x25] sm:$0xff]  ;;  %v6531_v63 = vpack.i.bf16 %v278_v58, %v277_v57  ;;  %v203_v5 = vld [vmem:[#allocation2 + $0x32] sm:$0xff]  ;;  %v6546_v9 = vpack.i.bf16 %v166_v4, %v165_v3  ;;  %v280_v14 = vld [vmem:[#allocation2 + $0x3c] sm:$0xff] }
  0x19   :  { %v353_v61 = vld [vmem:[#allocation2 + $0x26] sm:$0xff]  ;;  %v6536_v0 = vpack.i.bf16 %v316_v60, %v315_v59  ;;  %v241_v7 = vld [vmem:[#allocation2 + $0x33] sm:$0xff]  ;;  %v6551_v10 = vpack.i.bf16 %v204_v6, %v203_v5  ;;  %v318_v16 = vld [vmem:[#allocation2 + $0x3d] sm:$0xff] }
  0x1a   :  { %v6541_v2 = vpack.i.bf16 %v354_v62, %v353_v61  ;;  %v55_v11 = vld [vmem:[%s11090_s0 + $0x60] sm:$0xff]  ;;  %v6556_v12 = vpack.i.bf16 %v242_v8, %v241_v7  ;;  %v279_v13 = vld [vmem:[#allocation2 + $0x34] sm:$0xff]  ;;  %v56_v21 = vld [vmem:[%s11090_s0 + $0x68] sm:$0xff] }
  0x1b   :  { %94 = vst.msk [vmem:[#allocation2 + $0x63] sm:$0xff] %vm81_vm1, %v55_v11  ;;  %v317_v15 = vld [vmem:[#allocation2 + $0x35] sm:$0xff]  ;;  %v356_v18 = vld [vmem:[#allocation2 + $0x3e] sm:$0xff]  ;;  %v6561_v19 = vpack.i.bf16 %v280_v14, %v279_v13  ;;  %v168_v24 = vld [vmem:[#allocation2 + $0x49] sm:$0xff] }
  0x1c   :  { %v355_v17 = vld [vmem:[#allocation2 + $0x36] sm:$0xff]  ;;  %v6566_v20 = vpack.i.bf16 %v318_v16, %v317_v15  ;;  %95 = vst.msk [vmem:[#allocation2 + $0x6b] sm:$0xff] %vm81_vm1, %v56_v21  ;;  %v167_v23 = vld [vmem:[#allocation2 + $0x41] sm:$0xff]  ;;  %v206_v26 = vld [vmem:[#allocation2 + $0x4a] sm:$0xff] }
  0x1d   :  { %v6571_v22 = vpack.i.bf16 %v356_v18, %v355_v17  ;;  %v205_v25 = vld [vmem:[#allocation2 + $0x42] sm:$0xff]  ;;  %v244_v28 = vld [vmem:[#allocation2 + $0x4b] sm:$0xff]  ;;  %v6576_v29 = vpack.i.bf16 %v168_v24, %v167_v23  ;;  %v58_v41 = vld [vmem:[%s11090_s0 + $0x78] sm:$0xff] }
  0x1e   :  { %6492 = vrot.lane.b32.xlu1 %v6491_v34, %s7984_s17  ;;  %v243_v27 = vld [vmem:[#allocation2 + $0x43] sm:$0xff]  ;;  %v6581_v30 = vpack.i.bf16 %v206_v26, %v205_v25  ;;  %v57_v31 = vld [vmem:[%s11090_s0 + $0x70] sm:$0xff]  ;;  %97 = vst.msk [vmem:[#allocation2 + $0x7b] sm:$0xff] %vm81_vm1, %v58_v41  ;;  %v246_v48 = vld [vmem:[#allocation2 + $0x5b] sm:$0xff] }
  0x1f   :  { %6487 = vrot.lane.b32.xlu0 %v6486_v33, %s7981_s29  ;;  %v6586_v32 = vpack.i.bf16 %v244_v28, %v243_v27  ;;  %96 = vst.msk [vmem:[#allocation2 + $0x73] sm:$0xff] %vm81_vm1, %v57_v31  ;;  %v281_v33 = vld [vmem:[#allocation2 + $0x44] sm:$0xff]  ;;  %v282_v34 = vld [vmem:[#allocation2 + $0x4c] sm:$0xff]  ;;  %v321_v55 = vld [vmem:[#allocation2 + $0x55] sm:$0xff] }
  0x20   :  { %6497 = vrot.lane.b32.xlu2 %v6496_v35, %s7982_s30  ;;  %v319_v35 = vld [vmem:[#allocation2 + $0x45] sm:$0xff]  ;;  %v320_v36 = vld [vmem:[#allocation2 + $0x4d] sm:$0xff]  ;;  %v6591_v39 = vpack.i.bf16 %v282_v34, %v281_v33  ;;  %v359_v57 = vld [vmem:[#allocation2 + $0x56] sm:$0xff] }
  0x21   :  { %v357_v37 = vld [vmem:[#allocation2 + $0x46] sm:$0xff]  ;;  %v358_v38 = vld [vmem:[#allocation2 + $0x4e] sm:$0xff]  ;;  %v6596_v40 = vpack.i.bf16 %v320_v36, %v319_v35  ;;  %v62_v23 = vld [vmem:[%s11090_s0 + $0x98] sm:$0xff] }
  0x22   :  { %v6601_v42 = vpack.i.bf16 %v358_v38, %v357_v37  ;;  %v207_v45 = vld [vmem:[#allocation2 + $0x52] sm:$0xff]  ;;  %v59_v51 = vld [vmem:[%s11090_s0 + $0x80] sm:$0xff]  ;;  %v60_v61 = vld [vmem:[%s11090_s0 + $0x88] sm:$0xff]  ;;  %101 = vst.msk [vmem:[#allocation2 + $0x9b] sm:$0xff] %vm81_vm1, %v62_v23 }
  0x23   :  { %v245_v47 = vld [vmem:[#allocation2 + $0x53] sm:$0xff]  ;;  %98 = vst.msk [vmem:[#allocation2 + $0x83] sm:$0xff] %vm81_vm1, %v59_v51  ;;  %v360_v58 = vld [vmem:[#allocation2 + $0x5e] sm:$0xff]  ;;  %v172_v1 = vld [vmem:[#allocation2 + $0x69] sm:$0xff] }
  0x24   :  { %v6616_v52 = vpack.i.bf16 %v246_v48, %v245_v47  ;;  %v6631_v62 = vpack.i.bf16 %v360_v58, %v359_v57  ;;  %99 = vst.msk [vmem:[#allocation2 + $0x8b] sm:$0xff] %vm81_vm1, %v60_v61  ;;  %v210_v3 = vld [vmem:[#allocation2 + $0x6a] sm:$0xff]  ;;  %v6373_v13 = vld [vmem:[%s11091_s1] sm:$0xff] }
  0x25   :  { %v247_v4 = vld [vmem:[#allocation2 + $0x63] sm:$0xff]  ;;  %v248_v5 = vld [vmem:[#allocation2 + $0x6b] sm:$0xff] }
  0x26   :  { %6507 = vrot.lane.b32.xlu1 %v6506_v44, %s7983_s12  ;;  %v170_v44 = vld [vmem:[#allocation2 + $0x59] sm:$0xff]  ;;  %v61_v11 = vld [vmem:[%s11090_s0 + $0x90] sm:$0xff]  ;;  %v323_v15 = vld [vmem:[#allocation2 + $0x65] sm:$0xff] }
  0x27   :  { %6502 = vrot.lane.b32.xlu0 %v6501_v43, %s7985_s18  ;;  %v169_v43 = vld [vmem:[#allocation2 + $0x51] sm:$0xff]  ;;  %100 = vst.msk [vmem:[#allocation2 + $0x93] sm:$0xff] %vm81_vm1, %v61_v11  ;;  %v361_v17 = vld [vmem:[#allocation2 + $0x66] sm:$0xff]  ;;  %v174_v25 = vld [vmem:[#allocation2 + $0x79] sm:$0xff] }
  0x28   :  { %6512 = vrot.lane.b32.xlu2 %v6511_v46, %s7986_s19  ;;  %v208_v46 = vld [vmem:[#allocation2 + $0x5a] sm:$0xff]  ;;  %v6606_v49 = vpack.i.bf16 %v170_v44, %v169_v43  ;;  %v286_v14 = vld [vmem:[#allocation2 + $0x6c] sm:$0xff] }
  0x29   :  { %v6611_v50 = vpack.i.bf16 %v208_v46, %v207_v45  ;;  %v324_v16 = vld [vmem:[#allocation2 + $0x6d] sm:$0xff]  ;;  %v212_v27 = vld [vmem:[#allocation2 + $0x7a] sm:$0xff] }
  0x2a   :  { %v362_v18 = vld [vmem:[#allocation2 + $0x6e] sm:$0xff]  ;;  %v63_v34 = vld [vmem:[%s11090_s0 + $0xa0] sm:$0xff]  ;;  %v363_v41 = vld [vmem:[#allocation2 + $0x76] sm:$0xff] }
  0x2b   :  { %v173_v24 = vld [vmem:[#allocation2 + $0x71] sm:$0xff]  ;;  %102 = vst.msk [vmem:[#allocation2 + $0xa3] sm:$0xff] %vm81_vm1, %v63_v34  ;;  %v288_v36 = vld [vmem:[#allocation2 + $0x7c] sm:$0xff]  ;;  %v64_v48 = vld [vmem:[%s11090_s0 + $0xa8] sm:$0xff] }
  0x2c   :  { %v211_v26 = vld [vmem:[#allocation2 + $0x72] sm:$0xff]  ;;  %v326_v38 = vld [vmem:[#allocation2 + $0x7d] sm:$0xff]  ;;  %v214_v51 = vld [vmem:[#allocation2 + $0x8a] sm:$0xff]  ;;  %103 = vst.msk [vmem:[#allocation2 + $0xab] sm:$0xff] %vm81_vm1, %v64_v48 }
  0x2d   :  { %v249_v28 = vld [vmem:[#allocation2 + $0x73] sm:$0xff]  ;;  %v6671_v31 = vpack.i.bf16 %v212_v27, %v211_v26  ;;  %v175_v46 = vld [vmem:[#allocation2 + $0x81] sm:$0xff] }
  0x2e   :  { %6522 = vrot.lane.b32.xlu1 %v6521_v54, %s7984_s17  ;;  %v284_v54 = vld [vmem:[#allocation2 + $0x5c] sm:$0xff]  ;;  %v287_v35 = vld [vmem:[#allocation2 + $0x74] sm:$0xff] }
  0x2f   :  { %6517 = vrot.lane.b32.xlu0 %v6516_v53, %s7981_s29  ;;  %v283_v53 = vld [vmem:[#allocation2 + $0x54] sm:$0xff]  ;;  %v6681_v43 = vpack.i.bf16 %v288_v36, %v287_v35  ;;  %v121_v57 = vld [vmem:[#allocation2] sm:$0xff] }
  0x30   :  { %6527 = vrot.lane.b32.xlu2 %v6526_v56, %s7982_s30  ;;  %v322_v56 = vld [vmem:[#allocation2 + $0x5d] sm:$0xff]  ;;  %v6621_v59 = vpack.i.bf16 %v284_v54, %v283_v53  ;;  %v325_v37 = vld [vmem:[#allocation2 + $0x75] sm:$0xff]  ;;  %v328_v26 = vld [vmem:[#allocation2 + $0x8d] sm:$0xff] }
  0x31   :  { %v6626_v60 = vpack.i.bf16 %v322_v56, %v321_v55  ;;  %v6686_v44 = vpack.i.bf16 %v326_v38, %v325_v37  ;;  %v122_v56 = vld [vmem:[#allocation2 + $0x8] sm:$0xff]  ;;  %v123_v27 = vld [vmem:[#allocation2 + $0x10] sm:$0xff]  ;;  %v66_v48 = vld [vmem:[%s11090_s0 + $0xb8] sm:$0xff] }
  0x32   :  { %v365_v36 = vld [vmem:[#allocation2 + $0x86] sm:$0xff]  ;;  %v366_v37 = vld [vmem:[#allocation2 + $0x8e] sm:$0xff]  ;;  %105 = vst.msk [vmem:[#allocation2 + $0xbb] sm:$0xff] %vm81_vm1, %v66_v48 }
  0x33   :  { %v217_v48 = vld [vmem:[#allocation2 + $0xa2] sm:$0xff] }
  0x36   :  { %6537 = vrot.lane.b32.xlu1 %v6536_v0, %s7983_s12  ;;  %v6375_v0 = vld [vmem:[%s11091_s1 + $0x10] sm:$0xff] }
  0x37   :  { %6532 = vrot.lane.b32.xlu0 %v6531_v63, %s7985_s18  ;;  %v171_v63 = vld [vmem:[#allocation2 + $0x61] sm:$0xff]  ;;  %1681 = vmatpush.bf16.msra.mxu0 %v6375_v0 }
  0x38   :  { %6542 = vrot.lane.b32.xlu2 %v6541_v2, %s7986_s19  ;;  %v209_v2 = vld [vmem:[#allocation2 + $0x62] sm:$0xff]  ;;  %v6636_v6 = vpack.i.bf16 %v172_v1, %v171_v63 }
  0x39   :  { %v6641_v7 = vpack.i.bf16 %v210_v3, %v209_v2  ;;  %v251_v2 = vld [vmem:[#allocation2 + $0x83] sm:$0xff]  ;;  %v252_v3 = vld [vmem:[#allocation2 + $0x8b] sm:$0xff] }
  0x3e   :  { %6552 = vrot.lane.b32.xlu1 %v6551_v10, %s7984_s17  ;;  %v6646_v10 = vpack.i.bf16 %v248_v5, %v247_v4 }
  0x3f   :  { %6547 = vrot.lane.b32.xlu0 %v6546_v9, %s7981_s29  ;;  %v6374_v9 = vld [vmem:[%s11091_s1 + $0x8] sm:$0xff] }
  0x40   :  { %6557 = vrot.lane.b32.xlu2 %v6556_v12, %s7982_s30  ;;  %1682 = vmatpush.bf16.msra.mxu0 %v6374_v9  ;;  %v285_v12 = vld [vmem:[#allocation2 + $0x64] sm:$0xff] }
  0x44   :  { %1683 = vmatpush.bf16.msra.mxu0 %v6373_v13 }
  0x46   :  { %6567 = vrot.lane.b32.xlu1 %v6566_v20, %s7983_s12  ;;  %v6656_v20 = vpack.i.bf16 %v324_v16, %v323_v15  ;;  %v6706_v15 = vpack.i.bf16 %v252_v3, %v251_v2  ;;  %v65_v16 = vld [vmem:[%s11090_s0 + $0xb0] sm:$0xff] }
  0x47   :  { %6562 = vrot.lane.b32.xlu0 %v6561_v19, %s7985_s18  ;;  %v6651_v19 = vpack.i.bf16 %v286_v14, %v285_v12  ;;  %104 = vst.msk [vmem:[#allocation2 + $0xb3] sm:$0xff] %vm81_vm1, %v65_v16 }
  0x48   :  { %6572 = vrot.lane.b32.xlu2 %v6571_v22, %s7986_s19  ;;  %v6661_v22 = vpack.i.bf16 %v362_v18, %v361_v17 }
  0x4e   :  { %6582 = vrot.lane.b32.xlu1 %v6581_v30, %s7984_s17  ;;  %v6666_v30 = vpack.i.bf16 %v174_v25, %v173_v24  ;;  %v290_v24 = vld [vmem:[#allocation2 + $0x8c] sm:$0xff] }
  0x4f   :  { %6577 = vrot.lane.b32.xlu0 %v6576_v29, %s7981_s29  ;;  %v250_v29 = vld [vmem:[#allocation2 + $0x7b] sm:$0xff]  ;;  %v327_v25 = vld [vmem:[#allocation2 + $0x85] sm:$0xff] }
  0x50   :  { %6587 = vrot.lane.b32.xlu2 %v6586_v32, %s7982_s30  ;;  %v6676_v33 = vpack.i.bf16 %v250_v29, %v249_v28 }
  0x56   :  { %6597 = vrot.lane.b32.xlu1 %v6596_v40, %s7983_s12 }
  0x57   :  { %6592 = vrot.lane.b32.xlu0 %v6591_v39, %s7985_s18 }
  0x58   :  { %6602 = vrot.lane.b32.xlu2 %v6601_v42, %s7986_s19  ;;  %v364_v42 = vld [vmem:[#allocation2 + $0x7e] sm:$0xff] }
  0x59   :  { %v6691_v47 = vpack.i.bf16 %v364_v42, %v363_v41 }
  0x5e   :  { %6612 = vrot.lane.b32.xlu1 %v6611_v50, %s7984_s17  ;;  %v213_v50 = vld [vmem:[#allocation2 + $0x82] sm:$0xff] }
  0x5f   :  { %6607 = vrot.lane.b32.xlu0 %v6606_v49, %s7981_s29  ;;  %v176_v49 = vld [vmem:[#allocation2 + $0x89] sm:$0xff]  ;;  %v6701_v61 = vpack.i.bf16 %v214_v51, %v213_v50  ;;  %v177_v51 = vld [vmem:[#allocation2 + $0x91] sm:$0xff] }
  0x60   :  { %6617 = vrot.lane.b32.xlu2 %v6616_v52, %s7982_s30 }
  0x66   :  { %6627 = vrot.lane.b32.xlu1 %v6626_v60, %s7983_s12  ;;  %v6696_v60 = vpack.i.bf16 %v176_v49, %v175_v46 }
  0x67   :  { %6622 = vrot.lane.b32.xlu0 %v6621_v59, %s7985_s18 }
  0x68   :  { %6632 = vrot.lane.b32.xlu2 %v6631_v62, %s7986_s19 }
  0x6a   :  { %v8172_v8 = vpop.permute.xlu2 %6477 }
  0x6b   :  { %v6480_v54 = vunpack.i.h.bf16 %v8172_v8  ;;  %v6479_v55 = vunpack.i.l.bf16 %v8172_v8 }
  0x6e   :  { %6642 = vrot.lane.b32.xlu1 %v6641_v7, %s7984_s17 }
  0x6f   :  { %6637 = vrot.lane.b32.xlu0 %v6636_v6, %s7981_s29 }
  0x70   :  { %6647 = vrot.lane.b32.xlu2 %v6646_v10, %s7982_s30 }
  0x72   :  { %v8187_v21 = vpop.permute.xlu2 %6482 }
  0x73   :  { %v6485_v9 = vunpack.i.h.bf16 %v8187_v21  ;;  %v6484_v10 = vunpack.i.l.bf16 %v8187_v21  ;;  %v289_v21 = vld [vmem:[#allocation2 + $0x84] sm:$0xff] }
  0x76   :  { %6657 = vrot.lane.b32.xlu1 %v6656_v20, %s7983_s12 }
  0x77   :  { %6652 = vrot.lane.b32.xlu0 %v6651_v19, %s7985_s18 }
  0x78   :  { %6662 = vrot.lane.b32.xlu2 %v6661_v22, %s7986_s19 }
  0x7a   :  { %v8196_v32 = vpop.permute.xlu2 %6497 }
  0x7b   :  { %v6500_v49 = vunpack.i.h.bf16 %v8196_v32  ;;  %v6499_v50 = vunpack.i.l.bf16 %v8196_v32 }
  0x7e   :  { %6672 = vrot.lane.b32.xlu1 %v6671_v31, %s7984_s17 }
  0x7f   :  { %6667 = vrot.lane.b32.xlu0 %v6666_v30, %s7981_s29 }
  0x80   :  { %v6468_v40 = vpop.permute.xlu1 %6467  ;;  %6677 = vrot.lane.b32.xlu2 %v6676_v33, %s7982_s30  ;;  %v124_v33 = vld [vmem:[#allocation2 + $0x18] sm:$0xff] }
  0x81   :  { %v6458_v39 = vpop.permute.xlu0 %6457  ;;  %v6470_v6 = vunpack.i.h.bf16 %v6468_v40  ;;  %v6469_v7 = vunpack.i.l.bf16 %v6468_v40  ;;  %v6716_v40 = vpack.i.bf16 %v328_v26, %v327_v25 }
  0x82   :  { %v8205_v45 = vpop.permute.xlu2 %6512  ;;  %v6460_v52 = vunpack.i.h.bf16 %v6458_v39  ;;  %v6459_v53 = vunpack.i.l.bf16 %v6458_v39  ;;  %v6711_v39 = vpack.i.bf16 %v290_v24, %v289_v21  ;;  %v125_v21 = vld [vmem:[#allocation2 + $0x20] sm:$0xff]  ;;  %v126_v24 = vld [vmem:[#allocation2 + $0x28] sm:$0xff] }
  0x84   :  { %v1300_v4 = vsel %vm81_vm1, %v122_v56, %v6460_v52  ;;  %v1299_v5 = vsel %vm81_vm1, %v121_v57, %v6459_v53  ;;  %v216_v56 = vld [vmem:[#allocation2 + $0x9a] sm:$0xff]  ;;  %v6515_v57 = vunpack.i.h.bf16 %v8205_v45 }
  0x86   :  { %6687 = vrot.lane.b32.xlu1 %v6686_v44, %s7983_s12 }
  0x87   :  { %6682 = vrot.lane.b32.xlu0 %v6681_v43, %s7985_s18 }
  0x88   :  { %v6473_v59 = vpop.permute.xlu1 %6472  ;;  %6692 = vrot.lane.b32.xlu2 %v6691_v47, %s7986_s19  ;;  %v6721_v47 = vpack.i.bf16 %v366_v37, %v365_v36 }
  0x89   :  { %v6463_v58 = vpop.permute.xlu0 %6462  ;;  %v6475_v0 = vunpack.i.h.bf16 %v6473_v59  ;;  %v6474_v1 = vunpack.i.l.bf16 %v6473_v59 }
  0x8a   :  { %v6465_v62 = vunpack.i.h.bf16 %v6463_v58  ;;  %v6464_v63 = vunpack.i.l.bf16 %v6463_v58  ;;  %v8218_v8 = vpop.permute.xlu2 %6527  ;;  %v6514_v58 = vunpack.i.l.bf16 %v8205_v45 }
  0x8c   :  { %v1338_v11 = vsel %vm1337_vm2, %v1299_v5, %v6464_v63  ;;  %v1339_v12 = vsel %vm1337_vm2, %v1300_v4, %v6465_v62 }
  0x8d   :  { %v1377_v13 = vsel %vm1376_vm3, %v1338_v11, %v6469_v7  ;;  %v1378_v14 = vsel %vm1376_vm3, %v1339_v12, %v6470_v6  ;;  %v67_v12 = vld [vmem:[%s11090_s0 + $0xc0] sm:$0xff] }
  0x8e   :  { %v1416_v17 = vsel %vm1415_vm4, %v1377_v13, %v6474_v1  ;;  %v1417_v18 = vsel %vm1415_vm4, %v1378_v14, %v6475_v0  ;;  %6702 = vrot.lane.b32.xlu1 %v6701_v61, %s7984_s17  ;;  %v253_v0 = vld [vmem:[#allocation2 + $0x93] sm:$0xff]  ;;  %v254_v1 = vld [vmem:[#allocation2 + $0x9b] sm:$0xff]  ;;  %106 = vst.msk [vmem:[#allocation2 + $0xc3] sm:$0xff] %vm81_vm1, %v67_v12 }
  0x8f   :  { %6697 = vrot.lane.b32.xlu0 %v6696_v60, %s7981_s29  ;;  %v1455_v19 = vsel %vm1454_vm5, %v1416_v17, %v6479_v55  ;;  %v1456_v20 = vsel %vm1454_vm5, %v1417_v18, %v6480_v54  ;;  %v178_v54 = vld [vmem:[#allocation2 + $0x99] sm:$0xff]  ;;  %v6736_v11 = vpack.i.bf16 %v254_v1, %v253_v0  ;;  %v332_v12 = vld [vmem:[#allocation2 + $0xad] sm:$0xff] }
  0x90   :  { %v1494_v22 = vsel %vm1493_vm6, %v1455_v19, %v6484_v10  ;;  %v1495_v23 = vsel %vm1493_vm6, %v1456_v20, %v6485_v9  ;;  %v6493_v29 = vpop.permute.xlu1 %6492  ;;  %6707 = vrot.lane.b32.xlu2 %v6706_v15, %s7982_s30  ;;  %v215_v55 = vld [vmem:[#allocation2 + $0x92] sm:$0xff]  ;;  %v6726_v4 = vpack.i.bf16 %v178_v54, %v177_v51  ;;  %v292_v18 = vld [vmem:[#allocation2 + $0x9c] sm:$0xff] }
  0x91   :  { %v6488_v28 = vpop.permute.xlu0 %6487  ;;  %v1533_v30 = vsel %vm1532_vm7, %v1494_v22, 0.0  ;;  %v1534_v31 = vsel %vm1532_vm7, %v1495_v23, 0.0  ;;  %v6495_v42 = vunpack.i.h.bf16 %v6493_v29  ;;  %v6494_v43 = vunpack.i.l.bf16 %v6493_v29  ;;  %v291_v15 = vld [vmem:[#allocation2 + $0x94] sm:$0xff]  ;;  %v330_v20 = vld [vmem:[#allocation2 + $0x9d] sm:$0xff] }
  0x92   :  { %v6490_v34 = vunpack.i.h.bf16 %v6488_v28  ;;  %v6489_v35 = vunpack.i.l.bf16 %v6488_v28  ;;  %v1571_v38 = vpack.c.bf16 %v1534_v31, %v1533_v30  ;;  %v8241_v41 = vpop.permute.xlu2 %6542  ;;  %v6731_v5 = vpack.i.bf16 %v216_v56, %v215_v55  ;;  %v329_v19 = vld [vmem:[#allocation2 + $0x95] sm:$0xff]  ;;  %v368_v28 = vld [vmem:[#allocation2 + $0x9e] sm:$0xff] }
  0x93   :  { %v6741_v30 = vpack.i.bf16 %v292_v18, %v291_v15  ;;  %v6746_v31 = vpack.i.bf16 %v330_v20, %v329_v19  ;;  %v6544_v51 = vunpack.i.l.bf16 %v8241_v41  ;;  %v369_v19 = vld [vmem:[#allocation2 + $0xa6] sm:$0xff]  ;;  %v370_v20 = vld [vmem:[#allocation2 + $0xae] sm:$0xff] }
  0x94   :  { %v1302_v44 = vsel %vm81_vm1, %v124_v33, %v6490_v34  ;;  %v1301_v46 = vsel %vm81_vm1, %v123_v27, %v6489_v35  ;;  %6047 = vmatmul.msk.bf16.vlgmr.msra.gmra.mxu0 %vm1618_vm8, %v1571_v38  ;;  %v367_v27 = vld [vmem:[#allocation2 + $0x96] sm:$0xff] }
  0x95   :  { %v1340_v52 = vsel %vm1337_vm2, %v1301_v46, %v6494_v43  ;;  %v1341_v53 = vsel %vm1337_vm2, %v1302_v44, %v6495_v42  ;;  %v6751_v38 = vpack.i.bf16 %v368_v28, %v367_v27  ;;  %v6529_v42 = vunpack.i.l.bf16 %v8218_v8  ;;  %v179_v43 = vld [vmem:[#allocation2 + $0xa1] sm:$0xff] }
  0x96   :  { %6717 = vrot.lane.b32.xlu1 %v6716_v40, %s7983_s12  ;;  %v1379_v2 = vsel %vm1376_vm3, %v1340_v52, %v6499_v50  ;;  %v1380_v3 = vsel %vm1376_vm3, %v1341_v53, %v6500_v49  ;;  %v6530_v40 = vunpack.i.h.bf16 %v8218_v8  ;;  %v218_v49 = vld [vmem:[#allocation2 + $0xaa] sm:$0xff]  ;;  %v6545_v50 = vunpack.i.h.bf16 %v8241_v41 }
  0x97   :  { %6712 = vrot.lane.b32.xlu0 %v6711_v39, %s7985_s18  ;;  %v68_v39 = vld [vmem:[%s11090_s0 + $0xc8] sm:$0xff] }
  0x98   :  { %v6508_v60 = vpop.permute.xlu1 %6507  ;;  %6722 = vrot.lane.b32.xlu2 %v6721_v47, %s7986_s19  ;;  %107 = vst.msk [vmem:[#allocation2 + $0xcb] sm:$0xff] %vm81_vm1, %v68_v39  ;;  %v180_v47 = vld [vmem:[#allocation2 + $0xa9] sm:$0xff]  ;;  %v219_v39 = vld [vmem:[#allocation2 + $0xb2] sm:$0xff] }
  0x99   :  { %v6503_v59 = vpop.permute.xlu0 %6502  ;;  %v6510_v62 = vunpack.i.h.bf16 %v6508_v60  ;;  %v6509_v63 = vunpack.i.l.bf16 %v6508_v60 }
  0x9a   :  { %v6505_v32 = vunpack.i.h.bf16 %v6503_v59  ;;  %v6504_v61 = vunpack.i.l.bf16 %v6503_v59  ;;  %v8261_v6 = vpop.permute.xlu2 %6557 }
  0x9c   :  { %v1418_v45 = vsel %vm1415_vm4, %v1379_v2, %v6504_v61  ;;  %v1419_v7 = vsel %vm1415_vm4, %v1380_v3, %v6505_v32  ;;  %v6756_v32 = vpack.i.bf16 %v180_v47, %v179_v43  ;;  %v6761_v61 = vpack.i.bf16 %v218_v49, %v217_v48  ;;  %v69_v3 = vld [vmem:[%s11090_s0 + $0xd0] sm:$0xff] }
  0x9d   :  { %v1457_v9 = vsel %vm1454_vm5, %v1418_v45, %v6509_v63  ;;  %v1458_v10 = vsel %vm1454_vm5, %v1419_v7, %v6510_v62  ;;  %108 = vst.msk [vmem:[#allocation2 + $0xd3] sm:$0xff] %vm81_vm1, %v69_v3  ;;  %v293_v45 = vld [vmem:[#allocation2 + $0xa4] sm:$0xff] }
  0x9e   :  { %v1496_v13 = vsel %vm1493_vm6, %v1457_v9, %v6514_v58  ;;  %v1497_v14 = vsel %vm1493_vm6, %v1458_v10, %v6515_v57  ;;  %6732 = vrot.lane.b32.xlu1 %v6731_v5, %s7984_s17  ;;  %v255_v57 = vld [vmem:[#allocation2 + $0xa3] sm:$0xff]  ;;  %v256_v58 = vld [vmem:[#allocation2 + $0xab] sm:$0xff] }
  0x9f   :  { %6727 = vrot.lane.b32.xlu0 %v6726_v4, %s7981_s29  ;;  %v1535_v16 = vsel %vm1532_vm7, %v1496_v13, 0.0  ;;  %v1536_v17 = vsel %vm1532_vm7, %v1497_v14, 0.0  ;;  %v6766_v2 = vpack.i.bf16 %v256_v58, %v255_v57  ;;  %v294_v10 = vld [vmem:[#allocation2 + $0xac] sm:$0xff]  ;;  %v334_v3 = vld [vmem:[#allocation2 + $0xbd] sm:$0xff] }
  0xa0   :  { %v6523_v23 = vpop.permute.xlu1 %6522  ;;  %6737 = vrot.lane.b32.xlu2 %v6736_v11, %s7982_s30  ;;  %v1572_v29 = vpack.c.bf16 %v1536_v17, %v1535_v16  ;;  %v331_v11 = vld [vmem:[#allocation2 + $0xa5] sm:$0xff]  ;;  %v127_v13 = vld [vmem:[#allocation2 + $0x30] sm:$0xff]  ;;  %v128_v16 = vld [vmem:[#allocation2 + $0x38] sm:$0xff] }
  0xa1   :  { %v6518_v22 = vpop.permute.xlu0 %6517  ;;  %v6525_v34 = vunpack.i.h.bf16 %v6523_v23  ;;  %v6524_v35 = vunpack.i.l.bf16 %v6523_v23  ;;  %v6776_v23 = vpack.i.bf16 %v332_v12, %v331_v11  ;;  %v371_v11 = vld [vmem:[#allocation2 + $0xb6] sm:$0xff]  ;;  %v372_v12 = vld [vmem:[#allocation2 + $0xbe] sm:$0xff] }
  0xa2   :  { %v6520_v25 = vunpack.i.h.bf16 %v6518_v22  ;;  %v6519_v26 = vunpack.i.l.bf16 %v6518_v22  ;;  %v8278_v33 = vpop.permute.xlu2 %6572  ;;  %v6771_v22 = vpack.i.bf16 %v294_v10, %v293_v45 }
  0xa3   :  { %v6574_v43 = vunpack.i.l.bf16 %v8278_v33 }
  0xa4   :  { %v1304_v36 = vsel %vm81_vm1, %v126_v24, %v6520_v25  ;;  %v1303_v37 = vsel %vm81_vm1, %v125_v21, %v6519_v26  ;;  %6048 = vmatmul.msk.bf16.gmra.mxu0 %vm1618_vm8, %v1572_v29  ;;  %v6781_v29 = vpack.i.bf16 %v370_v20, %v369_v19 }
  0xa5   :  { %v1342_v44 = vsel %vm1337_vm2, %v1303_v37, %v6524_v35  ;;  %v1343_v46 = vsel %vm1337_vm2, %v1304_v36, %v6525_v34  ;;  %v6559_v34 = vunpack.i.l.bf16 %v8261_v6  ;;  %v181_v35 = vld [vmem:[#allocation2 + $0xb1] sm:$0xff] }
  0xa6   :  { %6747 = vrot.lane.b32.xlu1 %v6746_v31, %s7983_s12  ;;  %v1381_v59 = vsel %vm1376_vm3, %v1342_v44, %v6529_v42  ;;  %v1382_v60 = vsel %vm1376_vm3, %v1343_v46, %v6530_v40  ;;  %v6560_v31 = vunpack.i.h.bf16 %v8261_v6  ;;  %v220_v40 = vld [vmem:[#allocation2 + $0xba] sm:$0xff]  ;;  %v6575_v42 = vunpack.i.h.bf16 %v8278_v33 }
  0xa7   :  { %6742 = vrot.lane.b32.xlu0 %v6741_v30, %s7985_s18  ;;  %v70_v30 = vld [vmem:[%s11090_s0 + $0xd8] sm:$0xff] }
  0xa8   :  { %v6538_v53 = vpop.permute.xlu1 %6537  ;;  %6752 = vrot.lane.b32.xlu2 %v6751_v38, %s7986_s19  ;;  %109 = vst.msk [vmem:[#allocation2 + $0xdb] sm:$0xff] %vm81_vm1, %v70_v30  ;;  %v182_v38 = vld [vmem:[#allocation2 + $0xb9] sm:$0xff]  ;;  %v221_v30 = vld [vmem:[#allocation2 + $0xc2] sm:$0xff] }
  0xa9   :  { %v6533_v52 = vpop.permute.xlu0 %6532  ;;  %v6540_v55 = vunpack.i.h.bf16 %v6538_v53  ;;  %v6539_v56 = vunpack.i.l.bf16 %v6538_v53 }
  0xaa   :  { %v6535_v8 = vunpack.i.h.bf16 %v6533_v52  ;;  %v6534_v54 = vunpack.i.l.bf16 %v6533_v52  ;;  %v8298_v62 = vpop.permute.xlu2 %6587 }
  0xac   :  { %v1420_v41 = vsel %vm1415_vm4, %v1381_v59, %v6534_v54  ;;  %v1421_v63 = vsel %vm1415_vm4, %v1382_v60, %v6535_v8  ;;  %v6786_v8 = vpack.i.bf16 %v182_v38, %v181_v35  ;;  %v6791_v54 = vpack.i.bf16 %v220_v40, %v219_v39  ;;  %v71_v60 = vld [vmem:[%s11090_s0 + $0xe0] sm:$0xff] }
  0xad   :  { %v1459_v0 = vsel %vm1454_vm5, %v1420_v41, %v6539_v56  ;;  %v1460_v1 = vsel %vm1454_vm5, %v1421_v63, %v6540_v55  ;;  %110 = vst.msk [vmem:[#allocation2 + $0xe3] sm:$0xff] %vm81_vm1, %v71_v60  ;;  %v295_v41 = vld [vmem:[#allocation2 + $0xb4] sm:$0xff] }
  0xae   :  { %v1498_v4 = vsel %vm1493_vm6, %v1459_v0, %v6544_v51  ;;  %v1499_v5 = vsel %vm1493_vm6, %v1460_v1, %v6545_v50  ;;  %6762 = vrot.lane.b32.xlu1 %v6761_v61, %s7984_s17  ;;  %v257_v50 = vld [vmem:[#allocation2 + $0xb3] sm:$0xff]  ;;  %v258_v51 = vld [vmem:[#allocation2 + $0xbb] sm:$0xff] }
  0xaf   :  { %6757 = vrot.lane.b32.xlu0 %v6756_v32, %s7981_s29  ;;  %v1537_v7 = vsel %vm1532_vm7, %v1498_v4, 0.0  ;;  %v1538_v9 = vsel %vm1532_vm7, %v1499_v5, 0.0  ;;  %v6796_v59 = vpack.i.bf16 %v258_v51, %v257_v50  ;;  %v296_v1 = vld [vmem:[#allocation2 + $0xbc] sm:$0xff]  ;;  %v336_v60 = vld [vmem:[#allocation2 + $0xcd] sm:$0xff] }
  0xb0   :  { %v6553_v15 = vpop.permute.xlu1 %6552  ;;  %6767 = vrot.lane.b32.xlu2 %v6766_v2, %s7982_s30  ;;  %v1573_v21 = vpack.c.bf16 %v1538_v9, %v1537_v7  ;;  %v333_v2 = vld [vmem:[#allocation2 + $0xb5] sm:$0xff]  ;;  %v129_v4 = vld [vmem:[#allocation2 + $0x40] sm:$0xff]  ;;  %v130_v7 = vld [vmem:[#allocation2 + $0x48] sm:$0xff] }
  0xb1   :  { %v6548_v14 = vpop.permute.xlu0 %6547  ;;  %v6555_v25 = vunpack.i.h.bf16 %v6553_v15  ;;  %v6554_v26 = vunpack.i.l.bf16 %v6553_v15  ;;  %v6806_v15 = vpack.i.bf16 %v334_v3, %v333_v2  ;;  %v373_v2 = vld [vmem:[#allocation2 + $0xc6] sm:$0xff]  ;;  %v374_v3 = vld [vmem:[#allocation2 + $0xce] sm:$0xff] }
  0xb2   :  { %v6550_v17 = vunpack.i.h.bf16 %v6548_v14  ;;  %v6549_v18 = vunpack.i.l.bf16 %v6548_v14  ;;  %v8315_v24 = vpop.permute.xlu2 %6602  ;;  %v6801_v14 = vpack.i.bf16 %v296_v1, %v295_v41 }
  0xb3   :  { %v6604_v35 = vunpack.i.l.bf16 %v8315_v24 }
  0xb4   :  { %v1306_v27 = vsel %vm81_vm1, %v128_v16, %v6550_v17  ;;  %v1305_v28 = vsel %vm81_vm1, %v127_v13, %v6549_v18  ;;  %6049 = vmatmul.msk.bf16.gmra.mxu0 %vm1618_vm8, %v1573_v21  ;;  %v6811_v21 = vpack.i.bf16 %v372_v12, %v371_v11 }
  0xb5   :  { %v1344_v36 = vsel %vm1337_vm2, %v1305_v28, %v6554_v26  ;;  %v1345_v37 = vsel %vm1337_vm2, %v1306_v27, %v6555_v25  ;;  %v6589_v25 = vunpack.i.l.bf16 %v8298_v62  ;;  %v183_v26 = vld [vmem:[#allocation2 + $0xc1] sm:$0xff] }
  0xb6   :  { %6777 = vrot.lane.b32.xlu1 %v6776_v23, %s7983_s12  ;;  %v1383_v52 = vsel %vm1376_vm3, %v1344_v36, %v6559_v34  ;;  %v1384_v53 = vsel %vm1376_vm3, %v1345_v37, %v6560_v31  ;;  %v6590_v23 = vunpack.i.h.bf16 %v8298_v62  ;;  %v222_v31 = vld [vmem:[#allocation2 + $0xca] sm:$0xff]  ;;  %v6605_v34 = vunpack.i.h.bf16 %v8315_v24 }
  0xb7   :  { %6772 = vrot.lane.b32.xlu0 %v6771_v22, %s7985_s18  ;;  %v72_v22 = vld [vmem:[%s11090_s0 + $0xe8] sm:$0xff] }
  0xb8   :  { %v6568_v46 = vpop.permute.xlu1 %6567  ;;  %6782 = vrot.lane.b32.xlu2 %v6781_v29, %s7986_s19  ;;  %111 = vst.msk [vmem:[#allocation2 + $0xeb] sm:$0xff] %vm81_vm1, %v72_v22  ;;  %v184_v29 = vld [vmem:[#allocation2 + $0xc9] sm:$0xff]  ;;  %v223_v22 = vld [vmem:[#allocation2 + $0xd2] sm:$0xff] }
  0xb9   :  { %v6563_v44 = vpop.permute.xlu0 %6562  ;;  %v6570_v48 = vunpack.i.h.bf16 %v6568_v46  ;;  %v6569_v49 = vunpack.i.l.bf16 %v6568_v46 }
  0xba   :  { %v6565_v6 = vunpack.i.h.bf16 %v6563_v44  ;;  %v6564_v47 = vunpack.i.l.bf16 %v6563_v44  ;;  %v8335_v55 = vpop.permute.xlu2 %6617 }
  0xbc   :  { %v1422_v33 = vsel %vm1415_vm4, %v1383_v52, %v6564_v47  ;;  %v1423_v56 = vsel %vm1415_vm4, %v1384_v53, %v6565_v6  ;;  %v6816_v6 = vpack.i.bf16 %v184_v29, %v183_v26  ;;  %v6821_v47 = vpack.i.bf16 %v222_v31, %v221_v30  ;;  %v73_v53 = vld [vmem:[%s11090_s0 + $0xf0] sm:$0xff] }
  0xbd   :  { %v1461_v57 = vsel %vm1454_vm5, %v1422_v33, %v6569_v49  ;;  %v1462_v58 = vsel %vm1454_vm5, %v1423_v56, %v6570_v48  ;;  %112 = vst.msk [vmem:[#allocation2 + $0xf3] sm:$0xff] %vm81_vm1, %v73_v53  ;;  %v297_v33 = vld [vmem:[#allocation2 + $0xc4] sm:$0xff] }
  0xbe   :  { %v1500_v32 = vsel %vm1493_vm6, %v1461_v57, %v6574_v43  ;;  %v1501_v61 = vsel %vm1493_vm6, %v1462_v58, %v6575_v42  ;;  %6792 = vrot.lane.b32.xlu1 %v6791_v54, %s7984_s17  ;;  %v259_v42 = vld [vmem:[#allocation2 + $0xc3] sm:$0xff]  ;;  %v260_v43 = vld [vmem:[#allocation2 + $0xcb] sm:$0xff] }
  0xbf   :  { %6787 = vrot.lane.b32.xlu0 %v6786_v8, %s7981_s29  ;;  %v1539_v63 = vsel %vm1532_vm7, %v1500_v32, 0.0  ;;  %v1540_v0 = vsel %vm1532_vm7, %v1501_v61, 0.0  ;;  %v6826_v52 = vpack.i.bf16 %v260_v43, %v259_v42  ;;  %v298_v58 = vld [vmem:[#allocation2 + $0xcc] sm:$0xff]  ;;  %v338_v53 = vld [vmem:[#allocation2 + $0xdd] sm:$0xff] }
  0xc0   :  { %v6583_v45 = vpop.permute.xlu1 %6582  ;;  %6797 = vrot.lane.b32.xlu2 %v6796_v59, %s7982_s30  ;;  %v1574_v13 = vpack.c.bf16 %v1540_v0, %v1539_v63  ;;  %v335_v59 = vld [vmem:[#allocation2 + $0xc5] sm:$0xff]  ;;  %v131_v32 = vld [vmem:[#allocation2 + $0x50] sm:$0xff]  ;;  %v132_v63 = vld [vmem:[#allocation2 + $0x58] sm:$0xff] }
  0xc1   :  { %v6578_v5 = vpop.permute.xlu0 %6577  ;;  %v6585_v17 = vunpack.i.h.bf16 %v6583_v45  ;;  %v6584_v18 = vunpack.i.l.bf16 %v6583_v45  ;;  %v6836_v45 = vpack.i.bf16 %v336_v60, %v335_v59  ;;  %v375_v59 = vld [vmem:[#allocation2 + $0xd6] sm:$0xff]  ;;  %v376_v60 = vld [vmem:[#allocation2 + $0xde] sm:$0xff] }
  0xc2   :  { %v6580_v9 = vunpack.i.h.bf16 %v6578_v5  ;;  %v6579_v10 = vunpack.i.l.bf16 %v6578_v5  ;;  %v8352_v16 = vpop.permute.xlu2 %6632  ;;  %v6831_v5 = vpack.i.bf16 %v298_v58, %v297_v33 }
  0xc3   :  { %v6634_v26 = vunpack.i.l.bf16 %v8352_v16 }
  0xc4   :  { %v1308_v19 = vsel %vm81_vm1, %v130_v7, %v6580_v9  ;;  %v1307_v20 = vsel %vm81_vm1, %v129_v4, %v6579_v10  ;;  %6050 = vmatmul.msk.bf16.gmra.mxu0 %vm1618_vm8, %v1574_v13  ;;  %v6841_v13 = vpack.i.bf16 %v374_v3, %v373_v2 }
  0xc5   :  { %v1346_v27 = vsel %vm1337_vm2, %v1307_v20, %v6584_v18  ;;  %v1347_v28 = vsel %vm1337_vm2, %v1308_v19, %v6585_v17  ;;  %v6619_v17 = vunpack.i.l.bf16 %v8335_v55  ;;  %v185_v18 = vld [vmem:[#allocation2 + $0xd1] sm:$0xff] }
  0xc6   :  { %6807 = vrot.lane.b32.xlu1 %v6806_v15, %s7983_s12  ;;  %v1385_v44 = vsel %vm1376_vm3, %v1346_v27, %v6589_v25  ;;  %v1386_v46 = vsel %vm1376_vm3, %v1347_v28, %v6590_v23  ;;  %v6620_v15 = vunpack.i.h.bf16 %v8335_v55  ;;  %v224_v23 = vld [vmem:[#allocation2 + $0xda] sm:$0xff]  ;;  %v6635_v25 = vunpack.i.h.bf16 %v8352_v16 }
  0xc7   :  { %6802 = vrot.lane.b32.xlu0 %v6801_v14, %s7985_s18  ;;  %v74_v14 = vld [vmem:[%s11090_s0 + $0xf8] sm:$0xff] }
  0xc8   :  { %v6598_v37 = vpop.permute.xlu1 %6597  ;;  %6812 = vrot.lane.b32.xlu2 %v6811_v21, %s7986_s19  ;;  %113 = vst.msk [vmem:[#allocation2 + $0xfb] sm:$0xff] %vm81_vm1, %v74_v14  ;;  %v186_v21 = vld [vmem:[#allocation2 + $0xd9] sm:$0xff]  ;;  %v225_v14 = vld [vmem:[#allocation2 + $0xe2] sm:$0xff] }
  0xc9   :  { %v6593_v36 = vpop.permute.xlu0 %6592  ;;  %v6600_v39 = vunpack.i.h.bf16 %v6598_v37  ;;  %v6599_v40 = vunpack.i.l.bf16 %v6598_v37 }
  0xca   :  { %v6595_v62 = vunpack.i.h.bf16 %v6593_v36  ;;  %v6594_v38 = vunpack.i.l.bf16 %v6593_v36  ;;  %v8372_v48 = vpop.permute.xlu2 %6647 }
  0xcc   :  { %v1424_v24 = vsel %vm1415_vm4, %v1385_v44, %v6594_v38  ;;  %v1425_v49 = vsel %vm1415_vm4, %v1386_v46, %v6595_v62  ;;  %v6846_v62 = vpack.i.bf16 %v186_v21, %v185_v18  ;;  %v6851_v38 = vpack.i.bf16 %v224_v23, %v223_v22  ;;  %v75_v46 = vld [vmem:[%s11090_s0 + $0x100] sm:$0xff] }
  0xcd   :  { %v1463_v50 = vsel %vm1454_vm5, %v1424_v24, %v6599_v40  ;;  %v1464_v51 = vsel %vm1454_vm5, %v1425_v49, %v6600_v39  ;;  %114 = vst.msk [vmem:[#allocation2 + $0x103] sm:$0xff] %vm81_vm1, %v75_v46  ;;  %v299_v24 = vld [vmem:[#allocation2 + $0xd4] sm:$0xff] }
  0xce   :  { %v1502_v8 = vsel %vm1493_vm6, %v1463_v50, %v6604_v35  ;;  %v1503_v54 = vsel %vm1493_vm6, %v1464_v51, %v6605_v34  ;;  %6822 = vrot.lane.b32.xlu1 %v6821_v47, %s7984_s17  ;;  %v261_v34 = vld [vmem:[#allocation2 + $0xd3] sm:$0xff]  ;;  %v262_v35 = vld [vmem:[#allocation2 + $0xdb] sm:$0xff] }
  0xcf   :  { %6817 = vrot.lane.b32.xlu0 %v6816_v6, %s7981_s29  ;;  %v1541_v56 = vsel %vm1532_vm7, %v1502_v8, 0.0  ;;  %v1542_v57 = vsel %vm1532_vm7, %v1503_v54, 0.0  ;;  %v6856_v44 = vpack.i.bf16 %v262_v35, %v261_v34  ;;  %v300_v51 = vld [vmem:[#allocation2 + $0xdc] sm:$0xff]  ;;  %v340_v46 = vld [vmem:[#allocation2 + $0xed] sm:$0xff] }
  0xd0   :  { %v6613_v41 = vpop.permute.xlu1 %6612  ;;  %6827 = vrot.lane.b32.xlu2 %v6826_v52, %s7982_s30  ;;  %v1575_v4 = vpack.c.bf16 %v1542_v57, %v1541_v56  ;;  %v337_v52 = vld [vmem:[#allocation2 + $0xd5] sm:$0xff]  ;;  %v133_v8 = vld [vmem:[#allocation2 + $0x60] sm:$0xff]  ;;  %v134_v56 = vld [vmem:[#allocation2 + $0x68] sm:$0xff] }
  0xd1   :  { %v6608_v61 = vpop.permute.xlu0 %6607  ;;  %v6615_v9 = vunpack.i.h.bf16 %v6613_v41  ;;  %v6614_v10 = vunpack.i.l.bf16 %v6613_v41  ;;  %v6866_v41 = vpack.i.bf16 %v338_v53, %v337_v52  ;;  %v377_v52 = vld [vmem:[#allocation2 + $0xe6] sm:$0xff]  ;;  %v378_v53 = vld [vmem:[#allocation2 + $0xee] sm:$0xff] }
  0xd2   :  { %v6610_v0 = vunpack.i.h.bf16 %v6608_v61  ;;  %v6609_v1 = vunpack.i.l.bf16 %v6608_v61  ;;  %v8389_v7 = vpop.permute.xlu2 %6662  ;;  %v6861_v61 = vpack.i.bf16 %v300_v51, %v299_v24 }
  0xd3   :  { %v6664_v18 = vunpack.i.l.bf16 %v8389_v7 }
  0xd4   :  { %v1310_v11 = vsel %vm81_vm1, %v132_v63, %v6610_v0  ;;  %v1309_v12 = vsel %vm81_vm1, %v131_v32, %v6609_v1  ;;  %6051 = vmatmul.msk.bf16.gmra.mxu0 %vm1618_vm8, %v1575_v4  ;;  %v6871_v4 = vpack.i.bf16 %v376_v60, %v375_v59 }
  0xd5   :  { %v1348_v19 = vsel %vm1337_vm2, %v1309_v12, %v6614_v10  ;;  %v1349_v20 = vsel %vm1337_vm2, %v1310_v11, %v6615_v9  ;;  %v6649_v9 = vunpack.i.l.bf16 %v8372_v48  ;;  %v187_v10 = vld [vmem:[#allocation2 + $0xe1] sm:$0xff] }
  0xd6   :  { %6837 = vrot.lane.b32.xlu1 %v6836_v45, %s7983_s12  ;;  %v1387_v36 = vsel %vm1376_vm3, %v1348_v19, %v6619_v17  ;;  %v1388_v37 = vsel %vm1376_vm3, %v1349_v20, %v6620_v15  ;;  %v6650_v45 = vunpack.i.h.bf16 %v8372_v48  ;;  %v226_v15 = vld [vmem:[#allocation2 + $0xea] sm:$0xff]  ;;  %v6665_v17 = vunpack.i.h.bf16 %v8389_v7 }
  0xd7   :  { %6832 = vrot.lane.b32.xlu0 %v6831_v5, %s7985_s18  ;;  %v76_v5 = vld [vmem:[%s11090_s0 + $0x108] sm:$0xff] }
  0xd8   :  { %v6628_v28 = vpop.permute.xlu1 %6627  ;;  %6842 = vrot.lane.b32.xlu2 %v6841_v13, %s7986_s19  ;;  %115 = vst.msk [vmem:[#allocation2 + $0x10b] sm:$0xff] %vm81_vm1, %v76_v5  ;;  %v188_v13 = vld [vmem:[#allocation2 + $0xe9] sm:$0xff]  ;;  %v227_v5 = vld [vmem:[#allocation2 + $0xf2] sm:$0xff] }
  0xd9   :  { %v6623_v27 = vpop.permute.xlu0 %6622  ;;  %v6630_v30 = vunpack.i.h.bf16 %v6628_v28  ;;  %v6629_v31 = vunpack.i.l.bf16 %v6628_v28 }
  0xda   :  { %v6625_v55 = vunpack.i.h.bf16 %v6623_v27  ;;  %v6624_v29 = vunpack.i.l.bf16 %v6623_v27  ;;  %v8409_v39 = vpop.permute.xlu2 %6677 }
  0xdc   :  { %v1426_v16 = vsel %vm1415_vm4, %v1387_v36, %v6624_v29  ;;  %v1427_v40 = vsel %vm1415_vm4, %v1388_v37, %v6625_v55  ;;  %v6876_v55 = vpack.i.bf16 %v188_v13, %v187_v10  ;;  %v6881_v29 = vpack.i.bf16 %v226_v15, %v225_v14  ;;  %v77_v37 = vld [vmem:[%s11090_s0 + $0x110] sm:$0xff] }
  0xdd   :  { %v1465_v42 = vsel %vm1454_vm5, %v1426_v16, %v6629_v31  ;;  %v1466_v43 = vsel %vm1454_vm5, %v1427_v40, %v6630_v30  ;;  %116 = vst.msk [vmem:[#allocation2 + $0x113] sm:$0xff] %vm81_vm1, %v77_v37  ;;  %v301_v16 = vld [vmem:[#allocation2 + $0xe4] sm:$0xff] }
  0xde   :  { %v1504_v6 = vsel %vm1493_vm6, %v1465_v42, %v6634_v26  ;;  %v1505_v47 = vsel %vm1493_vm6, %v1466_v43, %v6635_v25  ;;  %6852 = vrot.lane.b32.xlu1 %v6851_v38, %s7984_s17  ;;  %v263_v25 = vld [vmem:[#allocation2 + $0xe3] sm:$0xff]  ;;  %v264_v26 = vld [vmem:[#allocation2 + $0xeb] sm:$0xff] }
  0xdf   :  { %6847 = vrot.lane.b32.xlu0 %v6846_v62, %s7981_s29  ;;  %v1543_v49 = vsel %vm1532_vm7, %v1504_v6, 0.0  ;;  %v1544_v50 = vsel %vm1532_vm7, %v1505_v47, 0.0  ;;  %v6886_v36 = vpack.i.bf16 %v264_v26, %v263_v25  ;;  %v302_v43 = vld [vmem:[#allocation2 + $0xec] sm:$0xff]  ;;  %v342_v37 = vld [vmem:[#allocation2 + $0xfd] sm:$0xff] }
  0xe0   :  { %v6643_v33 = vpop.permute.xlu1 %6642  ;;  %6857 = vrot.lane.b32.xlu2 %v6856_v44, %s7982_s30  ;;  %v1576_v32 = vpack.c.bf16 %v1544_v50, %v1543_v49  ;;  %v339_v44 = vld [vmem:[#allocation2 + $0xe5] sm:$0xff]  ;;  %v135_v6 = vld [vmem:[#allocation2 + $0x70] sm:$0xff]  ;;  %v136_v49 = vld [vmem:[#allocation2 + $0x78] sm:$0xff] }
  0xe1   :  { %v6638_v54 = vpop.permute.xlu0 %6637  ;;  %v6645_v0 = vunpack.i.h.bf16 %v6643_v33  ;;  %v6644_v1 = vunpack.i.l.bf16 %v6643_v33  ;;  %v6896_v33 = vpack.i.bf16 %v340_v46, %v339_v44  ;;  %v379_v44 = vld [vmem:[#allocation2 + $0xf6] sm:$0xff]  ;;  %v380_v46 = vld [vmem:[#allocation2 + $0xfe] sm:$0xff] }
  0xe2   :  { %v6640_v57 = vunpack.i.h.bf16 %v6638_v54  ;;  %v6639_v58 = vunpack.i.l.bf16 %v6638_v54  ;;  %v8426_v63 = vpop.permute.xlu2 %6692  ;;  %v6891_v54 = vpack.i.bf16 %v302_v43, %v301_v16 }
  0xe3   :  { %v6694_v10 = vunpack.i.l.bf16 %v8426_v63 }
  0xe4   :  { %v1312_v2 = vsel %vm81_vm1, %v134_v56, %v6640_v57  ;;  %v1311_v3 = vsel %vm81_vm1, %v133_v8, %v6639_v58  ;;  %6052 = vmatmul.msk.bf16.gmra.mxu0 %vm1618_vm8, %v1576_v32  ;;  %v6901_v32 = vpack.i.bf16 %v378_v53, %v377_v52 }
  0xe5   :  { %v1350_v11 = vsel %vm1337_vm2, %v1311_v3, %v6644_v1  ;;  %v1351_v12 = vsel %vm1337_vm2, %v1312_v2, %v6645_v0  ;;  %v6679_v0 = vunpack.i.l.bf16 %v8409_v39  ;;  %v189_v1 = vld [vmem:[#allocation2 + $0xf1] sm:$0xff] }
  0xe6   :  { %6867 = vrot.lane.b32.xlu1 %v6866_v41, %s7983_s12  ;;  %v1389_v27 = vsel %vm1376_vm3, %v1350_v11, %v6649_v9  ;;  %v1390_v28 = vsel %vm1376_vm3, %v1351_v12, %v6650_v45  ;;  %v6680_v41 = vunpack.i.h.bf16 %v8409_v39  ;;  %v228_v45 = vld [vmem:[#allocation2 + $0xfa] sm:$0xff]  ;;  %v6695_v9 = vunpack.i.h.bf16 %v8426_v63 }
  0xe7   :  { %6862 = vrot.lane.b32.xlu0 %v6861_v61, %s7985_s18  ;;  %v78_v61 = vld [vmem:[%s11090_s0 + $0x118] sm:$0xff] }
  0xe8   :  { %v6658_v20 = vpop.permute.xlu1 %6657  ;;  %6872 = vrot.lane.b32.xlu2 %v6871_v4, %s7986_s19  ;;  %117 = vst.msk [vmem:[#allocation2 + $0x11b] sm:$0xff] %vm81_vm1, %v78_v61  ;;  %v190_v4 = vld [vmem:[#allocation2 + $0xf9] sm:$0xff]  ;;  %v229_v61 = vld [vmem:[#allocation2 + $0x102] sm:$0xff] }
  0xe9   :  { %v6653_v19 = vpop.permute.xlu0 %6652  ;;  %v6660_v22 = vunpack.i.h.bf16 %v6658_v20  ;;  %v6659_v23 = vunpack.i.l.bf16 %v6658_v20 }
  0xea   :  { %v6655_v48 = vunpack.i.h.bf16 %v6653_v19  ;;  %v6654_v21 = vunpack.i.l.bf16 %v6653_v19  ;;  %v8446_v30 = vpop.permute.xlu2 %6707 }
  0xec   :  { %v1428_v7 = vsel %vm1415_vm4, %v1389_v27, %v6654_v21  ;;  %v1429_v31 = vsel %vm1415_vm4, %v1390_v28, %v6655_v48  ;;  %v6906_v48 = vpack.i.bf16 %v190_v4, %v189_v1  ;;  %v6911_v21 = vpack.i.bf16 %v228_v45, %v227_v5  ;;  %v79_v28 = vld [vmem:[%s11090_s0 + $0x120] sm:$0xff] }
  0xed   :  { %v1467_v34 = vsel %vm1454_vm5, %v1428_v7, %v6659_v23  ;;  %v1468_v35 = vsel %vm1454_vm5, %v1429_v31, %v6660_v22  ;;  %118 = vst.msk [vmem:[#allocation2 + $0x123] sm:$0xff] %vm81_vm1, %v79_v28  ;;  %v303_v7 = vld [vmem:[#allocation2 + $0xf4] sm:$0xff] }
  0xee   :  { %v1506_v62 = vsel %vm1493_vm6, %v1467_v34, %v6664_v18  ;;  %v1507_v38 = vsel %vm1493_vm6, %v1468_v35, %v6665_v17  ;;  %6882 = vrot.lane.b32.xlu1 %v6881_v29, %s7984_s17  ;;  %v265_v17 = vld [vmem:[#allocation2 + $0xf3] sm:$0xff]  ;;  %v266_v18 = vld [vmem:[#allocation2 + $0xfb] sm:$0xff] }
  0xef   :  { %6877 = vrot.lane.b32.xlu0 %v6876_v55, %s7981_s29  ;;  %v1545_v40 = vsel %vm1532_vm7, %v1506_v62, 0.0  ;;  %v1546_v42 = vsel %vm1532_vm7, %v1507_v38, 0.0  ;;  %v6916_v27 = vpack.i.bf16 %v266_v18, %v265_v17  ;;  %v304_v35 = vld [vmem:[#allocation2 + $0xfc] sm:$0xff]  ;;  %v344_v28 = vld [vmem:[#allocation2 + $0x10d] sm:$0xff] }
  0xf0   :  { %v6673_v24 = vpop.permute.xlu1 %6672  ;;  %6887 = vrot.lane.b32.xlu2 %v6886_v36, %s7982_s30  ;;  %v1577_v8 = vpack.c.bf16 %v1546_v42, %v1545_v40  ;;  %v341_v36 = vld [vmem:[#allocation2 + $0xf5] sm:$0xff]  ;;  %v137_v62 = vld [vmem:[#allocation2 + $0x80] sm:$0xff]  ;;  %v138_v40 = vld [vmem:[#allocation2 + $0x88] sm:$0xff] }
  0xf1   :  { %v6668_v47 = vpop.permute.xlu0 %6667  ;;  %v6675_v57 = vunpack.i.h.bf16 %v6673_v24  ;;  %v6674_v58 = vunpack.i.l.bf16 %v6673_v24  ;;  %v6926_v24 = vpack.i.bf16 %v342_v37, %v341_v36  ;;  %v381_v37 = vld [vmem:[#allocation2 + $0x106] sm:$0xff] }
  0xf2   :  { %v6670_v50 = vunpack.i.h.bf16 %v6668_v47  ;;  %v6669_v51 = vunpack.i.l.bf16 %v6668_v47  ;;  %v8463_v56 = vpop.permute.xlu2 %6722  ;;  %v6921_v47 = vpack.i.bf16 %v304_v35, %v303_v7 }
  0xf3   :  { %v6724_v1 = vunpack.i.l.bf16 %v8463_v56 }
  0xf4   :  { %v1314_v59 = vsel %vm81_vm1, %v136_v49, %v6670_v50  ;;  %v1313_v60 = vsel %vm81_vm1, %v135_v6, %v6669_v51  ;;  %6053 = vmatmul.msk.bf16.gmra.mxu0 %vm1618_vm8, %v1577_v8  ;;  %v6931_v8 = vpack.i.bf16 %v380_v46, %v379_v44 }
  0xf5   :  { %v1352_v2 = vsel %vm1337_vm2, %v1313_v60, %v6674_v58  ;;  %v1353_v3 = vsel %vm1337_vm2, %v1314_v59, %v6675_v57  ;;  %v6709_v57 = vunpack.i.l.bf16 %v8446_v30  ;;  %v191_v58 = vld [vmem:[#allocation2 + $0x101] sm:$0xff] }
  0xf6   :  { %6897 = vrot.lane.b32.xlu1 %v6896_v33, %s7983_s12  ;;  %v1391_v19 = vsel %vm1376_vm3, %v1352_v2, %v6679_v0  ;;  %v1392_v20 = vsel %vm1376_vm3, %v1353_v3, %v6680_v41  ;;  %v6710_v33 = vunpack.i.h.bf16 %v8446_v30  ;;  %v230_v41 = vld [vmem:[#allocation2 + $0x10a] sm:$0xff]  ;;  %v6725_v0 = vunpack.i.h.bf16 %v8463_v56 }
  0xf7   :  { %6892 = vrot.lane.b32.xlu0 %v6891_v54, %s7985_s18  ;;  %v80_v54 = vld [vmem:[%s11090_s0 + $0x128] sm:$0xf] }
  0xf8   :  { %v6688_v12 = vpop.permute.xlu1 %6687  ;;  %6902 = vrot.lane.b32.xlu2 %v6901_v32, %s7986_s19  ;;  %120 = vst.msk [vmem:[#allocation2 + $0x12b] sm:$0xf] %vm119_vm9, %v80_v54  ;;  %v192_v32 = vld [vmem:[#allocation2 + $0x109] sm:$0xff] }
  0xf9   :  { %v6683_v11 = vpop.permute.xlu0 %6682  ;;  %v6690_v14 = vunpack.i.h.bf16 %v6688_v12  ;;  %v6689_v15 = vunpack.i.l.bf16 %v6688_v12 }
  0xfa   :  { %v6685_v39 = vunpack.i.h.bf16 %v6683_v11  ;;  %v6684_v13 = vunpack.i.l.bf16 %v6683_v11  ;;  %v8483_v22 = vpop.permute.xlu2 %6737 }
  0xfc   :  { %v1430_v63 = vsel %vm1415_vm4, %v1391_v19, %v6684_v13  ;;  %v1431_v23 = vsel %vm1415_vm4, %v1392_v20, %v6685_v39  ;;  %v6936_v39 = vpack.i.bf16 %v192_v32, %v191_v58  ;;  %v6941_v13 = vpack.i.bf16 %v230_v41, %v229_v61  ;;  %v232_v58 = vld [vmem:[#allocation2 + $0x11a] sm:$0xff] }
  0xfd   :  { %v1469_v25 = vsel %vm1454_vm5, %v1430_v63, %v6689_v15  ;;  %v1470_v26 = vsel %vm1454_vm5, %v1431_v23, %v6690_v14  ;;  %v305_v63 = vld [vmem:[#allocation2 + $0x104] sm:$0xff] }
  0xfe   :  { %v1508_v55 = vsel %vm1493_vm6, %v1469_v25, %v6694_v10  ;;  %v1509_v29 = vsel %vm1493_vm6, %v1470_v26, %v6695_v9  ;;  %6912 = vrot.lane.b32.xlu1 %v6911_v21, %s7984_s17  ;;  %v267_v9 = vld [vmem:[#allocation2 + $0x103] sm:$0xff]  ;;  %v268_v10 = vld [vmem:[#allocation2 + $0x10b] sm:$0xff]  ;;  %v8533_v21 = vld [vmem:[%s11092_s2] ss:$0 sm:$0xff] }
  0xff   :  { %6907 = vrot.lane.b32.xlu0 %v6906_v48, %s7981_s29  ;;  %v1547_v31 = vsel %vm1532_vm7, %v1508_v55, 0.0  ;;  %v1548_v34 = vsel %vm1532_vm7, %v1509_v29, 0.0  ;;  %v6946_v19 = vpack.i.bf16 %v268_v10, %v267_v9  ;;  %v306_v26 = vld [vmem:[#allocation2 + $0x10c] sm:$0xff] }
 0x100   :  { %v6703_v16 = vpop.permute.xlu1 %6702  ;;  %6917 = vrot.lane.b32.xlu2 %v6916_v27, %s7982_s30  ;;  %v1578_v6 = vpack.c.bf16 %v1548_v34, %v1547_v31  ;;  %v343_v27 = vld [vmem:[#allocation2 + $0x105] sm:$0xff]  ;;  %v139_v55 = vld [vmem:[#allocation2 + $0x90] sm:$0xff]  ;;  %v140_v31 = vld [vmem:[#allocation2 + $0x98] sm:$0xff] }
 0x101   :  { %v6698_v38 = vpop.permute.xlu0 %6697  ;;  %v6705_v50 = vunpack.i.h.bf16 %v6703_v16  ;;  %v6704_v51 = vunpack.i.l.bf16 %v6703_v16 }
 0x102   :  { %v6700_v42 = vunpack.i.h.bf16 %v6698_v38  ;;  %v6699_v43 = vunpack.i.l.bf16 %v6698_v38  ;;  %v8500_v49 = vpop.permute.xlu2 %6752 }
 0x104   :  { %v1316_v52 = vsel %vm81_vm1, %v138_v40, %v6700_v42  ;;  %v1315_v53 = vsel %vm81_vm1, %v137_v62, %v6699_v43  ;;  %6054 = vmatmul.msk.bf16.gmra.mxu0 %vm1618_vm8, %v1578_v6  ;;  %v382_v62 = vld [vmem:[#allocation2 + $0x10e] sm:$0xff]  ;;  %v6951_v40 = vpack.i.bf16 %v306_v26, %v305_v63  ;;  %v6956_v42 = vpack.i.bf16 %v344_v28, %v343_v27  ;;  %v308_v63 = vld [vmem:[#allocation2 + $0x11c] sm:$0xff] }
 0x105   :  { %v1354_v59 = vsel %vm1337_vm2, %v1315_v53, %v6704_v51  ;;  %v1355_v60 = vsel %vm1337_vm2, %v1316_v52, %v6705_v50  ;;  %v6961_v50 = vpack.i.bf16 %v382_v62, %v381_v37  ;;  %v193_v51 = vld [vmem:[#allocation2 + $0x111] sm:$0xff]  ;;  %v194_v52 = vld [vmem:[#allocation2 + $0x119] sm:$0xff]  ;;  %v6740_v53 = vunpack.i.h.bf16 %v8483_v22 }
 0x106   :  { %6927 = vrot.lane.b32.xlu1 %v6926_v24, %s7983_s12  ;;  %v1393_v11 = vsel %vm1376_vm3, %v1354_v59, %v6709_v57  ;;  %v1394_v12 = vsel %vm1376_vm3, %v1355_v60, %v6710_v33  ;;  %v231_v57 = vld [vmem:[#allocation2 + $0x112] sm:$0xff]  ;;  %v6755_v59 = vunpack.i.h.bf16 %v8500_v49  ;;  %v6754_v60 = vunpack.i.l.bf16 %v8500_v49  ;;  %v141_v26 = vld [vmem:[#allocation2 + $0xa0] sm:$0xff] }
 0x107   :  { %6922 = vrot.lane.b32.xlu0 %v6921_v47, %s7985_s18  ;;  %v6966_v41 = vpack.i.bf16 %v194_v52, %v193_v51  ;;  %v6971_v10 = vpack.i.bf16 %v232_v58, %v231_v57 }
 0x108   :  { %v6718_v3 = vpop.permute.xlu1 %6717  ;;  %6932 = vrot.lane.b32.xlu2 %v6931_v8, %s7986_s19  ;;  %v6739_v8 = vunpack.i.l.bf16 %v8483_v22 }
 0x109   :  { %v6713_v2 = vpop.permute.xlu0 %6712  ;;  %v6720_v5 = vunpack.i.h.bf16 %v6718_v3  ;;  %v6719_v45 = vunpack.i.l.bf16 %v6718_v3 }
 0x10a   :  { %v6715_v30 = vunpack.i.h.bf16 %v6713_v2  ;;  %v6714_v4 = vunpack.i.l.bf16 %v6713_v2  ;;  %v8520_v14 = vpop.permute.xlu2 %6767 }
 0x10b   :  { %v6770_v51 = vunpack.i.h.bf16 %v8520_v14  ;;  %v6769_v52 = vunpack.i.l.bf16 %v8520_v14 }
 0x10c   :  { %v1432_v56 = vsel %vm1415_vm4, %v1393_v11, %v6714_v4  ;;  %v1433_v15 = vsel %vm1415_vm4, %v1394_v12, %v6715_v30  ;;  %v269_v30 = vld [vmem:[#allocation2 + $0x113] sm:$0xff]  ;;  %v270_v4 = vld [vmem:[#allocation2 + $0x11b] sm:$0xff] }
 0x10d   :  { %v1471_v17 = vsel %vm1454_vm5, %v1432_v56, %v6719_v45  ;;  %v1472_v18 = vsel %vm1454_vm5, %v1433_v15, %v6720_v5  ;;  %v6976_v15 = vpack.i.bf16 %v270_v4, %v269_v30 }
 0x10e   :  { %v1510_v20 = vsel %vm1493_vm6, %v1471_v17, %v6724_v1  ;;  %v1511_v48 = vsel %vm1493_vm6, %v1472_v18, %v6725_v0  ;;  %6942 = vrot.lane.b32.xlu1 %v6941_v13, %s7984_s17 }
 0x10f   :  { %6937 = vrot.lane.b32.xlu0 %v6936_v39, %s7981_s29  ;;  %v1549_v23 = vsel %vm1532_vm7, %v1510_v20, 0.0  ;;  %v1550_v25 = vsel %vm1532_vm7, %v1511_v48, 0.0 }
 0x110   :  { %v6733_v7 = vpop.permute.xlu1 %6732  ;;  %6947 = vrot.lane.b32.xlu2 %v6946_v19, %s7982_s30  ;;  %v1579_v16 = vpack.c.bf16 %v1550_v25, %v1549_v23  ;;  %v307_v19 = vld [vmem:[#allocation2 + $0x114] sm:$0xff]  ;;  %v346_v25 = vld [vmem:[#allocation2 + $0x11d] sm:$0xff] }
 0x111   :  { %v6728_v29 = vpop.permute.xlu0 %6727  ;;  %v1685_v36 = vpop.f32.mrf.mxu0  ;;  %v6735_v44 = vunpack.i.h.bf16 %v6733_v7  ;;  %v6734_v46 = vunpack.i.l.bf16 %v6733_v7  ;;  %v345_v23 = vld [vmem:[#allocation2 + $0x115] sm:$0xff]  ;;  %v6981_v62 = vpack.i.bf16 %v308_v63, %v307_v19  ;;  %v309_v19 = vld [vmem:[#allocation2 + $0x124] sm:$0xff] }
 0x112   :  { %v6730_v34 = vunpack.i.h.bf16 %v6728_v29  ;;  %v6729_v35 = vunpack.i.l.bf16 %v6728_v29  ;;  %v1686_v38 = vadd.f32 %v8533_v21, %v1685_v36  ;;  %v8539_v43 = vpop.permute.xlu2 %6782  ;;  %v143_v63 = vld [vmem:[#allocation2 + $0xb0] sm:$0xff] }
 0x113   :  { %v6785_v57 = vunpack.i.h.bf16 %v8539_v43  ;;  %v6784_v58 = vunpack.i.l.bf16 %v8539_v43 }
 0x114   :  { %v1318_v6 = vsel %vm81_vm1, %v140_v31, %v6730_v34  ;;  %v1317_v47 = vsel %vm81_vm1, %v139_v55, %v6729_v35  ;;  %v1780_v24 = vmax.f32 %v1686_v38, 0.0  ;;  %6055 = vmatmul.msk.bf16.gmra.mxu0 %vm1618_vm8, %v1579_v16  ;;  %v142_v55 = vld [vmem:[#allocation2 + $0xa8] sm:$0xff]  ;;  %v383_v34 = vld [vmem:[#allocation2 + $0x116] sm:$0xff]  ;;  %v384_v35 = vld [vmem:[#allocation2 + $0x11e] sm:$0xff]  ;;  %v6986_v38 = vpack.i.bf16 %v346_v25, %v345_v23 }
 0x115   :  { %v1356_v54 = vsel %vm1337_vm2, %v1317_v47, %v6734_v46  ;;  %v1357_v33 = vsel %vm1337_vm2, %v1318_v6, %v6735_v44  ;;  %v6991_v47 = vpack.i.bf16 %v384_v35, %v383_v34 }
 0x116   :  { %1819 = vst.msk [vmem:[#allocation3] sm:$0xff] %vm11106_vm10, %v1780_v24  ;;  %6957 = vrot.lane.b32.xlu1 %v6956_v42, %s7983_s12  ;;  %v1395_v5 = vsel %vm1376_vm3, %v1356_v54, %v6739_v8  ;;  %v1396_v45 = vsel %vm1376_vm3, %v1357_v33, %v6740_v53  ;;  %v195_v24 = vld [vmem:[#allocation2 + $0x121] sm:$0xff]  ;;  %v234_v33 = vld [vmem:[#allocation2 + $0x12a] sm:$0xf] }
 0x117   :  { %6952 = vrot.lane.b32.xlu0 %v6951_v40, %s7985_s18  ;;  %v233_v54 = vld [vmem:[#allocation2 + $0x122] sm:$0xff] }
 0x118   :  { %v6748_v61 = vpop.permute.xlu1 %6747  ;;  %6962 = vrot.lane.b32.xlu2 %v6961_v50, %s7986_s19  ;;  %v196_v50 = vld [vmem:[#allocation2 + $0x129] sm:$0xf] }
 0x119   :  { %v6743_v32 = vpop.permute.xlu0 %6742  ;;  %v1687_v1 = vpop.f32.mrf.mxu0  ;;  %v6750_v2 = vunpack.i.h.bf16 %v6748_v61  ;;  %v6749_v3 = vunpack.i.l.bf16 %v6748_v61 }
 0x11a   :  { %v6745_v22 = vunpack.i.h.bf16 %v6743_v32  ;;  %v6744_v0 = vunpack.i.l.bf16 %v6743_v32  ;;  %v1688_v9 = vadd.f32 %v8533_v21, %v1687_v1  ;;  %v8557_v49 = vpop.permute.xlu2 %6797  ;;  %v6996_v32 = vpack.i.bf16 %v196_v50, %v195_v24  ;;  %v271_v1 = vld [vmem:[#allocation2 + $0x123] sm:$0xff] }
 0x11c   :  { %v1434_v11 = vsel %vm1415_vm4, %v1395_v5, %v6744_v0  ;;  %v1435_v12 = vsel %vm1415_vm4, %v1396_v45, %v6745_v22  ;;  %v1781_v39 = vmax.f32 %v1688_v9, 0.0  ;;  %v7001_v5 = vpack.i.bf16 %v234_v33, %v233_v54 }
 0x11d   :  { %v1473_v13 = vsel %vm1454_vm5, %v1434_v11, %v6749_v3  ;;  %v1474_v56 = vsel %vm1454_vm5, %v1435_v12, %v6750_v2  ;;  %v272_v2 = vld [vmem:[#allocation2 + $0x12b] sm:$0xf] }
 0x11e   :  { %v1512_v17 = vsel %vm1493_vm6, %v1473_v13, %v6754_v60  ;;  %v1513_v18 = vsel %vm1493_vm6, %v1474_v56, %v6755_v59  ;;  %1820 = vst.msk [vmem:[#allocation3 + $0x8] sm:$0xff] %vm11106_vm10, %v1781_v39  ;;  %6972 = vrot.lane.b32.xlu1 %v6971_v10, %s7984_s17  ;;  %v7006_v39 = vpack.i.bf16 %v272_v2, %v271_v1 }
 0x11f   :  { %6967 = vrot.lane.b32.xlu0 %v6966_v41, %s7981_s29  ;;  %v1551_v20 = vsel %vm1532_vm7, %v1512_v17, 0.0  ;;  %v1552_v48 = vsel %vm1532_vm7, %v1513_v18, 0.0 }
 0x120   :  { %v6763_v28 = vpop.permute.xlu1 %6762  ;;  %6977 = vrot.lane.b32.xlu2 %v6976_v15, %s7982_s30  ;;  %v1580_v37 = vpack.c.bf16 %v1552_v48, %v1551_v20  ;;  %v310_v15 = vld [vmem:[#allocation2 + $0x12c] sm:$0xf] }
 0x121   :  { %v6758_v27 = vpop.permute.xlu0 %6757  ;;  %v1690_v31 = vpop.f32.mrf.mxu0  ;;  %v6765_v40 = vunpack.i.h.bf16 %v6763_v28  ;;  %v6764_v42 = vunpack.i.l.bf16 %v6763_v28  ;;  %v347_v20 = vld [vmem:[#allocation2 + $0x125] sm:$0xff]  ;;  %v348_v48 = vld [vmem:[#allocation2 + $0x12d] sm:$0xf]  ;;  %v7011_v35 = vpack.i.bf16 %v310_v15, %v309_v19 }
 0x122   :  { %v6760_v29 = vunpack.i.h.bf16 %v6758_v27  ;;  %v6759_v7 = vunpack.i.l.bf16 %v6758_v27  ;;  %v1691_v36 = vadd.f32 %v8533_v21, %v1690_v31  ;;  %v8572_v16 = vpop.permute.xlu2 %6812 }
 0x124   :  { %v1320_v44 = vsel %vm81_vm1, %v142_v55, %v6760_v29  ;;  %v1319_v46 = vsel %vm81_vm1, %v141_v26, %v6759_v7  ;;  %v1782_v6 = vmax.f32 %v1691_v36, 0.0  ;;  %6056 = vmatmul.msk.bf16.gmra.mxu0 %vm1618_vm8, %v1580_v37  ;;  %v144_v26 = vld [vmem:[#allocation2 + $0xb8] sm:$0xff]  ;;  %v385_v29 = vld [vmem:[#allocation2 + $0x126] sm:$0xff]  ;;  %v386_v7 = vld [vmem:[#allocation2 + $0x12e] sm:$0xf]  ;;  %v7016_v36 = vpack.i.bf16 %v348_v48, %v347_v20 }
 0x125   :  { %v1358_v53 = vsel %vm1337_vm2, %v1319_v46, %v6764_v42  ;;  %v1359_v8 = vsel %vm1337_vm2, %v1320_v44, %v6765_v40  ;;  %v7021_v46 = vpack.i.bf16 %v386_v7, %v385_v29 }
 0x126   :  { %1821 = vst.msk [vmem:[#allocation3 + $0x10] sm:$0xff] %vm11106_vm10, %v1782_v6  ;;  %6987 = vrot.lane.b32.xlu1 %v6986_v38, %s7983_s12  ;;  %v1397_v3 = vsel %vm1376_vm3, %v1358_v53, %v6769_v52  ;;  %v1398_v30 = vsel %vm1376_vm3, %v1359_v8, %v6770_v51  ;;  %v6800_v6 = vunpack.i.h.bf16 %v8557_v49  ;;  %v6815_v51 = vunpack.i.h.bf16 %v8572_v16 }
 0x127   :  { %6982 = vrot.lane.b32.xlu0 %v6981_v62, %s7985_s18  ;;  %v6814_v52 = vunpack.i.l.bf16 %v8572_v16 }
 0x128   :  { %v6778_v60 = vpop.permute.xlu1 %6777  ;;  %6992 = vrot.lane.b32.xlu2 %v6991_v47, %s7986_s19  ;;  %v6799_v47 = vunpack.i.l.bf16 %v8557_v49 }
 0x129   :  { %v6773_v59 = vpop.permute.xlu0 %6772  ;;  %v1692_v41 = vpop.f32.mrf.mxu0  ;;  %v6780_v22 = vunpack.i.h.bf16 %v6778_v60  ;;  %v6779_v0 = vunpack.i.l.bf16 %v6778_v60 }
 0x12a   :  { %v6775_v14 = vunpack.i.h.bf16 %v6773_v59  ;;  %v6774_v61 = vunpack.i.l.bf16 %v6773_v59  ;;  %v1693_v4 = vadd.f32 %v8533_v21, %v1692_v41  ;;  %v8590_v43 = vpop.permute.xlu2 %6827 }
 0x12b   :  { %v6829_v48 = vunpack.i.l.bf16 %v8590_v43  ;;  %v6830_v7 = vunpack.i.h.bf16 %v8590_v43 }
 0x12c   :  { %v1436_v45 = vsel %vm1415_vm4, %v1397_v3, %v6774_v61  ;;  %v1437_v9 = vsel %vm1415_vm4, %v1398_v30, %v6775_v14  ;;  %v1783_v10 = vmax.f32 %v1693_v4, 0.0  ;;  %v1858_v4 = vld [vmem:[#allocation3] ss:$2 sm:$0xff] }
 0x12d   :  { %v1475_v11 = vsel %vm1454_vm5, %v1436_v45, %v6779_v0  ;;  %v1476_v12 = vsel %vm1454_vm5, %v1437_v9, %v6780_v22 }
 0x12e   :  { %v1514_v13 = vsel %vm1493_vm6, %v1475_v11, %v6784_v58  ;;  %v1515_v56 = vsel %vm1493_vm6, %v1476_v12, %v6785_v57  ;;  %1822 = vst.msk [vmem:[#allocation3 + $0x18] sm:$0xff] %vm11106_vm10, %v1783_v10  ;;  %7002 = vrot.lane.b32.xlu1 %v7001_v5, %s7984_s17  ;;  %v1896_v5 = vld [vmem:[#allocation3 + $0x1] ss:$2 sm:$0xff]  ;;  %v146_v12 = vld [vmem:[#allocation2 + $0xc8] sm:$0xff] }
 0x12f   :  { %6997 = vrot.lane.b32.xlu0 %v6996_v32, %s7981_s29  ;;  %v1553_v17 = vsel %vm1532_vm7, %v1514_v13, 0.0  ;;  %v1554_v18 = vsel %vm1532_vm7, %v1515_v56, 0.0  ;;  %v145_v11 = vld [vmem:[#allocation2 + $0xc0] sm:$0xff]  ;;  %v8636_v56 = vmax.f32 %v1858_v4, %v1896_v5 }
 0x130   :  { %v6793_v25 = vpop.permute.xlu1 %6792  ;;  %7007 = vrot.lane.b32.xlu2 %v7006_v39, %s7982_s30  ;;  %v1581_v34 = vpack.c.bf16 %v1554_v18, %v1553_v17 }
 0x131   :  { %v6788_v23 = vpop.permute.xlu0 %6787  ;;  %v1695_v55 = vpop.f32.mrf.mxu0  ;;  %v6795_v62 = vunpack.i.h.bf16 %v6793_v25  ;;  %v6794_v38 = vunpack.i.l.bf16 %v6793_v25 }
 0x132   :  { %v6790_v27 = vunpack.i.h.bf16 %v6788_v23  ;;  %v6789_v28 = vunpack.i.l.bf16 %v6788_v23  ;;  %v1696_v31 = vadd.f32 %v8533_v21, %v1695_v55  ;;  %v8605_v37 = vpop.permute.xlu2 %6842 }
 0x134   :  { %v1322_v40 = vsel %vm81_vm1, %v144_v26, %v6790_v27  ;;  %v1321_v42 = vsel %vm81_vm1, %v143_v63, %v6789_v28  ;;  %v1784_v44 = vmax.f32 %v1696_v31, 0.0  ;;  %6057 = vmatmul.msk.bf16.gmra.mxu0 %vm1618_vm8, %v1581_v34 }
 0x135   :  { %v1360_v24 = vsel %vm1337_vm2, %v1321_v42, %v6794_v38  ;;  %v1361_v50 = vsel %vm1337_vm2, %v1322_v40, %v6795_v62  ;;  %v1860_v41 = vld [vmem:[#allocation3 + $0x10] ss:$2 sm:$0xff]  ;;  %v1898_v22 = vld [vmem:[#allocation3 + $0x11] ss:$2 sm:$0xff]  ;;  %v2067_v40 = vrot.slane %v8636_v56, 2  ;;  %v1972_v42 = vrot.slane %v8636_v56, 1 }
 0x136   :  { %1823 = vst.msk [vmem:[#allocation3 + $0x20] sm:$0xff] %vm11106_vm10, %v1784_v44  ;;  %7017 = vrot.lane.b32.xlu1 %v7016_v36, %s7983_s12  ;;  %v1399_v59 = vsel %vm1376_vm3, %v1360_v24, %v6799_v47  ;;  %v1400_v60 = vsel %vm1376_vm3, %v1361_v50, %v6800_v6  ;;  %v8632_v45 = vmax.f32 %v1860_v41, %v1898_v22  ;;  %v6845_v44 = vunpack.i.h.bf16 %v8605_v37 }
 0x137   :  { %7012 = vrot.lane.b32.xlu0 %v7011_v35, %s7985_s18  ;;  %v2162_v35 = vrot.slane %v8636_v56, 3 }
 0x138   :  { %v6808_v8 = vpop.permute.xlu1 %6807  ;;  %7022 = vrot.lane.b32.xlu2 %v7021_v46, %s7986_s19  ;;  %v2163_v25 = vrot.slane %v8632_v45, 3  ;;  %v2068_v55 = vrot.slane %v8632_v45, 2  ;;  %v1973_v29 = vrot.slane %v8632_v45, 1  ;;  %v6844_v46 = vunpack.i.l.bf16 %v8605_v37 }
 0x139   :  { %v6803_v53 = vpop.permute.xlu0 %6802  ;;  %v1697_v33 = vpop.f32.mrf.mxu0  ;;  %v6810_v57 = vunpack.i.h.bf16 %v6808_v8  ;;  %v6809_v58 = vunpack.i.l.bf16 %v6808_v8 }
 0x13a   :  { %v6805_v54 = vunpack.i.h.bf16 %v6803_v53  ;;  %v6804_v49 = vunpack.i.l.bf16 %v6803_v53  ;;  %v1698_v32 = vadd.f32 %v8533_v21, %v1697_v33  ;;  %v8623_v14 = vpop.permute.xlu2 %6857  ;;  %v2164_v47 = vsel %vm11105_vm11, %v2162_v35, %v2163_v25 }
 0x13b   :  { %v2069_v24 = vsel %vm2066_vm12, %v2067_v40, %v2068_v55  ;;  %v1974_v50 = vsel %vm1971_vm13, %v1972_v42, %v1973_v29 }
 0x13c   :  { %v1438_v61 = vsel %vm1415_vm4, %v1399_v59, %v6804_v49  ;;  %v1439_v16 = vsel %vm1415_vm4, %v1400_v60, %v6805_v54  ;;  %v1785_v0 = vmax.f32 %v1698_v32, 0.0 }
 0x13d   :  { %v1477_v1 = vsel %vm1454_vm5, %v1438_v61, %v6809_v58  ;;  %v1478_v2 = vsel %vm1454_vm5, %v1439_v16, %v6810_v57 }
 0x13e   :  { %v1516_v3 = vsel %vm1493_vm6, %v1477_v1, %v6814_v52  ;;  %v1517_v30 = vsel %vm1493_vm6, %v1478_v2, %v6815_v51  ;;  %1824 = vst.msk [vmem:[#allocation3 + $0x28] sm:$0xff] %vm11106_vm10, %v1785_v0 }
 0x13f   :  { %v1555_v9 = vsel %vm1532_vm7, %v1516_v3, 0.0  ;;  %v1556_v10 = vsel %vm1532_vm7, %v1517_v30, 0.0 }
 0x140   :  { %v6823_v13 = vpop.permute.xlu1 %6822  ;;  %v1582_v23 = vpack.c.bf16 %v1556_v10, %v1555_v9 }
 0x141   :  { %v6818_v39 = vpop.permute.xlu0 %6817  ;;  %v1700_v18 = vpop.f32.mrf.mxu0  ;;  %v6825_v19 = vunpack.i.h.bf16 %v6823_v13  ;;  %v6824_v20 = vunpack.i.l.bf16 %v6823_v13 }
 0x142   :  { %v6820_v15 = vunpack.i.h.bf16 %v6818_v39  ;;  %v6819_v17 = vunpack.i.l.bf16 %v6818_v39  ;;  %v1701_v63 = vadd.f32 %v8533_v21, %v1700_v18  ;;  %v8641_v26 = vpop.permute.xlu2 %6872 }
 0x144   :  { %v1324_v27 = vsel %vm81_vm1, %v146_v12, %v6820_v15  ;;  %v1323_v28 = vsel %vm81_vm1, %v145_v11, %v6819_v17  ;;  %v1786_v31 = vmax.f32 %v1701_v63, 0.0  ;;  %6058 = vmatmul.msk.bf16.gmra.mxu0 %vm1618_vm8, %v1582_v23  ;;  %v147_v15 = vld [vmem:[#allocation2 + $0xd0] sm:$0xff]  ;;  %v148_v17 = vld [vmem:[#allocation2 + $0xd8] sm:$0xff] }
 0x145   :  { %v1362_v34 = vsel %vm1337_vm2, %v1323_v28, %v6824_v20  ;;  %v1363_v36 = vsel %vm1337_vm2, %v1324_v27, %v6825_v19  ;;  %v1862_v62 = vld [vmem:[#allocation3 + $0x20] ss:$2 sm:$0xff]  ;;  %v1900_v38 = vld [vmem:[#allocation3 + $0x21] ss:$2 sm:$0xff] }
 0x146   :  { %1825 = vst.msk [vmem:[#allocation3 + $0x30] sm:$0xff] %vm11106_vm10, %v1786_v31  ;;  %v8657_v43 = vmax.f32 %v1862_v62, %v1900_v38  ;;  %v1401_v6 = vsel %vm1376_vm3, %v1362_v34, %v6829_v48  ;;  %v1402_v52 = vsel %vm1376_vm3, %v1363_v36, %v6830_v7  ;;  %v6860_v7 = vunpack.i.h.bf16 %v8623_v14 }
 0x147   :  { %v6859_v31 = vunpack.i.l.bf16 %v8623_v14  ;;  %v6875_v36 = vunpack.i.h.bf16 %v8641_v26  ;;  %v6874_v62 = vunpack.i.l.bf16 %v8641_v26 }
 0x148   :  { %v6838_v53 = vpop.permute.xlu1 %6837  ;;  %v2165_v8 = vrot.slane %v8657_v43, 3  ;;  %v2070_v37 = vrot.slane %v8657_v43, 2  ;;  %v1975_v54 = vrot.slane %v8657_v43, 1 }
 0x149   :  { %v6833_v51 = vpop.permute.xlu0 %6832  ;;  %v1702_v57 = vpop.f32.mrf.mxu0  ;;  %v6840_v58 = vunpack.i.h.bf16 %v6838_v53  ;;  %v6839_v59 = vunpack.i.l.bf16 %v6838_v53 }
 0x14a   :  { %v6835_v49 = vunpack.i.h.bf16 %v6833_v51  ;;  %v6834_v33 = vunpack.i.l.bf16 %v6833_v51  ;;  %v1703_v60 = vadd.f32 %v8533_v21, %v1702_v57  ;;  %v2166_v32 = vsel %vm11105_vm11, %v2163_v25, %v2165_v8  ;;  %v8679_v2 = vpop.permute.xlu2 %6887 }
 0x14b   :  { %v2071_v61 = vsel %vm2066_vm12, %v2068_v55, %v2070_v37  ;;  %v1976_v16 = vsel %vm1971_vm13, %v1973_v29, %v1975_v54  ;;  %v7036_v0 = vpack.i.bf16 %v2166_v32, %v2164_v47 }
 0x14c   :  { %v1440_v41 = vsel %vm1415_vm4, %v1401_v6, %v6834_v33  ;;  %v1441_v22 = vsel %vm1415_vm4, %v1402_v52, %v6835_v49  ;;  %v7031_v1 = vpack.i.bf16 %v2071_v61, %v2069_v24  ;;  %v1787_v3 = vmax.f32 %v1703_v60, 0.0 }
 0x14d   :  { %v1479_v30 = vsel %vm1454_vm5, %v1440_v41, %v6839_v59  ;;  %v1480_v4 = vsel %vm1454_vm5, %v1441_v22, %v6840_v58  ;;  %v7026_v5 = vpack.i.bf16 %v1976_v16, %v1974_v50  ;;  %7037 = vrot.lane.b32.xlu2 %v7036_v0, %s7987_s23  ;;  %v149_v41 = vld [vmem:[#allocation2 + $0xe0] sm:$0xff]  ;;  %v150_v22 = vld [vmem:[#allocation2 + $0xe8] sm:$0xff] }
 0x14e   :  { %7032 = vrot.lane.b32.xlu1 %v7031_v1, %s7988_s24  ;;  %v1518_v9 = vsel %vm1493_vm6, %v1479_v30, %v6844_v46  ;;  %v1519_v10 = vsel %vm1493_vm6, %v1480_v4, %v6845_v44  ;;  %1826 = vst.msk [vmem:[#allocation3 + $0x38] sm:$0xff] %vm11106_vm10, %v1787_v3 }
 0x14f   :  { %7027 = vrot.lane.b32.xlu0 %v7026_v5, %s7989_s25  ;;  %v1557_v11 = vsel %vm1532_vm7, %v1518_v9, 0.0  ;;  %v1558_v12 = vsel %vm1532_vm7, %v1519_v10, 0.0  ;;  %v6889_v10 = vunpack.i.l.bf16 %v8679_v2 }
 0x150   :  { %v6853_v13 = vpop.permute.xlu1 %6852  ;;  %v1583_v63 = vpack.c.bf16 %v1558_v12, %v1557_v11 }
 0x151   :  { %v6848_v39 = vpop.permute.xlu0 %6847  ;;  %v1705_v20 = vpop.f32.mrf.mxu0  ;;  %v6855_v23 = vunpack.i.h.bf16 %v6853_v13  ;;  %v6854_v25 = vunpack.i.l.bf16 %v6853_v13 }
 0x152   :  { %v6850_v18 = vunpack.i.h.bf16 %v6848_v39  ;;  %v6849_v19 = vunpack.i.l.bf16 %v6848_v39  ;;  %v1706_v48 = vadd.f32 %v8533_v21, %v1705_v20  ;;  %v8695_v29 = vpop.permute.xlu2 %6902 }
 0x154   :  { %v1326_v27 = vsel %vm81_vm1, %v148_v17, %v6850_v18  ;;  %v1325_v28 = vsel %vm81_vm1, %v147_v15, %v6849_v19  ;;  %v1788_v55 = vmax.f32 %v1706_v48, 0.0  ;;  %6059 = vmatmul.msk.bf16.gmra.mxu0 %vm1618_vm8, %v1583_v63  ;;  %v6890_v19 = vunpack.i.h.bf16 %v8679_v2 }
 0x155   :  { %v1364_v34 = vsel %vm1337_vm2, %v1325_v28, %v6854_v25  ;;  %v1365_v35 = vsel %vm1337_vm2, %v1326_v27, %v6855_v23  ;;  %v1864_v53 = vld [vmem:[#allocation3 + $0x30] ss:$2 sm:$0xff]  ;;  %v1902_v49 = vld [vmem:[#allocation3 + $0x31] ss:$2 sm:$0xff]  ;;  %v6905_v27 = vunpack.i.h.bf16 %v8695_v29  ;;  %v6904_v28 = vunpack.i.l.bf16 %v8695_v29 }
 0x156   :  { %1827 = vst.msk [vmem:[#allocation3 + $0x40] sm:$0xff] %vm11106_vm10, %v1788_v55  ;;  %v1403_v24 = vsel %vm1376_vm3, %v1364_v34, %v6859_v31  ;;  %v1404_v14 = vsel %vm1376_vm3, %v1365_v35, %v6860_v7  ;;  %v8714_v60 = vmax.f32 %v1864_v53, %v1902_v49 }
 0x158   :  { %v6868_v40 = vpop.permute.xlu1 %6867  ;;  %v2167_v39 = vrot.slane %v8714_v60, 3  ;;  %v2072_v17 = vrot.slane %v8714_v60, 2  ;;  %v1977_v18 = vrot.slane %v8714_v60, 1 }
 0x159   :  { %v6863_v38 = vpop.permute.xlu0 %6862  ;;  %v1707_v46 = vpop.f32.mrf.mxu0  ;;  %v6870_v6 = vunpack.i.h.bf16 %v6868_v40  ;;  %v6869_v47 = vunpack.i.l.bf16 %v6868_v40 }
 0x15a   :  { %v6865_v42 = vunpack.i.h.bf16 %v6863_v38  ;;  %v6864_v44 = vunpack.i.l.bf16 %v6863_v38  ;;  %v1708_v50 = vadd.f32 %v8533_v21, %v1707_v46  ;;  %v8718_v16 = vpop.permute.xlu2 %6917  ;;  %v2168_v2 = vsel %vm11105_vm11, %v2165_v8, %v2167_v39 }
 0x15b   :  { %v2073_v31 = vsel %vm2066_vm12, %v2070_v37, %v2072_v17  ;;  %v1978_v34 = vsel %vm1971_vm13, %v1975_v54, %v1977_v18 }
 0x15c   :  { %v1442_v51 = vsel %vm1415_vm4, %v1403_v24, %v6864_v44  ;;  %v1443_v52 = vsel %vm1415_vm4, %v1404_v14, %v6865_v42  ;;  %v1789_v26 = vmax.f32 %v1708_v50, 0.0 }
 0x15d   :  { %v1481_v33 = vsel %vm1454_vm5, %v1442_v51, %v6869_v47  ;;  %v1482_v57 = vsel %vm1454_vm5, %v1443_v52, %v6870_v6 }
 0x15e   :  { %v1520_v58 = vsel %vm1493_vm6, %v1481_v33, %v6874_v62  ;;  %v1521_v59 = vsel %vm1493_vm6, %v1482_v57, %v6875_v36  ;;  %1828 = vst.msk [vmem:[#allocation3 + $0x48] sm:$0xff] %vm11106_vm10, %v1789_v26 }
 0x15f   :  { %v1559_v32 = vsel %vm1532_vm7, %v1520_v58, 0.0  ;;  %v1560_v61 = vsel %vm1532_vm7, %v1521_v59, 0.0 }
 0x160   :  { %v6883_v1 = vpop.permute.xlu1 %6882  ;;  %v1584_v12 = vpack.c.bf16 %v1560_v61, %v1559_v32 }
 0x161   :  { %v6878_v0 = vpop.permute.xlu0 %6877  ;;  %v1710_v4 = vpop.f32.mrf.mxu0  ;;  %v6885_v5 = vunpack.i.h.bf16 %v6883_v1  ;;  %v6884_v9 = vunpack.i.l.bf16 %v6883_v1  ;;  %v152_v1 = vld [vmem:[#allocation2 + $0xf8] sm:$0xff] }
 0x162   :  { %v6880_v3 = vunpack.i.h.bf16 %v6878_v0  ;;  %v6879_v30 = vunpack.i.l.bf16 %v6878_v0  ;;  %v1711_v11 = vadd.f32 %v8533_v21, %v1710_v4  ;;  %v8750_v37 = vpop.permute.xlu2 %6932  ;;  %v151_v0 = vld [vmem:[#allocation2 + $0xf0] sm:$0xff] }
 0x164   :  { %v1328_v13 = vsel %vm81_vm1, %v150_v22, %v6880_v3  ;;  %v1327_v15 = vsel %vm81_vm1, %v149_v41, %v6879_v30  ;;  %v1790_v20 = vmax.f32 %v1711_v11, 0.0  ;;  %6060 = vmatmul.msk.bf16.gmra.mxu0 %vm1618_vm8, %v1584_v12 }
 0x165   :  { %v1366_v48 = vsel %vm1337_vm2, %v1327_v15, %v6884_v9  ;;  %v1367_v63 = vsel %vm1337_vm2, %v1328_v13, %v6885_v5  ;;  %v1866_v23 = vld [vmem:[#allocation3 + $0x40] ss:$2 sm:$0xff]  ;;  %v1904_v25 = vld [vmem:[#allocation3 + $0x41] ss:$2 sm:$0xff] }
 0x166   :  { %1829 = vst.msk [vmem:[#allocation3 + $0x50] sm:$0xff] %vm11106_vm10, %v1790_v20  ;;  %v8734_v55 = vmax.f32 %v1866_v23, %v1904_v25  ;;  %v1405_v7 = vsel %vm1376_vm3, %v1366_v48, %v6889_v10  ;;  %v1406_v29 = vsel %vm1376_vm3, %v1367_v63, %v6890_v19  ;;  %v6935_v48 = vunpack.i.h.bf16 %v8750_v37 }
 0x167   :  { %v6934_v63 = vunpack.i.l.bf16 %v8750_v37 }
 0x168   :  { %v6898_v36 = vpop.permute.xlu1 %6897  ;;  %v2169_v62 = vrot.slane %v8734_v55, 3  ;;  %v2074_v38 = vrot.slane %v8734_v55, 2  ;;  %v1979_v40 = vrot.slane %v8734_v55, 1 }
 0x169   :  { %v6893_v35 = vpop.permute.xlu0 %6892  ;;  %v1712_v44 = vpop.f32.mrf.mxu0  ;;  %v6900_v46 = vunpack.i.h.bf16 %v6898_v36  ;;  %v6899_v6 = vunpack.i.l.bf16 %v6898_v36 }
 0x16a   :  { %v6895_v42 = vunpack.i.h.bf16 %v6893_v35  ;;  %v6894_v8 = vunpack.i.l.bf16 %v6893_v35  ;;  %v1713_v47 = vadd.f32 %v8533_v21, %v1712_v44  ;;  %v2170_v54 = vsel %vm11105_vm11, %v2167_v39, %v2169_v62  ;;  %v8775_v12 = vpop.permute.xlu2 %6947 }
 0x16b   :  { %v2075_v24 = vsel %vm2066_vm12, %v2072_v17, %v2074_v38  ;;  %v1980_v14 = vsel %vm1971_vm13, %v1977_v18, %v1979_v40  ;;  %v7051_v52 = vpack.i.bf16 %v2170_v54, %v2168_v2  ;;  %v6920_v17 = vunpack.i.h.bf16 %v8718_v16 }
 0x16c   :  { %v1444_v50 = vsel %vm1415_vm4, %v1405_v7, %v6894_v8  ;;  %v1445_v51 = vsel %vm1415_vm4, %v1406_v29, %v6895_v42  ;;  %v7046_v53 = vpack.i.bf16 %v2075_v24, %v2073_v31  ;;  %v1791_v49 = vmax.f32 %v1713_v47, 0.0 }
 0x16d   :  { %v1483_v26 = vsel %vm1454_vm5, %v1444_v50, %v6899_v6  ;;  %v1484_v33 = vsel %vm1454_vm5, %v1445_v51, %v6900_v46  ;;  %v7041_v57 = vpack.i.bf16 %v1980_v14, %v1978_v34  ;;  %7052 = vrot.lane.b32.xlu2 %v7051_v52, %s7987_s23  ;;  %v6919_v18 = vunpack.i.l.bf16 %v8718_v16  ;;  %v153_v51 = vld [vmem:[#allocation2 + $0x100] sm:$0xff]  ;;  %v154_v52 = vld [vmem:[#allocation2 + $0x108] sm:$0xff] }
 0x16e   :  { %7047 = vrot.lane.b32.xlu1 %v7046_v53, %s7988_s24  ;;  %v1522_v58 = vsel %vm1493_vm6, %v1483_v26, %v6904_v28  ;;  %v1523_v59 = vsel %vm1493_vm6, %v1484_v33, %v6905_v27  ;;  %1830 = vst.msk [vmem:[#allocation3 + $0x58] sm:$0xff] %vm11106_vm10, %v1791_v49 }
 0x16f   :  { %7042 = vrot.lane.b32.xlu0 %v7041_v57, %s7989_s25  ;;  %v1561_v32 = vsel %vm1532_vm7, %v1522_v58, 0.0  ;;  %v1562_v61 = vsel %vm1532_vm7, %v1523_v59, 0.0 }
 0x170   :  { %v6913_v22 = vpop.permute.xlu1 %6912  ;;  %v1585_v9 = vpack.c.bf16 %v1562_v61, %v1561_v32  ;;  %v6949_v32 = vunpack.i.l.bf16 %v8775_v12 }
 0x171   :  { %v6908_v41 = vpop.permute.xlu0 %6907  ;;  %v1715_v4 = vpop.f32.mrf.mxu0  ;;  %v6915_v10 = vunpack.i.h.bf16 %v6913_v22  ;;  %v6914_v11 = vunpack.i.l.bf16 %v6913_v22 }
 0x172   :  { %v6910_v3 = vunpack.i.h.bf16 %v6908_v41  ;;  %v6909_v30 = vunpack.i.l.bf16 %v6908_v41  ;;  %v1716_v5 = vadd.f32 %v8533_v21, %v1715_v4  ;;  %v8794_v37 = vpop.permute.xlu2 %6962  ;;  %v6950_v4 = vunpack.i.h.bf16 %v8775_v12 }
 0x174   :  { %v1330_v39 = vsel %vm81_vm1, %v152_v1, %v6910_v3  ;;  %v1329_v13 = vsel %vm81_vm1, %v151_v0, %v6909_v30  ;;  %v1792_v15 = vmax.f32 %v1716_v5, 0.0  ;;  %6061 = vmatmul.msk.bf16.gmra.mxu0 %vm1618_vm8, %v1585_v9 }
 0x175   :  { %v1368_v19 = vsel %vm1337_vm2, %v1329_v13, %v6914_v11  ;;  %v1369_v20 = vsel %vm1337_vm2, %v1330_v39, %v6915_v10  ;;  %v1868_v42 = vld [vmem:[#allocation3 + $0x50] ss:$2 sm:$0xff]  ;;  %v1906_v8 = vld [vmem:[#allocation3 + $0x51] ss:$2 sm:$0xff]  ;;  %v6965_v13 = vunpack.i.h.bf16 %v8794_v37 }
 0x176   :  { %1831 = vst.msk [vmem:[#allocation3 + $0x60] sm:$0xff] %vm11106_vm10, %v1792_v15  ;;  %v1407_v34 = vsel %vm1376_vm3, %v1368_v19, %v6919_v18  ;;  %v1408_v16 = vsel %vm1376_vm3, %v1369_v20, %v6920_v17  ;;  %v8799_v24 = vmax.f32 %v1868_v42, %v1906_v8  ;;  %v6964_v15 = vunpack.i.l.bf16 %v8794_v37 }
 0x178   :  { %v6928_v25 = vpop.permute.xlu1 %6927  ;;  %v2171_v22 = vrot.slane %v8799_v24, 3  ;;  %v2076_v3 = vrot.slane %v8799_v24, 2  ;;  %v1981_v30 = vrot.slane %v8799_v24, 1 }
 0x179   :  { %v6923_v23 = vpop.permute.xlu0 %6922  ;;  %v1717_v7 = vpop.f32.mrf.mxu0  ;;  %v6930_v2 = vunpack.i.h.bf16 %v6928_v25  ;;  %v6929_v31 = vunpack.i.l.bf16 %v6928_v25 }
 0x17a   :  { %v6925_v27 = vunpack.i.h.bf16 %v6923_v23  ;;  %v6924_v28 = vunpack.i.l.bf16 %v6923_v23  ;;  %v1718_v35 = vadd.f32 %v8533_v21, %v1717_v7  ;;  %v8819_v18 = vpop.permute.xlu2 %6977  ;;  %v2172_v19 = vsel %vm11105_vm11, %v2169_v62, %v2171_v22 }
 0x17b   :  { %v2077_v20 = vsel %vm2066_vm12, %v2074_v38, %v2076_v3 }
 0x17c   :  { %v1446_v29 = vsel %vm1415_vm4, %v1407_v34, %v6924_v28  ;;  %v1447_v36 = vsel %vm1415_vm4, %v1408_v16, %v6925_v27  ;;  %v1793_v44 = vmax.f32 %v1718_v35, 0.0 }
 0x17d   :  { %v1485_v46 = vsel %vm1454_vm5, %v1446_v29, %v6929_v31  ;;  %v1486_v6 = vsel %vm1454_vm5, %v1447_v36, %v6930_v2 }
 0x17e   :  { %v1524_v47 = vsel %vm1493_vm6, %v1485_v46, %v6934_v63  ;;  %v1525_v54 = vsel %vm1493_vm6, %v1486_v6, %v6935_v48  ;;  %1832 = vst.msk [vmem:[#allocation3 + $0x68] sm:$0xff] %vm11106_vm10, %v1793_v44  ;;  %v1982_v48 = vsel %vm1971_vm13, %v1979_v40, %v1981_v30  ;;  %v6383_v63 = vld [vmem:[%s11093_s3 + $0x38] sm:$0xff] }
 0x17f   :  { %v1563_v14 = vsel %vm1532_vm7, %v1524_v47, 0.0  ;;  %v1564_v50 = vsel %vm1532_vm7, %v1525_v54, 0.0  ;;  %2393 = vmatpush.bf16.msra.mxu1 %v6383_v63 }
 0x180   :  { %v6943_v49 = vpop.permute.xlu1 %6942  ;;  %v1586_v41 = vpack.c.bf16 %v1564_v50, %v1563_v14 }
 0x181   :  { %v6938_v53 = vpop.permute.xlu0 %6937  ;;  %v1720_v57 = vpop.f32.mrf.mxu0  ;;  %v6945_v58 = vunpack.i.h.bf16 %v6943_v49  ;;  %v6944_v59 = vunpack.i.l.bf16 %v6943_v49 }
 0x182   :  { %v6940_v26 = vunpack.i.h.bf16 %v6938_v53  ;;  %v6939_v33 = vunpack.i.l.bf16 %v6938_v53  ;;  %v1721_v61 = vadd.f32 %v8533_v21, %v1720_v57  ;;  %v6381_v53 = vld [vmem:[%s11093_s3 + $0x28] sm:$0xff]  ;;  %v155_v57 = vld [vmem:[#allocation2 + $0x110] sm:$0xff] }
 0x184   :  { %v1332_v0 = vsel %vm81_vm1, %v154_v52, %v6940_v26  ;;  %v1331_v1 = vsel %vm81_vm1, %v153_v51, %v6939_v33  ;;  %v1794_v5 = vmax.f32 %v1721_v61, 0.0  ;;  %6062 = vmatmul.msk.bf16.gmra.mxu0 %vm1618_vm8, %v1586_v41  ;;  %v6993_v33 = vpop.permute.xlu2 %6992  ;;  %v8869_v41 = vld [vmem:[%s11092_s2] ss:$0 sm:$0xff] }
 0x185   :  { %v1370_v9 = vsel %vm1337_vm2, %v1331_v1, %v6944_v59  ;;  %v1371_v10 = vsel %vm1337_vm2, %v1332_v0, %v6945_v58  ;;  %v1870_v11 = vld [vmem:[#allocation3 + $0x60] ss:$2 sm:$0xff]  ;;  %v1908_v39 = vld [vmem:[#allocation3 + $0x61] ss:$2 sm:$0xff] }
 0x186   :  { %1833 = vst.msk [vmem:[#allocation3 + $0x70] sm:$0xff] %vm11106_vm10, %v1794_v5  ;;  %v8817_v17 = vmax.f32 %v1870_v11, %v1908_v39  ;;  %v1409_v12 = vsel %vm1376_vm3, %v1370_v9, %v6949_v32  ;;  %v1410_v25 = vsel %vm1376_vm3, %v1371_v10, %v6950_v4  ;;  %v156_v58 = vld [vmem:[#allocation2 + $0x118] sm:$0xff]  ;;  %v6380_v9 = vld [vmem:[%s11093_s3 + $0x20] sm:$0xff]  ;;  %v6980_v10 = vunpack.i.h.bf16 %v8819_v18 }
 0x187   :  { %v6979_v11 = vunpack.i.l.bf16 %v8819_v18  ;;  %v6379_v39 = vld [vmem:[%s11093_s3 + $0x18] sm:$0xff] }
 0x188   :  { %v6958_v27 = vpop.permute.xlu1 %6957  ;;  %v2173_v28 = vrot.slane %v8817_v17, 3  ;;  %v2078_v62 = vrot.slane %v8817_v17, 2  ;;  %v1983_v7 = vrot.slane %v8817_v17, 1 }
 0x189   :  { %v6953_v23 = vpop.permute.xlu0 %6952  ;;  %v1722_v31 = vpop.f32.mrf.mxu0  ;;  %v6960_v34 = vunpack.i.h.bf16 %v6958_v27  ;;  %v6959_v16 = vunpack.i.l.bf16 %v6958_v27 }
 0x18a   :  { %v6955_v2 = vunpack.i.h.bf16 %v6953_v23  ;;  %v6954_v38 = vunpack.i.l.bf16 %v6953_v23  ;;  %v1723_v40 = vadd.f32 %v8533_v21, %v1722_v31  ;;  %v2174_v35 = vsel %vm11105_vm11, %v2171_v22, %v2173_v28  ;;  %v6382_v21 = vld [vmem:[%s11093_s3 + $0x30] sm:$0xff] }
 0x18b   :  { %v2079_v29 = vsel %vm2066_vm12, %v2076_v3, %v2078_v62  ;;  %v1984_v36 = vsel %vm1971_vm13, %v1981_v30, %v1983_v7  ;;  %v7066_v44 = vpack.i.bf16 %v2174_v35, %v2172_v19  ;;  %2394 = vmatpush.bf16.msra.mxu1 %v6382_v21  ;;  %v6994_v19 = vunpack.i.l.bf16 %v6993_v33 }
 0x18c   :  { %v1448_v42 = vsel %vm1415_vm4, %v1409_v12, %v6954_v38  ;;  %v1449_v8 = vsel %vm1415_vm4, %v1410_v25, %v6955_v2  ;;  %v7061_v46 = vpack.i.bf16 %v2079_v29, %v2077_v20  ;;  %v1795_v6 = vmax.f32 %v1723_v40, 0.0 }
 0x18d   :  { %v1487_v37 = vsel %vm1454_vm5, %v1448_v42, %v6959_v16  ;;  %v1488_v47 = vsel %vm1454_vm5, %v1449_v8, %v6960_v34  ;;  %v7056_v54 = vpack.i.bf16 %v1984_v36, %v1982_v48  ;;  %7067 = vrot.lane.b32.xlu2 %v7066_v44, %s7987_s23  ;;  %v6995_v12 = vunpack.i.h.bf16 %v6993_v33  ;;  %v7008_v34 = vpop.permute.xlu2 %7007  ;;  %v6378_v44 = vld [vmem:[%s11093_s3 + $0x10] sm:$0xff] }
 0x18e   :  { %7062 = vrot.lane.b32.xlu1 %v7061_v46, %s7988_s24  ;;  %v1526_v14 = vsel %vm1493_vm6, %v1487_v37, %v6964_v15  ;;  %v1527_v50 = vsel %vm1493_vm6, %v1488_v47, %v6965_v13  ;;  %1834 = vst.msk [vmem:[#allocation3 + $0x78] sm:$0xff] %vm11106_vm10, %v1795_v6 }
 0x18f   :  { %7057 = vrot.lane.b32.xlu0 %v7056_v54, %s7989_s25  ;;  %v1565_v51 = vsel %vm1532_vm7, %v1526_v14, 0.0  ;;  %v1566_v52 = vsel %vm1532_vm7, %v1527_v50, 0.0  ;;  %2395 = vmatpush.bf16.msra.mxu1 %v6381_v53  ;;  %v157_v54 = vld [vmem:[#allocation2 + $0x120] sm:$0xff]  ;;  %v158_v14 = vld [vmem:[#allocation2 + $0x128] sm:$0xf] }
 0x190   :  { %v6973_v26 = vpop.permute.xlu1 %6972  ;;  %v1587_v0 = vpack.c.bf16 %v1566_v52, %v1565_v51  ;;  %v6377_v52 = vld [vmem:[%s11093_s3 + $0x8] sm:$0xff] }
 0x191   :  { %v6968_v49 = vpop.permute.xlu0 %6967  ;;  %v1725_v61 = vpop.f32.mrf.mxu0  ;;  %v6975_v1 = vunpack.i.h.bf16 %v6973_v26  ;;  %v6974_v3 = vunpack.i.l.bf16 %v6973_v26 }
 0x192   :  { %v6970_v59 = vunpack.i.h.bf16 %v6968_v49  ;;  %v6969_v32 = vunpack.i.l.bf16 %v6968_v49  ;;  %v1726_v22 = vadd.f32 %v8869_v41, %v1725_v61 }
 0x193   :  { %2396 = vmatpush.bf16.msra.mxu1 %v6380_v9 }
 0x194   :  { %v1334_v30 = vsel %vm81_vm1, %v156_v58, %v6970_v59  ;;  %v1333_v4 = vsel %vm81_vm1, %v155_v57, %v6969_v32  ;;  %v1796_v5 = vmax.f32 %v1726_v22, 0.0  ;;  %6063 = vmatmul.msk.bf16.gmra.mxu0 %vm1618_vm8, %v1587_v0 }
 0x195   :  { %v1372_v13 = vsel %vm1337_vm2, %v1333_v4, %v6974_v3  ;;  %v1373_v15 = vsel %vm1337_vm2, %v1334_v30, %v6975_v1  ;;  %v1872_v35 = vld [vmem:[#allocation3 + $0x70] ss:$2 sm:$0xff]  ;;  %v1910_v29 = vld [vmem:[#allocation3 + $0x71] ss:$2 sm:$0xff]  ;;  %v7010_v3 = vunpack.i.h.bf16 %v7008_v34  ;;  %v7009_v30 = vunpack.i.l.bf16 %v7008_v34  ;;  %v7023_v9 = vpop.permute.xlu2 %7022 }
 0x196   :  { %1835 = vst.msk [vmem:[#allocation3 + $0x80] sm:$0xff] %vm11106_vm10, %v1796_v5  ;;  %v1411_v2 = vsel %vm1376_vm3, %v1372_v13, %v6979_v11  ;;  %v1412_v38 = vsel %vm1376_vm3, %v1373_v15, %v6980_v10  ;;  %v8899_v6 = vmax.f32 %v1872_v35, %v1910_v29  ;;  %v6376_v5 = vld [vmem:[%s11093_s3] sm:$0xff]  ;;  %v7025_v15 = vunpack.i.h.bf16 %v7023_v9 }
 0x197   :  { %2397 = vmatpush.bf16.msra.mxu1 %v6379_v39 }
 0x198   :  { %v6988_v48 = vpop.permute.xlu1 %6987  ;;  %v2175_v32 = vrot.slane %v8899_v6, 3  ;;  %v2080_v0 = vrot.slane %v8899_v6, 2  ;;  %v1985_v1 = vrot.slane %v8899_v6, 1 }
 0x199   :  { %v6983_v20 = vpop.permute.xlu0 %6982  ;;  %v1727_v25 = vpop.f32.mrf.mxu0  ;;  %v6990_v27 = vunpack.i.h.bf16 %v6988_v48  ;;  %v6989_v18 = vunpack.i.l.bf16 %v6988_v48 }
 0x19a   :  { %v6985_v63 = vunpack.i.h.bf16 %v6983_v20  ;;  %v6984_v23 = vunpack.i.l.bf16 %v6983_v20  ;;  %v1728_v31 = vadd.f32 %v8869_v41, %v1727_v25  ;;  %v2176_v20 = vsel %vm11105_vm11, %v2173_v28, %v2175_v32 }
 0x19b   :  { %2398 = vmatpush.bf16.msra.mxu1 %v6378_v44  ;;  %v2081_v48 = vsel %vm2066_vm12, %v2078_v62, %v2080_v0 }
 0x19c   :  { %v1450_v16 = vsel %vm1415_vm4, %v1411_v2, %v6984_v23  ;;  %v1451_v40 = vsel %vm1415_vm4, %v1412_v38, %v6985_v63  ;;  %v1797_v36 = vmax.f32 %v1728_v31, 0.0  ;;  %v1986_v63 = vsel %vm1971_vm13, %v1983_v7, %v1985_v1 }
 0x19d   :  { %v1489_v42 = vsel %vm1454_vm5, %v1450_v16, %v6989_v18  ;;  %v1490_v8 = vsel %vm1454_vm5, %v1451_v40, %v6990_v27 }
 0x19e   :  { %v1528_v46 = vsel %vm1493_vm6, %v1489_v42, %v6994_v19  ;;  %v1529_v21 = vsel %vm1493_vm6, %v1490_v8, %v6995_v12  ;;  %1836 = vst.msk [vmem:[#allocation3 + $0x88] sm:$0xff] %vm11106_vm10, %v1797_v36  ;;  %v7024_v19 = vunpack.i.l.bf16 %v7023_v9 }
 0x19f   :  { %v1567_v37 = vsel %vm1532_vm7, %v1528_v46, 0.0  ;;  %v1568_v47 = vsel %vm1532_vm7, %v1529_v21, 0.0  ;;  %2399 = vmatpush.bf16.msra.mxu1 %v6377_v52 }
 0x1a0   :  { %v7003_v51 = vpop.permute.xlu1 %7002  ;;  %v1588_v59 = vpack.c.bf16 %v1568_v47, %v1567_v37 }
 0x1a1   :  { %v6998_v50 = vpop.permute.xlu0 %6997  ;;  %v1730_v26 = vpop.f32.mrf.mxu0  ;;  %v7005_v33 = vunpack.i.h.bf16 %v7003_v51  ;;  %v7004_v57 = vunpack.i.l.bf16 %v7003_v51 }
 0x1a2   :  { %v7000_v53 = vunpack.i.h.bf16 %v6998_v50  ;;  %v6999_v49 = vunpack.i.l.bf16 %v6998_v50  ;;  %v1731_v58 = vadd.f32 %v8869_v41, %v1730_v26 }
 0x1a3   :  { %2400 = vmatpush.bf16.msra.mxu1 %v6376_v5 }
 0x1a4   :  { %v1336_v61 = vsel %vm81_vm1, %v158_v14, %v7000_v53  ;;  %v1335_v22 = vsel %vm81_vm1, %v157_v54, %v6999_v49  ;;  %v1798_v4 = vmax.f32 %v1731_v58, 0.0  ;;  %6064 = vmatmul.msk.bf16.gmra.mxu0 %vm1618_vm8, %v1588_v59 }
 0x1a5   :  { %v1374_v10 = vsel %vm1337_vm2, %v1335_v22, %v7004_v57  ;;  %v1375_v11 = vsel %vm1337_vm2, %v1336_v61, %v7005_v33  ;;  %v1874_v39 = vld [vmem:[#allocation3 + $0x80] ss:$2 sm:$0xff]  ;;  %v1912_v13 = vld [vmem:[#allocation3 + $0x81] ss:$2 sm:$0xff] }
 0x1a6   :  { %1837 = vst.msk [vmem:[#allocation3 + $0x90] sm:$0xff] %vm11106_vm10, %v1798_v4  ;;  %v8919_v12 = vmax.f32 %v1874_v39, %v1912_v13  ;;  %v1413_v25 = vsel %vm1376_vm3, %v1374_v10, %v7009_v30  ;;  %v1414_v27 = vsel %vm1376_vm3, %v1375_v11, %v7010_v3 }
 0x1a8   :  { %v7018_v18 = vpop.permute.xlu1 %7017  ;;  %v2177_v2 = vrot.slane %v8919_v12, 3  ;;  %v2082_v38 = vrot.slane %v8919_v12, 2  ;;  %v1987_v29 = vrot.slane %v8919_v12, 1 }
 0x1a9   :  { %v7013_v23 = vpop.permute.xlu0 %7012  ;;  %v1732_v34 = vpop.f32.mrf.mxu0  ;;  %v7020_v16 = vunpack.i.h.bf16 %v7018_v18  ;;  %v7019_v40 = vunpack.i.l.bf16 %v7018_v18 }
 0x1aa   :  { %v7015_v31 = vunpack.i.h.bf16 %v7013_v23  ;;  %v7014_v28 = vunpack.i.l.bf16 %v7013_v23  ;;  %v1733_v62 = vadd.f32 %v8869_v41, %v1732_v34  ;;  %v2178_v7 = vsel %vm11105_vm11, %v2175_v32, %v2177_v2 }
 0x1ab   :  { %v2083_v35 = vsel %vm2066_vm12, %v2080_v0, %v2082_v38  ;;  %v7081_v8 = vpack.i.bf16 %v2178_v7, %v2176_v20  ;;  %v1988_v47 = vsel %vm1971_vm13, %v1985_v1, %v1987_v29  ;;  %v7038_v0 = vpop.permute.xlu2 %7037 }
 0x1ac   :  { %v1452_v36 = vsel %vm1415_vm4, %v1413_v25, %v7014_v28  ;;  %v1453_v42 = vsel %vm1415_vm4, %v1414_v27, %v7015_v31  ;;  %v7076_v44 = vpack.i.bf16 %v2083_v35, %v2081_v48  ;;  %v1799_v46 = vmax.f32 %v1733_v62, 0.0 }
 0x1ad   :  { %v1491_v21 = vsel %vm1454_vm5, %v1452_v36, %v7019_v40  ;;  %v1492_v37 = vsel %vm1454_vm5, %v1453_v42, %v7020_v16  ;;  %7082 = vrot.lane.b32.xlu2 %v7081_v8, %s7987_s23  ;;  %v7071_v54 = vpack.i.bf16 %v1988_v47, %v1986_v63  ;;  %v7040_v39 = vunpack.i.h.bf16 %v7038_v0 }
 0x1ae   :  { %7077 = vrot.lane.b32.xlu1 %v7076_v44, %s7988_s24  ;;  %v1530_v14 = vsel %vm1493_vm6, %v1491_v21, %v7024_v19  ;;  %v1531_v50 = vsel %vm1493_vm6, %v1492_v37, %v7025_v15  ;;  %1838 = vst.msk [vmem:[#allocation3 + $0x98] sm:$0xff] %vm11106_vm10, %v1799_v46  ;;  %v7039_v13 = vunpack.i.l.bf16 %v7038_v0 }
 0x1af   :  { %7072 = vrot.lane.b32.xlu0 %v7071_v54, %s7989_s25  ;;  %v1569_v51 = vsel %vm1532_vm7, %v1530_v14, 0.0  ;;  %v1570_v52 = vsel %vm1532_vm7, %v1531_v50, 0.0 }
 0x1b0   :  { %v1589_v26 = vpack.c.bf16 %v1570_v52, %v1569_v51 }
 0x1b1   :  { %v1735_v53 = vpop.f32.mrf.mxu0 }
 0x1b2   :  { %v1736_v49 = vadd.f32 %v8869_v41, %v1735_v53 }
 0x1b4   :  { %v1800_v33 = vmax.f32 %v1736_v49, 0.0  ;;  %6065 = vmatmul.msk.bf16.gmra.mxu0 %vm1618_vm8, %v1589_v26 }
 0x1b5   :  { %v1876_v32 = vld [vmem:[#allocation3 + $0x90] ss:$2 sm:$0xff]  ;;  %v1914_v61 = vld [vmem:[#allocation3 + $0x91] ss:$2 sm:$0xff] }
 0x1b6   :  { %1839 = vst.msk [vmem:[#allocation3 + $0xa0] sm:$0xff] %vm11106_vm10, %v1800_v33  ;;  %v8962_v10 = vmax.f32 %v1876_v32, %v1914_v61 }
 0x1b8   :  { %v2179_v31 = vrot.slane %v8962_v10, 3  ;;  %v1989_v34 = vrot.slane %v8962_v10, 1 }
 0x1b9   :  { %v1737_v57 = vpop.f32.mrf.mxu0 }
 0x1ba   :  { %v1738_v58 = vadd.f32 %v8869_v41, %v1737_v57  ;;  %v2180_v7 = vsel %vm11105_vm11, %v2177_v2, %v2179_v31  ;;  %v1990_v2 = vsel %vm1971_vm13, %v1987_v29, %v1989_v34 }
 0x1bc   :  { %v1801_v59 = vmax.f32 %v1738_v58, 0.0 }
 0x1be   :  { %1840 = vst.msk [vmem:[#allocation3 + $0xa8] sm:$0xff] %vm11106_vm10, %v1801_v59 }
 0x1c0   :  { %v7033_v22 = vpop.permute.xlu1 %7032 }
 0x1c1   :  { %v7035_v1 = vunpack.i.h.bf16 %v7033_v22  ;;  %v7034_v3 = vunpack.i.l.bf16 %v7033_v22  ;;  %v7028_v30 = vpop.permute.xlu0 %7027  ;;  %v1740_v9 = vpop.f32.mrf.mxu0 }
 0x1c2   :  { %v7030_v4 = vunpack.i.h.bf16 %v7028_v30  ;;  %v7029_v5 = vunpack.i.l.bf16 %v7028_v30  ;;  %v1741_v11 = vadd.f32 %v8869_v41, %v1740_v9 }
 0x1c4   :  { %v2256_v15 = vsel %vm11106_vm10, %v8636_v56, %v7029_v5  ;;  %v2257_v19 = vsel %vm11106_vm10, %v8632_v45, %v7030_v4  ;;  %v1802_v20 = vmax.f32 %v1741_v11, 0.0  ;;  %v2084_v45 = vrot.slane %v8962_v10, 2 }
 0x1c5   :  { %v2276_v48 = vsel %vm11104_vm14, %v2256_v15, %v7034_v3  ;;  %v2277_v63 = vsel %vm11104_vm14, %v2257_v19, %v7035_v1  ;;  %v1878_v27 = vld [vmem:[#allocation3 + $0xa0] ss:$2 sm:$0xff]  ;;  %v1916_v18 = vld [vmem:[#allocation3 + $0xa1] ss:$2 sm:$0xff] }
 0x1c6   :  { %v2296_v23 = vsel %vm11103_vm15, %v2276_v48, %v7039_v13  ;;  %v2297_v25 = vsel %vm11103_vm15, %v2277_v63, %v7040_v39  ;;  %1841 = vst.msk [vmem:[#allocation3 + $0xb0] sm:$0xff] %vm11106_vm10, %v1802_v20  ;;  %v8975_v56 = vmax.f32 %v1878_v27, %v1916_v18  ;;  %v2085_v8 = vsel %vm2066_vm12, %v2082_v38, %v2084_v45 }
 0x1c7   :  { %v2315_v28 = vpack.c.bf16 %v2297_v25, %v2296_v23  ;;  %v7053_v33 = vpop.permute.xlu2 %7052 }
 0x1c8   :  { %v2181_v16 = vrot.slane %v8975_v56, 3  ;;  %v2086_v40 = vrot.slane %v8975_v56, 2  ;;  %v1991_v35 = vrot.slane %v8975_v56, 1  ;;  %v7055_v3 = vunpack.i.h.bf16 %v7053_v33 }
 0x1c9   :  { %2401 = vmatmul.bf16.vlgmr.msra.gmra.mxu1 %v2315_v28  ;;  %v1742_v62 = vpop.f32.mrf.mxu0  ;;  %v7054_v30 = vunpack.i.l.bf16 %v7053_v33 }
 0x1ca   :  { %v1743_v36 = vadd.f32 %v8869_v41, %v1742_v62  ;;  %v2182_v42 = vsel %vm11105_vm11, %v2179_v31, %v2181_v16  ;;  %v2087_v44 = vsel %vm2066_vm12, %v2084_v45, %v2086_v40  ;;  %v1992_v37 = vsel %vm1971_vm13, %v1989_v34, %v1991_v35 }
 0x1cb   :  { %v7096_v46 = vpack.i.bf16 %v2182_v42, %v2180_v7  ;;  %v7091_v21 = vpack.i.bf16 %v2087_v44, %v2085_v8  ;;  %v7086_v54 = vpack.i.bf16 %v1992_v37, %v1990_v2 }
 0x1cc   :  { %v1803_v47 = vmax.f32 %v1743_v36, 0.0 }
 0x1cd   :  { %7097 = vrot.lane.b32.xlu2 %v7096_v46, %s7987_s23  ;;  %7092 = vrot.lane.b32.xlu1 %v7091_v21, %s7988_s24 }
 0x1ce   :  { %1842 = vst.msk [vmem:[#allocation3 + $0xb8] sm:$0xff] %vm11106_vm10, %v1803_v47  ;;  %7087 = vrot.lane.b32.xlu0 %v7086_v54, %s7989_s25 }
 0x1d1   :  { %v1745_v38 = vpop.f32.mrf.mxu0 }
 0x1d2   :  { %v1746_v14 = vadd.f32 %v8869_v41, %v1745_v38 }
 0x1d4   :  { %v1804_v50 = vmax.f32 %v1746_v14, 0.0 }
 0x1d5   :  { %v1880_v53 = vld [vmem:[#allocation3 + $0xb0] ss:$2 sm:$0xff]  ;;  %v1918_v49 = vld [vmem:[#allocation3 + $0xb1] ss:$2 sm:$0xff] }
 0x1d6   :  { %1843 = vst.msk [vmem:[#allocation3 + $0xc0] sm:$0xff] %vm11106_vm10, %v1804_v50  ;;  %v9007_v0 = vmax.f32 %v1880_v53, %v1918_v49 }
 0x1d8   :  { %v2183_v48 = vrot.slane %v9007_v0, 3  ;;  %v1993_v23 = vrot.slane %v9007_v0, 1 }
 0x1d9   :  { %v1747_v29 = vpop.f32.mrf.mxu0 }
 0x1da   :  { %v1748_v51 = vadd.f32 %v8869_v41, %v1747_v29  ;;  %v2184_v31 = vsel %vm11105_vm11, %v2181_v16, %v2183_v48  ;;  %v1994_v16 = vsel %vm1971_vm13, %v1991_v35, %v1993_v23 }
 0x1dc   :  { %v1805_v52 = vmax.f32 %v1748_v51, 0.0 }
 0x1de   :  { %1844 = vst.msk [vmem:[#allocation3 + $0xc8] sm:$0xff] %vm11106_vm10, %v1805_v52 }
 0x1e0   :  { %v7048_v26 = vpop.permute.xlu1 %7047 }
 0x1e1   :  { %v7050_v57 = vunpack.i.h.bf16 %v7048_v26  ;;  %v7049_v58 = vunpack.i.l.bf16 %v7048_v26  ;;  %v7043_v59 = vpop.permute.xlu0 %7042  ;;  %v1750_v22 = vpop.f32.mrf.mxu0 }
 0x1e2   :  { %v7045_v32 = vunpack.i.h.bf16 %v7043_v59  ;;  %v7044_v61 = vunpack.i.l.bf16 %v7043_v59  ;;  %v1751_v1 = vadd.f32 %v8869_v41, %v1750_v22 }
 0x1e4   :  { %v2258_v4 = vsel %vm11106_vm10, %v8657_v43, %v7044_v61  ;;  %v2259_v5 = vsel %vm11106_vm10, %v8714_v60, %v7045_v32  ;;  %v1806_v9 = vmax.f32 %v1751_v1, 0.0  ;;  %v2088_v60 = vrot.slane %v9007_v0, 2 }
 0x1e5   :  { %v2278_v11 = vsel %vm11104_vm14, %v2258_v4, %v7049_v58  ;;  %v2279_v39 = vsel %vm11104_vm14, %v2259_v5, %v7050_v57  ;;  %v1882_v19 = vld [vmem:[#allocation3 + $0xc0] ss:$2 sm:$0xff]  ;;  %v1920_v20 = vld [vmem:[#allocation3 + $0xc1] ss:$2 sm:$0xff] }
 0x1e6   :  { %v2298_v13 = vsel %vm11103_vm15, %v2278_v11, %v7054_v30  ;;  %v2299_v15 = vsel %vm11103_vm15, %v2279_v39, %v7055_v3  ;;  %1845 = vst.msk [vmem:[#allocation3 + $0xd0] sm:$0xff] %vm11106_vm10, %v1806_v9  ;;  %v9020_v43 = vmax.f32 %v1882_v19, %v1920_v20  ;;  %v2089_v62 = vsel %vm2066_vm12, %v2086_v40, %v2088_v60 }
 0x1e7   :  { %v2316_v63 = vpack.c.bf16 %v2299_v15, %v2298_v13  ;;  %v7068_v50 = vpop.permute.xlu2 %7067 }
 0x1e8   :  { %v2185_v25 = vrot.slane %v9020_v43, 3  ;;  %v2090_v27 = vrot.slane %v9020_v43, 2  ;;  %v1995_v28 = vrot.slane %v9020_v43, 1  ;;  %v7070_v58 = vunpack.i.h.bf16 %v7068_v50 }
 0x1e9   :  { %2406 = vmatmul.bf16.gmra.mxu1 %v2316_v63  ;;  %v1752_v18 = vpop.f32.mrf.mxu0  ;;  %v7069_v59 = vunpack.i.l.bf16 %v7068_v50 }
 0x1ea   :  { %v1753_v45 = vadd.f32 %v8869_v41, %v1752_v18  ;;  %v2186_v34 = vsel %vm11105_vm11, %v2183_v48, %v2185_v25  ;;  %v2091_v7 = vsel %vm2066_vm12, %v2088_v60, %v2090_v27  ;;  %v1996_v8 = vsel %vm1971_vm13, %v1993_v23, %v1995_v28 }
 0x1eb   :  { %v7111_v36 = vpack.i.bf16 %v2186_v34, %v2184_v31  ;;  %v7106_v42 = vpack.i.bf16 %v2091_v7, %v2089_v62  ;;  %v7101_v46 = vpack.i.bf16 %v1996_v8, %v1994_v16 }
 0x1ec   :  { %v1807_v44 = vmax.f32 %v1753_v45, 0.0 }
 0x1ed   :  { %7112 = vrot.lane.b32.xlu2 %v7111_v36, %s7987_s23  ;;  %7107 = vrot.lane.b32.xlu1 %v7106_v42, %s7988_s24 }
 0x1ee   :  { %1846 = vst.msk [vmem:[#allocation3 + $0xd8] sm:$0xff] %vm11106_vm10, %v1807_v44  ;;  %7102 = vrot.lane.b32.xlu0 %v7101_v46, %s7989_s25 }
 0x1f1   :  { %v1755_v40 = vpop.f32.mrf.mxu0 }
 0x1f2   :  { %v1756_v21 = vadd.f32 %v8869_v41, %v1755_v40 }
 0x1f4   :  { %v1808_v2 = vmax.f32 %v1756_v21, 0.0 }
 0x1f5   :  { %v1884_v54 = vld [vmem:[#allocation3 + $0xd0] ss:$2 sm:$0xff]  ;;  %v1922_v38 = vld [vmem:[#allocation3 + $0xd1] ss:$2 sm:$0xff] }
 0x1f6   :  { %1847 = vst.msk [vmem:[#allocation3 + $0xe0] sm:$0xff] %vm11106_vm10, %v1808_v2  ;;  %v9050_v33 = vmax.f32 %v1884_v54, %v1922_v38 }
 0x1f8   :  { %v2187_v11 = vrot.slane %v9050_v33, 3  ;;  %v1997_v13 = vrot.slane %v9050_v33, 1 }
 0x1f9   :  { %v1757_v35 = vpop.f32.mrf.mxu0 }
 0x1fa   :  { %v1758_v37 = vadd.f32 %v8869_v41, %v1757_v35  ;;  %v2188_v48 = vsel %vm11105_vm11, %v2185_v25, %v2187_v11  ;;  %v1998_v25 = vsel %vm1971_vm13, %v1995_v28, %v1997_v13 }
 0x1fc   :  { %v1809_v47 = vmax.f32 %v1758_v37, 0.0 }
 0x1fe   :  { %1848 = vst.msk [vmem:[#allocation3 + $0xe8] sm:$0xff] %vm11106_vm10, %v1809_v47 }
 0x200   :  { %v7063_v14 = vpop.permute.xlu1 %7062 }
 0x201   :  { %v7065_v29 = vunpack.i.h.bf16 %v7063_v14  ;;  %v7064_v51 = vunpack.i.l.bf16 %v7063_v14  ;;  %v7058_v52 = vpop.permute.xlu0 %7057  ;;  %v1760_v26 = vpop.f32.mrf.mxu0 }
 0x202   :  { %v7060_v53 = vunpack.i.h.bf16 %v7058_v52  ;;  %v7059_v49 = vunpack.i.l.bf16 %v7058_v52  ;;  %v1761_v57 = vadd.f32 %v8869_v41, %v1760_v26 }
 0x204   :  { %v2260_v32 = vsel %vm11106_vm10, %v8734_v55, %v7059_v49  ;;  %v2261_v61 = vsel %vm11106_vm10, %v8799_v24, %v7060_v53  ;;  %v1810_v22 = vmax.f32 %v1761_v57, 0.0  ;;  %v2092_v24 = vrot.slane %v9050_v33, 2 }
 0x205   :  { %v2280_v1 = vsel %vm11104_vm14, %v2260_v32, %v7064_v51  ;;  %v2281_v3 = vsel %vm11104_vm14, %v2261_v61, %v7065_v29  ;;  %v1886_v5 = vld [vmem:[#allocation3 + $0xe0] ss:$2 sm:$0xff]  ;;  %v1924_v9 = vld [vmem:[#allocation3 + $0xe1] ss:$2 sm:$0xff] }
 0x206   :  { %v2300_v30 = vsel %vm11103_vm15, %v2280_v1, %v7069_v59  ;;  %v2301_v4 = vsel %vm11103_vm15, %v2281_v3, %v7070_v58  ;;  %1849 = vst.msk [vmem:[#allocation3 + $0xf0] sm:$0xff] %vm11106_vm10, %v1810_v22  ;;  %v9063_v55 = vmax.f32 %v1886_v5, %v1924_v9  ;;  %v2093_v18 = vsel %vm2066_vm12, %v2090_v27, %v2092_v24 }
 0x207   :  { %v2317_v39 = vpack.c.bf16 %v2301_v4, %v2300_v30  ;;  %v7083_v2 = vpop.permute.xlu2 %7082 }
 0x208   :  { %v2189_v15 = vrot.slane %v9063_v55, 3  ;;  %v2094_v19 = vrot.slane %v9063_v55, 2  ;;  %v1999_v63 = vrot.slane %v9063_v55, 1  ;;  %v7085_v51 = vunpack.i.h.bf16 %v7083_v2 }
 0x209   :  { %2411 = vmatmul.bf16.gmra.mxu1 %v2317_v39  ;;  %v1762_v20 = vpop.f32.mrf.mxu0  ;;  %v7084_v52 = vunpack.i.l.bf16 %v7083_v2  ;;  %v9143_v2 = vld [vmem:[%s11094_s4] ss:$0 sm:$0xff] }
 0x20a   :  { %v1763_v60 = vadd.f32 %v8869_v41, %v1762_v20  ;;  %v2190_v23 = vsel %vm11105_vm11, %v2187_v11, %v2189_v15  ;;  %v2095_v31 = vsel %vm2066_vm12, %v2092_v24, %v2094_v19  ;;  %v2000_v62 = vsel %vm1971_vm13, %v1997_v13, %v1999_v63 }
 0x20b   :  { %v7126_v45 = vpack.i.bf16 %v2190_v23, %v2188_v48  ;;  %v7121_v34 = vpack.i.bf16 %v2095_v31, %v2093_v18  ;;  %v7116_v36 = vpack.i.bf16 %v2000_v62, %v1998_v25 }
 0x20c   :  { %v1811_v7 = vmax.f32 %v1763_v60, 0.0 }
 0x20d   :  { %7127 = vrot.lane.b32.xlu2 %v7126_v45, %s7987_s23  ;;  %7122 = vrot.lane.b32.xlu1 %v7121_v34, %s7988_s24 }
 0x20e   :  { %1850 = vst.msk [vmem:[#allocation3 + $0xf8] sm:$0xff] %vm11106_vm10, %v1811_v7  ;;  %7117 = vrot.lane.b32.xlu0 %v7116_v36, %s7989_s25 }
 0x211   :  { %v1765_v27 = vpop.f32.mrf.mxu0 }
 0x212   :  { %v1766_v42 = vadd.f32 %v8869_v41, %v1765_v27 }
 0x214   :  { %v1812_v16 = vmax.f32 %v1766_v42, 0.0 }
 0x215   :  { %v1888_v46 = vld [vmem:[#allocation3 + $0xf0] ss:$2 sm:$0xff]  ;;  %v1926_v40 = vld [vmem:[#allocation3 + $0xf1] ss:$2 sm:$0xff] }
 0x216   :  { %1851 = vst.msk [vmem:[#allocation3 + $0x100] sm:$0xff] %vm11106_vm10, %v1812_v16  ;;  %v9093_v38 = vmax.f32 %v1888_v46, %v1926_v40 }
 0x218   :  { %v2191_v61 = vrot.slane %v9093_v38, 3 }
 0x219   :  { %v1767_v28 = vpop.f32.mrf.mxu0 }
 0x21a   :  { %v1768_v8 = vadd.f32 %v8869_v41, %v1767_v28  ;;  %v2192_v11 = vsel %vm11105_vm11, %v2189_v15, %v2191_v61 }
 0x21c   :  { %v1813_v44 = vmax.f32 %v1768_v8, 0.0 }
 0x21e   :  { %1852 = vst.msk [vmem:[#allocation3 + $0x108] sm:$0xff] %vm11106_vm10, %v1813_v44 }
 0x220   :  { %v7078_v21 = vpop.permute.xlu1 %7077 }
 0x221   :  { %v7080_v35 = vunpack.i.h.bf16 %v7078_v21  ;;  %v7079_v37 = vunpack.i.l.bf16 %v7078_v21  ;;  %v7073_v47 = vpop.permute.xlu0 %7072  ;;  %v1770_v54 = vpop.f32.mrf.mxu0 }
 0x222   :  { %v7075_v14 = vunpack.i.h.bf16 %v7073_v47  ;;  %v7074_v50 = vunpack.i.l.bf16 %v7073_v47  ;;  %v1771_v29 = vadd.f32 %v8869_v41, %v1770_v54 }
 0x224   :  { %v1814_v53 = vmax.f32 %v1771_v29, 0.0  ;;  %v2262_v49 = vsel %vm11106_vm10, %v8817_v17, %v7074_v50  ;;  %v2263_v26 = vsel %vm11106_vm10, %v8899_v6, %v7075_v14  ;;  %v2096_v17 = vrot.slane %v9093_v38, 2 }
 0x225   :  { %v2282_v57 = vsel %vm11104_vm14, %v2262_v49, %v7079_v37  ;;  %v2283_v58 = vsel %vm11104_vm14, %v2263_v26, %v7080_v35  ;;  %v1890_v59 = vld [vmem:[#allocation3 + $0x100] ss:$2 sm:$0xff]  ;;  %v1928_v32 = vld [vmem:[#allocation3 + $0x101] ss:$2 sm:$0xff]  ;;  %v2001_v6 = vrot.slane %v9093_v38, 1 }
 0x226   :  { %1853 = vst.msk [vmem:[#allocation3 + $0x110] sm:$0xff] %vm11106_vm10, %v1814_v53  ;;  %v2302_v22 = vsel %vm11103_vm15, %v2282_v57, %v7084_v52  ;;  %v2303_v1 = vsel %vm11103_vm15, %v2283_v58, %v7085_v51  ;;  %v9106_v3 = vmax.f32 %v1890_v59, %v1928_v32  ;;  %v2097_v20 = vsel %vm2066_vm12, %v2094_v19, %v2096_v17 }
 0x227   :  { %v2318_v30 = vpack.c.bf16 %v2303_v1, %v2302_v22  ;;  %v2002_v15 = vsel %vm1971_vm13, %v1999_v63, %v2001_v6  ;;  %v7098_v16 = vpop.permute.xlu2 %7097 }
 0x228   :  { %v2193_v4 = vrot.slane %v9106_v3, 3  ;;  %v2098_v5 = vrot.slane %v9106_v3, 2  ;;  %v2003_v39 = vrot.slane %v9106_v3, 1  ;;  %v7099_v35 = vunpack.i.l.bf16 %v7098_v16 }
 0x229   :  { %2416 = vmatmul.bf16.gmra.mxu1 %v2318_v30  ;;  %v1772_v9 = vpop.f32.mrf.mxu0 }
 0x22a   :  { %v1773_v24 = vadd.f32 %v8869_v41, %v1772_v9  ;;  %v2194_v13 = vsel %vm11105_vm11, %v2191_v61, %v2193_v4  ;;  %v2099_v48 = vsel %vm2066_vm12, %v2096_v17, %v2098_v5  ;;  %v2004_v18 = vsel %vm1971_vm13, %v2001_v6, %v2003_v39 }
 0x22b   :  { %v7141_v60 = vpack.i.bf16 %v2194_v13, %v2192_v11  ;;  %v7136_v23 = vpack.i.bf16 %v2099_v48, %v2097_v20  ;;  %v7131_v45 = vpack.i.bf16 %v2004_v18, %v2002_v15 }
 0x22c   :  { %v1815_v31 = vmax.f32 %v1773_v24, 0.0 }
 0x22d   :  { %7142 = vrot.lane.b32.xlu2 %v7141_v60, %s7987_s23  ;;  %7137 = vrot.lane.b32.xlu1 %v7136_v23, %s7988_s24 }
 0x22e   :  { %1854 = vst.msk [vmem:[#allocation3 + $0x118] sm:$0xff] %vm11106_vm10, %v1815_v31  ;;  %7132 = vrot.lane.b32.xlu0 %v7131_v45, %s7989_s25 }
 0x231   :  { %v1775_v19 = vpop.f32.mrf.mxu0 }
 0x232   :  { %v1776_v34 = vadd.f32 %v8869_v41, %v1775_v19 }
 0x234   :  { %v1816_v25 = vmax.f32 %v1776_v34, 0.0 }
 0x235   :  { %v1892_v36 = vld [vmem:[#allocation3 + $0x110] ss:$2 sm:$0xff]  ;;  %v1930_v27 = vld [vmem:[#allocation3 + $0x111] ss:$2 sm:$0xff] }
 0x236   :  { %1855 = vst.msk [vmem:[#allocation3 + $0x120] sm:$0xff] %vm11106_vm10, %v1816_v25  ;;  %v9138_v46 = vmax.f32 %v1892_v36, %v1930_v27 }
 0x238   :  { %v2195_v50 = vrot.slane %v9138_v46, 3  ;;  %v2005_v58 = vrot.slane %v9138_v46, 1 }
 0x239   :  { %v1777_v63 = vpop.f32.mrf.mxu0 }
 0x23a   :  { %v1778_v62 = vadd.f32 %v8869_v41, %v1777_v63  ;;  %v7100_v41 = vunpack.i.h.bf16 %v7098_v16  ;;  %v2196_v1 = vsel %vm11105_vm11, %v2193_v4, %v2195_v50  ;;  %v2006_v11 = vsel %vm1971_vm13, %v2003_v39, %v2005_v58 }
 0x23c   :  { %v1817_v7 = vmax.f32 %v1778_v62, 0.0 }
 0x23e   :  { %1857 = vst.msk [vmem:[#allocation3 + $0x128] sm:$0xf] %vm11102_vm0, %v1817_v7  ;;  %vm2470_vm0 = vcmask 64512  }
 0x23f   :  { %v7093_v42 = vpop.permute.xlu1 %7092 }
 0x240   :  { %v7095_v28 = vunpack.i.h.bf16 %v7093_v42  ;;  %v7094_v8 = vunpack.i.l.bf16 %v7093_v42  ;;  %v7088_v44 = vpop.permute.xlu0 %7087 }
 0x241   :  { %v7090_v40 = vunpack.i.h.bf16 %v7088_v44  ;;  %v7089_v21 = vunpack.i.l.bf16 %v7088_v44 }
 0x243   :  { %v2264_v37 = vsel %vm11106_vm10, %v8919_v12, %v7089_v21  ;;  %v2265_v47 = vsel %vm11106_vm10, %v8962_v10, %v7090_v40  ;;  %v2100_v10 = vrot.slane %v9138_v46, 2 }
 0x244   :  { %v2284_v54 = vsel %vm11104_vm14, %v2264_v37, %v7094_v8  ;;  %v2285_v14 = vsel %vm11104_vm14, %v2265_v47, %v7095_v28 }
 0x245   :  { %v2304_v51 = vsel %vm11103_vm15, %v2284_v54, %v7099_v35  ;;  %v2305_v52 = vsel %vm11103_vm15, %v2285_v14, %v7100_v41  ;;  %v1894_v53 = vld [vmem:[#allocation3 + $0x120] ss:$2 sm:$0x3f]  ;;  %v1932_v49 = vld [vmem:[#allocation3 + $0x121] ss:$2 sm:$0x3f]  ;;  %v2101_v30 = vsel %vm2066_vm12, %v2098_v5, %v2100_v10 }
 0x246   :  { %v2402_v29 = vpop.f32.mrf.mxu1  ;;  %v2319_v57 = vpack.c.bf16 %v2305_v52, %v2304_v51  ;;  %v9155_v12 = vmax.f32 %v1894_v53, %v1932_v49 }
 0x247   :  { %v2403_v26 = vadd.f32 %v9143_v2, %v2402_v29  ;;  %v7113_v60 = vpop.permute.xlu2 %7112 }
 0x248   :  { %2421 = vmatmul.bf16.gmra.mxu1 %v2319_v57  ;;  %v2197_v32 = vrot.slane %v9155_v12, 3  ;;  %v2102_v61 = vrot.slane %v9155_v12, 2  ;;  %v2007_v22 = vrot.slane %v9155_v12, 1  ;;  %v7115_v19 = vunpack.i.h.bf16 %v7113_v60 }
 0x249   :  { %v2451_v59 = vmax.f32 %v2403_v26, 0.0  ;;  %v7114_v34 = vunpack.i.l.bf16 %v7113_v60 }
 0x24a   :  { %v2198_v17 = vsel %vm11105_vm11, %v2195_v50, %v2197_v32  ;;  %v2103_v9 = vsel %vm2066_vm12, %v2100_v10, %v2102_v61  ;;  %v2008_v24 = vsel %vm1971_vm13, %v2005_v58, %v2007_v22  ;;  %vm11110_vm11 = vcmask 195584  }
 0x24b   :  { %2471 = vst.msk [vmem:[#allocation4] sm:$0xff] %vm2470_vm0, %v2451_v59  ;;  %v7156_v6 = vpack.i.bf16 %v2198_v17, %v2196_v1  ;;  %v7151_v13 = vpack.i.bf16 %v2103_v9, %v2101_v30  ;;  %v7146_v20 = vpack.i.bf16 %v2008_v24, %v2006_v11 }
 0x24d   :  { %7157 = vrot.lane.b32.xlu2 %v7156_v6, %s7987_s23  ;;  %7152 = vrot.lane.b32.xlu1 %v7151_v13, %s7988_s24 }
 0x24e   :  { %v2404_v48 = vpop.f32.mrf.mxu1  ;;  %7147 = vrot.lane.b32.xlu0 %v7146_v20, %s7989_s25 }
 0x24f   :  { %v2405_v4 = vadd.f32 %v9143_v2, %v2404_v48 }
 0x251   :  { %v2452_v5 = vmax.f32 %v2405_v4, 0.0 }
 0x253   :  { %2472 = vst.msk [vmem:[#allocation4 + $0x8] sm:$0xff] %vm2470_vm0, %v2452_v5 }
 0x255   :  { %2235 = vrot.lane.b32.xlu2 %v2197_v32, %s7987_s23  ;;  %2140 = vrot.lane.b32.xlu1 %v2102_v61, %s7988_s24 }
 0x256   :  { %2045 = vrot.lane.b32.xlu0 %v2007_v22, %s7989_s25 }
 0x25a   :  { %v2491_v1 = vld [vmem:[#allocation4] ss:$2 sm:$0xff]  ;;  %v2511_v17 = vld [vmem:[#allocation4 + $0x1] ss:$2 sm:$0xff] }
 0x25b   :  { %v9209_v6 = vmax.f32 %v2491_v1, %v2511_v17 }
 0x25d   :  { %v2594_v48 = vrot.slane %v9209_v6, 2  ;;  %v2549_v5 = vrot.slane %v9209_v6, 1 }
 0x25f   :  { %v7108_v39 = vpop.permute.xlu1 %7107 }
 0x260   :  { %v7110_v23 = vunpack.i.h.bf16 %v7108_v39  ;;  %v7109_v15 = vunpack.i.l.bf16 %v7108_v39  ;;  %v7103_v18 = vpop.permute.xlu0 %7102 }
 0x261   :  { %v7105_v31 = vunpack.i.h.bf16 %v7103_v18  ;;  %v7104_v45 = vunpack.i.l.bf16 %v7103_v18 }
 0x263   :  { %v2266_v25 = vsel %vm11106_vm10, %v8975_v56, %v7104_v45  ;;  %v2267_v63 = vsel %vm11106_vm10, %v9007_v0, %v7105_v31 }
 0x264   :  { %v2286_v62 = vsel %vm11104_vm14, %v2266_v25, %v7109_v15  ;;  %v2287_v7 = vsel %vm11104_vm14, %v2267_v63, %v7110_v23 }
 0x265   :  { %v2306_v27 = vsel %vm11103_vm15, %v2286_v62, %v7114_v34  ;;  %v2307_v42 = vsel %vm11103_vm15, %v2287_v7, %v7115_v19 }
 0x266   :  { %v2407_v36 = vpop.f32.mrf.mxu1  ;;  %v2320_v28 = vpack.c.bf16 %v2307_v42, %v2306_v27 }
 0x267   :  { %v2408_v16 = vadd.f32 %v9143_v2, %v2407_v36  ;;  %v7128_v21 = vpop.permute.xlu2 %7127 }
 0x268   :  { %2426 = vmatmul.bf16.gmra.mxu1 %v2320_v28  ;;  %v7130_v14 = vunpack.i.h.bf16 %v7128_v21  ;;  %v7129_v50 = vunpack.i.l.bf16 %v7128_v21 }
 0x269   :  { %v2453_v8 = vmax.f32 %v2408_v16, 0.0 }
 0x26b   :  { %2473 = vst.msk [vmem:[#allocation4 + $0x10] sm:$0xff] %vm2470_vm0, %v2453_v8 }
 0x26e   :  { %v2409_v56 = vpop.f32.mrf.mxu1 }
 0x26f   :  { %v2410_v44 = vadd.f32 %v9143_v2, %v2409_v56 }
 0x271   :  { %v2454_v0 = vmax.f32 %v2410_v44, 0.0 }
 0x273   :  { %2474 = vst.msk [vmem:[#allocation4 + $0x18] sm:$0xff] %vm2470_vm0, %v2454_v0 }
 0x27a   :  { %v2493_v61 = vld [vmem:[#allocation4 + $0x10] ss:$2 sm:$0xff]  ;;  %v2513_v22 = vld [vmem:[#allocation4 + $0x11] ss:$2 sm:$0xff] }
 0x27b   :  { %v9207_v30 = vmax.f32 %v2493_v61, %v2513_v22 }
 0x27d   :  { %v2595_v13 = vrot.slane %v9207_v30, 2  ;;  %v2550_v20 = vrot.slane %v9207_v30, 1 }
 0x27f   :  { %v7123_v40 = vpop.permute.xlu1 %7122  ;;  %v2596_v60 = vsel %vm2066_vm12, %v2594_v48, %v2595_v13  ;;  %v2551_v15 = vsel %vm1971_vm13, %v2549_v5, %v2550_v20 }
 0x280   :  { %v7125_v41 = vunpack.i.h.bf16 %v7123_v40  ;;  %v7124_v35 = vunpack.i.l.bf16 %v7123_v40  ;;  %v7118_v37 = vpop.permute.xlu0 %7117 }
 0x281   :  { %v7120_v47 = vunpack.i.h.bf16 %v7118_v37  ;;  %v7119_v54 = vunpack.i.l.bf16 %v7118_v37 }
 0x283   :  { %v2268_v29 = vsel %vm11106_vm10, %v9020_v43, %v7119_v54  ;;  %v2269_v51 = vsel %vm11106_vm10, %v9050_v33, %v7120_v47 }
 0x284   :  { %v2288_v52 = vsel %vm11104_vm14, %v2268_v29, %v7124_v35  ;;  %v2289_v53 = vsel %vm11104_vm14, %v2269_v51, %v7125_v41 }
 0x285   :  { %v2308_v26 = vsel %vm11103_vm15, %v2288_v52, %v7129_v50  ;;  %v2309_v57 = vsel %vm11103_vm15, %v2289_v53, %v7130_v14 }
 0x286   :  { %v2412_v49 = vpop.f32.mrf.mxu1  ;;  %v2321_v58 = vpack.c.bf16 %v2309_v57, %v2308_v26 }
 0x287   :  { %v2413_v10 = vadd.f32 %v9143_v2, %v2412_v49  ;;  %v7143_v34 = vpop.permute.xlu2 %7142 }
 0x288   :  { %2431 = vmatmul.bf16.gmra.mxu1 %v2321_v58  ;;  %v7145_v27 = vunpack.i.h.bf16 %v7143_v34  ;;  %v7144_v42 = vunpack.i.l.bf16 %v7143_v34 }
 0x289   :  { %v2455_v59 = vmax.f32 %v2413_v10, 0.0 }
 0x28b   :  { %2475 = vst.msk [vmem:[#allocation4 + $0x20] sm:$0xff] %vm2470_vm0, %v2455_v59 }
 0x28e   :  { %v2414_v43 = vpop.f32.mrf.mxu1 }
 0x28f   :  { %v2415_v32 = vadd.f32 %v9143_v2, %v2414_v43 }
 0x291   :  { %v2456_v33 = vmax.f32 %v2415_v32, 0.0 }
 0x293   :  { %2476 = vst.msk [vmem:[#allocation4 + $0x28] sm:$0xff] %vm2470_vm0, %v2456_v33 }
 0x29a   :  { %v2495_v9 = vld [vmem:[#allocation4 + $0x20] ss:$2 sm:$0xff]  ;;  %v2515_v11 = vld [vmem:[#allocation4 + $0x21] ss:$2 sm:$0xff] }
 0x29b   :  { %v9211_v24 = vmax.f32 %v2495_v9, %v2515_v11 }
 0x29d   :  { %v2597_v4 = vrot.slane %v9211_v24, 2  ;;  %v2552_v39 = vrot.slane %v9211_v24, 1 }
 0x29f   :  { %v2598_v23 = vsel %vm2066_vm12, %v2595_v13, %v2597_v4  ;;  %v2553_v18 = vsel %vm1971_vm13, %v2550_v20, %v2552_v39  ;;  %v7138_v31 = vpop.permute.xlu1 %7137 }
 0x2a0   :  { %v7166_v45 = vpack.i.bf16 %v2598_v23, %v2596_v60  ;;  %v7161_v19 = vpack.i.bf16 %v2553_v18, %v2551_v15  ;;  %v7140_v25 = vunpack.i.h.bf16 %v7138_v31  ;;  %v7139_v63 = vunpack.i.l.bf16 %v7138_v31  ;;  %v7133_v62 = vpop.permute.xlu0 %7132 }
 0x2a1   :  { %v7135_v7 = vunpack.i.h.bf16 %v7133_v62  ;;  %v7134_v36 = vunpack.i.l.bf16 %v7133_v62 }
 0x2a2   :  { %7167 = vrot.lane.b32.xlu1 %v7166_v45, %s7990_s26  ;;  %7162 = vrot.lane.b32.xlu0 %v7161_v19, %s7991_s27 }
 0x2a3   :  { %v2270_v16 = vsel %vm11106_vm10, %v9063_v55, %v7134_v36  ;;  %v2271_v28 = vsel %vm11106_vm10, %v9093_v38, %v7135_v7 }
 0x2a4   :  { %v2290_v8 = vsel %vm11104_vm14, %v2270_v16, %v7139_v63  ;;  %v2291_v56 = vsel %vm11104_vm14, %v2271_v28, %v7140_v25 }
 0x2a5   :  { %v2310_v44 = vsel %vm11103_vm15, %v2290_v8, %v7144_v42  ;;  %v2311_v0 = vsel %vm11103_vm15, %v2291_v56, %v7145_v27 }
 0x2a6   :  { %v2417_v40 = vpop.f32.mrf.mxu1  ;;  %v2322_v21 = vpack.c.bf16 %v2311_v0, %v2310_v44 }
 0x2a7   :  { %v2418_v41 = vadd.f32 %v9143_v2, %v2417_v40  ;;  %v7158_v47 = vpop.permute.xlu2 %7157 }
 0x2a8   :  { %2436 = vmatmul.bf16.gmra.mxu1 %v2322_v21  ;;  %v7160_v53 = vunpack.i.h.bf16 %v7158_v47  ;;  %v7159_v49 = vunpack.i.l.bf16 %v7158_v47 }
 0x2a9   :  { %v2457_v35 = vmax.f32 %v2418_v41, 0.0  ;;  %v6384_v41 = vld [vmem:[%s11095_s5] sm:$0xff] }
 0x2ab   :  { %2477 = vst.msk [vmem:[#allocation4 + $0x30] sm:$0xff] %vm2470_vm0, %v2457_v35 }
 0x2ae   :  { %v2419_v55 = vpop.f32.mrf.mxu1 }
 0x2af   :  { %v2420_v37 = vadd.f32 %v9143_v2, %v2419_v55  ;;  %v2236_v20 = vpop.permute.xlu2 %2235 }
 0x2b1   :  { %v2458_v38 = vmax.f32 %v2420_v37, 0.0 }
 0x2b3   :  { %2478 = vst.msk [vmem:[#allocation4 + $0x38] sm:$0xff] %vm2470_vm0, %v2458_v38 }
 0x2ba   :  { %v2497_v5 = vld [vmem:[#allocation4 + $0x30] ss:$2 sm:$0xff]  ;;  %v2517_v60 = vld [vmem:[#allocation4 + $0x31] ss:$2 sm:$0xff] }
 0x2bb   :  { %v9257_v15 = vmax.f32 %v2497_v5, %v2517_v60 }
 0x2bd   :  { %v2554_v45 = vrot.slane %v9257_v15, 1  ;;  %v2599_v19 = vrot.slane %v9257_v15, 2 }
 0x2bf   :  { %v7153_v54 = vpop.permute.xlu1 %7152  ;;  %v2555_v63 = vsel %vm1971_vm13, %v2552_v39, %v2554_v45  ;;  %v2600_v7 = vsel %vm2066_vm12, %v2597_v4, %v2599_v19  ;;  %v2666_v4 = vld [vmem:[%s11095_s5 + $0x8] sm:$0xf] }
 0x2c0   :  { %v7148_v14 = vpop.permute.xlu0 %7147  ;;  %v7155_v50 = vunpack.i.h.bf16 %v7153_v54  ;;  %v7154_v29 = vunpack.i.l.bf16 %v7153_v54  ;;  %v2676_v44 = vunpack.c.l.b16 %v2666_v4 }
 0x2c1   :  { %v7150_v51 = vunpack.i.h.bf16 %v7148_v14  ;;  %v7149_v52 = vunpack.i.l.bf16 %v7148_v14 }
 0x2c2   :  { %v2678_v40 = vpack.c.b16 %v2676_v44, %v2676_v44 }
 0x2c3   :  { %v2272_v26 = vsel %vm11106_vm10, %v9106_v3, %v7149_v52  ;;  %v2273_v57 = vsel %vm11106_vm10, %v9138_v46, %v7150_v51 }
 0x2c4   :  { %v2292_v10 = vsel %vm11104_vm14, %v2272_v26, %v7154_v29  ;;  %v2293_v58 = vsel %vm11104_vm14, %v2273_v57, %v7155_v50 }
 0x2c5   :  { %v2422_v59 = vpop.f32.mrf.mxu1  ;;  %v2312_v43 = vsel %vm11103_vm15, %v2292_v10, %v7159_v49  ;;  %v2313_v32 = vsel %vm11103_vm15, %v2293_v58, %v7160_v53 }
 0x2c6   :  { %v2423_v33 = vadd.f32 %v9143_v2, %v2422_v59  ;;  %v2323_v61 = vpack.c.bf16 %v2313_v32, %v2312_v43 }
 0x2c7   :  { %v2141_v1 = vpop.permute.xlu1 %2140 }
 0x2c8   :  { %v2459_v22 = vmax.f32 %v2423_v33, 0.0  ;;  %2441 = vmatmul.bf16.gmra.mxu1 %v2323_v61  ;;  %v2046_v3 = vpop.permute.xlu0 %2045 }
 0x2c9   :  { %v2274_v46 = vsel %vm11106_vm10, %v9155_v12, %v2046_v3  ;;  %vm11107_vm10 = vcmask 59392  }
 0x2ca   :  { %2479 = vst.msk [vmem:[#allocation4 + $0x40] sm:$0xff] %vm2470_vm0, %v2459_v22  ;;  %v2294_v13 = vsel %vm11104_vm14, %v2274_v46, %v2141_v1  ;;  %vm11111_vm14 = vcmask 130048  }
 0x2cb   :  { %v2314_v48 = vsel %vm11103_vm15, %v2294_v13, %v2236_v20  ;;  %vm2696_vm15 = vcmask 1043456  }
 0x2cc   :  { %v2324_v23 = vpack.c.bf16 %v2314_v48, %v2314_v48  ;;  %v2698_v21 = vsel %vm2696_vm15, %v2678_v40, 0 }
 0x2cd   :  { %v2424_v17 = vpop.f32.mrf.mxu1  ;;  %2706 = vmatpush.bf16.msra.mxu2 %v2698_v21 }
 0x2ce   :  { %v2425_v9 = vadd.f32 %v9143_v2, %v2424_v17 }
 0x2d0   :  { %v2460_v11 = vmax.f32 %v2425_v9, 0.0 }
 0x2d1   :  { %2707 = vmatpush.bf16.msra.mxu2 %v6384_v41 }
 0x2d2   :  { %2480 = vst.msk [vmem:[#allocation4 + $0x48] sm:$0xff] %vm2470_vm0, %v2460_v11 }
 0x2d8   :  { %2446 = vmatmul.bf16.gmra.mxu1 %v2324_v23 }
 0x2d9   :  { %v2499_v18 = vld [vmem:[#allocation4 + $0x40] ss:$2 sm:$0xff]  ;;  %v2519_v31 = vld [vmem:[#allocation4 + $0x41] ss:$2 sm:$0xff] }
 0x2da   :  { %v9259_v12 = vmax.f32 %v2499_v18, %v2519_v31 }
 0x2dc   :  { %v2556_v34 = vrot.slane %v9259_v12, 1  ;;  %v2601_v25 = vrot.slane %v9259_v12, 2 }
 0x2de   :  { %v2557_v62 = vsel %vm1971_vm13, %v2554_v45, %v2556_v34  ;;  %v2602_v36 = vsel %vm2066_vm12, %v2599_v19, %v2601_v25 }
 0x2df   :  { %v7171_v27 = vpack.i.bf16 %v2557_v62, %v2555_v63  ;;  %v7176_v42 = vpack.i.bf16 %v2602_v36, %v2600_v7 }
 0x2e1   :  { %7172 = vrot.lane.b32.xlu2 %v7171_v27, %s7991_s27  ;;  %7177 = vrot.lane.b32.xlu0 %v7176_v42, %s7990_s26 }
 0x2e5   :  { %v2427_v16 = vpop.f32.mrf.mxu1 }
 0x2e6   :  { %v2428_v28 = vadd.f32 %v9143_v2, %v2427_v16 }
 0x2e8   :  { %v2461_v8 = vmax.f32 %v2428_v28, 0.0 }
 0x2ea   :  { %2481 = vst.msk [vmem:[#allocation4 + $0x50] sm:$0xff] %vm2470_vm0, %v2461_v8 }
 0x2ed   :  { %v2429_v39 = vpop.f32.mrf.mxu1 }
 0x2ee   :  { %v2430_v56 = vadd.f32 %v9143_v2, %v2429_v39 }
 0x2f0   :  { %v2462_v0 = vmax.f32 %v2430_v56, 0.0 }
 0x2f2   :  { %2482 = vst.msk [vmem:[#allocation4 + $0x58] sm:$0xff] %vm2470_vm0, %v2462_v0 }
 0x2f9   :  { %v2501_v29 = vld [vmem:[#allocation4 + $0x50] ss:$2 sm:$0xff]  ;;  %v2521_v51 = vld [vmem:[#allocation4 + $0x51] ss:$2 sm:$0xff] }
 0x2fa   :  { %v9294_v58 = vmax.f32 %v2501_v29, %v2521_v51 }
 0x2fc   :  { %v2603_v3 = vrot.slane %v9294_v58, 2 }
 0x2fe   :  { %v2604_v46 = vsel %vm2066_vm12, %v2601_v25, %v2603_v3 }
 0x305   :  { %v2432_v35 = vpop.f32.mrf.mxu1 }
 0x306   :  { %v2433_v55 = vadd.f32 %v9143_v2, %v2432_v35 }
 0x308   :  { %v2463_v37 = vmax.f32 %v2433_v55, 0.0 }
 0x30a   :  { %2483 = vst.msk [vmem:[#allocation4 + $0x60] sm:$0xff] %vm2470_vm0, %v2463_v37 }
 0x30d   :  { %v2434_v38 = vpop.f32.mrf.mxu1 }
 0x30e   :  { %v2435_v47 = vadd.f32 %v9143_v2, %v2434_v38 }
 0x310   :  { %v2464_v54 = vmax.f32 %v2435_v47, 0.0 }
 0x312   :  { %2484 = vst.msk [vmem:[#allocation4 + $0x68] sm:$0xff] %vm2470_vm0, %v2464_v54 }
 0x314   :  { %v7168_v14 = vpop.permute.xlu1 %7167  ;;  %v7163_v50 = vpop.permute.xlu0 %7162 }
 0x315   :  { %v7170_v52 = vunpack.i.h.bf16 %v7168_v14  ;;  %v7169_v53 = vunpack.i.l.bf16 %v7168_v14  ;;  %v7165_v49 = vunpack.i.h.bf16 %v7163_v50  ;;  %v7164_v26 = vunpack.i.l.bf16 %v7163_v50 }
 0x317   :  { %v2640_v57 = vsel %vm2470_vm0, %v9209_v6, %v7164_v26  ;;  %v2641_v10 = vsel %vm2470_vm0, %v9207_v30, %v7165_v49  ;;  %v2558_v6 = vrot.slane %v9294_v58, 1 }
 0x318   :  { %v2650_v59 = vsel %vm11111_vm14, %v2640_v57, %v7169_v53  ;;  %v2651_v43 = vsel %vm11111_vm14, %v2641_v10, %v7170_v52 }
 0x319   :  { %v2659_v32 = vpack.c.bf16 %v2651_v43, %v2650_v59  ;;  %v2503_v33 = vld [vmem:[#allocation4 + $0x60] ss:$2 sm:$0xff]  ;;  %v2523_v61 = vld [vmem:[#allocation4 + $0x61] ss:$2 sm:$0xff]  ;;  %v2559_v9 = vsel %vm1971_vm13, %v2556_v34, %v2558_v6 }
 0x31a   :  { %v9299_v22 = vmax.f32 %v2503_v33, %v2523_v61 }
 0x31b   :  { %6102 = vmatmul.msk.bf16.vlgmr.msra.gmra.mxu2 %vm11110_vm11, %v2659_v32 }
 0x31c   :  { %v2605_v30 = vrot.slane %v9299_v22, 2  ;;  %v2560_v1 = vrot.slane %v9299_v22, 1 }
 0x31e   :  { %v2606_v17 = vsel %vm2066_vm12, %v2603_v3, %v2605_v30  ;;  %v2561_v11 = vsel %vm1971_vm13, %v2558_v6, %v2560_v1 }
 0x31f   :  { %v7186_v13 = vpack.i.bf16 %v2606_v17, %v2604_v46  ;;  %v7181_v20 = vpack.i.bf16 %v2561_v11, %v2559_v9 }
 0x321   :  { %7187 = vrot.lane.b32.xlu2 %v7186_v13, %s7990_s26  ;;  %7182 = vrot.lane.b32.xlu1 %v7181_v20, %s7991_s27  ;;  %v9355_v13 = vld [vmem:[%s11096_s6] ss:$0 sm:$0xff] }
 0x325   :  { %v2437_v48 = vpop.f32.mrf.mxu1 }
 0x326   :  { %v2438_v5 = vadd.f32 %v9143_v2, %v2437_v48 }
 0x328   :  { %v2465_v60 = vmax.f32 %v2438_v5, 0.0 }
 0x32a   :  { %2485 = vst.msk [vmem:[#allocation4 + $0x70] sm:$0xff] %vm2470_vm0, %v2465_v60 }
 0x32d   :  { %v2439_v23 = vpop.f32.mrf.mxu1 }
 0x32e   :  { %v2440_v18 = vadd.f32 %v9143_v2, %v2439_v23 }
 0x330   :  { %v2466_v31 = vmax.f32 %v2440_v18, 0.0 }
 0x332   :  { %2486 = vst.msk [vmem:[#allocation4 + $0x78] sm:$0xff] %vm2470_vm0, %v2466_v31 }
 0x339   :  { %v2505_v16 = vld [vmem:[#allocation4 + $0x70] ss:$2 sm:$0xff]  ;;  %v2525_v28 = vld [vmem:[#allocation4 + $0x71] ss:$2 sm:$0xff] }
 0x33a   :  { %v9326_v41 = vmax.f32 %v2505_v16, %v2525_v28  ;;  %v6188_v28 = vld [vmem:[%s11090_s0 + $0x148] sm:$0xff] }
 0x33b   :  { %v7173_v63 = vpop.permute.xlu2 %7172  ;;  %3118 = vst.msk [vmem:[#allocation2 + $0x1b] sm:$0xff] %vm81_vm1, %v6188_v28 }
 0x33c   :  { %v7175_v36 = vunpack.i.h.bf16 %v7173_v63  ;;  %v7174_v27 = vunpack.i.l.bf16 %v7173_v63 }
 0x33e   :  { %v2642_v4 = vsel %vm2470_vm0, %v9211_v24, %v7174_v27  ;;  %v2643_v44 = vsel %vm2470_vm0, %v9257_v15, %v7175_v36  ;;  %v2607_v15 = vrot.slane %v9326_v41, 2  ;;  %v6187_v27 = vld [vmem:[%s11090_s0 + $0x140] sm:$0xff] }
 0x33f   :  { %3117 = vst.msk [vmem:[#allocation2 + $0x13] sm:$0xff] %vm81_vm1, %v6187_v27 }
 0x340   :  { %v2608_v50 = vsel %vm2066_vm12, %v2605_v30, %v2607_v15 }
 0x345   :  { %v2442_v45 = vpop.f32.mrf.mxu1 }
 0x346   :  { %v2443_v19 = vadd.f32 %v9143_v2, %v2442_v45  ;;  %v6185_v45 = vld [vmem:[%s11090_s0 + $0x130] sm:$0xff] }
 0x347   :  { %3115 = vst.msk [vmem:[#allocation2 + $0x3] sm:$0xff] %vm81_vm1, %v6185_v45 }
 0x348   :  { %v2467_v34 = vmax.f32 %v2443_v19, 0.0  ;;  %v6186_v19 = vld [vmem:[%s11090_s0 + $0x138] sm:$0xff] }
 0x349   :  { %3116 = vst.msk [vmem:[#allocation2 + $0xb] sm:$0xff] %vm81_vm1, %v6186_v19  ;;  %v6194_v19 = vld [vmem:[%s11090_s0 + $0x178] sm:$0xff] }
 0x34a   :  { %2487 = vst.msk [vmem:[#allocation4 + $0x80] sm:$0xff] %vm2470_vm0, %v2467_v34 }
 0x34b   :  { %3124 = vst.msk [vmem:[#allocation2 + $0x4b] sm:$0xff] %vm81_vm1, %v6194_v19  ;;  %v6204_v19 = vld [vmem:[%s11090_s0 + $0x1c8] sm:$0xff] }
 0x34c   :  { %3134 = vst.msk [vmem:[#allocation2 + $0x9b] sm:$0xff] %vm81_vm1, %v6204_v19 }
 0x34d   :  { %v2444_v25 = vpop.f32.mrf.mxu1 }
 0x34e   :  { %v2445_v62 = vadd.f32 %v9143_v2, %v2444_v25  ;;  %v3191_v34 = vld [vmem:[#allocation2 + $0x1] sm:$0xff] }
 0x350   :  { %v2468_v7 = vmax.f32 %v2445_v62, 0.0  ;;  %v3192_v25 = vld [vmem:[#allocation2 + $0x9] sm:$0xff] }
 0x351   :  { %v7201_v63 = vpack.i.bf16 %v3192_v25, %v3191_v34  ;;  %v3267_v62 = vld [vmem:[#allocation2 + $0x3] sm:$0xff] }
 0x352   :  { %2488 = vst.msk [vmem:[#allocation4 + $0x88] sm:$0xff] %vm2470_vm0, %v2468_v7  ;;  %v3268_v7 = vld [vmem:[#allocation2 + $0xb] sm:$0xff]  ;;  %v6195_v34 = vld [vmem:[%s11090_s0 + $0x180] sm:$0xff] }
 0x353   :  { %v7178_v42 = vpop.permute.xlu0 %7177  ;;  %v7211_v36 = vpack.i.bf16 %v3268_v7, %v3267_v62  ;;  %3125 = vst.msk [vmem:[#allocation2 + $0x53] sm:$0xff] %vm81_vm1, %v6195_v34 }
 0x354   :  { %v7180_v8 = vunpack.i.h.bf16 %v7178_v42  ;;  %v7179_v39 = vunpack.i.l.bf16 %v7178_v42 }
 0x355   :  { %v2447_v56 = vpop.f32.mrf.mxu1 }
 0x356   :  { %v2448_v0 = vadd.f32 %v9143_v2, %v2447_v56  ;;  %v2652_v40 = vsel %vm11111_vm14, %v2642_v4, %v7179_v39  ;;  %v2653_v21 = vsel %vm11111_vm14, %v2643_v44, %v7180_v8  ;;  %v2562_v2 = vrot.slane %v9326_v41, 1  ;;  %v6189_v8 = vld [vmem:[%s11090_s0 + $0x150] sm:$0xff] }
 0x357   :  { %v2660_v35 = vpack.c.bf16 %v2653_v21, %v2652_v40  ;;  %3119 = vst.msk [vmem:[#allocation2 + $0x23] sm:$0xff] %vm81_vm1, %v6189_v8 }
 0x358   :  { %v2469_v55 = vmax.f32 %v2448_v0, 0.0  ;;  %v2563_v51 = vsel %vm1971_vm13, %v2560_v1, %v2562_v2  ;;  %v6190_v0 = vld [vmem:[%s11090_s0 + $0x158] sm:$0xff] }
 0x359   :  { %6103 = vmatmul.msk.bf16.gmra.mxu2 %vm11110_vm11, %v2660_v35  ;;  %v2507_v37 = vld [vmem:[#allocation4 + $0x80] ss:$2 sm:$0xff]  ;;  %v2527_v38 = vld [vmem:[#allocation4 + $0x81] ss:$2 sm:$0xff]  ;;  %3120 = vst.msk [vmem:[#allocation2 + $0x2b] sm:$0xff] %vm81_vm1, %v6190_v0 }
 0x35a   :  { %2490 = vst.msk [vmem:[#allocation4 + $0x90] sm:$0x7] %vm11107_vm10, %v2469_v55  ;;  %v9330_v24 = vmax.f32 %v2507_v37, %v2527_v38  ;;  %v3343_v37 = vld [vmem:[#allocation2 + $0x5] sm:$0xff]  ;;  %vm11109_vm10 = vcmask 63488  }
 0x35c   :  { %v2564_v47 = vrot.slane %v9330_v24, 1  ;;  %v2609_v54 = vrot.slane %v9330_v24, 2 }
 0x35d   :  { %v2449_v14 = vpop.f32.mrf.mxu1 }
 0x35e   :  { %2582 = vrot.lane.b32.xlu2 %v2564_v47, %s7991_s27  ;;  %v2610_v29 = vsel %vm2066_vm12, %v2607_v15, %v2609_v54  ;;  %v2565_v52 = vsel %vm1971_vm13, %v2562_v2, %v2564_v47  ;;  %v3344_v15 = vld [vmem:[#allocation2 + $0xd] sm:$0xff]  ;;  %v3194_v14 = vld [vmem:[#allocation2 + $0x19] sm:$0xff] }
 0x35f   :  { %v7196_v53 = vpack.i.bf16 %v2610_v29, %v2608_v50  ;;  %v7191_v49 = vpack.i.bf16 %v2565_v52, %v2563_v51  ;;  %v7221_v2 = vpack.i.bf16 %v3344_v15, %v3343_v37 }
 0x361   :  { %7197 = vrot.lane.b32.xlu1 %v7196_v53, %s7990_s26  ;;  %7192 = vrot.lane.b32.xlu0 %v7191_v49, %s7991_s27  ;;  %v2509_v26 = vld [vmem:[#allocation4 + $0x90] ss:$2 sm:$0x1]  ;;  %v2529_v57 = vld [vmem:[#allocation4 + $0x91] ss:$2 sm:$0x1] }
 0x362   :  { %v2539_v10 = vmax.f32 %v2509_v26, %v2529_v57  ;;  %v3269_v57 = vld [vmem:[#allocation2 + $0x13] sm:$0xff] }
 0x364   :  { %v2611_v59 = vrot.slane %v2539_v10, 2  ;;  %v3270_v10 = vld [vmem:[#allocation2 + $0x1b] sm:$0xff] }
 0x366   :  { %v2612_v43 = vsel %vm2066_vm12, %v2609_v54, %v2611_v59 }
 0x369   :  { %2629 = vrot.lane.b32.xlu0 %v2612_v43, %s7990_s26 }
 0x371   :  { %7202 = vrot.lane.b32.xlu0 %v7201_v63, %s7981_s29 }
 0x379   :  { %7212 = vrot.lane.b32.xlu0 %v7211_v36, %s7982_s30 }
 0x37b   :  { %v7188_v32 = vpop.permute.xlu2 %7187 }
 0x37c   :  { %v7190_v6 = vunpack.i.h.bf16 %v7188_v32  ;;  %v7189_v30 = vunpack.i.l.bf16 %v7188_v32  ;;  %v7241_v32 = vpack.i.bf16 %v3270_v10, %v3269_v57 }
 0x381   :  { %7222 = vrot.lane.b32.xlu0 %v7221_v2, %s7983_s12  ;;  %v3390_v2 = vld [vmem:[#allocation2 + $0x4e] sm:$0xff] }
 0x393   :  { %v7183_v33 = vpop.permute.xlu1 %7182 }
 0x394   :  { %v7185_v61 = vunpack.i.h.bf16 %v7183_v33  ;;  %v7184_v3 = vunpack.i.l.bf16 %v7183_v33  ;;  %v3345_v33 = vld [vmem:[#allocation2 + $0x15] sm:$0xff] }
 0x396   :  { %v2645_v1 = vsel %vm2470_vm0, %v9294_v58, %v7185_v61  ;;  %v2644_v46 = vsel %vm2470_vm0, %v9259_v12, %v7184_v3 }
 0x397   :  { %v2654_v17 = vsel %vm11111_vm14, %v2644_v46, %v7189_v30  ;;  %v2655_v9 = vsel %vm11111_vm14, %v2645_v1, %v7190_v6  ;;  %v3195_v1 = vld [vmem:[#allocation2 + $0x21] sm:$0xff]  ;;  %v3196_v46 = vld [vmem:[#allocation2 + $0x29] sm:$0xff] }
 0x398   :  { %v2661_v11 = vpack.c.bf16 %v2655_v9, %v2654_v17  ;;  %v7261_v17 = vpack.i.bf16 %v3196_v46, %v3195_v1  ;;  %v3271_v9 = vld [vmem:[#allocation2 + $0x23] sm:$0xff]  ;;  %v6202_v1 = vld [vmem:[%s11090_s0 + $0x1b8] sm:$0xff] }
 0x399   :  { %3132 = vst.msk [vmem:[#allocation2 + $0x8b] sm:$0xff] %vm81_vm1, %v6202_v1  ;;  %v6209_v1 = vld [vmem:[%s11090_s0 + $0x1f0] sm:$0xff] }
 0x39a   :  { %6104 = vmatmul.msk.bf16.gmra.mxu2 %vm11110_vm11, %v2661_v11  ;;  %v3272_v11 = vld [vmem:[#allocation2 + $0x2b] sm:$0xff]  ;;  %3139 = vst.msk [vmem:[#allocation2 + $0xc3] sm:$0xff] %vm81_vm1, %v6209_v1 }
 0x39b   :  { %v3385_v1 = vld [vmem:[#allocation2 + $0x26] sm:$0xff] }
 0x39e   :  { %v2709_v20 = vpop.f32.mrf.mxu2 }
 0x39f   :  { %v2710_v48 = vadd.f32 %v9355_v13, %v2709_v20  ;;  %v6191_v20 = vld [vmem:[%s11090_s0 + $0x160] sm:$0xff] }
 0x3a0   :  { %3121 = vst.msk [vmem:[#allocation2 + $0x33] sm:$0xff] %vm81_vm1, %v6191_v20 }
 0x3a1   :  { %v2733_v5 = vmax.f32 %v2710_v48, 0.0  ;;  %v7271_v48 = vpack.i.bf16 %v3272_v11, %v3271_v9 }
 0x3a3   :  { %2742 = vst.msk [vmem:[#allocation5] sm:$0xff] %vm2470_vm0, %v2733_v5  ;;  %v3347_v5 = vld [vmem:[#allocation2 + $0x25] sm:$0xff] }
 0x3a6   :  { %v2711_v58 = vpop.f32.mrf.mxu2 }
 0x3a7   :  { %v2712_v12 = vadd.f32 %v9355_v13, %v2711_v58  ;;  %v3348_v58 = vld [vmem:[#allocation2 + $0x2d] sm:$0xff] }
 0x3a9   :  { %v2734_v60 = vmax.f32 %v2712_v12, 0.0  ;;  %v6192_v12 = vld [vmem:[%s11090_s0 + $0x168] sm:$0xff] }
 0x3aa   :  { %3122 = vst.msk [vmem:[#allocation2 + $0x3b] sm:$0xff] %vm81_vm1, %v6192_v12  ;;  %v6203_v12 = vld [vmem:[%s11090_s0 + $0x1c0] sm:$0xff] }
 0x3ab   :  { %2743 = vst.msk [vmem:[#allocation5 + $0x8] sm:$0xff] %vm2470_vm0, %v2734_v60  ;;  %v7281_v60 = vpack.i.bf16 %v3348_v58, %v3347_v5 }
 0x3ac   :  { %3133 = vst.msk [vmem:[#allocation2 + $0x93] sm:$0xff] %vm81_vm1, %v6203_v12  ;;  %v3383_v12 = vld [vmem:[#allocation2 + $0x16] sm:$0xff] }
 0x3b1   :  { %v3311_v25 = vld [vmem:[#allocation2 + $0x34] sm:$0xff] }
 0x3b2   :  { %v2752_v23 = vld [vmem:[#allocation5] ss:$2 sm:$0xff]  ;;  %v2762_v18 = vld [vmem:[#allocation5 + $0x1] ss:$2 sm:$0xff]  ;;  %v3387_v27 = vld [vmem:[#allocation2 + $0x36] sm:$0xff] }
 0x3b3   :  { %v2771_v31 = vmax.f32 %v2752_v23, %v2762_v18  ;;  %v3197_v23 = vld [vmem:[#allocation2 + $0x31] sm:$0xff]  ;;  %v3198_v18 = vld [vmem:[#allocation2 + $0x39] sm:$0xff] }
 0x3b4   :  { %v7291_v45 = vpack.i.bf16 %v3198_v18, %v3197_v23 }
 0x3b5   :  { %2776 = vxpose.xlu1.b32.start [1/5] (short) (narrow) %v2771_v31, 8  ;;  %v6193_v31 = vld [vmem:[%s11090_s0 + $0x170] sm:$0xff] }
 0x3b6   :  { %3123 = vst.msk [vmem:[#allocation2 + $0x43] sm:$0xff] %vm81_vm1, %v6193_v31 }
 0x3b8   :  { %v2583_v50 = vpop.permute.xlu2 %2582 }
 0x3b9   :  { %v2648_v52 = vsel %vm2470_vm0, %v9330_v24, %v2583_v50  ;;  %v3346_v24 = vld [vmem:[#allocation2 + $0x1d] sm:$0xff] }
 0x3ba   :  { %v7251_v30 = vpack.i.bf16 %v3346_v24, %v3345_v33  ;;  %v6200_v24 = vld [vmem:[%s11090_s0 + $0x1a8] sm:$0xff] }
 0x3bb   :  { %3130 = vst.msk [vmem:[#allocation2 + $0x7b] sm:$0xff] %vm81_vm1, %v6200_v24 }
 0x3bd   :  { %v3312_v63 = vld [vmem:[#allocation2 + $0x3c] sm:$0xff]  ;;  %v3389_v15 = vld [vmem:[#allocation2 + $0x46] sm:$0xff] }
 0x3be   :  { %v7306_v62 = vpack.i.bf16 %v3312_v63, %v3311_v25 }
 0x3c2   :  { %v3282_v31 = vld [vmem:[#allocation2 + $0x7b] sm:$0xff] }
 0x3d3   :  { %v7198_v42 = vpop.permute.xlu1 %7197  ;;  %v7193_v16 = vpop.permute.xlu0 %7192 }
 0x3d4   :  { %v7200_v39 = vunpack.i.h.bf16 %v7198_v42  ;;  %v7199_v56 = vunpack.i.l.bf16 %v7198_v42  ;;  %v7195_v4 = vunpack.i.h.bf16 %v7193_v16  ;;  %v7194_v44 = vunpack.i.l.bf16 %v7193_v16  ;;  %v3388_v42 = vld [vmem:[#allocation2 + $0x3e] sm:$0xff] }
 0x3d5   :  { %v7316_v28 = vpack.i.bf16 %v3388_v42, %v3387_v27  ;;  %v3229_v27 = vld [vmem:[#allocation2 + $0x2] sm:$0xff]  ;;  %v3230_v42 = vld [vmem:[#allocation2 + $0xa] sm:$0xff] }
 0x3d6   :  { %v2646_v40 = vsel %vm2470_vm0, %v9299_v22, %v7194_v44  ;;  %v2647_v21 = vsel %vm2470_vm0, %v9326_v41, %v7195_v4  ;;  %v3193_v22 = vld [vmem:[#allocation2 + $0x11] sm:$0xff] }
 0x3d7   :  { %v2656_v35 = vsel %vm11111_vm14, %v2646_v40, %v7199_v56  ;;  %v2657_v55 = vsel %vm11111_vm14, %v2647_v21, %v7200_v39  ;;  %v7231_v29 = vpack.i.bf16 %v3194_v14, %v3193_v22  ;;  %v3237_v56 = vld [vmem:[#allocation2 + $0x42] sm:$0xff]  ;;  %v3238_v4 = vld [vmem:[#allocation2 + $0x4a] sm:$0xff]  ;;  %v3239_v22 = vld [vmem:[#allocation2 + $0x52] sm:$0xff] }
 0x3d8   :  { %v2662_v38 = vpack.c.bf16 %v2657_v55, %v2656_v35  ;;  %v7326_v0 = vpack.i.bf16 %v3238_v4, %v3237_v56  ;;  %v3313_v40 = vld [vmem:[#allocation2 + $0x44] sm:$0xff]  ;;  %v3314_v21 = vld [vmem:[#allocation2 + $0x4c] sm:$0xff] }
 0x3d9   :  { %7232 = vrot.lane.b32.xlu0 %v7231_v29, %s7981_s29  ;;  %v7336_v37 = vpack.i.bf16 %v3314_v21, %v3313_v40  ;;  %v6205_v4 = vld [vmem:[%s11090_s0 + $0x1d0] sm:$0xff]  ;;  %v3305_v40 = vld [vmem:[#allocation2 + $0x4] sm:$0xff] }
 0x3da   :  { %6105 = vmatmul.msk.bf16.gmra.mxu2 %vm11110_vm11, %v2662_v38  ;;  %3135 = vst.msk [vmem:[#allocation2 + $0xa3] sm:$0xff] %vm81_vm1, %v6205_v4  ;;  %v3306_v21 = vld [vmem:[#allocation2 + $0xc] sm:$0xff] }
 0x3db   :  { %v2630_v51 = vpop.permute.xlu0 %2629 }
 0x3dc   :  { %v2714_v47 = vpop.f32.mrf.mxu2  ;;  %v2658_v49 = vsel %vm11111_vm14, %v2648_v52, %v2630_v51  ;;  %vm11114_vm14 = vcmask 957440  }
 0x3dd   :  { %v2715_v54 = vadd.f32 %v9355_v13, %v2714_v47  ;;  %v2663_v43 = vpack.c.bf16 %v2658_v49, %v2658_v49  ;;  %v7346_v47 = vpack.i.bf16 %v3390_v2, %v3389_v15  ;;  %v3398_v15 = vld [vmem:[#allocation2 + $0x8e] sm:$0xff]  ;;  %v3381_v2 = vld [vmem:[#allocation2 + $0x6] sm:$0xff] }
 0x3df   :  { %v2735_v41 = vmax.f32 %v2715_v54, 0.0  ;;  %v6196_v54 = vld [vmem:[%s11090_s0 + $0x188] sm:$0xff] }
 0x3e0   :  { %3126 = vst.msk [vmem:[#allocation2 + $0x5b] sm:$0xff] %vm81_vm1, %v6196_v54 }
 0x3e1   :  { %2744 = vst.msk [vmem:[#allocation5 + $0x10] sm:$0xff] %vm2470_vm0, %v2735_v41  ;;  %7242 = vrot.lane.b32.xlu0 %v7241_v32, %s7982_s30  ;;  %v6197_v41 = vld [vmem:[%s11090_s0 + $0x190] sm:$0xff] }
 0x3e2   :  { %3127 = vst.msk [vmem:[#allocation2 + $0x63] sm:$0xff] %vm81_vm1, %v6197_v41  ;;  %v3285_v41 = vld [vmem:[#allocation2 + $0x93] sm:$0xff] }
 0x3e4   :  { %v2716_v53 = vpop.f32.mrf.mxu2 }
 0x3e5   :  { %v2717_v26 = vadd.f32 %v9355_v13, %v2716_v53 }
 0x3e7   :  { %v2736_v59 = vmax.f32 %v2717_v26, 0.0  ;;  %v3240_v14 = vld [vmem:[#allocation2 + $0x5a] sm:$0xff] }
 0x3e8   :  { %v7356_v50 = vpack.i.bf16 %v3240_v14, %v3239_v22  ;;  %v3315_v29 = vld [vmem:[#allocation2 + $0x54] sm:$0xff]  ;;  %v6207_v14 = vld [vmem:[%s11090_s0 + $0x1e0] sm:$0xff] }
 0x3e9   :  { %2745 = vst.msk [vmem:[#allocation5 + $0x18] sm:$0xff] %vm2470_vm0, %v2736_v59  ;;  %7252 = vrot.lane.b32.xlu0 %v7251_v30, %s7983_s12  ;;  %v3316_v51 = vld [vmem:[#allocation2 + $0x5c] sm:$0xff] }
 0x3ea   :  { %6106 = vmatmul.msk.bf16.gmra.mxu2 %vm11110_vm11, %v2663_v43  ;;  %v7366_v52 = vpack.i.bf16 %v3316_v51, %v3315_v29  ;;  %v3391_v53 = vld [vmem:[#allocation2 + $0x56] sm:$0xff]  ;;  %v3392_v49 = vld [vmem:[#allocation2 + $0x5e] sm:$0xff]  ;;  %3137 = vst.msk [vmem:[#allocation2 + $0xb3] sm:$0xff] %vm81_vm1, %v6207_v14 }
 0x3eb   :  { %v6198_v26 = vld [vmem:[%s11090_s0 + $0x198] sm:$0xff]  ;;  %v7376_v57 = vpack.i.bf16 %v3392_v49, %v3391_v53  ;;  %v3241_v10 = vld [vmem:[#allocation2 + $0x62] sm:$0xff] }
 0x3ec   :  { %3128 = vst.msk [vmem:[#allocation2 + $0x6b] sm:$0xff] %vm81_vm1, %v6198_v26  ;;  %v6199_v43 = vld [vmem:[%s11090_s0 + $0x1a0] sm:$0xff]  ;;  %v3231_v29 = vld [vmem:[#allocation2 + $0x12] sm:$0xff] }
 0x3ed   :  { %3129 = vst.msk [vmem:[#allocation2 + $0x73] sm:$0xff] %vm81_vm1, %v6199_v43  ;;  %v3232_v51 = vld [vmem:[#allocation2 + $0x1a] sm:$0xff] }
 0x3ee   :  { %v7236_v49 = vpack.i.bf16 %v3232_v51, %v3231_v29  ;;  %v3399_v26 = vld [vmem:[#allocation2 + $0x96] sm:$0xff] }
 0x3f0   :  { %v2754_v61 = vld [vmem:[#allocation5 + $0x10] ss:$2 sm:$0xff]  ;;  %v2764_v3 = vld [vmem:[#allocation5 + $0x11] ss:$2 sm:$0xff] }
 0x3f1   :  { %v2772_v6 = vmax.f32 %v2754_v61, %v2764_v3  ;;  %7262 = vrot.lane.b32.xlu0 %v7261_v17, %s7981_s29  ;;  %v6201_v61 = vld [vmem:[%s11090_s0 + $0x1b0] sm:$0xff] }
 0x3f2   :  { %3131 = vst.msk [vmem:[#allocation2 + $0x83] sm:$0xff] %vm81_vm1, %v6201_v61 }
 0x3f3   :  { %2777 = vxpose.xlu1.b32.cont [2/5] (short) (narrow) %v2772_v6, 8  ;;  %v3242_v59 = vld [vmem:[#allocation2 + $0x6a] sm:$0xff] }
 0x3f4   :  { %v7386_v32 = vpack.i.bf16 %v3242_v59, %v3241_v10  ;;  %v3317_v6 = vld [vmem:[#allocation2 + $0x64] sm:$0xff]  ;;  %v3318_v46 = vld [vmem:[#allocation2 + $0x6c] sm:$0xff] }
 0x3f5   :  { %v7396_v17 = vpack.i.bf16 %v3318_v46, %v3317_v6  ;;  %v3393_v20 = vld [vmem:[#allocation2 + $0x66] sm:$0xff]  ;;  %v3281_v18 = vld [vmem:[#allocation2 + $0x73] sm:$0xff] }
 0x3f6   :  { %v7421_v63 = vpack.i.bf16 %v3282_v31, %v3281_v18  ;;  %v3287_v59 = vld [vmem:[#allocation2 + $0xa3] sm:$0xff]  ;;  %v3307_v46 = vld [vmem:[#allocation2 + $0x14] sm:$0xff] }
 0x3f7   :  { %v3291_v18 = vld [vmem:[#allocation2 + $0xc3] sm:$0xff] }
 0x3f9   :  { %7272 = vrot.lane.b32.xlu0 %v7271_v48, %s7982_s30  ;;  %v3394_v48 = vld [vmem:[#allocation2 + $0x6e] sm:$0xff] }
 0x3fa   :  { %v7406_v58 = vpack.i.bf16 %v3394_v48, %v3393_v20  ;;  %v6210_v48 = vld [vmem:[%s11090_s0 + $0x1f8] sm:$0xff]  ;;  %v3246_v29 = vld [vmem:[#allocation2 + $0x8a] sm:$0xff] }
 0x3fb   :  { %3140 = vst.msk [vmem:[#allocation2 + $0xcb] sm:$0xff] %vm81_vm1, %v6210_v48 }
 0x401   :  { %7282 = vrot.lane.b32.xlu0 %v7281_v60, %s7983_s12 }
 0x402   :  { %v3292_v31 = vld [vmem:[#allocation2 + $0xcb] sm:$0xff] }
 0x403   :  { %v7571_v19 = vpack.i.bf16 %v3292_v31, %v3291_v18 }
 0x409   :  { %7292 = vrot.lane.b32.xlu0 %v7291_v45, %s7981_s29 }
 0x411   :  { %7307 = vrot.lane.b32.xlu0 %v7306_v62, %s7985_s18 }
 0x419   :  { %7317 = vrot.lane.b32.xlu0 %v7316_v28, %s7986_s19 }
 0x41d   :  { %v2719_v7 = vpop.f32.mrf.mxu2 }
 0x41e   :  { %v2720_v36 = vadd.f32 %v9355_v13, %v2719_v7 }
 0x420   :  { %v2737_v16 = vmax.f32 %v2720_v36, 0.0  ;;  %v3396_v36 = vld [vmem:[#allocation2 + $0x7e] sm:$0xff] }
 0x421   :  { %7327 = vrot.lane.b32.xlu0 %v7326_v0, %s7984_s17  ;;  %v3284_v0 = vld [vmem:[#allocation2 + $0x8b] sm:$0xff] }
 0x422   :  { %2746 = vst.msk [vmem:[#allocation5 + $0x20] sm:$0xff] %vm2470_vm0, %v2737_v16 }
 0x425   :  { %v2721_v8 = vpop.f32.mrf.mxu2 }
 0x426   :  { %v2722_v39 = vadd.f32 %v9355_v13, %v2721_v8 }
 0x428   :  { %v2738_v44 = vmax.f32 %v2722_v39, 0.0  ;;  %v7206_v39 = vpack.i.bf16 %v3230_v42, %v3229_v27  ;;  %v3309_v42 = vld [vmem:[#allocation2 + $0x24] sm:$0xff] }
 0x429   :  { %7337 = vrot.lane.b32.xlu0 %v7336_v37, %s7985_s18  ;;  %v7216_v37 = vpack.i.bf16 %v3306_v21, %v3305_v40 }
 0x42a   :  { %2747 = vst.msk [vmem:[#allocation5 + $0x28] sm:$0xff] %vm2470_vm0, %v2738_v44  ;;  %7207 = vrot.lane.b32.xlu2 %v7206_v39, %s7984_s17  ;;  %v3283_v44 = vld [vmem:[#allocation2 + $0x83] sm:$0xff] }
 0x431   :  { %v2756_v35 = vld [vmem:[#allocation5 + $0x20] ss:$2 sm:$0xff]  ;;  %v2766_v55 = vld [vmem:[#allocation5 + $0x21] ss:$2 sm:$0xff]  ;;  %7347 = vrot.lane.b32.xlu0 %v7346_v47, %s7986_s19 }
 0x432   :  { %v2773_v38 = vmax.f32 %v2756_v35, %v2766_v55  ;;  %v6206_v35 = vld [vmem:[%s11090_s0 + $0x1d8] sm:$0xff]  ;;  %v7451_v55 = vpack.i.bf16 %v3284_v0, %v3283_v44  ;;  %7217 = vrot.lane.b32.xlu2 %v7216_v37, %s7985_s18  ;;  %v3382_v47 = vld [vmem:[#allocation2 + $0xe] sm:$0xff] }
 0x433   :  { %3136 = vst.msk [vmem:[#allocation2 + $0xab] sm:$0xff] %vm81_vm1, %v6206_v35  ;;  %v7226_v22 = vpack.i.bf16 %v3382_v47, %v3381_v2  ;;  %v6213_v0 = vld [vmem:[%s11090_s0 + $0x210] sm:$0xff] }
 0x434   :  { %2778 = vxpose.xlu1.b32.cont [3/5] (short) (narrow) %v2773_v38, 8  ;;  %v3397_v38 = vld [vmem:[#allocation2 + $0x86] sm:$0xff]  ;;  %3143 = vst.msk [vmem:[#allocation2 + $0xe3] sm:$0xff] %vm81_vm1, %v6213_v0  ;;  %v3243_v35 = vld [vmem:[#allocation2 + $0x72] sm:$0xff] }
 0x435   :  { %v7466_v54 = vpack.i.bf16 %v3398_v15, %v3397_v38 }
 0x439   :  { %7357 = vrot.lane.b32.xlu0 %v7356_v50, %s7984_s17  ;;  %v3286_v50 = vld [vmem:[#allocation2 + $0x9b] sm:$0xff] }
 0x43a   :  { %7227 = vrot.lane.b32.xlu2 %v7226_v22, %s7986_s19  ;;  %v7481_v53 = vpack.i.bf16 %v3286_v50, %v3285_v41  ;;  %v3288_v43 = vld [vmem:[#allocation2 + $0xab] sm:$0xff]  ;;  %v3358_v22 = vld [vmem:[#allocation2 + $0x7d] sm:$0xff] }
 0x43b   :  { %v3402_v24 = vld [vmem:[#allocation2 + $0xae] sm:$0xff]  ;;  %v3245_v50 = vld [vmem:[#allocation2 + $0x82] sm:$0xff] }
 0x43c   :  { %v7446_v51 = vpack.i.bf16 %v3246_v29, %v3245_v50  ;;  %v3363_v18 = vld [vmem:[#allocation2 + $0xa5] sm:$0xff]  ;;  %v3364_v31 = vld [vmem:[#allocation2 + $0xad] sm:$0xff] }
 0x43d   :  { %v3367_v29 = vld [vmem:[#allocation2 + $0xc5] sm:$0xff] }
 0x441   :  { %7367 = vrot.lane.b32.xlu0 %v7366_v52, %s7985_s18  ;;  %v6208_v52 = vld [vmem:[%s11090_s0 + $0x1e8] sm:$0xff] }
 0x442   :  { %3138 = vst.msk [vmem:[#allocation2 + $0xbb] sm:$0xff] %vm81_vm1, %v6208_v52  ;;  %7237 = vrot.lane.b32.xlu2 %v7236_v49, %s7984_s17  ;;  %v3360_v49 = vld [vmem:[#allocation2 + $0x8d] sm:$0xff] }
 0x449   :  { %7377 = vrot.lane.b32.xlu0 %v7376_v57, %s7986_s19  ;;  %v3400_v57 = vld [vmem:[#allocation2 + $0x9e] sm:$0xff] }
 0x44a   :  { %v7496_v10 = vpack.i.bf16 %v3400_v57, %v3399_v26  ;;  %v3290_v6 = vld [vmem:[#allocation2 + $0xbb] sm:$0xff]  ;;  %v3247_v57 = vld [vmem:[#allocation2 + $0x92] sm:$0xff] }
 0x44b   :  { %v3404_v20 = vld [vmem:[#allocation2 + $0xbe] sm:$0xff] }
 0x451   :  { %7387 = vrot.lane.b32.xlu0 %v7386_v32, %s7984_s17  ;;  %v7511_v32 = vpack.i.bf16 %v3288_v43, %v3287_v59 }
 0x459   :  { %7397 = vrot.lane.b32.xlu0 %v7396_v17, %s7985_s18  ;;  %v3308_v17 = vld [vmem:[#allocation2 + $0x1c] sm:$0xff] }
 0x45d   :  { %v2724_v33 = vpop.f32.mrf.mxu2 }
 0x45e   :  { %v2725_v3 = vadd.f32 %v9355_v13, %v2724_v33  ;;  %v3401_v33 = vld [vmem:[#allocation2 + $0xa6] sm:$0xff] }
 0x45f   :  { %v7526_v61 = vpack.i.bf16 %v3402_v24, %v3401_v33  ;;  %v3362_v33 = vld [vmem:[#allocation2 + $0x9d] sm:$0xff] }
 0x460   :  { %v2739_v30 = vmax.f32 %v2725_v3, 0.0  ;;  %v3289_v3 = vld [vmem:[#allocation2 + $0xb3] sm:$0xff] }
 0x461   :  { %7407 = vrot.lane.b32.xlu0 %v7406_v58, %s7986_s19  ;;  %v9525_v58 = vpop.permute.xlu0 %7202 }
 0x462   :  { %2748 = vst.msk [vmem:[#allocation5 + $0x30] sm:$0xff] %vm2470_vm0, %v2739_v30  ;;  %v7541_v30 = vpack.i.bf16 %v3290_v6, %v3289_v3 }
 0x465   :  { %v2726_v9 = vpop.f32.mrf.mxu2 }
 0x466   :  { %v2727_v11 = vadd.f32 %v9355_v13, %v2726_v9  ;;  %v7246_v9 = vpack.i.bf16 %v3308_v17, %v3307_v46  ;;  %v3386_v46 = vld [vmem:[#allocation2 + $0x2e] sm:$0xff] }
 0x467   :  { %v7286_v17 = vpack.i.bf16 %v3386_v46, %v3385_v1 }
 0x468   :  { %v2740_v5 = vmax.f32 %v2727_v11, 0.0  ;;  %v3403_v11 = vld [vmem:[#allocation2 + $0xb6] sm:$0xff]  ;;  %7247 = vrot.lane.b32.xlu2 %v7246_v9, %s7985_s18  ;;  %v3249_v9 = vld [vmem:[#allocation2 + $0xa2] sm:$0xff] }
 0x469   :  { %7422 = vrot.lane.b32.xlu0 %v7421_v63, %s7982_s30  ;;  %v9534_v63 = vpop.permute.xlu0 %7212 }
 0x46a   :  { %2749 = vst.msk [vmem:[#allocation5 + $0x38] sm:$0xff] %vm2470_vm0, %v2740_v5  ;;  %v7556_v5 = vpack.i.bf16 %v3404_v20, %v3403_v11  ;;  %v3250_v11 = vld [vmem:[#allocation2 + $0xaa] sm:$0xff] }
 0x46b   :  { %v7506_v48 = vpack.i.bf16 %v3250_v11, %v3249_v9  ;;  %v3277_v9 = vld [vmem:[#allocation2 + $0x53] sm:$0xff]  ;;  %v3278_v11 = vld [vmem:[#allocation2 + $0x5b] sm:$0xff] }
 0x46d   :  { %v2729_v60 = vpop.f32.mrf.mxu2 }
 0x46e   :  { %v2730_v23 = vadd.f32 %v9355_v13, %v2729_v60  ;;  %v3395_v13 = vld [vmem:[#allocation2 + $0x76] sm:$0xff]  ;;  %v3384_v60 = vld [vmem:[#allocation2 + $0x1e] sm:$0xff] }
 0x46f   :  { %v7436_v8 = vpack.i.bf16 %v3396_v36, %v3395_v13  ;;  %v6212_v36 = vld [vmem:[%s11090_s0 + $0x208] sm:$0xff] }
 0x470   :  { %v2741_v45 = vmax.f32 %v2730_v23, 0.0  ;;  %v7256_v23 = vpack.i.bf16 %v3384_v60, %v3383_v12  ;;  %3142 = vst.msk [vmem:[#allocation2 + $0xdb] sm:$0xff] %vm81_vm1, %v6212_v36  ;;  %v3236_v12 = vld [vmem:[#allocation2 + $0x3a] sm:$0xff] }
 0x471   :  { %v2758_v34 = vld [vmem:[#allocation5 + $0x30] ss:$2 sm:$0xff]  ;;  %v2768_v25 = vld [vmem:[#allocation5 + $0x31] ss:$2 sm:$0xff]  ;;  %7437 = vrot.lane.b32.xlu0 %v7436_v8, %s7986_s19  ;;  %v9542_v4 = vpop.permute.xlu0 %7222 }
 0x472   :  { %2751 = vst.msk [vmem:[#allocation5 + $0x40] sm:$0x7f] %vm11109_vm10, %v2741_v45  ;;  %v2774_v62 = vmax.f32 %v2758_v34, %v2768_v25  ;;  %7257 = vrot.lane.b32.xlu2 %v7256_v23, %s7986_s19  ;;  %v6211_v45 = vld [vmem:[%s11090_s0 + $0x200] sm:$0xff]  ;;  %v3234_v25 = vld [vmem:[#allocation2 + $0x2a] sm:$0xff] }
 0x473   :  { %3141 = vst.msk [vmem:[#allocation2 + $0xd3] sm:$0xff] %vm81_vm1, %v6211_v45  ;;  %v3233_v34 = vld [vmem:[#allocation2 + $0x22] sm:$0xff]  ;;  %v3252_v36 = vld [vmem:[#allocation2 + $0xba] sm:$0xff] }
 0x474   :  { %2779 = vxpose.xlu1.b32.cont [4/5] (short) (narrow) %v2774_v62, 8  ;;  %v3405_v62 = vld [vmem:[#allocation2 + $0xc6] sm:$0xff]  ;;  %v3274_v8 = vld [vmem:[#allocation2 + $0x3b] sm:$0xff] }
 0x475   :  { %v2731_v7 = vpop.f32.mrf.mxu2 }
 0x476   :  { %v7266_v7 = vpack.i.bf16 %v3234_v25, %v3233_v34  ;;  %v3349_v34 = vld [vmem:[#allocation2 + $0x35] sm:$0xff]  ;;  %v3350_v25 = vld [vmem:[#allocation2 + $0x3d] sm:$0xff] }
 0x477   :  { %v3370_v38 = vld [vmem:[#allocation2 + $0xdd] sm:$0xff] }
 0x479   :  { %v2760_v16 = vld [vmem:[#allocation5 + $0x40] ss:$2 sm:$0x7]  ;;  %v2770_v28 = vld [vmem:[#allocation5 + $0x41] ss:$2 sm:$0x7]  ;;  %7452 = vrot.lane.b32.xlu0 %v7451_v55, %s7982_s30  ;;  %v9551_v47 = vpop.permute.xlu0 %7232 }
 0x47a   :  { %v2775_v56 = vmax.f32 %v2760_v16, %v2770_v28  ;;  %v3406_v13 = vld [vmem:[#allocation2 + $0xce] sm:$0xff]  ;;  %7267 = vrot.lane.b32.xlu2 %v7266_v7, %s7984_s17  ;;  %v3218_v44 = vld [vmem:[#allocation2 + $0xd9] sm:$0xff]  ;;  %v7311_v7 = vpack.i.bf16 %v3350_v25, %v3349_v34 }
 0x47b   :  { %v7586_v27 = vpack.i.bf16 %v3406_v13, %v3405_v62  ;;  %v3310_v16 = vld [vmem:[#allocation2 + $0x2c] sm:$0xff]  ;;  %v3244_v55 = vld [vmem:[#allocation2 + $0x7a] sm:$0xff] }
 0x47c   :  { %2780 = vxpose.xlu1.b32.end [5/5] (short) (narrow) %v2775_v56, 8  ;;  %v3273_v28 = vld [vmem:[#allocation2 + $0x33] sm:$0xff]  ;;  %v7276_v56 = vpack.i.bf16 %v3310_v16, %v3309_v42  ;;  %v7416_v15 = vpack.i.bf16 %v3244_v55, %v3243_v35  ;;  %v3199_v16 = vld [vmem:[#allocation2 + $0x41] sm:$0xff] }
 0x47d   :  { %v3217_v39 = vld [vmem:[#allocation2 + $0xd1] sm:$0xff]  ;;  %v7301_v40 = vpack.i.bf16 %v3274_v8, %v3273_v28  ;;  %v3200_v28 = vld [vmem:[#allocation2 + $0x49] sm:$0xff]  ;;  %v3354_v34 = vld [vmem:[#allocation2 + $0x5d] sm:$0xff] }
 0x47e   :  { %v7591_v21 = vpack.i.bf16 %v3218_v44, %v3217_v39  ;;  %v3369_v37 = vld [vmem:[#allocation2 + $0xd5] sm:$0xff]  ;;  %v7321_v8 = vpack.i.bf16 %v3200_v28, %v3199_v16  ;;  %v3203_v28 = vld [vmem:[#allocation2 + $0x61] sm:$0xff] }
 0x47f   :  { %v7611_v2 = vpack.i.bf16 %v3370_v38, %v3369_v37  ;;  %v3251_v13 = vld [vmem:[#allocation2 + $0xb2] sm:$0xff]  ;;  %v3253_v37 = vld [vmem:[#allocation2 + $0xc2] sm:$0xff]  ;;  %v3254_v38 = vld [vmem:[#allocation2 + $0xca] sm:$0xff] }
 0x480   :  { %v3365_v39 = vld [vmem:[#allocation2 + $0xb5] sm:$0xff] }
 0x481   :  { %7467 = vrot.lane.b32.xlu0 %v7466_v54, %s7986_s19  ;;  %v3357_v54 = vld [vmem:[#allocation2 + $0x75] sm:$0xff]  ;;  %v9555_v41 = vpop.permute.xlu0 %7242 }
 0x482   :  { %7277 = vrot.lane.b32.xlu2 %v7276_v56, %s7985_s18  ;;  %v7431_v14 = vpack.i.bf16 %v3358_v22, %v3357_v54  ;;  %v3366_v56 = vld [vmem:[#allocation2 + $0xbd] sm:$0xff]  ;;  %v3351_v54 = vld [vmem:[#allocation2 + $0x45] sm:$0xff]  ;;  %v3352_v22 = vld [vmem:[#allocation2 + $0x4d] sm:$0xff] }
 0x483   :  { %v7551_v0 = vpack.i.bf16 %v3366_v56, %v3365_v39  ;;  %v7341_v50 = vpack.i.bf16 %v3352_v22, %v3351_v54 }
 0x484   :  { %v9580_v45 = vpop.permute.xlu2 %7207 }
 0x485   :  { %v7210_v22 = vunpack.i.h.bf16 %v9580_v45 }
 0x489   :  { %7482 = vrot.lane.b32.xlu0 %v7481_v53, %s7982_s30  ;;  %v9559_v52 = vpop.permute.xlu0 %7252  ;;  %v3359_v53 = vld [vmem:[#allocation2 + $0x85] sm:$0xff] }
 0x48a   :  { %v7461_v26 = vpack.i.bf16 %v3360_v49, %v3359_v53  ;;  %v3201_v49 = vld [vmem:[#allocation2 + $0x51] sm:$0xff] }
 0x48c   :  { %v9586_v42 = vpop.permute.xlu2 %7217 }
 0x491   :  { %7497 = vrot.lane.b32.xlu0 %v7496_v10, %s7986_s19  ;;  %v3248_v10 = vld [vmem:[#allocation2 + $0x9a] sm:$0xff]  ;;  %v9562_v59 = vpop.permute.xlu0 %7262 }
 0x492   :  { %v7476_v43 = vpack.i.bf16 %v3248_v10, %v3247_v57  ;;  %v2887_v57 = vld [vmem:[%s11097_s7 + $0x88] sm:$0xf] }
 0x494   :  { %v9593_v35 = vpop.permute.xlu2 %7227 }
 0x499   :  { %7512 = vrot.lane.b32.xlu0 %v7511_v32, %s7982_s30  ;;  %v3361_v32 = vld [vmem:[#allocation2 + $0x95] sm:$0xff] }
 0x49a   :  { %v7491_v6 = vpack.i.bf16 %v3362_v33, %v3361_v32  ;;  %v3255_v33 = vld [vmem:[#allocation2 + $0xd2] sm:$0xff] }
 0x4a1   :  { %7527 = vrot.lane.b32.xlu0 %v7526_v61, %s7986_s19 }
 0x4a9   :  { %7542 = vrot.lane.b32.xlu0 %v7541_v30, %s7982_s30  ;;  %v9569_v30 = vpop.permute.xlu0 %7272 }
 0x4b1   :  { %7557 = vrot.lane.b32.xlu0 %v7556_v5, %s7986_s19  ;;  %v3235_v5 = vld [vmem:[#allocation2 + $0x32] sm:$0xff]  ;;  %v9577_v60 = vpop.permute.xlu0 %7282 }
 0x4b2   :  { %v7296_v23 = vpack.i.bf16 %v3236_v12, %v3235_v5  ;;  %v3331_v5 = vld [vmem:[#allocation2 + $0xd4] sm:$0xff]  ;;  %v3332_v12 = vld [vmem:[#allocation2 + $0xdc] sm:$0xff] }
 0x4b9   :  { %7572 = vrot.lane.b32.xlu0 %v7571_v19, %s7982_s30  ;;  %v7521_v19 = vpack.i.bf16 %v3364_v31, %v3363_v18  ;;  %v9584_v62 = vpop.permute.xlu0 %7292  ;;  %v6406_v31 = vld [vmem:[%s11091_s1 + $0x10] sm:$0xff] }
 0x4c1   :  { %7587 = vrot.lane.b32.xlu0 %v7586_v27, %s7986_s19  ;;  %v7536_v27 = vpack.i.bf16 %v3252_v36, %v3251_v13  ;;  %v9590_v44 = vpop.permute.xlu0 %7307 }
 0x4c9   :  { %7592 = vrot.lane.b32.xlu0 %v7591_v21, %s7981_s29  ;;  %v3276_v21 = vld [vmem:[#allocation2 + $0x4b] sm:$0xff] }
 0x4d1   :  { %7612 = vrot.lane.b32.xlu0 %v7611_v2, %s7983_s12  ;;  %v9596_v2 = vpop.permute.xlu0 %7317 }
 0x4d6   :  { %7302 = vrot.lane.b32.xlu1 %v7301_v40, %s7982_s30  ;;  %v3275_v40 = vld [vmem:[#allocation2 + $0x43] sm:$0xff] }
 0x4d7   :  { %v7331_v55 = vpack.i.bf16 %v3276_v21, %v3275_v40  ;;  %v3280_v40 = vld [vmem:[#allocation2 + $0x6b] sm:$0xff]  ;;  %v7205_v21 = vunpack.i.h.bf16 %v9525_v58 }
 0x4d9   :  { %v9606_v10 = vpop.permute.xlu0 %7327 }
 0x4de   :  { %7417 = vrot.lane.b32.xlu1 %v7416_v15, %s7984_s17  ;;  %v7566_v15 = vpack.i.bf16 %v3254_v38, %v3253_v37  ;;  %v3153_v38 = vld [vmem:[#allocation2] sm:$0xff] }
 0x4e6   :  { %7432 = vrot.lane.b32.xlu1 %v7431_v14, %s7983_s12  ;;  %v9600_v14 = vpop.permute.xlu2 %7237 }
 0x4ee   :  { %7447 = vrot.lane.b32.xlu1 %v7446_v51, %s7984_s17  ;;  %v3368_v51 = vld [vmem:[#allocation2 + $0xcd] sm:$0xff] }
 0x4ef   :  { %v7581_v53 = vpack.i.bf16 %v3368_v51, %v3367_v29 }
 0x4f6   :  { %7462 = vrot.lane.b32.xlu1 %v7461_v26, %s7983_s12  ;;  %v3202_v26 = vld [vmem:[#allocation2 + $0x59] sm:$0xff] }
 0x4f7   :  { %v7351_v32 = vpack.i.bf16 %v3202_v26, %v3201_v49  ;;  %v7214_v49 = vunpack.i.l.bf16 %v9534_v63 }
 0x4fe   :  { %7477 = vrot.lane.b32.xlu1 %v7476_v43, %s7984_s17  ;;  %v2958_v43 = vunpack.c.l.b16 %v2887_v57  ;;  %v3355_v57 = vld [vmem:[#allocation2 + $0x65] sm:$0xff] }
 0x500   :  { %v9565_v24 = vpop.trf.xlu1 }
 0x501   :  { %v2833_v61 = vrot.slane %v9565_v24, 7  ;;  %v2829_v3 = vrot.slane %v9565_v24, 6  ;;  %v2813_v20 = vrot.slane %v9565_v24, 2  ;;  %v2821_v16 = vrot.slane %v9565_v24, 4 }
 0x503   :  { %2834 = vrot.lane.b32.xlu2 %v2833_v61, %s11108_s28  ;;  %2830 = vrot.lane.b32.xlu0 %v2829_v3, %s7993_s13  ;;  %v3256_v61 = vld [vmem:[#allocation2 + $0xda] sm:$0xff]  ;;  %v2976_v3 = vpack.c.b16 %v2958_v43, %v2958_v43  ;;  %v3356_v43 = vld [vmem:[#allocation2 + $0x6d] sm:$0xff] }
 0x504   :  { %v7596_v46 = vpack.i.bf16 %v3256_v61, %v3255_v33  ;;  %v7219_v61 = vunpack.i.l.bf16 %v9586_v42 }
 0x505   :  { %v2998_v1 = vsel %vm2696_vm15, %v2976_v3, 0 }
 0x506   :  { %7492 = vrot.lane.b32.xlu1 %v7491_v6, %s7983_s12  ;;  %v9609_v6 = vpop.permute.xlu2 %7247  ;;  %3032 = vmatpush.bf16.msra.mxu3 %v2998_v1 }
 0x50b   :  { %7287 = vrot.lane.b32.xlu2 %v7286_v17, %s7986_s19  ;;  %2814 = vrot.lane.b32.xlu0 %v2813_v20, %s7994_s14  ;;  %v6401_v17 = vld [vmem:[%s11097_s7 + $0x80] sm:$0xff]  ;;  %v9617_v20 = vpop.permute.xlu0 %7337 }
 0x50c   :  { %3033 = vmatpush.bf16.msra.mxu3 %v6401_v17  ;;  %v7225_v17 = vunpack.i.h.bf16 %v9542_v4 }
 0x50e   :  { %7507 = vrot.lane.b32.xlu1 %v7506_v48, %s7984_s17  ;;  %v7361_v48 = vpack.i.bf16 %v3278_v11, %v3277_v9  ;;  %v9619_v18 = vpop.permute.xlu2 %7257  ;;  %v7224_v9 = vunpack.i.l.bf16 %v9542_v4 }
 0x510   :  { %4706 = vmatpush.bf16.msrb.mxu3 %v6406_v31  ;;  %v7235_v31 = vunpack.i.h.bf16 %v9551_v47 }
 0x513   :  { %7297 = vrot.lane.b32.xlu2 %v7296_v23, %s7984_s17  ;;  %v7606_v23 = vpack.i.bf16 %v3332_v12, %v3331_v5  ;;  %v9629_v13 = vpop.permute.xlu0 %7347  ;;  %v7229_v5 = vunpack.i.l.bf16 %v9593_v35  ;;  %v3205_v12 = vld [vmem:[#allocation2 + $0x71] sm:$0xff] }
 0x516   :  { %7522 = vrot.lane.b32.xlu1 %v7521_v19, %s7983_s12  ;;  %v3353_v19 = vld [vmem:[#allocation2 + $0x55] sm:$0xff]  ;;  %v9631_v36 = vpop.permute.xlu2 %7267 }
 0x517   :  { %v7371_v25 = vpack.i.bf16 %v3354_v34, %v3353_v19  ;;  %v7234_v19 = vunpack.i.l.bf16 %v9551_v47 }
 0x51b   :  { %7312 = vrot.lane.b32.xlu2 %v7311_v7, %s7983_s12  ;;  %v6405_v7 = vld [vmem:[%s11091_s1 + $0x8] sm:$0xff]  ;;  %v9639_v56 = vpop.permute.xlu0 %7357 }
 0x51c   :  { %4707 = vmatpush.bf16.msrb.mxu3 %v6405_v7  ;;  %v3155_v7 = vld [vmem:[#allocation2 + $0x10] sm:$0xff] }
 0x51e   :  { %7537 = vrot.lane.b32.xlu1 %v7536_v27, %s7984_s17  ;;  %v6404_v27 = vld [vmem:[%s11091_s1] sm:$0xff]  ;;  %v9644_v37 = vpop.permute.xlu2 %7277  ;;  %s7996_s1 = smov 105  }
 0x520   :  { %4708 = vmatpush.bf16.msrb.mxu3 %v6404_v27  ;;  %v3156_v27 = vld [vmem:[#allocation2 + $0x18] sm:$0xff] }
 0x521   :  { %v4334_v47 = vsel %vm81_vm1, %v3156_v27, %v7235_v31 }
 0x523   :  { %7322 = vrot.lane.b32.xlu2 %v7321_v8, %s7981_s29  ;;  %v3204_v8 = vld [vmem:[#allocation2 + $0x69] sm:$0xff] }
 0x524   :  { %v7381_v39 = vpack.i.bf16 %v3204_v8, %v3203_v28 }
 0x526   :  { %7552 = vrot.lane.b32.xlu1 %v7551_v0, %s7983_s12  ;;  %v3279_v0 = vld [vmem:[#allocation2 + $0x63] sm:$0xff] }
 0x527   :  { %v7391_v54 = vpack.i.bf16 %v3280_v40, %v3279_v0  ;;  %v7239_v0 = vunpack.i.l.bf16 %v9600_v14  ;;  %v4333_v40 = vsel %vm81_vm1, %v3155_v7, %v7234_v19  ;;  %v7269_v19 = vunpack.i.l.bf16 %v9631_v36 }
 0x52b   :  { %7332 = vrot.lane.b32.xlu2 %v7331_v55, %s7982_s30  ;;  %v7204_v55 = vunpack.i.l.bf16 %v9525_v58 }
 0x52d   :  { %v4331_v51 = vsel %vm81_vm1, %v3153_v38, %v7204_v55  ;;  %v7244_v55 = vunpack.i.l.bf16 %v9555_v41 }
 0x52e   :  { %7567 = vrot.lane.b32.xlu1 %v7566_v15, %s7984_s17  ;;  %v3154_v15 = vld [vmem:[#allocation2 + $0x8] sm:$0xff] }
 0x52f   :  { %v4332_v29 = vsel %vm81_vm1, %v3154_v15, %v7205_v21  ;;  %v7245_v21 = vunpack.i.h.bf16 %v9555_v41 }
 0x530   :  { %v4370_v26 = vsel %vm1337_vm2, %v4332_v29, %v7210_v22 }
 0x533   :  { %7342 = vrot.lane.b32.xlu2 %v7341_v50, %s7983_s12  ;;  %v7209_v50 = vunpack.i.l.bf16 %v9580_v45  ;;  %v7220_v45 = vunpack.i.h.bf16 %v9586_v42  ;;  %v7230_v42 = vunpack.i.h.bf16 %v9593_v35 }
 0x535   :  { %v4369_v58 = vsel %vm1337_vm2, %v4331_v51, %v7209_v50  ;;  %v3319_v50 = vld [vmem:[#allocation2 + $0x74] sm:$0xff]  ;;  %v7250_v51 = vunpack.i.h.bf16 %v9609_v6 }
 0x536   :  { %7582 = vrot.lane.b32.xlu1 %v7581_v53, %s7983_s12  ;;  %v7215_v53 = vunpack.i.h.bf16 %v9534_v63  ;;  %v4407_v63 = vsel %vm1376_vm3, %v4369_v58, %v7214_v49 }
 0x537   :  { %v4445_v11 = vsel %vm1415_vm4, %v4407_v63, %v7219_v61  ;;  %v7259_v63 = vunpack.i.l.bf16 %v9619_v18 }
 0x538   :  { %v4408_v1 = vsel %vm1376_vm3, %v4370_v26, %v7215_v53  ;;  %v4483_v34 = vsel %vm1454_vm5, %v4445_v11, %v7224_v9  ;;  %v7249_v53 = vunpack.i.l.bf16 %v9609_v6  ;;  %v7260_v6 = vunpack.i.h.bf16 %v9619_v18 }
 0x539   :  { %v4521_v8 = vsel %vm1493_vm6, %v4483_v34, %v7229_v5  ;;  %v7265_v11 = vunpack.i.h.bf16 %v9562_v59  ;;  %v3157_v5 = vld [vmem:[#allocation2 + $0x20] sm:$0xff]  ;;  %v7270_v18 = vunpack.i.h.bf16 %v9631_v36 }
 0x53a   :  { %v4559_v38 = vsel %vm1532_vm7, %v4521_v8, 0.0  ;;  %v3322_v8 = vld [vmem:[#allocation2 + $0x8c] sm:$0xff] }
 0x53b   :  { %7352 = vrot.lane.b32.xlu2 %v7351_v32, %s7981_s29  ;;  %v9655_v32 = vpop.permute.xlu0 %7367 }
 0x53e   :  { %7597 = vrot.lane.b32.xlu1 %v7596_v46, %s7984_s17  ;;  %v7401_v46 = vpack.i.bf16 %v3356_v43, %v3355_v57  ;;  %v7255_v57 = vunpack.i.h.bf16 %v9559_v52  ;;  %v7254_v43 = vunpack.i.l.bf16 %v9559_v52 }
 0x543   :  { %7362 = vrot.lane.b32.xlu2 %v7361_v48, %s7982_s30  ;;  %v4446_v48 = vsel %vm1415_vm4, %v4408_v1, %v7220_v45  ;;  %v3207_v1 = vld [vmem:[#allocation2 + $0x81] sm:$0xff] }
 0x544   :  { %v4484_v4 = vsel %vm1454_vm5, %v4446_v48, %v7225_v17  ;;  %v7264_v48 = vunpack.i.l.bf16 %v9562_v59 }
 0x545   :  { %v4522_v35 = vsel %vm1493_vm6, %v4484_v4, %v7230_v42 }
 0x546   :  { %7607 = vrot.lane.b32.xlu1 %v7606_v23, %s7985_s18  ;;  %v3206_v23 = vld [vmem:[#allocation2 + $0x79] sm:$0xff]  ;;  %v4560_v15 = vsel %vm1532_vm7, %v4522_v35, 0.0  ;;  %v4335_v4 = vsel %vm81_vm1, %v3157_v5, %v7264_v48  ;;  %v7275_v35 = vunpack.i.h.bf16 %v9569_v30 }
 0x547   :  { %v7411_v28 = vpack.i.bf16 %v3206_v23, %v3205_v12  ;;  %v4597_v49 = vpack.c.bf16 %v4560_v15, %v4559_v38  ;;  %v3158_v12 = vld [vmem:[#allocation2 + $0x28] sm:$0xff]  ;;  %v4373_v36 = vsel %vm1337_vm2, %v4335_v4, %v7269_v19  ;;  %v7279_v38 = vunpack.i.l.bf16 %v9644_v37  ;;  %v3323_v48 = vld [vmem:[#allocation2 + $0x94] sm:$0xff] }
 0x548   :  { %v4336_v34 = vsel %vm81_vm1, %v3158_v12, %v7265_v11 }
 0x54b   :  { %7372 = vrot.lane.b32.xlu2 %v7371_v25, %s7983_s12 }
 0x54e   :  { %2822 = vrot.lane.b32.xlu1 %v2821_v16, %s7995_s15  ;;  %v9679_v16 = vpop.permute.xlu0 %7377 }
 0x553   :  { %7382 = vrot.lane.b32.xlu2 %v7381_v39, %s7981_s29  ;;  %v7240_v39 = vunpack.i.h.bf16 %v9600_v14  ;;  %v3320_v14 = vld [vmem:[#allocation2 + $0x7c] sm:$0xff] }
 0x554   :  { %v7426_v26 = vpack.i.bf16 %v3320_v14, %v3319_v50 }
 0x555   :  { %v4372_v22 = vsel %vm1337_vm2, %v4334_v47, %v7240_v39  ;;  %v7274_v39 = vunpack.i.l.bf16 %v9569_v30  ;;  %v4374_v47 = vsel %vm1337_vm2, %v4336_v34, %v7270_v18  ;;  %v7285_v30 = vunpack.i.h.bf16 %v9577_v60 }
 0x556   :  { %v4410_v58 = vsel %vm1376_vm3, %v4372_v22, %v7245_v21  ;;  %v9703_v45 = vpop.permute.xlu0 %7387  ;;  %v7284_v22 = vunpack.i.l.bf16 %v9577_v60 }
 0x557   :  { %v4411_v15 = vsel %vm1376_vm3, %v4373_v36, %v7274_v39 }
 0x558   :  { %v4449_v50 = vsel %vm1415_vm4, %v4411_v15, %v7279_v38  ;;  %v3212_v38 = vld [vmem:[#allocation2 + $0xa9] sm:$0xff]  ;;  %v3407_v15 = vld [vmem:[#allocation2 + $0xd6] sm:$0xff] }
 0x559   :  { %v4487_v60 = vsel %vm1454_vm5, %v4449_v50, %v7284_v22 }
 0x55b   :  { %7392 = vrot.lane.b32.xlu2 %v7391_v54, %s7982_s30  ;;  %v4371_v54 = vsel %vm1337_vm2, %v4333_v40, %v7239_v0 }
 0x55c   :  { %v4409_v41 = vsel %vm1376_vm3, %v4371_v54, %v7244_v55  ;;  %v7280_v55 = vunpack.i.h.bf16 %v9644_v37  ;;  %v4412_v54 = vsel %vm1376_vm3, %v4374_v47, %v7275_v35  ;;  %v3211_v47 = vld [vmem:[#allocation2 + $0xa1] sm:$0xff] }
 0x55d   :  { %v9657_v33 = vpop.permute.xlu2 %2834  ;;  %v4447_v61 = vsel %vm1415_vm4, %v4409_v41, %v7249_v53  ;;  %v3209_v53 = vld [vmem:[#allocation2 + $0x91] sm:$0xff] }
 0x55e   :  { %v2852_v3 = vpack.c.bf16 %v9657_v33, %v9657_v33  ;;  %v4485_v9 = vsel %vm1454_vm5, %v4447_v61, %v7254_v43  ;;  %v9722_v7 = vpop.permute.xlu0 %7397  ;;  %v4450_v14 = vsel %vm1415_vm4, %v4412_v54, %v7280_v55  ;;  %v3408_v54 = vld [vmem:[#allocation2 + $0xde] sm:$0xff] }
 0x55f   :  { %v4523_v23 = vsel %vm1493_vm6, %v4485_v9, %v7259_v63  ;;  %v4488_v43 = vsel %vm1454_vm5, %v4450_v14, %v7285_v30  ;;  %v3159_v63 = vld [vmem:[#allocation2 + $0x30] sm:$0xff]  ;;  %v7501_v14 = vpack.i.bf16 %v3212_v38, %v3211_v47  ;;  %v3164_v38 = vld [vmem:[#allocation2 + $0x58] sm:$0xff] }
 0x560   :  { %6175 = vmatmul.msk.bf16.vlgmr.msra.gmra.mxu3 %vm11110_vm11, %v2852_v3  ;;  %v4448_v3 = vsel %vm1415_vm4, %v4410_v58, %v7250_v51  ;;  %v4561_v59 = vsel %vm1532_vm7, %v4523_v23, 0.0  ;;  %vm11119_vm11 = vcmask 261120  }
 0x561   :  { %v4486_v52 = vsel %vm1454_vm5, %v4448_v3, %v7255_v57 }
 0x562   :  { %v4524_v31 = vsel %vm1493_vm6, %v4486_v52, %v7260_v6  ;;  %v7295_v6 = vunpack.i.h.bf16 %v9584_v62 }
 0x563   :  { %7402 = vrot.lane.b32.xlu2 %v7401_v46, %s7983_s12  ;;  %v3208_v46 = vld [vmem:[#allocation2 + $0x89] sm:$0xff]  ;;  %v4562_v27 = vsel %vm1532_vm7, %v4524_v31, 0.0 }
 0x564   :  { %v7441_v42 = vpack.i.bf16 %v3208_v46, %v3207_v1  ;;  %v4598_v40 = vpack.c.bf16 %v4562_v27, %v4561_v59  ;;  %v3160_v1 = vld [vmem:[#allocation2 + $0x38] sm:$0xff]  ;;  %v7310_v59 = vunpack.i.h.bf16 %v9590_v44  ;;  %v7309_v27 = vunpack.i.l.bf16 %v9590_v44 }
 0x565   :  { %v9677_v25 = vpop.permute.xlu2 %7287  ;;  %v4338_v5 = vsel %vm81_vm1, %v3160_v1, %v7295_v6  ;;  %v7329_v6 = vunpack.i.l.bf16 %v9606_v10 }
 0x566   :  { %v7290_v51 = vunpack.i.h.bf16 %v9677_v25  ;;  %v7289_v37 = vunpack.i.l.bf16 %v9677_v25  ;;  %v9745_v41 = vpop.permute.xlu0 %7407  ;;  %v7294_v25 = vunpack.i.l.bf16 %v9584_v62 }
 0x568   :  { %v4525_v61 = vsel %vm1493_vm6, %v4487_v60, %v7289_v37  ;;  %v4526_v3 = vsel %vm1493_vm6, %v4488_v43, %v7290_v51  ;;  %v4337_v12 = vsel %vm81_vm1, %v3159_v63, %v7294_v25  ;;  %v3162_v60 = vld [vmem:[#allocation2 + $0x48] sm:$0xff] }
 0x569   :  { %v4563_v52 = vsel %vm1532_vm7, %v4525_v61, 0.0  ;;  %v4564_v11 = vsel %vm1532_vm7, %v4526_v3, 0.0  ;;  %v7330_v3 = vunpack.i.h.bf16 %v9606_v10  ;;  %v3325_v25 = vld [vmem:[#allocation2 + $0xa4] sm:$0xff]  ;;  %v3326_v63 = vld [vmem:[#allocation2 + $0xac] sm:$0xff] }
 0x56a   :  { %v4599_v19 = vpack.c.bf16 %v4564_v11, %v4563_v52 }
 0x56b   :  { %7412 = vrot.lane.b32.xlu2 %v7411_v28, %s7981_s29  ;;  %v3321_v28 = vld [vmem:[#allocation2 + $0x84] sm:$0xff] }
 0x56c   :  { %v7456_v21 = vpack.i.bf16 %v3322_v8, %v3321_v28 }
 0x56d   :  { %v9694_v29 = vpop.permute.xlu2 %7297 }
 0x56e   :  { %v7300_v46 = vunpack.i.h.bf16 %v9694_v29  ;;  %v7299_v9 = vunpack.i.l.bf16 %v9694_v29  ;;  %v9766_v34 = vpop.permute.xlu0 %7422 }
 0x570   :  { %6235 = vmatmul.msk.bf16.vlgmr.msrb.gmra.mxu3 %vm1618_vm8, %v4597_v49  ;;  %v3210_v49 = vld [vmem:[#allocation2 + $0x99] sm:$0xff]  ;;  %v4376_v18 = vsel %vm1337_vm2, %v4338_v5, %v7300_v46  ;;  %v4375_v29 = vsel %vm1337_vm2, %v4337_v12, %v7299_v9  ;;  %v7339_v5 = vunpack.i.l.bf16 %v9617_v20 }
 0x571   :  { %v7471_v57 = vpack.i.bf16 %v3210_v49, %v3209_v53 }
 0x573   :  { %7427 = vrot.lane.b32.xlu2 %v7426_v26, %s7985_s18  ;;  %v7303_v26 = vpop.permute.xlu1 %7302 }
 0x574   :  { %v7305_v23 = vunpack.i.h.bf16 %v7303_v26  ;;  %v7304_v62 = vunpack.i.l.bf16 %v7303_v26 }
 0x575   :  { %v9710_v17 = vpop.permute.xlu2 %7312 }
 0x576   :  { %v4413_v8 = vsel %vm1376_vm3, %v4375_v29, %v7304_v62  ;;  %v4414_v35 = vsel %vm1376_vm3, %v4376_v18, %v7305_v23  ;;  %v7315_v39 = vunpack.i.h.bf16 %v9710_v17  ;;  %v7314_v36 = vunpack.i.l.bf16 %v9710_v17  ;;  %v9789_v37 = vpop.permute.xlu0 %7437 }
 0x577   :  { %v4451_v44 = vsel %vm1415_vm4, %v4413_v8, %v7309_v27  ;;  %v4452_v55 = vsel %vm1415_vm4, %v4414_v35, %v7310_v59  ;;  %v7616_v17 = vpack.i.bf16 %v3408_v54, %v3407_v15  ;;  %v3213_v8 = vld [vmem:[#allocation2 + $0xb1] sm:$0xff]  ;;  %v3214_v35 = vld [vmem:[#allocation2 + $0xb9] sm:$0xff] }
 0x578   :  { %v4489_v30 = vsel %vm1454_vm5, %v4451_v44, %v7314_v36  ;;  %v4490_v22 = vsel %vm1454_vm5, %v4452_v55, %v7315_v39  ;;  %v7531_v47 = vpack.i.bf16 %v3214_v35, %v3213_v8  ;;  %v3163_v55 = vld [vmem:[#allocation2 + $0x50] sm:$0xff]  ;;  %v6214_v15 = vld [vmem:[%s11090_s0 + $0x218] sm:$0xff] }
 0x579   :  { %7617 = vrot.lane.b32.xlu1 %v7616_v17, %s7986_s19  ;;  %3144 = vst.msk [vmem:[#allocation2 + $0xeb] sm:$0xff] %vm81_vm1, %v6214_v15  ;;  %v7359_v17 = vunpack.i.l.bf16 %v9639_v56 }
 0x57b   :  { %7442 = vrot.lane.b32.xlu2 %v7441_v42, %s7981_s29  ;;  %v3324_v42 = vld [vmem:[#allocation2 + $0x9c] sm:$0xff]  ;;  %v9770_v28 = vpop.permute.xlu1 %7417 }
 0x57c   :  { %v7486_v4 = vpack.i.bf16 %v3324_v42, %v3323_v48  ;;  %v7516_v48 = vpack.i.bf16 %v3326_v63, %v3325_v25  ;;  %v7340_v42 = vunpack.i.h.bf16 %v9617_v20  ;;  %v7350_v20 = vunpack.i.h.bf16 %v9629_v13 }
 0x57d   :  { %v9729_v0 = vpop.permute.xlu2 %7322  ;;  %v7369_v25 = vunpack.i.l.bf16 %v9655_v32 }
 0x57e   :  { %v7325_v53 = vunpack.i.h.bf16 %v9729_v0  ;;  %v7324_v49 = vunpack.i.l.bf16 %v9729_v0  ;;  %v9813_v29 = vpop.permute.xlu0 %7452 }
 0x580   :  { %6236 = vmatmul.msk.bf16.gmra.mxu3 %vm1618_vm8, %v4598_v40  ;;  %v7320_v40 = vunpack.i.h.bf16 %v9596_v2  ;;  %v4340_v1 = vsel %vm81_vm1, %v3162_v60, %v7325_v53 }
 0x581   :  { %v4378_v10 = vsel %vm1337_vm2, %v4340_v1, %v7330_v3 }
 0x583   :  { %7457 = vrot.lane.b32.xlu2 %v7456_v21, %s7985_s18  ;;  %v7319_v21 = vunpack.i.l.bf16 %v9596_v2  ;;  %v4528_v2 = vsel %vm1493_vm6, %v4490_v22, %v7320_v40  ;;  %v9793_v26 = vpop.permute.xlu1 %7432  ;;  %v7360_v22 = vunpack.i.h.bf16 %v9639_v56 }
 0x584   :  { %v4566_v61 = vsel %vm1532_vm7, %v4528_v2, 0.0 }
 0x585   :  { %v9747_v58 = vpop.permute.xlu2 %7332  ;;  %v4527_v51 = vsel %vm1493_vm6, %v4489_v30, %v7319_v21 }
 0x586   :  { %v4565_v43 = vsel %vm1532_vm7, %v4527_v51, 0.0  ;;  %v7335_v46 = vunpack.i.h.bf16 %v9747_v58  ;;  %v7334_v9 = vunpack.i.l.bf16 %v9747_v58  ;;  %v9837_v51 = vpop.permute.xlu0 %7467 }
 0x587   :  { %v4600_v11 = vpack.c.bf16 %v4566_v61, %v4565_v43 }
 0x588   :  { %v4416_v62 = vsel %vm1376_vm3, %v4378_v10, %v7335_v46 }
 0x589   :  { %v4454_v27 = vsel %vm1415_vm4, %v4416_v62, %v7340_v42  ;;  %v3295_v42 = vld [vmem:[#allocation2 + $0xe3] sm:$0xff] }
 0x58a   :  { %v3215_v62 = vld [vmem:[#allocation2 + $0xc1] sm:$0xff] }
 0x58b   :  { %7472 = vrot.lane.b32.xlu2 %v7471_v57, %s7981_s29  ;;  %v3161_v57 = vld [vmem:[#allocation2 + $0x40] sm:$0xff] }
 0x58c   :  { %v4339_v0 = vsel %vm81_vm1, %v3161_v57, %v7324_v49 }
 0x58d   :  { %v9762_v31 = vpop.permute.xlu2 %7342  ;;  %v4377_v12 = vsel %vm1337_vm2, %v4339_v0, %v7329_v6  ;;  %v7370_v6 = vunpack.i.h.bf16 %v9655_v32 }
 0x58e   :  { %v4415_v23 = vsel %vm1376_vm3, %v4377_v12, %v7334_v9  ;;  %v7345_v18 = vunpack.i.h.bf16 %v9762_v31  ;;  %v7344_v58 = vunpack.i.l.bf16 %v9762_v31  ;;  %v7379_v12 = vunpack.i.l.bf16 %v9679_v16  ;;  %v9862_v8 = vpop.permute.xlu0 %7482 }
 0x58f   :  { %v4453_v59 = vsel %vm1415_vm4, %v4415_v23, %v7339_v5  ;;  %v7380_v5 = vunpack.i.h.bf16 %v9679_v16 }
 0x590   :  { %6237 = vmatmul.msk.bf16.gmra.mxu3 %vm1618_vm8, %v4599_v19  ;;  %v7349_v19 = vunpack.i.l.bf16 %v9629_v13  ;;  %v4491_v39 = vsel %vm1454_vm5, %v4453_v59, %v7344_v58  ;;  %v4492_v31 = vsel %vm1454_vm5, %v4454_v27, %v7345_v18  ;;  %v3216_v18 = vld [vmem:[#allocation2 + $0xc9] sm:$0xff] }
 0x591   :  { %v4530_v21 = vsel %vm1493_vm6, %v4492_v31, %v7350_v20  ;;  %v3296_v58 = vld [vmem:[#allocation2 + $0xeb] sm:$0xff] }
 0x592   :  { %v4529_v40 = vsel %vm1493_vm6, %v4491_v39, %v7349_v19  ;;  %v4568_v30 = vsel %vm1532_vm7, %v4530_v21, 0.0  ;;  %v7631_v27 = vpack.i.bf16 %v3296_v58, %v3295_v42  ;;  %v7561_v39 = vpack.i.bf16 %v3216_v18, %v3215_v62  ;;  %v3166_v31 = vld [vmem:[#allocation2 + $0x68] sm:$0xff]  ;;  %v3165_v21 = vld [vmem:[#allocation2 + $0x60] sm:$0xff] }
 0x593   :  { %7487 = vrot.lane.b32.xlu2 %v7486_v4, %s7985_s18  ;;  %v9818_v4 = vpop.permute.xlu1 %7447  ;;  %v4567_v54 = vsel %vm1532_vm7, %v4529_v40, 0.0  ;;  %v3294_v58 = vld [vmem:[#allocation2 + $0xdb] sm:$0xff] }
 0x594   :  { %v4601_v61 = vpack.c.bf16 %v4568_v30, %v4567_v54  ;;  %7632 = vrot.lane.b32.xlu0 %v7631_v27, %s7982_s30 }
 0x595   :  { %v9784_v50 = vpop.permute.xlu2 %7352 }
 0x596   :  { %v7355_v13 = vunpack.i.h.bf16 %v9784_v50  ;;  %v7354_v44 = vunpack.i.l.bf16 %v9784_v50  ;;  %v3328_v50 = vld [vmem:[#allocation2 + $0xbc] sm:$0xff] }
 0x598   :  { %v4342_v2 = vsel %vm81_vm1, %v3164_v38, %v7355_v13  ;;  %v4341_v53 = vsel %vm81_vm1, %v3163_v55, %v7354_v44  ;;  %v7390_v13 = vunpack.i.h.bf16 %v9703_v45  ;;  %v7389_v44 = vunpack.i.l.bf16 %v9703_v45  ;;  %v3371_v55 = vld [vmem:[#allocation2 + $0xe5] sm:$0xff] }
 0x599   :  { %v4379_v56 = vsel %vm1337_vm2, %v4341_v53, %v7359_v17  ;;  %v4380_v63 = vsel %vm1337_vm2, %v4342_v2, %v7360_v22  ;;  %v3409_v17 = vld [vmem:[#allocation2 + $0xe6] sm:$0xff] }
 0x59b   :  { %7502 = vrot.lane.b32.xlu2 %v7501_v14, %s7981_s29  ;;  %v3327_v14 = vld [vmem:[#allocation2 + $0xb4] sm:$0xff]  ;;  %v9841_v43 = vpop.permute.xlu1 %7462 }
 0x59c   :  { %v7546_v3 = vpack.i.bf16 %v3328_v50, %v3327_v14  ;;  %v6216_v50 = vld [vmem:[%s11090_s0 + $0x228] sm:$0xff] }
 0x59d   :  { %v7363_v52 = vpop.permute.xlu2 %7362  ;;  %3146 = vst.msk [vmem:[#allocation2 + $0xfb] sm:$0xff] %vm81_vm1, %v6216_v50  ;;  %v7425_v50 = vunpack.i.h.bf16 %v9766_v34 }
 0x59e   :  { %v7365_v49 = vunpack.i.h.bf16 %v7363_v52  ;;  %v7364_v57 = vunpack.i.l.bf16 %v7363_v52  ;;  %v3257_v52 = vld [vmem:[#allocation2 + $0xe2] sm:$0xff] }
 0x5a0   :  { %6238 = vmatmul.msk.bf16.gmra.mxu3 %vm1618_vm8, %v4600_v11  ;;  %v4417_v1 = vsel %vm1376_vm3, %v4379_v56, %v7364_v57  ;;  %v4418_v0 = vsel %vm1376_vm3, %v4380_v63, %v7365_v49  ;;  %v3258_v11 = vld [vmem:[#allocation2 + $0xea] sm:$0xff] }
 0x5a1   :  { %v7626_v32 = vpack.i.bf16 %v3258_v11, %v3257_v52  ;;  %v4455_v10 = vsel %vm1415_vm4, %v4417_v1, %v7369_v25  ;;  %v4456_v23 = vsel %vm1415_vm4, %v4418_v0, %v7370_v6  ;;  %v3329_v49 = vld [vmem:[#allocation2 + $0xc4] sm:$0xff]  ;;  %v3330_v57 = vld [vmem:[#allocation2 + $0xcc] sm:$0xff]  ;;  %v7399_v25 = vunpack.i.l.bf16 %v9722_v7  ;;  %v9889_v11 = vpop.permute.xlu0 %7497 }
 0x5a2   :  { %v7576_v1 = vpack.i.bf16 %v3330_v57, %v3329_v49 }
 0x5a3   :  { %7517 = vrot.lane.b32.xlu2 %v7516_v48, %s7985_s18  ;;  %v6215_v48 = vld [vmem:[%s11090_s0 + $0x220] sm:$0xff]  ;;  %7627 = vrot.lane.b32.xlu1 %v7626_v32, %s7984_s17  ;;  %v9865_v16 = vpop.permute.xlu1 %7477  ;;  %v7409_v32 = vunpack.i.l.bf16 %v9745_v41 }
 0x5a4   :  { %3145 = vst.msk [vmem:[#allocation2 + $0xf3] sm:$0xff] %vm81_vm1, %v6215_v48 }
 0x5a5   :  { %v7373_v36 = vpop.permute.xlu2 %7372 }
 0x5a6   :  { %v7375_v46 = vunpack.i.h.bf16 %v7373_v36  ;;  %v7374_v9 = vunpack.i.l.bf16 %v7373_v36 }
 0x5a8   :  { %v4493_v20 = vsel %vm1454_vm5, %v4455_v10, %v7374_v9  ;;  %v4494_v19 = vsel %vm1454_vm5, %v4456_v23, %v7375_v46 }
 0x5a9   :  { %v4532_v40 = vsel %vm1493_vm6, %v4494_v19, %v7380_v5 }
 0x5aa   :  { %v4570_v30 = vsel %vm1532_vm7, %v4532_v40, 0.0 }
 0x5ab   :  { %7532 = vrot.lane.b32.xlu2 %v7531_v47, %s7981_s29  ;;  %v4531_v47 = vsel %vm1493_vm6, %v4493_v20, %v7379_v12  ;;  %v3372_v38 = vld [vmem:[#allocation2 + $0xed] sm:$0xff]  ;;  %v9891_v48 = vpop.permute.xlu1 %7492  ;;  %v3260_v23 = vld [vmem:[#allocation2 + $0xfa] sm:$0xff] }
 0x5ac   :  { %v4569_v54 = vsel %vm1532_vm7, %v4531_v47, 0.0  ;;  %v7641_v22 = vpack.i.bf16 %v3372_v38, %v3371_v55  ;;  %v3410_v14 = vld [vmem:[#allocation2 + $0xee] sm:$0xff]  ;;  %v3168_v47 = vld [vmem:[#allocation2 + $0x78] sm:$0xff]  ;;  %v7419_v55 = vunpack.i.l.bf16 %v9770_v28 }
 0x5ad   :  { %v7383_v60 = vpop.permute.xlu2 %7382  ;;  %v4602_v6 = vpack.c.bf16 %v4570_v30, %v4569_v54  ;;  %v3293_v12 = vld [vmem:[#allocation2 + $0xd3] sm:$0xff] }
 0x5ae   :  { %v7385_v35 = vunpack.i.h.bf16 %v7383_v60  ;;  %v7384_v36 = vunpack.i.l.bf16 %v7383_v60  ;;  %v7646_v60 = vpack.i.bf16 %v3410_v14, %v3409_v17  ;;  %7642 = vrot.lane.b32.xlu1 %v7641_v22, %s7983_s12  ;;  %v3259_v10 = vld [vmem:[#allocation2 + $0xf2] sm:$0xff]  ;;  %v7601_v40 = vpack.i.bf16 %v3294_v58, %v3293_v12  ;;  %v9914_v22 = vpop.permute.xlu0 %7512  ;;  %v6219_v12 = vld [vmem:[%s11090_s0 + $0x240] sm:$0xff] }
 0x5af   :  { %v7656_v20 = vpack.i.bf16 %v3260_v23, %v3259_v10  ;;  %v3297_v19 = vld [vmem:[#allocation2 + $0xf3] sm:$0xff]  ;;  %3149 = vst.msk [vmem:[#allocation2 + $0x113] sm:$0xff] %vm81_vm1, %v6219_v12  ;;  %v3220_v12 = vld [vmem:[#allocation2 + $0xe9] sm:$0xff] }
 0x5b0   :  { %6239 = vmatmul.msk.bf16.gmra.mxu3 %vm1618_vm8, %v4601_v61  ;;  %v4344_v15 = vsel %vm81_vm1, %v3166_v31, %v7385_v35  ;;  %v4343_v2 = vsel %vm81_vm1, %v3165_v21, %v7384_v36  ;;  %7647 = vrot.lane.b32.xlu0 %v7646_v60, %s7986_s19  ;;  %v3167_v36 = vld [vmem:[#allocation2 + $0x70] sm:$0xff]  ;;  %v6218_v14 = vld [vmem:[%s11090_s0 + $0x238] sm:$0xff] }
 0x5b1   :  { %v4381_v56 = vsel %vm1337_vm2, %v4343_v2, %v7389_v44  ;;  %v4382_v63 = vsel %vm1337_vm2, %v4344_v15, %v7390_v13  ;;  %v7420_v44 = vunpack.i.h.bf16 %v9770_v28  ;;  %v3373_v17 = vld [vmem:[#allocation2 + $0xf5] sm:$0xff]  ;;  %v7424_v28 = vunpack.i.l.bf16 %v9766_v34  ;;  %3148 = vst.msk [vmem:[#allocation2 + $0x10b] sm:$0xff] %vm81_vm1, %v6218_v14 }
 0x5b2   :  { %v7434_v34 = vunpack.i.l.bf16 %v9793_v26 }
 0x5b3   :  { %7547 = vrot.lane.b32.xlu2 %v7546_v3, %s7985_s18  ;;  %v7400_v3 = vunpack.i.h.bf16 %v9722_v7  ;;  %v7410_v7 = vunpack.i.h.bf16 %v9745_v41  ;;  %v6217_v41 = vld [vmem:[%s11090_s0 + $0x230] sm:$0xff]  ;;  %v9922_v2 = vpop.permute.xlu1 %7507 }
 0x5b4   :  { %3147 = vst.msk [vmem:[#allocation2 + $0x103] sm:$0xff] %vm81_vm1, %v6217_v41 }
 0x5b5   :  { %v7393_v59 = vpop.permute.xlu2 %7392 }
 0x5b6   :  { %v7395_v45 = vunpack.i.h.bf16 %v7393_v59  ;;  %v7394_v53 = vunpack.i.l.bf16 %v7393_v59  ;;  %v3298_v59 = vld [vmem:[#allocation2 + $0xfb] sm:$0xff]  ;;  %7657 = vrot.lane.b32.xlu1 %v7656_v20, %s7984_s17  ;;  %v9946_v20 = vpop.permute.xlu0 %7527 }
 0x5b7   :  { %v7661_v35 = vpack.i.bf16 %v3298_v59, %v3297_v19 }
 0x5b8   :  { %v4419_v0 = vsel %vm1376_vm3, %v4381_v56, %v7394_v53  ;;  %v4420_v46 = vsel %vm1376_vm3, %v4382_v63, %v7395_v45  ;;  %v3411_v45 = vld [vmem:[#allocation2 + $0xf6] sm:$0xff]  ;;  %v3300_v58 = vld [vmem:[#allocation2 + $0x10b] sm:$0xff] }
 0x5b9   :  { %v4457_v42 = vsel %vm1415_vm4, %v4419_v0, %v7399_v25  ;;  %v4458_v5 = vsel %vm1415_vm4, %v4420_v46, %v7400_v3  ;;  %7662 = vrot.lane.b32.xlu0 %v7661_v35, %s7982_s30 }
 0x5bb   :  { %7562 = vrot.lane.b32.xlu2 %v7561_v39, %s7981_s29  ;;  %v3412_v3 = vld [vmem:[#allocation2 + $0xfe] sm:$0xff]  ;;  %v9948_v59 = vpop.permute.xlu1 %7522 }
 0x5bc   :  { %v7676_v63 = vpack.i.bf16 %v3412_v3, %v3411_v45  ;;  %v7454_v45 = vunpack.i.l.bf16 %v9813_v29 }
 0x5bd   :  { %v7403_v61 = vpop.permute.xlu2 %7402 }
 0x5be   :  { %v7405_v9 = vunpack.i.h.bf16 %v7403_v61  ;;  %v7404_v52 = vunpack.i.l.bf16 %v7403_v61  ;;  %v3374_v61 = vld [vmem:[#allocation2 + $0xfd] sm:$0xff] }
 0x5bf   :  { %v7671_v56 = vpack.i.bf16 %v3374_v61, %v3373_v17  ;;  %v6220_v17 = vld [vmem:[%s11090_s0 + $0x248] sm:$0xff] }
 0x5c0   :  { %6240 = vmatmul.msk.bf16.gmra.mxu3 %vm1618_vm8, %v4602_v6  ;;  %v4495_v62 = vsel %vm1454_vm5, %v4457_v42, %v7404_v52  ;;  %v4496_v18 = vsel %vm1454_vm5, %v4458_v5, %v7405_v9  ;;  %v3261_v42 = vld [vmem:[#allocation2 + $0x102] sm:$0xff]  ;;  %v3262_v5 = vld [vmem:[#allocation2 + $0x10a] sm:$0xff]  ;;  %3150 = vst.msk [vmem:[#allocation2 + $0x11b] sm:$0xff] %vm81_vm1, %v6220_v17 }
 0x5c1   :  { %v4533_v21 = vsel %vm1493_vm6, %v4495_v62, %v7409_v32  ;;  %v4534_v13 = vsel %vm1493_vm6, %v4496_v18, %v7410_v7  ;;  %7672 = vrot.lane.b32.xlu1 %v7671_v56, %s7983_s12  ;;  %v2817_v7 = vrot.slane %v9565_v24, 3  ;;  %7677 = vrot.lane.b32.xlu0 %v7676_v63, %s7986_s19  ;;  %v7440_v32 = vunpack.i.h.bf16 %v9789_v37  ;;  %v3299_v18 = vld [vmem:[#allocation2 + $0x103] sm:$0xff] }
 0x5c2   :  { %v4571_v54 = vsel %vm1532_vm7, %v4533_v21, 0.0  ;;  %v4572_v30 = vsel %vm1532_vm7, %v4534_v13, 0.0  ;;  %v7686_v62 = vpack.i.bf16 %v3262_v5, %v3261_v42  ;;  %v7691_v19 = vpack.i.bf16 %v3300_v58, %v3299_v18 }
 0x5c3   :  { %7577 = vrot.lane.b32.xlu2 %v7576_v1, %s7985_s18  ;;  %v4603_v60 = vpack.c.bf16 %v4572_v30, %v4571_v54  ;;  %v7435_v1 = vunpack.i.h.bf16 %v9793_v26  ;;  %v7439_v26 = vunpack.i.l.bf16 %v9789_v37  ;;  %v7450_v21 = vunpack.i.h.bf16 %v9818_v4  ;;  %v3375_v54 = vld [vmem:[#allocation2 + $0x105] sm:$0xff]  ;;  %v3376_v30 = vld [vmem:[#allocation2 + $0x10d] sm:$0xff]  ;;  %v9975_v56 = vpop.permute.xlu1 %7537 }
 0x5c4   :  { %v7449_v13 = vunpack.i.l.bf16 %v9818_v4  ;;  %v7701_v14 = vpack.i.bf16 %v3376_v30, %v3375_v54  ;;  %v3413_v4 = vld [vmem:[#allocation2 + $0x106] sm:$0xff]  ;;  %v2809_v63 = vrot.slane %v9565_v24, 1  ;;  %v7470_v42 = vunpack.i.h.bf16 %v9837_v51 }
 0x5c5   :  { %v7413_v27 = vpop.permute.xlu2 %7412  ;;  %v7469_v5 = vunpack.i.l.bf16 %v9837_v51 }
 0x5c6   :  { %v7415_v39 = vunpack.i.h.bf16 %v7413_v27  ;;  %v7414_v31 = vunpack.i.l.bf16 %v7413_v27 }
 0x5c7   :  { %v3377_v17 = vld [vmem:[#allocation2 + $0x115] sm:$0xff] }
 0x5c8   :  { %v4346_v38 = vsel %vm81_vm1, %v3168_v47, %v7415_v39  ;;  %v4345_v15 = vsel %vm81_vm1, %v3167_v36, %v7414_v31  ;;  %v3169_v31 = vld [vmem:[#allocation2 + $0x80] sm:$0xff]  ;;  %v3170_v36 = vld [vmem:[#allocation2 + $0x88] sm:$0xff]  ;;  %v2825_v47 = vrot.slane %v9565_v24, 5 }
 0x5c9   :  { %v4383_v53 = vsel %vm1337_vm2, %v4345_v15, %v7419_v55  ;;  %v4384_v49 = vsel %vm1337_vm2, %v4346_v38, %v7420_v44  ;;  %7687 = vrot.lane.b32.xlu1 %v7686_v62, %s7984_s17  ;;  %7692 = vrot.lane.b32.xlu0 %v7691_v19, %s7982_s30  ;;  %v3302_v62 = vld [vmem:[#allocation2 + $0x11b] sm:$0xff] }
 0x5ca   :  { %v4421_v0 = vsel %vm1376_vm3, %v4383_v53, %v7424_v28  ;;  %v4422_v46 = vsel %vm1376_vm3, %v4384_v49, %v7425_v50  ;;  %v3414_v50 = vld [vmem:[#allocation2 + $0x10e] sm:$0xff]  ;;  %v7455_v28 = vunpack.i.h.bf16 %v9813_v29  ;;  %v7465_v29 = vunpack.i.h.bf16 %v9841_v43 }
 0x5cb   :  { %7602 = vrot.lane.b32.xlu2 %v7601_v40, %s7982_s30  ;;  %v6392_v40 = vld [vmem:[%s11097_s7 + $0x38] sm:$0xff] }
 0x5cc   :  { %3000 = vmatpush.bf16.msrb.mxu1 %v6392_v40  ;;  %v7480_v40 = vunpack.i.h.bf16 %v9865_v16 }
 0x5cd   :  { %v7428_v57 = vpop.permute.xlu2 %7427 }
 0x5ce   :  { %v7430_v6 = vunpack.i.h.bf16 %v7428_v57  ;;  %v7429_v25 = vunpack.i.l.bf16 %v7428_v57  ;;  %v7706_v57 = vpack.i.bf16 %v3414_v50, %v3413_v4  ;;  %v6222_v4 = vld [vmem:[%s11090_s0 + $0x258] sm:$0xf]  ;;  %v7485_v50 = vunpack.i.h.bf16 %v9862_v8 }
 0x5cf   :  { %3152 = vst.msk [vmem:[#allocation2 + $0x12b] sm:$0xf] %vm119_vm9, %v6222_v4  ;;  %vm11116_vm9 = vcmask 261120  }
 0x5d0   :  { %6241 = vmatmul.msk.bf16.gmra.mxu3 %vm1618_vm8, %v4603_v60  ;;  %v4459_v9 = vsel %vm1415_vm4, %v4421_v0, %v7429_v25  ;;  %v4460_v52 = vsel %vm1415_vm4, %v4422_v46, %v7430_v6  ;;  %v9973_v25 = vpop.permute.xlu0 %7542 }
 0x5d1   :  { %v4497_v10 = vsel %vm1454_vm5, %v4459_v9, %v7434_v34  ;;  %v4498_v23 = vsel %vm1454_vm5, %v4460_v52, %v7435_v1  ;;  %7702 = vrot.lane.b32.xlu1 %v7701_v14, %s7983_s12  ;;  %v7464_v1 = vunpack.i.l.bf16 %v9841_v43  ;;  %7707 = vrot.lane.b32.xlu0 %v7706_v57, %s7986_s19  ;;  %v3219_v52 = vld [vmem:[#allocation2 + $0xe1] sm:$0xff]  ;;  %v6221_v43 = vld [vmem:[%s11090_s0 + $0x250] sm:$0xff] }
 0x5d2   :  { %v4535_v41 = vsel %vm1493_vm6, %v4497_v10, %v7439_v26  ;;  %v4536_v39 = vsel %vm1493_vm6, %v4498_v23, %v7440_v32  ;;  %v3263_v32 = vld [vmem:[#allocation2 + $0x112] sm:$0xff]  ;;  %v3264_v26 = vld [vmem:[#allocation2 + $0x11a] sm:$0xff]  ;;  %3151 = vst.msk [vmem:[#allocation2 + $0x123] sm:$0xff] %vm81_vm1, %v6221_v43  ;;  %v7499_v43 = vunpack.i.l.bf16 %v9889_v11 }
 0x5d3   :  { %2818 = vrot.lane.b32.xlu2 %v2817_v7, %s7996_s1  ;;  %v4573_v44 = vsel %vm1532_vm7, %v4535_v41, 0.0  ;;  %v4574_v55 = vsel %vm1532_vm7, %v4536_v39, 0.0  ;;  %v7716_v10 = vpack.i.bf16 %v3264_v26, %v3263_v32  ;;  %v3301_v23 = vld [vmem:[#allocation2 + $0x113] sm:$0xff] }
 0x5d4   :  { %v4604_v49 = vpack.c.bf16 %v4574_v55, %v4573_v44  ;;  %v7721_v19 = vpack.i.bf16 %v3302_v62, %v3301_v23  ;;  %v3171_v41 = vld [vmem:[#allocation2 + $0x90] sm:$0xff]  ;;  %v3172_v39 = vld [vmem:[#allocation2 + $0x98] sm:$0xff]  ;;  %v10009_v44 = vpop.permute.xlu1 %7552 }
 0x5d5   :  { %v7443_v37 = vpop.permute.xlu2 %7442 }
 0x5d6   :  { %v7445_v27 = vunpack.i.h.bf16 %v7443_v37  ;;  %v7444_v35 = vunpack.i.l.bf16 %v7443_v37 }
 0x5d8   :  { %v4348_v38 = vsel %vm81_vm1, %v3170_v36, %v7445_v27  ;;  %v4347_v15 = vsel %vm81_vm1, %v3169_v31, %v7444_v35  ;;  %v7621_v31 = vpack.i.bf16 %v3220_v12, %v3219_v52  ;;  %v10032_v52 = vld [vmem:[%s11092_s2] ss:$0 sm:$0xff]  ;;  %v3221_v12 = vld [vmem:[#allocation2 + $0xf1] sm:$0xff] }
 0x5d9   :  { %v4385_v60 = vsel %vm1337_vm2, %v4347_v15, %v7449_v13  ;;  %v4386_v61 = vsel %vm1337_vm2, %v4348_v38, %v7450_v21  ;;  %7717 = vrot.lane.b32.xlu1 %v7716_v10, %s7984_s17  ;;  %v7479_v21 = vunpack.i.l.bf16 %v9865_v16  ;;  %7722 = vrot.lane.b32.xlu0 %v7721_v19, %s7982_s30  ;;  %v6391_v13 = vld [vmem:[%s11097_s7 + $0x30] sm:$0xff]  ;;  %v3333_v15 = vld [vmem:[#allocation2 + $0xe4] sm:$0xff] }
 0x5da   :  { %v4423_v34 = vsel %vm1376_vm3, %v4385_v60, %v7454_v45  ;;  %v4424_v0 = vsel %vm1376_vm3, %v4386_v61, %v7455_v28  ;;  %3001 = vmatpush.bf16.msrb.mxu1 %v6391_v13  ;;  %v3378_v14 = vld [vmem:[#allocation2 + $0x11d] sm:$0xff]  ;;  %v7484_v28 = vunpack.i.l.bf16 %v9862_v8  ;;  %v3334_v45 = vld [vmem:[#allocation2 + $0xec] sm:$0xff]  ;;  %v7494_v8 = vunpack.i.l.bf16 %v9891_v48 }
 0x5db   :  { %2826 = vrot.lane.b32.xlu2 %v2825_v47, %s7997_s16  ;;  %v10001_v47 = vpop.permute.xlu0 %7557  ;;  %v3416_v57 = vld [vmem:[#allocation2 + $0x11e] sm:$0xff]  ;;  %v3266_v23 = vld [vmem:[#allocation2 + $0x12a] sm:$0xf] }
 0x5dc   :  { %v3265_v10 = vld [vmem:[#allocation2 + $0x122] sm:$0xff]  ;;  %v10043_v62 = vpop.permute.xlu1 %7567 }
 0x5dd   :  { %v7458_v53 = vpop.permute.xlu2 %7457 }
 0x5de   :  { %v7460_v3 = vunpack.i.h.bf16 %v7458_v53  ;;  %v7459_v6 = vunpack.i.l.bf16 %v7458_v53  ;;  %v7731_v53 = vpack.i.bf16 %v3378_v14, %v3377_v17  ;;  %v3335_v14 = vld [vmem:[#allocation2 + $0xf4] sm:$0xff] }
 0x5e0   :  { %6242 = vmatmul.msk.bf16.gmra.mxu3 %vm1618_vm8, %v4604_v49  ;;  %v4461_v46 = vsel %vm1415_vm4, %v4423_v34, %v7459_v6  ;;  %v4462_v9 = vsel %vm1415_vm4, %v4424_v0, %v7460_v3  ;;  %v3415_v49 = vld [vmem:[#allocation2 + $0x116] sm:$0xff]  ;;  %v7636_v34 = vpack.i.bf16 %v3334_v45, %v3333_v15  ;;  %v7495_v0 = vunpack.i.h.bf16 %v9891_v48  ;;  %v3379_v45 = vld [vmem:[#allocation2 + $0x125] sm:$0xff] }
 0x5e1   :  { %v4499_v58 = vsel %vm1454_vm5, %v4461_v46, %v7464_v1  ;;  %v4500_v37 = vsel %vm1454_vm5, %v4462_v9, %v7465_v29  ;;  %v7736_v6 = vpack.i.bf16 %v3416_v57, %v3415_v49  ;;  %7732 = vrot.lane.b32.xlu1 %v7731_v53, %s7983_s12  ;;  %v7500_v48 = vunpack.i.h.bf16 %v9889_v11  ;;  %v3304_v11 = vld [vmem:[#allocation2 + $0x12b] sm:$0xf] }
 0x5e2   :  { %v4537_v36 = vsel %vm1493_vm6, %v4499_v58, %v7469_v5  ;;  %v4538_v51 = vsel %vm1493_vm6, %v4500_v37, %v7470_v42  ;;  %v3222_v58 = vld [vmem:[#allocation2 + $0xf9] sm:$0xff]  ;;  %v7509_v15 = vunpack.i.l.bf16 %v9922_v2  ;;  %v3380_v53 = vld [vmem:[#allocation2 + $0x12d] sm:$0xf]  ;;  %v7515_v49 = vunpack.i.h.bf16 %v9914_v22 }
 0x5e3   :  { %v9987_v7 = vpop.f32.mrf.mxu3  ;;  %2810 = vrot.lane.b32.xlu2 %v2809_v63, %s7998_s22  ;;  %v4575_v30 = vsel %vm1532_vm7, %v4537_v36, 0.0  ;;  %v4576_v16 = vsel %vm1532_vm7, %v4538_v51, 0.0  ;;  %7737 = vrot.lane.b32.xlu0 %v7736_v6, %s7986_s19  ;;  %v10040_v42 = vpop.permute.xlu0 %7572  ;;  %v3173_v51 = vld [vmem:[#allocation2 + $0xa0] sm:$0xff]  ;;  %v7514_v6 = vunpack.i.l.bf16 %v9914_v22  ;;  %v6399_v22 = vld [vmem:[%s11097_s7 + $0x70] sm:$0xff] }
 0x5e4   :  { %v4605_v1 = vpack.c.bf16 %v4576_v16, %v4575_v30 }
 0x5e5   :  { %v7473_v18 = vpop.permute.xlu2 %7472 }
 0x5e6   :  { %v7475_v27 = vunpack.i.h.bf16 %v7473_v18  ;;  %v7474_v35 = vunpack.i.l.bf16 %v7473_v18 }
 0x5e8   :  { %v4350_v55 = vsel %vm81_vm1, %v3172_v39, %v7475_v27  ;;  %v4349_v38 = vsel %vm81_vm1, %v3171_v41, %v7474_v35  ;;  %v7746_v27 = vpack.i.bf16 %v3266_v23, %v3265_v10  ;;  %v3303_v35 = vld [vmem:[#allocation2 + $0x123] sm:$0xff] }
 0x5e9   :  { %v4387_v60 = vsel %vm1337_vm2, %v4349_v38, %v7479_v21  ;;  %v4388_v61 = vsel %vm1337_vm2, %v4350_v55, %v7480_v40  ;;  %v7751_v39 = vpack.i.bf16 %v3304_v11, %v3303_v35  ;;  %v7651_v21 = vpack.i.bf16 %v3222_v58, %v3221_v12  ;;  %v3174_v38 = vld [vmem:[#allocation2 + $0xa8] sm:$0xff] }
 0x5ea   :  { %v4425_v46 = vsel %vm1376_vm3, %v4387_v60, %v7484_v28  ;;  %v4426_v9 = vsel %vm1376_vm3, %v4388_v61, %v7485_v50  ;;  %7747 = vrot.lane.b32.xlu1 %v7746_v27, %s7984_s17  ;;  %v3336_v28 = vld [vmem:[#allocation2 + $0xfc] sm:$0xff]  ;;  %v7761_v60 = vpack.i.bf16 %v3380_v53, %v3379_v45  ;;  %v3417_v61 = vld [vmem:[#allocation2 + $0x126] sm:$0xff] }
 0x5eb   :  { %v3037_v54 = vpop.f32.mrf.mxu3  ;;  %7622 = vrot.lane.b32.xlu2 %v7621_v31, %s7981_s29  ;;  %7752 = vrot.lane.b32.xlu0 %v7751_v39, %s7982_s30  ;;  %v6390_v23 = vld [vmem:[%s11097_s7 + $0x28] sm:$0xff] }
 0x5ec   :  { %v7510_v54 = vunpack.i.h.bf16 %v9922_v2  ;;  %v6400_v2 = vld [vmem:[%s11097_s7 + $0x78] sm:$0xff]  ;;  %3002 = vmatpush.bf16.msrb.mxu1 %v6390_v23  ;;  %v3223_v35 = vld [vmem:[#allocation2 + $0x101] sm:$0xff]  ;;  %v3224_v11 = vld [vmem:[#allocation2 + $0x109] sm:$0xff]  ;;  %v7560_v23 = vunpack.i.h.bf16 %v10001_v47 }
 0x5ed   :  { %v7488_v3 = vpop.permute.xlu2 %7487  ;;  %3013 = vmatpush.bf16.msrb.mxu2 %v6400_v2 }
 0x5ee   :  { %v7490_v63 = vunpack.i.h.bf16 %v7488_v3  ;;  %v7489_v29 = vunpack.i.l.bf16 %v7488_v3  ;;  %v3418_v3 = vld [vmem:[#allocation2 + $0x12e] sm:$0xf] }
 0x5f0   :  { %6243 = vmatmul.msk.bf16.gmra.mxu3 %vm1618_vm8, %v4605_v1  ;;  %v4463_v32 = vsel %vm1415_vm4, %v4425_v46, %v7489_v29  ;;  %v4464_v26 = vsel %vm1415_vm4, %v4426_v9, %v7490_v63  ;;  %v10066_v63 = vpop.permute.xlu0 %7587 }
 0x5f1   :  { %v4501_v37 = vsel %vm1454_vm5, %v4463_v32, %v7494_v8  ;;  %v4502_v19 = vsel %vm1454_vm5, %v4464_v26, %v7495_v0  ;;  %v7766_v0 = vpack.i.bf16 %v3418_v3, %v3417_v61  ;;  %v10069_v8 = vpop.permute.xlu1 %7582  ;;  %3014 = vmatpush.bf16.msrb.mxu2 %v6399_v22  ;;  %v6396_v61 = vld [vmem:[%s11097_s7 + $0x58] sm:$0xff]  ;;  %v6389_v22 = vld [vmem:[%s11097_s7 + $0x20] sm:$0xff] }
 0x5f2   :  { %v4539_v13 = vsel %vm1493_vm6, %v4501_v37, %v7499_v43  ;;  %v4540_v55 = vsel %vm1493_vm6, %v4502_v19, %v7500_v48  ;;  %v7666_v48 = vpack.i.bf16 %v3336_v28, %v3335_v14  ;;  %7762 = vrot.lane.b32.xlu1 %v7761_v60, %s7983_s12  ;;  %v7525_v43 = vunpack.i.h.bf16 %v9948_v59  ;;  %v3337_v60 = vld [vmem:[#allocation2 + $0x104] sm:$0xff]  ;;  %3003 = vmatpush.bf16.msrb.mxu1 %v6389_v22  ;;  %s8000_s12 = smov 1  }
 0x5f3   :  { %v4710_v5 = vpop.f32.mrf.mxu3  ;;  %7637 = vrot.lane.b32.xlu2 %v7636_v34, %s7985_s18  ;;  %v4577_v16 = vsel %vm1532_vm7, %v4539_v13, 0.0  ;;  %v4578_v17 = vsel %vm1532_vm7, %v4540_v55, 0.0  ;;  %7767 = vrot.lane.b32.xlu0 %v7766_v0, %s7986_s19  ;;  %v7529_v19 = vunpack.i.l.bf16 %v9946_v20  ;;  %v3176_v55 = vld [vmem:[#allocation2 + $0xb8] sm:$0xff]  ;;  %v7539_v14 = vunpack.i.l.bf16 %v9975_v56 }
 0x5f4   :  { %v4711_v18 = vadd.f32 %v10032_v52, %v4710_v5  ;;  %v4606_v34 = vpack.c.bf16 %v4578_v17, %v4577_v16  ;;  %v7524_v5 = vunpack.i.l.bf16 %v9948_v59  ;;  %v7530_v59 = vunpack.i.h.bf16 %v9946_v20  ;;  %v3175_v20 = vld [vmem:[#allocation2 + $0xb0] sm:$0xff]  ;;  %v6397_v16 = vld [vmem:[%s11097_s7 + $0x60] sm:$0xff] }
 0x5f5   :  { %v7503_v41 = vpop.permute.xlu2 %7502  ;;  %v7540_v17 = vunpack.i.h.bf16 %v9975_v56  ;;  %v3338_v56 = vld [vmem:[#allocation2 + $0x10c] sm:$0xff] }
 0x5f6   :  { %v4805_v31 = vmax.f32 %v4711_v18, 0.0  ;;  %v7504_v36 = vunpack.i.l.bf16 %v7503_v41  ;;  %v7505_v40 = vunpack.i.h.bf16 %v7503_v41  ;;  %v6398_v41 = vld [vmem:[%s11097_s7 + $0x68] sm:$0xff] }
 0x5f7   :  { %3015 = vmatpush.bf16.msrb.mxu2 %v6398_v41  ;;  %v6394_v41 = vld [vmem:[%s11097_s7 + $0x48] sm:$0xff] }
 0x5f8   :  { %4843 = vst.msk [vmem:[#allocation3] sm:$0xff] %vm11116_vm9, %v4805_v31  ;;  %v4351_v30 = vsel %vm81_vm1, %v3173_v51, %v7504_v36  ;;  %v4352_v4 = vsel %vm81_vm1, %v3174_v38, %v7505_v40  ;;  %v10097_v13 = vpop.permute.xlu0 %7592  ;;  %v7681_v38 = vpack.i.bf16 %v3224_v11, %v3223_v35  ;;  %v3226_v35 = vld [vmem:[#allocation2 + $0x119] sm:$0xff] }
 0x5f9   :  { %v4389_v29 = vsel %vm1337_vm2, %v4351_v30, %v7509_v15  ;;  %v4390_v46 = vsel %vm1337_vm2, %v4352_v4, %v7510_v54  ;;  %v10099_v15 = vpop.permute.xlu1 %7597  ;;  %v6388_v11 = vld [vmem:[%s11097_s7 + $0x18] sm:$0xff] }
 0x5fa   :  { %v4427_v12 = vsel %vm1376_vm3, %v4389_v29, %v7514_v6  ;;  %v4428_v10 = vsel %vm1376_vm3, %v4390_v46, %v7515_v49  ;;  %v7545_v49 = vunpack.i.h.bf16 %v9973_v25  ;;  %3004 = vmatpush.bf16.msrb.mxu1 %v6388_v11  ;;  %v3228_v11 = vld [vmem:[#allocation2 + $0x129] sm:$0xf] }
 0x5fb   :  { %v4712_v50 = vpop.f32.mrf.mxu3  ;;  %7652 = vrot.lane.b32.xlu2 %v7651_v21, %s7981_s29  ;;  %3016 = vmatpush.bf16.msrb.mxu2 %v6397_v16  ;;  %v7570_v16 = vunpack.i.h.bf16 %v10043_v62 }
 0x5fc   :  { %v4713_v57 = vadd.f32 %v10032_v52, %v4712_v50 }
 0x5fd   :  { %v7518_v1 = vpop.permute.xlu2 %7517 }
 0x5fe   :  { %v4806_v9 = vmax.f32 %v4713_v57, 0.0  ;;  %v7520_v32 = vunpack.i.h.bf16 %v7518_v1  ;;  %v7519_v26 = vunpack.i.l.bf16 %v7518_v1  ;;  %v7544_v57 = vunpack.i.l.bf16 %v9973_v25 }
 0x5ff   :  { %3017 = vmatpush.bf16.msrb.mxu2 %v6396_v61  ;;  %v7555_v25 = vunpack.i.h.bf16 %v10009_v44 }
 0x600   :  { %4844 = vst.msk [vmem:[#allocation3 + $0x8] sm:$0xff] %vm11116_vm9, %v4806_v9  ;;  %6244 = vmatmul.msk.bf16.gmra.mxu3 %vm1618_vm8, %v4606_v34  ;;  %v4465_v18 = vsel %vm1415_vm4, %v4427_v12, %v7519_v26  ;;  %v4466_v58 = vsel %vm1415_vm4, %v4428_v10, %v7520_v32  ;;  %v7696_v9 = vpack.i.bf16 %v3338_v56, %v3337_v60  ;;  %v7554_v32 = vunpack.i.l.bf16 %v10009_v44 }
 0x601   :  { %v4503_v31 = vsel %vm1454_vm5, %v4465_v18, %v7524_v5  ;;  %v4504_v36 = vsel %vm1454_vm5, %v4466_v58, %v7525_v43  ;;  %v6395_v43 = vld [vmem:[%s11097_s7 + $0x50] sm:$0xff]  ;;  %v10134_v5 = vpop.permute.xlu0 %7612  ;;  %v10138_v10 = vpop.permute.xlu1 %7607  ;;  %v7559_v18 = vunpack.i.l.bf16 %v10001_v47  ;;  %v7575_v60 = vunpack.i.h.bf16 %v10040_v42 }
 0x602   :  { %v4541_v54 = vsel %vm1493_vm6, %v4503_v31, %v7529_v19  ;;  %v4542_v30 = vsel %vm1493_vm6, %v4504_v36, %v7530_v59  ;;  %v3177_v36 = vld [vmem:[#allocation2 + $0xc0] sm:$0xff]  ;;  %v7574_v56 = vunpack.i.l.bf16 %v10040_v42  ;;  %v7585_v42 = vunpack.i.h.bf16 %v10069_v8 }
 0x603   :  { %v4715_v37 = vpop.f32.mrf.mxu3  ;;  %7667 = vrot.lane.b32.xlu2 %v7666_v48, %s7985_s18  ;;  %v4579_v45 = vsel %vm1532_vm7, %v4541_v54, 0.0  ;;  %v4580_v53 = vsel %vm1532_vm7, %v4542_v30, 0.0  ;;  %3018 = vmatpush.bf16.msrb.mxu2 %v6395_v43  ;;  %v6393_v54 = vld [vmem:[%s11097_s7 + $0x40] sm:$0xff]  ;;  %v7569_v30 = vunpack.i.l.bf16 %v10043_v62  ;;  %v3339_v62 = vld [vmem:[#allocation2 + $0x114] sm:$0xff]  ;;  %v7595_v43 = vunpack.i.h.bf16 %v10097_v13 }
 0x604   :  { %v4716_v27 = vadd.f32 %v10032_v52, %v4715_v37  ;;  %v4607_v46 = vpack.c.bf16 %v4580_v53, %v4579_v45  ;;  %v3225_v37 = vld [vmem:[#allocation2 + $0x111] sm:$0xff] }
 0x605   :  { %v7533_v39 = vpop.permute.xlu2 %7532 }
 0x606   :  { %v4807_v51 = vmax.f32 %v4716_v27, 0.0  ;;  %v7535_v40 = vunpack.i.h.bf16 %v7533_v39  ;;  %v7534_v21 = vunpack.i.l.bf16 %v7533_v39 }
 0x607   :  { %3019 = vmatpush.bf16.msrb.mxu2 %v6394_v41 }
 0x608   :  { %4845 = vst.msk [vmem:[#allocation3 + $0x10] sm:$0xff] %vm11116_vm9, %v4807_v51  ;;  %v4354_v4 = vsel %vm81_vm1, %v3176_v55, %v7535_v40  ;;  %v4353_v50 = vsel %vm81_vm1, %v3175_v20, %v7534_v21  ;;  %v7711_v40 = vpack.i.bf16 %v3226_v35, %v3225_v37  ;;  %v3178_v55 = vld [vmem:[#allocation2 + $0xc8] sm:$0xff]  ;;  %v4900_v37 = vld [vmem:[#allocation3 + $0x1] ss:$2 sm:$0xff] }
 0x609   :  { %v4391_v3 = vsel %vm1337_vm2, %v4353_v50, %v7539_v14  ;;  %v4392_v6 = vsel %vm1337_vm2, %v4354_v4, %v7540_v17  ;;  %v10166_v50 = vpop.permute.xlu0 %2830  ;;  %v10170_v53 = vpop.permute.xlu1 %2822  ;;  %v3227_v35 = vld [vmem:[#allocation2 + $0x121] sm:$0xff] }
 0x60a   :  { %v4429_v26 = vsel %vm1376_vm3, %v4391_v3, %v7544_v57  ;;  %v4430_v48 = vsel %vm1376_vm3, %v4392_v6, %v7545_v49  ;;  %v3340_v57 = vld [vmem:[#allocation2 + $0x11c] sm:$0xff] }
 0x60b   :  { %v4717_v28 = vpop.f32.mrf.mxu3  ;;  %7682 = vrot.lane.b32.xlu2 %v7681_v38, %s7981_s29  ;;  %v6387_v38 = vld [vmem:[%s11097_s7 + $0x10] sm:$0xff]  ;;  %3020 = vmatpush.bf16.msrb.mxu2 %v6393_v54  ;;  %v7741_v54 = vpack.i.bf16 %v3228_v11, %v3227_v35 }
 0x60c   :  { %v4718_v2 = vadd.f32 %v10032_v52, %v4717_v28  ;;  %3005 = vmatpush.bf16.msrb.mxu1 %v6387_v38  ;;  %v7599_v38 = vunpack.i.l.bf16 %v10099_v15 }
 0x60d   :  { %v7548_v29 = vpop.permute.xlu2 %7547 }
 0x60e   :  { %v4808_v1 = vmax.f32 %v4718_v2, 0.0  ;;  %v7550_v34 = vunpack.i.h.bf16 %v7548_v29  ;;  %v7549_v0 = vunpack.i.l.bf16 %v7548_v29  ;;  %v6386_v2 = vld [vmem:[%s11097_s7 + $0x8] sm:$0xff] }
 0x610   :  { %4846 = vst.msk [vmem:[#allocation3 + $0x18] sm:$0xff] %vm11116_vm9, %v4808_v1  ;;  %6245 = vmatmul.msk.bf16.gmra.mxu3 %vm1618_vm8, %v4607_v46  ;;  %v4467_v44 = vsel %vm1415_vm4, %v4429_v26, %v7549_v0  ;;  %v4468_v12 = vsel %vm1415_vm4, %v4430_v48, %v7550_v34  ;;  %3006 = vmatpush.bf16.msrb.mxu1 %v6386_v2 }
 0x611   :  { %v4505_v59 = vsel %vm1454_vm5, %v4467_v44, %v7554_v32  ;;  %v4506_v19 = vsel %vm1454_vm5, %v4468_v12, %v7555_v25  ;;  %v7726_v46 = vpack.i.bf16 %v3340_v57, %v3339_v62  ;;  %v7584_v25 = vunpack.i.l.bf16 %v10069_v8 }
 0x612   :  { %v4543_v21 = vsel %vm1493_vm6, %v4505_v59, %v7559_v18  ;;  %v4544_v20 = vsel %vm1493_vm6, %v4506_v19, %v7560_v23  ;;  %v3180_v23 = vld [vmem:[#allocation2 + $0xd8] sm:$0xff]  ;;  %v7590_v8 = vunpack.i.h.bf16 %v10066_v63  ;;  %v7589_v59 = vunpack.i.l.bf16 %v10066_v63  ;;  %v3179_v63 = vld [vmem:[#allocation2 + $0xd0] sm:$0xff] }
 0x613   :  { %v4720_v58 = vpop.f32.mrf.mxu3  ;;  %7697 = vrot.lane.b32.xlu2 %v7696_v9, %s7985_s18  ;;  %v4581_v14 = vsel %vm1532_vm7, %v4543_v21, 0.0  ;;  %v4582_v4 = vsel %vm1532_vm7, %v4544_v20, 0.0  ;;  %v6385_v9 = vld [vmem:[%s11097_s7] sm:$0xff]  ;;  %v4358_v21 = vsel %vm81_vm1, %v3180_v23, %v7595_v43 }
 0x614   :  { %v4721_v27 = vadd.f32 %v10032_v52, %v4720_v58  ;;  %v4608_v6 = vpack.c.bf16 %v4582_v4, %v4581_v14  ;;  %3007 = vmatpush.bf16.msrb.mxu1 %v6385_v9  ;;  %v4881_v58 = vld [vmem:[#allocation3] ss:$2 sm:$0xff]  ;;  %v3342_v9 = vld [vmem:[#allocation2 + $0x12c] sm:$0xf] }
 0x615   :  { %v7563_v47 = vpop.permute.xlu2 %7562 }
 0x616   :  { %v4809_v39 = vmax.f32 %v4721_v27, 0.0  ;;  %v7564_v31 = vunpack.i.l.bf16 %v7563_v47  ;;  %v7565_v51 = vunpack.i.h.bf16 %v7563_v47  ;;  %v10196_v27 = vpop.permute.xlu1 %7617  ;;  %v7594_v47 = vunpack.i.l.bf16 %v10097_v13 }
 0x617   :  { %v4882_v48 = vld [vmem:[#allocation3 + $0x10] ss:$2 sm:$0xff]  ;;  %v4901_v22 = vld [vmem:[#allocation3 + $0x11] ss:$2 sm:$0xff] }
 0x618   :  { %4847 = vst.msk [vmem:[#allocation3 + $0x20] sm:$0xff] %vm11116_vm9, %v4809_v39  ;;  %v4355_v17 = vsel %vm81_vm1, %v3177_v36, %v7564_v31  ;;  %v4356_v28 = vsel %vm81_vm1, %v3178_v55, %v7565_v51  ;;  %v10198_v41 = vmax.f32 %v4882_v48, %v4901_v22  ;;  %v10201_v39 = vpop.permute.xlu0 %2814  ;;  %v7600_v31 = vunpack.i.h.bf16 %v10099_v15 }
 0x619   :  { %v4393_v61 = vsel %vm1337_vm2, %v4355_v17, %v7569_v30  ;;  %v4394_v29 = vsel %vm1337_vm2, %v4356_v28, %v7570_v16  ;;  %v10207_v55 = vmax.f32 %v4881_v58, %v4900_v37  ;;  %v4357_v28 = vsel %vm81_vm1, %v3179_v63, %v7594_v47 }
 0x61a   :  { %v4431_v32 = vsel %vm1376_vm3, %v4393_v61, %v7574_v56  ;;  %v4432_v26 = vsel %vm1376_vm3, %v4394_v29, %v7575_v60  ;;  %v5052_v17 = vrot.slane %v10198_v41, 2  ;;  %v4395_v29 = vsel %vm1337_vm2, %v4357_v28, %v7599_v38 }
 0x61b   :  { %v4722_v45 = vpop.f32.mrf.mxu3  ;;  %7712 = vrot.lane.b32.xlu2 %v7711_v40, %s7981_s29  ;;  %v5051_v15 = vrot.slane %v10207_v55, 2  ;;  %v5145_v57 = vrot.slane %v10207_v55, 3  ;;  %v7620_v47 = vunpack.i.h.bf16 %v10196_v27 }
 0x61c   :  { %v4723_v49 = vadd.f32 %v10032_v52, %v4722_v45  ;;  %v4396_v45 = vsel %vm1337_vm2, %v4358_v21, %v7600_v31 }
 0x61d   :  { %v7578_v3 = vpop.permute.xlu2 %7577 }
 0x61e   :  { %v4810_v1 = vmax.f32 %v4723_v49, 0.0  ;;  %v7580_v34 = vunpack.i.h.bf16 %v7578_v3  ;;  %v7579_v0 = vunpack.i.l.bf16 %v7578_v3  ;;  %v5146_v49 = vrot.slane %v10198_v41, 3 }
 0x620   :  { %4848 = vst.msk [vmem:[#allocation3 + $0x28] sm:$0xff] %vm11116_vm9, %v4810_v1  ;;  %6246 = vmatmul.msk.bf16.gmra.mxu3 %vm1618_vm8, %v4608_v6  ;;  %v4469_v44 = vsel %vm1415_vm4, %v4431_v32, %v7579_v0  ;;  %v4470_v12 = vsel %vm1415_vm4, %v4432_v26, %v7580_v34  ;;  %v5053_v34 = vsel %vm2066_vm12, %v5051_v15, %v5052_v17  ;;  %v10241_v43 = vpop.permute.xlu0 %7632 }
 0x621   :  { %v4507_v36 = vsel %vm1454_vm5, %v4469_v44, %v7584_v25  ;;  %v4508_v51 = vsel %vm1454_vm5, %v4470_v12, %v7585_v42  ;;  %v10232_v42 = vpop.permute.xlu1 %7627  ;;  %v7610_v25 = vunpack.i.h.bf16 %v10138_v10  ;;  %v7609_v44 = vunpack.i.l.bf16 %v10138_v10 }
 0x622   :  { %v4545_v14 = vsel %vm1493_vm6, %v4507_v36, %v7589_v59  ;;  %v4546_v4 = vsel %vm1493_vm6, %v4508_v51, %v7590_v8  ;;  %v7615_v59 = vunpack.i.h.bf16 %v10134_v5  ;;  %v7614_v10 = vunpack.i.l.bf16 %v10134_v5 }
 0x623   :  { %7727 = vrot.lane.b32.xlu2 %v7726_v46, %s7985_s18  ;;  %v4725_v18 = vpop.f32.mrf.mxu3  ;;  %v4583_v3 = vsel %vm1532_vm7, %v4545_v14, 0.0  ;;  %v4584_v6 = vsel %vm1532_vm7, %v4546_v4, 0.0  ;;  %v3341_v46 = vld [vmem:[#allocation2 + $0x124] sm:$0xff]  ;;  %v7619_v36 = vunpack.i.l.bf16 %v10196_v27  ;;  %v4958_v5 = vrot.slane %v10198_v41, 1 }
 0x624   :  { %v4726_v19 = vadd.f32 %v10032_v52, %v4725_v18  ;;  %v4609_v18 = vpack.c.bf16 %v4584_v6, %v4583_v3  ;;  %v7756_v8 = vpack.i.bf16 %v3342_v9, %v3341_v46  ;;  %v4957_v27 = vrot.slane %v10207_v55, 1 }
 0x625   :  { %v7603_v40 = vpop.permute.xlu2 %7602 }
 0x626   :  { %v4811_v20 = vmax.f32 %v4726_v19, 0.0  ;;  %v7605_v60 = vunpack.i.h.bf16 %v7603_v40  ;;  %v7604_v56 = vunpack.i.l.bf16 %v7603_v40  ;;  %v4959_v28 = vsel %vm1971_vm13, %v4957_v27, %v4958_v5 }
 0x627   :  { %v4883_v30 = vld [vmem:[#allocation3 + $0x20] ss:$2 sm:$0xff]  ;;  %v4902_v13 = vld [vmem:[#allocation3 + $0x21] ss:$2 sm:$0xff] }
 0x628   :  { %4849 = vst.msk [vmem:[#allocation3 + $0x30] sm:$0xff] %vm11116_vm9, %v4811_v20  ;;  %v10211_v16 = vmax.f32 %v4883_v30, %v4902_v13  ;;  %vm11117_vm9 = vcmask 1044480   ;;  %v4433_v58 = vsel %vm1376_vm3, %v4395_v29, %v7604_v56  ;;  %v4434_v37 = vsel %vm1376_vm3, %v4396_v45, %v7605_v60  ;;  %v10274_v14 = vpop.permute.xlu0 %7647 }
 0x629   :  { %v5147_v48 = vsel %vm11117_vm9, %v5145_v57, %v5146_v49  ;;  %vm11118_vm10 = vmmov %vm11117_vm9  ;;  %v4471_v19 = vsel %vm1415_vm4, %v4433_v58, %v7609_v44  ;;  %v4472_v35 = vsel %vm1415_vm4, %v4434_v37, %v7610_v25  ;;  %vm11113_vm9 = vcmask 670720   ;;  %v10270_v13 = vpop.permute.xlu1 %7642 }
 0x62a   :  { %v5054_v62 = vrot.slane %v10211_v16, 2  ;;  %v5148_v2 = vrot.slane %v10211_v16, 3  ;;  %v4960_v11 = vrot.slane %v10211_v16, 1  ;;  %v4509_v40 = vsel %vm1454_vm5, %v4471_v19, %v7614_v10 }
 0x62b   :  { %7742 = vrot.lane.b32.xlu2 %v7741_v54, %s7981_s29  ;;  %v4727_v61 = vpop.f32.mrf.mxu3  ;;  %v4510_v63 = vsel %vm1454_vm5, %v4472_v35, %v7615_v59  ;;  %v7629_v58 = vunpack.i.l.bf16 %v10232_v42  ;;  %v7635_v35 = vunpack.i.h.bf16 %v10241_v43 }
 0x62c   :  { %v4728_v1 = vadd.f32 %v10032_v52, %v4727_v61  ;;  %v5055_v0 = vsel %vm2066_vm12, %v5052_v17, %v5054_v62  ;;  %v5149_v22 = vsel %vm11118_vm10, %v5146_v49, %v5148_v2  ;;  %vm11112_vm10 = vcmask 97280  }
 0x62d   :  { %v10235_v32 = vpop.permute.xlu2 %2818  ;;  %v7776_v26 = vpack.i.bf16 %v5055_v0, %v5053_v34  ;;  %v7781_v23 = vpack.i.bf16 %v5149_v22, %v5147_v48  ;;  %v4961_v30 = vsel %vm1971_vm13, %v4958_v5, %v4960_v11  ;;  %v4548_v4 = vsel %vm1493_vm6, %v4510_v63, %v7620_v47  ;;  %v3182_v48 = vld [vmem:[#allocation2 + $0xe8] sm:$0xff] }
 0x62e   :  { %v4812_v12 = vmax.f32 %v4728_v1, 0.0  ;;  %v2843_v21 = vsel %vm11112_vm10, %v10235_v32, %v10170_v53  ;;  %v4547_v53 = vsel %vm1493_vm6, %v4509_v40, %v7619_v36  ;;  %vm11120_vm10 = vcmask 261120  }
 0x62f   :  { %7777 = vrot.lane.b32.xlu1 %v7776_v26, %s7988_s24  ;;  %7782 = vrot.lane.b32.xlu0 %v7781_v23, %s7987_s23  ;;  %v7771_v49 = vpack.i.bf16 %v4961_v30, %v4959_v28  ;;  %v4585_v57 = vsel %vm1532_vm7, %v4547_v53, 0.0  ;;  %v4586_v60 = vsel %vm1532_vm7, %v4548_v4, 0.0  ;;  %v7634_v47 = vunpack.i.l.bf16 %v10241_v43 }
 0x630   :  { %4850 = vst.msk [vmem:[#allocation3 + $0x38] sm:$0xff] %vm11119_vm11, %v4812_v12  ;;  %6247 = vmatmul.msk.bf16.gmra.mxu3 %vm1618_vm8, %v4609_v18  ;;  %vm11115_vm11 = vcmask 384000   ;;  %v10296_v25 = vpop.permute.xlu0 %7662  ;;  %v3181_v12 = vld [vmem:[#allocation2 + $0xe0] sm:$0xff]  ;;  %v7650_v40 = vunpack.i.h.bf16 %v10274_v14  ;;  %v7649_v63 = vunpack.i.l.bf16 %v10274_v14 }
 0x631   :  { %v10294_v46 = vpop.permute.xlu1 %7657 }
 0x633   :  { %7757 = vrot.lane.b32.xlu2 %v7756_v8, %s7985_s18  ;;  %v4730_v31 = vpop.f32.mrf.mxu3 }
 0x634   :  { %v4731_v51 = vadd.f32 %v10032_v52, %v4730_v31 }
 0x635   :  { %v2827_v20 = vpop.permute.xlu2 %2826 }
 0x636   :  { %v4813_v38 = vmax.f32 %v4731_v51, 0.0  ;;  %v2845_v54 = vsel %vm11115_vm11, %v2843_v21, %v2827_v20  ;;  %v7644_v51 = vunpack.i.l.bf16 %v10270_v13 }
 0x637   :  { %v2847_v17 = vsel %vm11113_vm9, %v2845_v54, %v10166_v50  ;;  %vm2838_vm9 = vcmask 572416   ;;  %v4884_v34 = vld [vmem:[#allocation3 + $0x30] ss:$2 sm:$0xff]  ;;  %v4903_v0 = vld [vmem:[#allocation3 + $0x31] ss:$2 sm:$0xff] }
 0x638   :  { %4851 = vst.msk [vmem:[#allocation3 + $0x40] sm:$0xff] %vm11120_vm10, %v4813_v38  ;;  %v2849_v45 = vsel %vm11114_vm14, %v2847_v17, %v9657_v33  ;;  %vm2840_vm10 = vcmask 859136   ;;  %v4610_v33 = vpack.c.bf16 %v4586_v60, %v4585_v57  ;;  %vm11121_vm14 = vcmask 261120   ;;  %v10329_v17 = vpop.permute.xlu0 %7677 }
 0x639   :  { %v2851_v15 = vpack.c.bf16 %v2849_v45, %v2849_v45  ;;  %v10298_v26 = vmax.f32 %v4884_v34, %v4903_v0  ;;  %v10319_v38 = vpop.permute.xlu1 %7672 }
 0x63b   :  { %7772 = vrot.lane.b32.xlu2 %v7771_v49, %s7989_s25  ;;  %3021 = vmatmul.bf16.vlgmr.msrb.gmra.mxu2 %v2851_v15  ;;  %v4732_v50 = vpop.f32.mrf.mxu3  ;;  %v5150_v59 = vrot.slane %v10298_v26, 3  ;;  %v5056_v10 = vrot.slane %v10298_v26, 2  ;;  %v4962_v5 = vrot.slane %v10298_v26, 1 }
 0x63c   :  { %v4733_v56 = vadd.f32 %v10032_v52, %v4732_v50 }
 0x63d   :  { %v2811_v61 = vpop.permute.xlu2 %2810  ;;  %v5057_v30 = vsel %vm2066_vm12, %v5054_v62, %v5056_v10  ;;  %v4963_v62 = vsel %vm1971_vm13, %v4960_v11, %v4962_v5 }
 0x63e   :  { %v4814_v3 = vmax.f32 %v4733_v56, 0.0  ;;  %v2837_v6 = vsel %vm1532_vm7, %v9565_v24, %v2811_v61 }
 0x63f   :  { %v2839_v29 = vsel %vm2838_vm9, %v2837_v6, %v10201_v39 }
 0x640   :  { %4852 = vst.msk [vmem:[#allocation3 + $0x48] sm:$0xff] %vm11121_vm14, %v4814_v3  ;;  %6248 = vmatmul.msk.bf16.gmra.mxu3 %vm1618_vm8, %v4610_v33  ;;  %v2841_v1 = vsel %vm2840_vm10, %v2839_v29, %v10235_v32  ;;  %v7630_v32 = vunpack.i.h.bf16 %v10232_v42  ;;  %v7645_v42 = vunpack.i.h.bf16 %v10270_v13 }
 0x641   :  { %v2850_v9 = vpack.c.bf16 %v2841_v1, %v2841_v1 }
 0x643   :  { %3008 = vmatmul.bf16.vlgmr.msrb.gmra.mxu1 %v2850_v9  ;;  %v4735_v24 = vpop.f32.mrf.mxu3 }
 0x644   :  { %v4736_v39 = vadd.f32 %v10032_v52, %v4735_v24 }
 0x645   :  { %v7623_v22 = vpop.permute.xlu2 %7622 }
 0x646   :  { %v4815_v44 = vmax.f32 %v4736_v39, 0.0  ;;  %v7625_v23 = vunpack.i.h.bf16 %v7623_v22  ;;  %v7624_v18 = vunpack.i.l.bf16 %v7623_v22  ;;  %v10360_v22 = vpop.permute.xlu1 %7687 }
 0x647   :  { %v4885_v37 = vld [vmem:[#allocation3 + $0x40] ss:$2 sm:$0xff]  ;;  %v4904_v8 = vld [vmem:[#allocation3 + $0x41] ss:$2 sm:$0xff] }
 0x648   :  { %4853 = vst.msk [vmem:[#allocation3 + $0x50] sm:$0xff] %vm11121_vm14, %v4815_v44  ;;  %v4360_v19 = vsel %vm81_vm1, %v3182_v48, %v7625_v23  ;;  %v10309_v31 = vmax.f32 %v4885_v37, %v4904_v8  ;;  %v4359_v36 = vsel %vm81_vm1, %v3181_v12, %v7624_v18  ;;  %vm11122_vm14 = vcmask 1044480   ;;  %v10362_v12 = vpop.permute.xlu0 %7692  ;;  %v3183_v18 = vld [vmem:[#allocation2 + $0xf0] sm:$0xff] }
 0x649   :  { %v4398_v43 = vsel %vm1337_vm2, %v4360_v19, %v7630_v32  ;;  %v5151_v27 = vsel %vm11122_vm14, %v5148_v2, %v5150_v59  ;;  %v4397_v14 = vsel %vm1337_vm2, %v4359_v36, %v7629_v58  ;;  %vm11123_vm11 = vmmov %vm11122_vm14  ;;  %v3184_v32 = vld [vmem:[#allocation2 + $0xf8] sm:$0xff]  ;;  %v7660_v8 = vunpack.i.h.bf16 %v10294_v46 }
 0x64a   :  { %v5152_v21 = vrot.slane %v10309_v31, 3  ;;  %v5058_v20 = vrot.slane %v10309_v31, 2  ;;  %v4964_v13 = vrot.slane %v10309_v31, 1  ;;  %v4435_v61 = vsel %vm1376_vm3, %v4397_v14, %v7634_v47 }
 0x64b   :  { %v4737_v54 = vpop.f32.mrf.mxu3  ;;  %v4436_v3 = vsel %vm1376_vm3, %v4398_v43, %v7635_v35  ;;  %v7665_v35 = vunpack.i.h.bf16 %v10296_v25  ;;  %v7664_v47 = vunpack.i.l.bf16 %v10296_v25  ;;  %v7680_v43 = vunpack.i.h.bf16 %v10329_v17 }
 0x64c   :  { %v4738_v53 = vadd.f32 %v10032_v52, %v4737_v54  ;;  %v5153_v4 = vsel %vm11123_vm11, %v5150_v59, %v5152_v21  ;;  %v5059_v2 = vsel %vm2066_vm12, %v5056_v10, %v5058_v20  ;;  %v4965_v15 = vsel %vm1971_vm13, %v4962_v5, %v4964_v13 }
 0x64d   :  { %v7638_v28 = vpop.permute.xlu2 %7637  ;;  %v7796_v45 = vpack.i.bf16 %v5153_v4, %v5151_v27  ;;  %v7791_v49 = vpack.i.bf16 %v5059_v2, %v5057_v30  ;;  %v7786_v56 = vpack.i.bf16 %v4965_v15, %v4963_v62  ;;  %vm11124_vm11 = vcmask 261120  }
 0x64e   :  { %v4816_v57 = vmax.f32 %v4738_v53, 0.0  ;;  %v7640_v60 = vunpack.i.h.bf16 %v7638_v28  ;;  %v7639_v50 = vunpack.i.l.bf16 %v7638_v28  ;;  %vm11125_vm14 = vmmov %vm11124_vm11  ;;  %v7659_v59 = vunpack.i.l.bf16 %v10294_v46  ;;  %v10379_v25 = vpop.permute.xlu1 %7702 }
 0x64f   :  { %7797 = vrot.lane.b32.xlu0 %v7796_v45, %s7987_s23  ;;  %7792 = vrot.lane.b32.xlu1 %v7791_v49, %s7988_s24  ;;  %v7674_v46 = vunpack.i.l.bf16 %v10319_v38  ;;  %v7679_v14 = vunpack.i.l.bf16 %v10329_v17 }
 0x650   :  { %4854 = vst.msk [vmem:[#allocation3 + $0x58] sm:$0xff] %vm11124_vm11, %v4816_v57  ;;  %v4473_v11 = vsel %vm1415_vm4, %v4435_v61, %v7639_v50  ;;  %v4474_v6 = vsel %vm1415_vm4, %v4436_v3, %v7640_v60  ;;  %7787 = vrot.lane.b32.xlu2 %v7786_v56, %s7989_s25  ;;  %v10383_v2 = vpop.permute.xlu0 %7707 }
 0x651   :  { %v4511_v33 = vsel %vm1454_vm5, %v4473_v11, %v7644_v51  ;;  %v4512_v29 = vsel %vm1454_vm5, %v4474_v6, %v7645_v42  ;;  %v3186_v6 = vld [vmem:[#allocation2 + $0x108] sm:$0xff] }
 0x652   :  { %v4549_v1 = vsel %vm1493_vm6, %v4511_v33, %v7649_v63  ;;  %v4550_v34 = vsel %vm1493_vm6, %v4512_v29, %v7650_v40  ;;  %v7675_v63 = vunpack.i.h.bf16 %v10319_v38 }
 0x653   :  { %v4587_v0 = vsel %vm1532_vm7, %v4549_v1, 0.0  ;;  %v4588_v9 = vsel %vm1532_vm7, %v4550_v34, 0.0  ;;  %v4740_v24 = vpop.f32.mrf.mxu3  ;;  %v3185_v1 = vld [vmem:[#allocation2 + $0x100] sm:$0xff] }
 0x654   :  { %v4741_v39 = vadd.f32 %v10032_v52, %v4740_v24  ;;  %v4611_v48 = vpack.c.bf16 %v4588_v9, %v4587_v0  ;;  %v7690_v9 = vunpack.i.h.bf16 %v10360_v22  ;;  %v7689_v24 = vunpack.i.l.bf16 %v10360_v22 }
 0x655   :  { %v7653_v44 = vpop.permute.xlu2 %7652 }
 0x656   :  { %v4817_v23 = vmax.f32 %v4741_v39, 0.0  ;;  %v7655_v58 = vunpack.i.h.bf16 %v7653_v44  ;;  %v7654_v37 = vunpack.i.l.bf16 %v7653_v44  ;;  %6249 = vmatmul.msk.bf16.gmra.mxu3 %vm1618_vm8, %v4611_v48 }
 0x657   :  { %v4886_v45 = vld [vmem:[#allocation3 + $0x50] ss:$2 sm:$0xff]  ;;  %v4905_v49 = vld [vmem:[#allocation3 + $0x51] ss:$2 sm:$0xff] }
 0x658   :  { %4855 = vst.msk [vmem:[#allocation3 + $0x60] sm:$0xff] %vm11125_vm14, %v4817_v23  ;;  %v4362_v10 = vsel %vm81_vm1, %v3184_v32, %v7655_v58  ;;  %v4361_v19 = vsel %vm81_vm1, %v3183_v18, %v7654_v37  ;;  %v10394_v61 = vmax.f32 %v4886_v45, %v4905_v49  ;;  %vm11126_vm14 = vmmov %vm11124_vm11  ;;  %v7695_v32 = vunpack.i.h.bf16 %v10362_v12 }
 0x659   :  { %v4400_v42 = vsel %vm1337_vm2, %v4362_v10, %v7660_v8  ;;  %v4399_v51 = vsel %vm1337_vm2, %v4361_v19, %v7659_v59  ;;  %v7694_v58 = vunpack.i.l.bf16 %v10362_v12  ;;  %v10408_v8 = vpop.permute.xlu1 %7717  ;;  %v7705_v59 = vunpack.i.h.bf16 %v10379_v25 }
 0x65a   :  { %v4437_v53 = vsel %vm1376_vm3, %v4399_v51, %v7664_v47  ;;  %v4438_v4 = vsel %vm1376_vm3, %v4400_v42, %v7665_v35  ;;  %v5154_v44 = vrot.slane %v10394_v61, 3  ;;  %v5060_v23 = vrot.slane %v10394_v61, 2  ;;  %v10414_v35 = vpop.permute.xlu0 %7722 }
 0x65b   :  { %v4742_v36 = vpop.f32.mrf.mxu3  ;;  %v7704_v10 = vunpack.i.l.bf16 %v10379_v25  ;;  %v4966_v19 = vrot.slane %v10394_v61, 1  ;;  %v7710_v47 = vunpack.i.h.bf16 %v10383_v2 }
 0x65c   :  { %v4743_v5 = vadd.f32 %v10032_v52, %v4742_v36  ;;  %v7709_v36 = vunpack.i.l.bf16 %v10383_v2 }
 0x65d   :  { %v7668_v40 = vpop.permute.xlu2 %7667 }
 0x65e   :  { %v4818_v54 = vmax.f32 %v4743_v5, 0.0  ;;  %v7670_v27 = vunpack.i.h.bf16 %v7668_v40  ;;  %v7669_v30 = vunpack.i.l.bf16 %v7668_v40 }
 0x660   :  { %4856 = vst.msk [vmem:[#allocation3 + $0x68] sm:$0xff] %vm11124_vm11, %v4818_v54  ;;  %v4475_v28 = vsel %vm1415_vm4, %v4437_v53, %v7669_v30  ;;  %v4476_v38 = vsel %vm1415_vm4, %v4438_v4, %v7670_v27  ;;  %vm11127_vm11 = vcmask 1044480  }
 0x661   :  { %v4513_v62 = vsel %vm1454_vm5, %v4475_v28, %v7674_v46  ;;  %v4514_v17 = vsel %vm1454_vm5, %v4476_v38, %v7675_v63  ;;  %v5155_v40 = vsel %vm11127_vm11, %v5152_v21, %v5154_v44  ;;  %v5061_v63 = vsel %vm2066_vm12, %v5058_v20, %v5060_v23 }
 0x662   :  { %v4551_v15 = vsel %vm1493_vm6, %v4513_v62, %v7679_v14  ;;  %v4552_v57 = vsel %vm1493_vm6, %v4514_v17, %v7680_v43  ;;  %v4967_v20 = vsel %vm1971_vm13, %v4964_v13, %v4966_v19 }
 0x663   :  { %v4589_v60 = vsel %vm1532_vm7, %v4551_v15, 0.0  ;;  %v4590_v50 = vsel %vm1532_vm7, %v4552_v57, 0.0  ;;  %v4745_v56 = vpop.f32.mrf.mxu3 }
 0x664   :  { %v4746_v3 = vadd.f32 %v10032_v52, %v4745_v56  ;;  %v4612_v11 = vpack.c.bf16 %v4590_v50, %v4589_v60  ;;  %v7733_v50 = vpop.permute.xlu1 %7732 }
 0x665   :  { %v7683_v33 = vpop.permute.xlu2 %7682 }
 0x666   :  { %v4819_v29 = vmax.f32 %v4746_v3, 0.0  ;;  %v7685_v34 = vunpack.i.h.bf16 %v7683_v33  ;;  %v7684_v0 = vunpack.i.l.bf16 %v7683_v33  ;;  %6250 = vmatmul.msk.bf16.gmra.mxu3 %vm1618_vm8, %v4612_v11 }
 0x667   :  { %v4887_v39 = vld [vmem:[#allocation3 + $0x60] ss:$2 sm:$0xff]  ;;  %v4906_v48 = vld [vmem:[#allocation3 + $0x61] ss:$2 sm:$0xff] }
 0x668   :  { %4857 = vst.msk [vmem:[#allocation3 + $0x70] sm:$0xff] %vm11126_vm14, %v4819_v29  ;;  %v4364_v18 = vsel %vm81_vm1, %v3186_v6, %v7685_v34  ;;  %v10406_v37 = vmax.f32 %v4887_v39, %v4906_v48  ;;  %v4363_v22 = vsel %vm81_vm1, %v3185_v1, %v7684_v0  ;;  %vm11128_vm14 = vmmov %vm11127_vm11  ;;  %vm11129_vm11 = vcmask 261120   ;;  %v7738_v6 = vpop.permute.xlu0 %7737  ;;  %v3187_v0 = vld [vmem:[#allocation2 + $0x110] sm:$0xff] }
 0x669   :  { %v4402_v51 = vsel %vm1337_vm2, %v4364_v18, %v7690_v9  ;;  %v4401_v43 = vsel %vm1337_vm2, %v4363_v22, %v7689_v24  ;;  %v3188_v9 = vld [vmem:[#allocation2 + $0x118] sm:$0xff]  ;;  %v7720_v48 = vunpack.i.h.bf16 %v10408_v8 }
 0x66a   :  { %v5156_v12 = vrot.slane %v10406_v37, 3  ;;  %v5062_v42 = vrot.slane %v10406_v37, 2  ;;  %v4968_v46 = vrot.slane %v10406_v37, 1  ;;  %v4439_v45 = vsel %vm1376_vm3, %v4401_v43, %v7694_v58 }
 0x66b   :  { %v4747_v5 = vpop.f32.mrf.mxu3  ;;  %v4440_v49 = vsel %vm1376_vm3, %v4402_v51, %v7695_v32  ;;  %v7724_v32 = vunpack.i.l.bf16 %v10414_v35  ;;  %v7734_v51 = vunpack.i.l.bf16 %v7733_v50 }
 0x66c   :  { %v4748_v54 = vadd.f32 %v10032_v52, %v4747_v5  ;;  %v5157_v27 = vsel %vm11128_vm14, %v5154_v44, %v5156_v12  ;;  %v5063_v30 = vsel %vm2066_vm12, %v5060_v23, %v5062_v42  ;;  %v4969_v53 = vsel %vm1971_vm13, %v4966_v19, %v4968_v46  ;;  %vm11130_vm14 = vmmov %vm11129_vm11  ;;  %v7748_v19 = vpop.permute.xlu1 %7747 }
 0x66d   :  { %v7698_v14 = vpop.permute.xlu2 %7697  ;;  %v7811_v21 = vpack.i.bf16 %v5157_v27, %v5155_v40  ;;  %v7806_v25 = vpack.i.bf16 %v5063_v30, %v5061_v63  ;;  %v7801_v38 = vpack.i.bf16 %v4969_v53, %v4967_v20  ;;  %v7719_v44 = vunpack.i.l.bf16 %v10408_v8 }
 0x66e   :  { %v4820_v4 = vmax.f32 %v4748_v54, 0.0  ;;  %v7700_v2 = vunpack.i.h.bf16 %v7698_v14  ;;  %v7699_v28 = vunpack.i.l.bf16 %v7698_v14  ;;  %v7740_v5 = vunpack.i.h.bf16 %v7738_v6 }
 0x66f   :  { %7812 = vrot.lane.b32.xlu0 %v7811_v21, %s7987_s23  ;;  %7807 = vrot.lane.b32.xlu1 %v7806_v25, %s7988_s24  ;;  %v7739_v54 = vunpack.i.l.bf16 %v7738_v6  ;;  %v7750_v6 = vunpack.i.h.bf16 %v7748_v19 }
 0x670   :  { %4858 = vst.msk [vmem:[#allocation3 + $0x78] sm:$0xff] %vm11129_vm11, %v4820_v4  ;;  %v4477_v13 = vsel %vm1415_vm4, %v4439_v45, %v7699_v28  ;;  %v4478_v62 = vsel %vm1415_vm4, %v4440_v49, %v7700_v2  ;;  %7802 = vrot.lane.b32.xlu2 %v7801_v38, %s7989_s25  ;;  %v10473_v40 = vpop.permute.xlu0 %7752 }
 0x671   :  { %v4515_v17 = vsel %vm1454_vm5, %v4477_v13, %v7704_v10  ;;  %v4516_v15 = vsel %vm1454_vm5, %v4478_v62, %v7705_v59  ;;  %v10470_v10 = vld [vmem:[%s11092_s2] ss:$0 sm:$0xff] }
 0x672   :  { %v4553_v57 = vsel %vm1493_vm6, %v4515_v17, %v7709_v36  ;;  %v4554_v60 = vsel %vm1493_vm6, %v4516_v15, %v7710_v47  ;;  %v7735_v36 = vunpack.i.h.bf16 %v7733_v50  ;;  %v3190_v15 = vld [vmem:[#allocation2 + $0x128] sm:$0xf]  ;;  %v3189_v50 = vld [vmem:[#allocation2 + $0x120] sm:$0xff] }
 0x673   :  { %v4591_v56 = vsel %vm1532_vm7, %v4553_v57, 0.0  ;;  %v4592_v3 = vsel %vm1532_vm7, %v4554_v60, 0.0  ;;  %v4750_v11 = vpop.f32.mrf.mxu3 }
 0x674   :  { %v4751_v33 = vadd.f32 %v10032_v52, %v4750_v11  ;;  %v4613_v29 = vpack.c.bf16 %v4592_v3, %v4591_v56  ;;  %v7725_v52 = vunpack.i.h.bf16 %v10414_v35  ;;  %v7763_v11 = vpop.permute.xlu1 %7762 }
 0x675   :  { %v7713_v1 = vpop.permute.xlu2 %7712 }
 0x676   :  { %v4821_v34 = vmax.f32 %v4751_v33, 0.0  ;;  %v7715_v24 = vunpack.i.h.bf16 %v7713_v1  ;;  %v7714_v39 = vunpack.i.l.bf16 %v7713_v1  ;;  %6251 = vmatmul.msk.bf16.gmra.mxu3 %vm1618_vm8, %v4613_v29  ;;  %v7749_v33 = vunpack.i.l.bf16 %v7748_v19 }
 0x677   :  { %v4888_v25 = vld [vmem:[#allocation3 + $0x70] ss:$2 sm:$0xff]  ;;  %v4907_v20 = vld [vmem:[#allocation3 + $0x71] ss:$2 sm:$0xff] }
 0x678   :  { %4859 = vst.msk [vmem:[#allocation3 + $0x80] sm:$0xff] %vm11130_vm14, %v4821_v34  ;;  %v4366_v23 = vsel %vm81_vm1, %v3188_v9, %v7715_v24  ;;  %v4365_v18 = vsel %vm81_vm1, %v3187_v0, %v7714_v39  ;;  %v10486_v13 = vmax.f32 %v4888_v25, %v4907_v20  ;;  %v7768_v29 = vpop.permute.xlu0 %7767  ;;  %vm11131_vm14 = vmmov %vm11129_vm11  ;;  %v7755_v39 = vunpack.i.h.bf16 %v10473_v40 }
 0x679   :  { %v4404_v22 = vsel %vm1337_vm2, %v4366_v23, %v7720_v48  ;;  %v4403_v59 = vsel %vm1337_vm2, %v4365_v18, %v7719_v44  ;;  %v7754_v48 = vunpack.i.l.bf16 %v10473_v40  ;;  %v7765_v18 = vunpack.i.h.bf16 %v7763_v11 }
 0x67a   :  { %v4441_v27 = vsel %vm1376_vm3, %v4403_v59, %v7724_v32  ;;  %v4442_v30 = vsel %vm1376_vm3, %v4404_v22, %v7725_v52  ;;  %v5158_v0 = vrot.slane %v10486_v13, 3  ;;  %v5064_v9 = vrot.slane %v10486_v13, 2 }
 0x67b   :  { %v4752_v58 = vpop.f32.mrf.mxu3  ;;  %v7764_v52 = vunpack.i.l.bf16 %v7763_v11  ;;  %v4970_v32 = vrot.slane %v10486_v13, 1  ;;  %v7769_v22 = vunpack.i.l.bf16 %v7768_v29 }
 0x67c   :  { %v4753_v8 = vadd.f32 %v10470_v10, %v4752_v58  ;;  %v7770_v58 = vunpack.i.h.bf16 %v7768_v29 }
 0x67d   :  { %v7728_v47 = vpop.permute.xlu2 %7727 }
 0x67e   :  { %v4822_v35 = vmax.f32 %v4753_v8, 0.0  ;;  %v7730_v63 = vunpack.i.h.bf16 %v7728_v47  ;;  %v7729_v43 = vunpack.i.l.bf16 %v7728_v47 }
 0x680   :  { %4860 = vst.msk [vmem:[#allocation3 + $0x88] sm:$0xff] %vm11129_vm11, %v4822_v35  ;;  %v4479_v14 = vsel %vm1415_vm4, %v4441_v27, %v7729_v43  ;;  %v4480_v21 = vsel %vm1415_vm4, %v4442_v30, %v7730_v63  ;;  %vm11132_vm11 = vcmask 1044480  }
 0x681   :  { %v4517_v53 = vsel %vm1454_vm5, %v4479_v14, %v7734_v51  ;;  %v4518_v4 = vsel %vm1454_vm5, %v4480_v21, %v7735_v36  ;;  %v5159_v36 = vsel %vm11132_vm11, %v5156_v12, %v5158_v0  ;;  %v5065_v51 = vsel %vm2066_vm12, %v5062_v42, %v5064_v9 }
 0x682   :  { %v4555_v2 = vsel %vm1493_vm6, %v4517_v53, %v7739_v54  ;;  %v4556_v28 = vsel %vm1493_vm6, %v4518_v4, %v7740_v5  ;;  %v4971_v42 = vsel %vm1971_vm13, %v4968_v46, %v4970_v32 }
 0x683   :  { %v4593_v38 = vsel %vm1532_vm7, %v4555_v2, 0.0  ;;  %v4594_v45 = vsel %vm1532_vm7, %v4556_v28, 0.0  ;;  %v4755_v49 = vpop.f32.mrf.mxu3 }
 0x684   :  { %v4756_v62 = vadd.f32 %v10470_v10, %v4755_v49  ;;  %v4614_v17 = vpack.c.bf16 %v4594_v45, %v4593_v38 }
 0x685   :  { %v7743_v57 = vpop.permute.xlu2 %7742 }
 0x686   :  { %v4823_v60 = vmax.f32 %v4756_v62, 0.0  ;;  %v7745_v56 = vunpack.i.h.bf16 %v7743_v57  ;;  %v7744_v3 = vunpack.i.l.bf16 %v7743_v57  ;;  %6252 = vmatmul.msk.bf16.gmra.mxu3 %vm1618_vm8, %v4614_v17 }
 0x687   :  { %v4889_v1 = vld [vmem:[#allocation3 + $0x80] ss:$2 sm:$0xff]  ;;  %v4908_v34 = vld [vmem:[#allocation3 + $0x81] ss:$2 sm:$0xff] }
 0x688   :  { %4861 = vst.msk [vmem:[#allocation3 + $0x90] sm:$0xff] %vm11131_vm14, %v4823_v60  ;;  %v4368_v24 = vsel %vm81_vm1, %v3190_v15, %v7745_v56  ;;  %v10496_v44 = vmax.f32 %v4889_v1, %v4908_v34  ;;  %v4367_v23 = vsel %vm81_vm1, %v3189_v50, %v7744_v3  ;;  %vm11133_vm1 = vmmov %vm11132_vm11  ;;  %v6403_v56 = vld [vmem:[%s11099_s9 + $0x8] sm:$0xff]  ;;  %v6402_v3 = vld [vmem:[%s11099_s9] sm:$0xff] }
 0x689   :  { %v4406_v19 = vsel %vm1337_vm2, %v4368_v24, %v7750_v6  ;;  %v4405_v40 = vsel %vm1337_vm2, %v4367_v23, %v7749_v33  ;;  %vm11134_vm2 = vmmov %vm11131_vm14  ;;  %3067 = vmatpush.bf16.msra.mxu2 %v6403_v56  ;;  %v6414_v33 = vld [vmem:[%s11093_s3 + $0x38] sm:$0xff] }
 0x68a   :  { %v5160_v59 = vrot.slane %v10496_v44, 3  ;;  %v5066_v8 = vrot.slane %v10496_v44, 2  ;;  %v4972_v5 = vrot.slane %v10496_v44, 1  ;;  %v4443_v53 = vsel %vm1376_vm3, %v4405_v40, %v7754_v48  ;;  %v6412_v48 = vld [vmem:[%s11093_s3 + $0x28] sm:$0xff]  ;;  %vm11140_vm14 = vmmov %vm11134_vm2 }
 0x68b   :  { %v4757_v47 = vpop.f32.mrf.mxu3  ;;  %v4444_v4 = vsel %vm1376_vm3, %v4406_v19, %v7755_v39  ;;  %vm11135_vm3 = vmmov %vm11134_vm2  ;;  %v6411_v19 = vld [vmem:[%s11093_s3 + $0x20] sm:$0xff] }
 0x68c   :  { %v4758_v35 = vadd.f32 %v10470_v10, %v4757_v47  ;;  %v5161_v63 = vsel %vm11133_vm1, %v5158_v0, %v5160_v59  ;;  %v5067_v43 = vsel %vm2066_vm12, %v5064_v9, %v5066_v8  ;;  %v4973_v30 = vsel %vm1971_vm13, %v4970_v32, %v4972_v5  ;;  %v6413_v0 = vld [vmem:[%s11093_s3 + $0x30] sm:$0xff]  ;;  %vm11141_vm11 = vmmov %vm11134_vm2 }
 0x68d   :  { %v7758_v54 = vpop.permute.xlu2 %7757  ;;  %v7826_v12 = vpack.i.bf16 %v5161_v63, %v5159_v36  ;;  %v7821_v27 = vpack.i.bf16 %v5067_v43, %v5065_v51  ;;  %v7816_v20 = vpack.i.bf16 %v4973_v30, %v4971_v42  ;;  %3068 = vmatpush.bf16.msra.mxu2 %v6402_v3 }
 0x68e   :  { %v4824_v14 = vmax.f32 %v4758_v35, 0.0  ;;  %v7760_v21 = vunpack.i.h.bf16 %v7758_v54  ;;  %v7759_v25 = vunpack.i.l.bf16 %v7758_v54 }
 0x68f   :  { %7827 = vrot.lane.b32.xlu0 %v7826_v12, %s7987_s23  ;;  %7822 = vrot.lane.b32.xlu1 %v7821_v27, %s7988_s24 }
 0x690   :  { %4862 = vst.msk [vmem:[#allocation3 + $0x98] sm:$0xff] %vm11134_vm2, %v4824_v14  ;;  %v4481_v46 = vsel %vm1415_vm4, %v4443_v53, %v7759_v25  ;;  %v4482_v2 = vsel %vm1415_vm4, %v4444_v4, %v7760_v21  ;;  %7817 = vrot.lane.b32.xlu2 %v7816_v20, %s7989_s25  ;;  %vm11136_vm4 = vmmov %vm11134_vm2  ;;  %v6409_v20 = vld [vmem:[%s11093_s3 + $0x10] sm:$0xff] }
 0x691   :  { %v4519_v28 = vsel %vm1454_vm5, %v4481_v46, %v7764_v52  ;;  %v4520_v38 = vsel %vm1454_vm5, %v4482_v2, %v7765_v18  ;;  %5374 = vmatpush.bf16.msrb.mxu2 %v6414_v33  ;;  %vm11137_vm5 = vmmov %vm11134_vm2  ;;  %v6407_v2 = vld [vmem:[%s11093_s3] sm:$0xff] }
 0x692   :  { %v4557_v45 = vsel %vm1493_vm6, %v4519_v28, %v7769_v22  ;;  %v4558_v49 = vsel %vm1493_vm6, %v4520_v38, %v7770_v58  ;;  %vm11138_vm6 = vmmov %vm11133_vm1 }
 0x693   :  { %v4595_v62 = vsel %vm1532_vm7, %v4557_v45, 0.0  ;;  %v4596_v17 = vsel %vm1532_vm7, %v4558_v49, 0.0  ;;  %v4760_v15 = vpop.f32.mrf.mxu3 }
 0x694   :  { %v4761_v57 = vadd.f32 %v10470_v10, %v4760_v15  ;;  %v4615_v60 = vpack.c.bf16 %v4596_v17, %v4595_v62  ;;  %v2888_v62 = vld [vmem:[%s11098_s8] sm:$0x1] }
 0x695   :  { %5375 = vmatpush.bf16.msrb.mxu2 %v6413_v0 }
 0x696   :  { %v4825_v50 = vmax.f32 %v4761_v57, 0.0  ;;  %6253 = vmatmul.msk.bf16.gmra.mxu3 %vm1618_vm8, %v4615_v60  ;;  %vm11139_vm8 = vmmov %vm11133_vm1 }
 0x697   :  { %v4890_v1 = vld [vmem:[#allocation3 + $0x90] ss:$2 sm:$0xff]  ;;  %v4909_v34 = vld [vmem:[#allocation3 + $0x91] ss:$2 sm:$0xff]  ;;  %vm11142_vm1 = vmmov %vm11134_vm2 }
 0x698   :  { %4863 = vst.msk [vmem:[#allocation3 + $0xa0] sm:$0xff] %vm11135_vm3, %v4825_v50  ;;  %v10555_v24 = vmax.f32 %v4890_v1, %v4909_v34  ;;  %vm11143_vm2 = vmmov %vm11142_vm1 }
 0x699   :  { %5376 = vmatpush.bf16.msrb.mxu2 %v6412_v48  ;;  %vm11144_vm3 = vmmov %vm11142_vm1 }
 0x69a   :  { %v5162_v32 = vrot.slane %v10555_v24, 3  ;;  %v5068_v58 = vrot.slane %v10555_v24, 2  ;;  %v4974_v47 = vrot.slane %v10555_v24, 1 }
 0x69b   :  { %v4762_v11 = vpop.f32.mrf.mxu3 }
 0x69c   :  { %v4763_v6 = vadd.f32 %v10470_v10, %v4762_v11  ;;  %v5163_v63 = vsel %vm11138_vm6, %v5160_v59, %v5162_v32  ;;  %v5069_v43 = vsel %vm2066_vm12, %v5066_v8, %v5068_v58  ;;  %v6410_v59 = vld [vmem:[%s11093_s3 + $0x18] sm:$0xff]  ;;  %v4975_v14 = vsel %vm1971_vm13, %v4972_v5, %v4974_v47  ;;  %v6408_v5 = vld [vmem:[%s11093_s3 + $0x8] sm:$0xff] }
 0x69d   :  { %5377 = vmatpush.bf16.msrb.mxu2 %v6411_v19  ;;  %v7773_v19 = vpop.permute.xlu2 %7772 }
 0x69e   :  { %v4826_v29 = vmax.f32 %v4763_v6, 0.0 }
 0x6a0   :  { %4864 = vst.msk [vmem:[#allocation3 + $0xa8] sm:$0xff] %vm11136_vm4, %v4826_v29  ;;  %vm11145_vm4 = vmmov %vm11138_vm6 }
 0x6a1   :  { %5378 = vmatpush.bf16.msrb.mxu2 %v6410_v59  ;;  %vm11147_vm6 = vmmov %vm11142_vm1 }
 0x6a3   :  { %v4765_v9 = vpop.f32.mrf.mxu3 }
 0x6a4   :  { %v4766_v39 = vadd.f32 %v10470_v10, %v4765_v9 }
 0x6a5   :  { %5379 = vmatpush.bf16.msrb.mxu2 %v6409_v20 }
 0x6a6   :  { %v4827_v23 = vmax.f32 %v4766_v39, 0.0 }
 0x6a7   :  { %v4891_v18 = vld [vmem:[#allocation3 + $0xa0] ss:$2 sm:$0xff]  ;;  %v4910_v52 = vld [vmem:[#allocation3 + $0xa1] ss:$2 sm:$0xff] }
 0x6a8   :  { %4865 = vst.msk [vmem:[#allocation3 + $0xb0] sm:$0xff] %vm11137_vm5, %v4827_v23  ;;  %v10564_v22 = vmax.f32 %v4891_v18, %v4910_v52  ;;  %vm11146_vm5 = vmmov %vm11145_vm4 }
 0x6a9   :  { %5380 = vmatpush.bf16.msrb.mxu2 %v6408_v5 }
 0x6aa   :  { %v5164_v36 = vrot.slane %v10564_v22, 3  ;;  %v5070_v51 = vrot.slane %v10564_v22, 2  ;;  %v4976_v40 = vrot.slane %v10564_v22, 1 }
 0x6ab   :  { %v4767_v35 = vpop.f32.mrf.mxu3 }
 0x6ac   :  { %v4768_v54 = vadd.f32 %v10470_v10, %v4767_v35  ;;  %v5165_v12 = vsel %vm11139_vm8, %v5162_v32, %v5164_v36  ;;  %v5071_v27 = vsel %vm2066_vm12, %v5068_v58, %v5070_v51  ;;  %v4977_v42 = vsel %vm1971_vm13, %v4974_v47, %v4976_v40  ;;  %vm11148_vm8 = vmmov %vm11142_vm1 }
 0x6ad   :  { %v7841_v30 = vpack.i.bf16 %v5165_v12, %v5163_v63  ;;  %v7836_v8 = vpack.i.bf16 %v5071_v27, %v5069_v43  ;;  %v7831_v25 = vpack.i.bf16 %v4977_v42, %v4975_v14  ;;  %5381 = vmatpush.bf16.msrb.mxu2 %v6407_v2  ;;  %v7778_v43 = vpop.permute.xlu1 %7777 }
 0x6ae   :  { %v4828_v21 = vmax.f32 %v4768_v54, 0.0  ;;  %v7780_v20 = vunpack.i.h.bf16 %v7778_v43  ;;  %v7779_v5 = vunpack.i.l.bf16 %v7778_v43 }
 0x6af   :  { %7842 = vrot.lane.b32.xlu0 %v7841_v30, %s7987_s23  ;;  %7837 = vrot.lane.b32.xlu1 %v7836_v8, %s7988_s24  ;;  %v7775_v30 = vunpack.i.h.bf16 %v7773_v19  ;;  %v7774_v8 = vunpack.i.l.bf16 %v7773_v19 }
 0x6b0   :  { %4866 = vst.msk [vmem:[#allocation3 + $0xb8] sm:$0xff] %vm11140_vm14, %v4828_v21  ;;  %7832 = vrot.lane.b32.xlu2 %v7831_v25, %s7989_s25  ;;  %v7783_v25 = vpop.permute.xlu0 %7782  ;;  %vm11149_vm14 = vmmov %vm11142_vm1 }
 0x6b3   :  { %v4770_v53 = vpop.f32.mrf.mxu3 }
 0x6b4   :  { %v4771_v4 = vadd.f32 %v10470_v10, %v4770_v53  ;;  %v5240_v53 = vsel %vm11148_vm8, %v10198_v41, %v7775_v30 }
 0x6b6   :  { %v4829_v46 = vmax.f32 %v4771_v4, 0.0  ;;  %v7785_v4 = vunpack.i.h.bf16 %v7783_v25 }
 0x6b7   :  { %v4892_v17 = vld [vmem:[#allocation3 + $0xb0] ss:$2 sm:$0xff]  ;;  %v4911_v15 = vld [vmem:[#allocation3 + $0xb1] ss:$2 sm:$0xff] }
 0x6b8   :  { %4867 = vst.msk [vmem:[#allocation3 + $0xc0] sm:$0xff] %vm11141_vm11, %v4829_v46  ;;  %v10615_v50 = vmax.f32 %v4892_v17, %v4911_v15  ;;  %v7784_v46 = vunpack.i.l.bf16 %v7783_v25  ;;  %vm11150_vm11 = vcmask 523264   ;;  %v7788_v17 = vpop.permute.xlu2 %7787 }
 0x6b9   :  { %v5259_v2 = vsel %vm11150_vm11, %v5240_v53, %v7780_v20 }
 0x6ba   :  { %v5166_v1 = vrot.slane %v10615_v50, 3  ;;  %v5072_v39 = vrot.slane %v10615_v50, 2  ;;  %v4978_v52 = vrot.slane %v10615_v50, 1 }
 0x6bb   :  { %v4772_v28 = vpop.f32.mrf.mxu3 }
 0x6bc   :  { %v4773_v38 = vadd.f32 %v10470_v10, %v4772_v28  ;;  %v5167_v35 = vsel %vm11145_vm4, %v5164_v36, %v5166_v1  ;;  %v5073_v63 = vsel %vm2066_vm12, %v5070_v51, %v5072_v39  ;;  %v4979_v51 = vsel %vm1971_vm13, %v4976_v40, %v4978_v52  ;;  %vm11154_vm4 = vmmov %vm11147_vm6 }
 0x6bd   :  { %v5239_v40 = vsel %vm11149_vm14, %v10207_v55, %v7774_v8  ;;  %v7789_v55 = vunpack.i.l.bf16 %v7788_v17 }
 0x6be   :  { %v4830_v45 = vmax.f32 %v4773_v38, 0.0  ;;  %v3022_v49 = vpop.f32.mrf.mxu2 }
 0x6c0   :  { %4868 = vst.msk [vmem:[#allocation3 + $0xc8] sm:$0xff] %vm11142_vm1, %v4830_v45  ;;  %v3009_v57 = vpop.f32.mrf.mxu1  ;;  %vm11151_vm1 = vmmov %vm11150_vm11 }
 0x6c1   :  { %v3010_v60 = vadd.f32 %v3009_v57, %v2888_v62  ;;  %v5258_v28 = vsel %vm11151_vm1, %v5239_v40, %v7779_v5  ;;  %v7793_v41 = vpop.permute.xlu1 %7792  ;;  %vm11157_vm8 = vmmov %vm11151_vm1 }
 0x6c2   :  { %vm11158_vm14 = vmmov %vm11151_vm1 }
 0x6c3   :  { %v3023_v56 = vadd.f32 %v3022_v49, %v3010_v60  ;;  %v4775_v3 = vpop.f32.mrf.mxu3  ;;  %v7790_v60 = vunpack.i.h.bf16 %v7788_v17  ;;  %vm11159_vm11 = vmmov %vm11154_vm4 }
 0x6c4   :  { %v4776_v11 = vadd.f32 %v10470_v10, %v4775_v3  ;;  %v7795_v3 = vunpack.i.h.bf16 %v7793_v41 }
 0x6c5   :  { %v3036_v6 = vadd.f32 %v9987_v7, %v3023_v56  ;;  %v7798_v56 = vpop.permute.xlu0 %7797 }
 0x6c6   :  { %v4831_v33 = vmax.f32 %v4776_v11, 0.0  ;;  %v3024_v29 = vpop.f32.mrf.mxu2  ;;  %v7794_v11 = vunpack.i.l.bf16 %v7793_v41 }
 0x6c7   :  { %v3039_v34 = vmax.f32 %v3036_v6, 0.0  ;;  %v4893_v0 = vld [vmem:[#allocation3 + $0xc0] ss:$2 sm:$0xff]  ;;  %v4912_v9 = vld [vmem:[#allocation3 + $0xc1] ss:$2 sm:$0xff] }
 0x6c8   :  { %4869 = vst.msk [vmem:[#allocation3 + $0xd0] sm:$0xff] %vm11143_vm2, %v4831_v33  ;;  %v3011_v48 = vpop.f32.mrf.mxu1  ;;  %v10622_v23 = vmax.f32 %v4893_v0, %v4912_v9  ;;  %vm11152_vm2 = vcmask 785408  }
 0x6c9   :  { %v3040_v18 = vpack.c.bf16 %v3039_v34, %v3039_v34  ;;  %v5277_v38 = vsel %vm11152_vm2, %v5258_v28, %v7784_v46  ;;  %v7799_v34 = vunpack.i.l.bf16 %v7798_v56  ;;  %vm11160_vm1 = vmmov %vm11152_vm2 }
 0x6ca   :  { %v5168_v32 = vrot.slane %v10622_v23, 3  ;;  %v5074_v7 = vrot.slane %v10622_v23, 2  ;;  %v4980_v58 = vrot.slane %v10622_v23, 1 }
 0x6cb   :  { %6184 = vmatmul.msk.bf16.vlgmr.msra.gmra.mxu2 %vm11144_vm3, %v3040_v18  ;;  %v4777_v47 = vpop.f32.mrf.mxu3  ;;  %vm11153_vm3 = vmmov %vm11152_vm2 }
 0x6cc   :  { %v4778_v54 = vadd.f32 %v10470_v10, %v4777_v47  ;;  %v5169_v12 = vsel %vm11146_vm5, %v5166_v1, %v5168_v32  ;;  %v5075_v27 = vsel %vm2066_vm12, %v5072_v39, %v5074_v7  ;;  %v4981_v42 = vsel %vm1971_vm13, %v4978_v52, %v4980_v58  ;;  %vm11155_vm5 = vmmov %vm11154_vm4 }
 0x6cd   :  { %v7856_v36 = vpack.i.bf16 %v5169_v12, %v5167_v35  ;;  %v7851_v59 = vpack.i.bf16 %v5075_v27, %v5073_v63  ;;  %v7846_v21 = vpack.i.bf16 %v4981_v42, %v4979_v51  ;;  %v5278_v45 = vsel %vm11153_vm3, %v5259_v2, %v7785_v4  ;;  %vm11161_vm2 = vmmov %vm11160_vm1 }
 0x6ce   :  { %v4832_v14 = vmax.f32 %v4778_v54, 0.0  ;;  %v5296_v62 = vpack.c.bf16 %v5278_v45, %v5277_v38  ;;  %v5242_v6 = vsel %vm11155_vm5, %v10298_v26, %v7790_v60  ;;  %v7800_v1 = vunpack.i.h.bf16 %v7798_v56  ;;  %vm11162_vm3 = vmmov %vm11154_vm4 }
 0x6cf   :  { %7857 = vrot.lane.b32.xlu0 %v7856_v36, %s7987_s23  ;;  %7852 = vrot.lane.b32.xlu1 %v7851_v59, %s7988_s24  ;;  %v5261_v39 = vsel %vm11158_vm14, %v5242_v6, %v7795_v3  ;;  %vm11164_vm5 = vmmov %vm11162_vm3 }
 0x6d0   :  { %4870 = vst.msk [vmem:[#allocation3 + $0xd8] sm:$0xff] %vm11147_vm6, %v4832_v14  ;;  %7847 = vrot.lane.b32.xlu2 %v7846_v21, %s7989_s25  ;;  %vm11156_vm6 = vmmov %vm11154_vm4  ;;  %v5280_v26 = vsel %vm11161_vm2, %v5261_v39, %v7800_v1 }
 0x6d1   :  { %v5241_v29 = vsel %vm11156_vm6, %v10211_v16, %v7789_v55  ;;  %v7803_v16 = vpop.permute.xlu2 %7802  ;;  %vm11165_vm6 = vcmask 1044480  }
 0x6d2   :  { %v5260_v9 = vsel %vm11157_vm8, %v5241_v29, %v7794_v11  ;;  %v7805_v12 = vunpack.i.h.bf16 %v7803_v16  ;;  %v7804_v27 = vunpack.i.l.bf16 %v7803_v16  ;;  %vm11166_vm14 = vmmov %vm11165_vm6 }
 0x6d3   :  { %v5279_v19 = vsel %vm11160_vm1, %v5260_v9, %v7799_v34  ;;  %vm11168_vm1 = vmmov %vm11162_vm3 }
 0x6d4   :  { %v5297_v63 = vpack.c.bf16 %v5280_v26, %v5279_v19  ;;  %v5243_v5 = vsel %vm11164_vm5, %v10309_v31, %v7804_v27  ;;  %vm11171_vm5 = vmmov %vm11168_vm1 }
 0x6d7   :  { %v4894_v18 = vld [vmem:[#allocation3 + $0xd0] ss:$2 sm:$0xff]  ;;  %v4913_v52 = vld [vmem:[#allocation3 + $0xd1] ss:$2 sm:$0xff] }
 0x6d8   :  { %v10672_v47 = vmax.f32 %v4894_v18, %v4913_v52 }
 0x6d9   :  { %v4780_v49 = vpop.f32.mrf.mxu3 }
 0x6da   :  { %v4781_v15 = vadd.f32 %v10470_v10, %v4780_v49  ;;  %v5170_v42 = vrot.slane %v10672_v47, 3  ;;  %v5076_v59 = vrot.slane %v10672_v47, 2  ;;  %v4982_v14 = vrot.slane %v10672_v47, 1 }
 0x6db   :  { %5382 = vmatmul.bf16.vlgmr.msrb.gmra.mxu2 %v5296_v62 }
 0x6dc   :  { %v4833_v57 = vmax.f32 %v4781_v15, 0.0  ;;  %v5171_v40 = vsel %vm11165_vm6, %v5168_v32, %v5170_v42  ;;  %v5077_v46 = vsel %vm2066_vm12, %v5074_v7, %v5076_v59  ;;  %v4983_v31 = vsel %vm1971_vm13, %v4980_v58, %v4982_v14  ;;  %vm11172_vm6 = vmmov %vm11168_vm1 }
 0x6de   :  { %4871 = vst.msk [vmem:[#allocation3 + $0xe0] sm:$0xff] %vm11154_vm4, %v4833_v57  ;;  %vm11163_vm4 = vmmov %vm11162_vm3 }
 0x6df   :  { %v5244_v20 = vsel %vm11163_vm4, %v10394_v61, %v7805_v12  ;;  %vm11170_vm4 = vmmov %vm11168_vm1 }
 0x6e1   :  { %v4782_v33 = vpop.f32.mrf.mxu3  ;;  %v7808_v43 = vpop.permute.xlu1 %7807 }
 0x6e2   :  { %v4783_v0 = vadd.f32 %v10470_v10, %v4782_v33  ;;  %v7809_v51 = vunpack.i.l.bf16 %v7808_v43  ;;  %v7813_v21 = vpop.permute.xlu0 %7812  ;;  %v7810_v53 = vunpack.i.h.bf16 %v7808_v43 }
 0x6e3   :  { %v7815_v38 = vunpack.i.h.bf16 %v7813_v21  ;;  %v7814_v61 = vunpack.i.l.bf16 %v7813_v21 }
 0x6e4   :  { %v4834_v48 = vmax.f32 %v4783_v0, 0.0  ;;  %v5262_v49 = vsel %vm11157_vm8, %v5243_v5, %v7809_v51 }
 0x6e5   :  { %v5281_v55 = vsel %vm11161_vm2, %v5262_v49, %v7814_v61 }
 0x6e6   :  { %4872 = vst.msk [vmem:[#allocation3 + $0xe8] sm:$0xff] %vm11159_vm11, %v4834_v48  ;;  %vm11167_vm11 = vmmov %vm11157_vm8 }
 0x6e7   :  { %v5263_v58 = vsel %vm11167_vm11, %v5244_v20, %v7810_v53  ;;  %vm11174_vm11 = vmmov %vm11168_vm1 }
 0x6e9   :  { %v4785_v35 = vpop.f32.mrf.mxu3 }
 0x6ea   :  { %v4786_v54 = vadd.f32 %v10470_v10, %v4785_v35  ;;  %v7818_v29 = vpop.permute.xlu2 %7817 }
 0x6eb   :  { %5387 = vmatmul.bf16.gmra.mxu2 %v5297_v63  ;;  %v7820_v1 = vunpack.i.h.bf16 %v7818_v29  ;;  %v7819_v34 = vunpack.i.l.bf16 %v7818_v29 }
 0x6ec   :  { %v4835_v36 = vmax.f32 %v4786_v54, 0.0 }
 0x6ed   :  { %v4895_v30 = vld [vmem:[#allocation3 + $0xe0] ss:$2 sm:$0xff]  ;;  %v4914_v8 = vld [vmem:[#allocation3 + $0xe1] ss:$2 sm:$0xff]  ;;  %v5246_v16 = vsel %vm11171_vm5, %v10486_v13, %v7820_v1  ;;  %v5245_v35 = vsel %vm11172_vm6, %v10406_v37, %v7819_v34 }
 0x6ee   :  { %4873 = vst.msk [vmem:[#allocation3 + $0xf0] sm:$0xff] %vm11162_vm3, %v4835_v36  ;;  %v10679_v25 = vmax.f32 %v4895_v30, %v4914_v8  ;;  %vm11169_vm3 = vmmov %vm11161_vm2 }
 0x6ef   :  { %v5282_v56 = vsel %vm11169_vm3, %v5263_v58, %v7815_v38  ;;  %vm11177_vm3 = vmmov %vm11170_vm4 }
 0x6f0   :  { %v5172_v4 = vrot.slane %v10679_v25, 3  ;;  %v5078_v2 = vrot.slane %v10679_v25, 2  ;;  %v4984_v28 = vrot.slane %v10679_v25, 1  ;;  %v5298_v11 = vpack.c.bf16 %v5282_v56, %v5281_v55  ;;  %vm11180_vm6 = vmmov %vm11177_vm3 }
 0x6f1   :  { %v4787_v45 = vpop.f32.mrf.mxu3 }
 0x6f2   :  { %v4788_v32 = vadd.f32 %v10470_v10, %v4787_v45  ;;  %v5173_v62 = vsel %vm11166_vm14, %v5170_v42, %v5172_v4  ;;  %v5079_v7 = vsel %vm2066_vm12, %v5076_v59, %v5078_v2  ;;  %v4985_v17 = vsel %vm1971_vm13, %v4982_v14, %v4984_v28  ;;  %vm11173_vm14 = vmmov %vm11157_vm8 }
 0x6f3   :  { %v7871_v15 = vpack.i.bf16 %v5173_v62, %v5171_v40  ;;  %v7866_v41 = vpack.i.bf16 %v5079_v7, %v5077_v46  ;;  %v7861_v57 = vpack.i.bf16 %v4985_v17, %v4983_v31 }
 0x6f4   :  { %v4836_v60 = vmax.f32 %v4788_v32, 0.0 }
 0x6f5   :  { %7872 = vrot.lane.b32.xlu0 %v7871_v15, %s7987_s23  ;;  %7867 = vrot.lane.b32.xlu1 %v7866_v41, %s7988_s24 }
 0x6f6   :  { %4874 = vst.msk [vmem:[#allocation3 + $0xf8] sm:$0xff] %vm11168_vm1, %v4836_v60  ;;  %7862 = vrot.lane.b32.xlu2 %v7861_v57, %s7989_s25  ;;  %vm11175_vm1 = vmmov %vm11161_vm2 }
 0x6f7   :  { %vm11176_vm2 = vmmov %vm11175_vm1 }
 0x6f9   :  { %v4790_v3 = vpop.f32.mrf.mxu3 }
 0x6fa   :  { %v4791_v6 = vadd.f32 %v10470_v10, %v4790_v3 }
 0x6fb   :  { %5392 = vmatmul.bf16.gmra.mxu2 %v5298_v11 }
 0x6fc   :  { %v4837_v33 = vmax.f32 %v4791_v6, 0.0 }
 0x6fd   :  { %v4896_v12 = vld [vmem:[#allocation3 + $0xf0] ss:$2 sm:$0xff]  ;;  %v4915_v27 = vld [vmem:[#allocation3 + $0xf1] ss:$2 sm:$0xff] }
 0x6fe   :  { %4875 = vst.msk [vmem:[#allocation3 + $0x100] sm:$0xff] %vm11170_vm4, %v4837_v33  ;;  %v10727_v59 = vmax.f32 %v4896_v12, %v4915_v27  ;;  %vm11178_vm4 = vcmask 1044480  }
 0x6ff   :  { %vm11179_vm5 = vmmov %vm11178_vm4 }
 0x700   :  { %v5174_v8 = vrot.slane %v10727_v59, 3  ;;  %v5080_v20 = vrot.slane %v10727_v59, 2  ;;  %v4986_v5 = vrot.slane %v10727_v59, 1 }
 0x701   :  { %v4792_v0 = vpop.f32.mrf.mxu3  ;;  %v7828_v9 = vpop.permute.xlu0 %7827 }
 0x702   :  { %v4793_v39 = vadd.f32 %v10470_v10, %v4792_v0  ;;  %v7830_v48 = vunpack.i.h.bf16 %v7828_v9  ;;  %v7829_v18 = vunpack.i.l.bf16 %v7828_v9  ;;  %v7823_v52 = vpop.permute.xlu1 %7822  ;;  %v5175_v45 = vsel %vm11178_vm4, %v5172_v4, %v5174_v8 }
 0x703   :  { %v7825_v19 = vunpack.i.h.bf16 %v7823_v52  ;;  %v7824_v26 = vunpack.i.l.bf16 %v7823_v52  ;;  %v5081_v31 = vsel %vm2066_vm12, %v5078_v2, %v5080_v20  ;;  %v4987_v49 = vsel %vm1971_vm13, %v4984_v28, %v4986_v5 }
 0x704   :  { %v4838_v63 = vmax.f32 %v4793_v39, 0.0  ;;  %vm11187_vm4 = vcmask 785408  }
 0x705   :  { %v5264_v43 = vsel %vm11157_vm8, %v5245_v35, %v7824_v26  ;;  %v5265_v54 = vsel %vm11173_vm14, %v5246_v16, %v7825_v19  ;;  %vm11181_vm8 = vmmov %vm11177_vm3 }
 0x706   :  { %4876 = vst.msk [vmem:[#allocation3 + $0x108] sm:$0xff] %vm11174_vm11, %v4838_v63  ;;  %v5283_v42 = vsel %vm11175_vm1, %v5264_v43, %v7829_v18  ;;  %v5284_v36 = vsel %vm11176_vm2, %v5265_v54, %v7830_v48  ;;  %vm11182_vm14 = vmmov %vm11177_vm3  ;;  %vm11184_vm1 = vcmask 523264  }
 0x707   :  { %v5299_v13 = vpack.c.bf16 %v5284_v36, %v5283_v42  ;;  %vm11183_vm11 = vmmov %vm11177_vm3 }
 0x708   :  { %vm11185_vm2 = vmmov %vm11184_vm1 }
 0x709   :  { %v4795_v51 = vpop.f32.mrf.mxu3 }
 0x70a   :  { %v4796_v30 = vadd.f32 %v10470_v10, %v4795_v51  ;;  %v7833_v60 = vpop.permute.xlu2 %7832 }
 0x70b   :  { %5397 = vmatmul.bf16.gmra.mxu2 %v5299_v13  ;;  %v7835_v55 = vunpack.i.h.bf16 %v7833_v60  ;;  %v7834_v56 = vunpack.i.l.bf16 %v7833_v60 }
 0x70c   :  { %v4839_v37 = vmax.f32 %v4796_v30, 0.0 }
 0x70d   :  { %v4897_v14 = vld [vmem:[#allocation3 + $0x100] ss:$2 sm:$0xff]  ;;  %v4916_v21 = vld [vmem:[#allocation3 + $0x101] ss:$2 sm:$0xff]  ;;  %v5248_v9 = vsel %vm11182_vm14, %v10555_v24, %v7835_v55  ;;  %v5247_v39 = vsel %vm11183_vm11, %v10496_v44, %v7834_v56  ;;  %vm11191_vm14 = vmmov %vm11183_vm11 }
 0x70e   :  { %4877 = vst.msk [vmem:[#allocation3 + $0x110] sm:$0xff] %vm11177_vm3, %v4839_v37  ;;  %v10734_v53 = vmax.f32 %v4897_v14, %v4916_v21  ;;  %vm11186_vm3 = vcmask 257024   ;;  %v10805_v55 = vld [vmem:[%s11094_s4] ss:$0 sm:$0xff] }
 0x710   :  { %v5176_v40 = vrot.slane %v10734_v53, 3  ;;  %v5082_v46 = vrot.slane %v10734_v53, 2  ;;  %v4988_v38 = vrot.slane %v10734_v53, 1 }
 0x711   :  { %v4797_v61 = vpop.f32.mrf.mxu3 }
 0x712   :  { %v4798_v32 = vadd.f32 %v10470_v10, %v4797_v61  ;;  %v5177_v62 = vsel %vm11179_vm5, %v5174_v8, %v5176_v40  ;;  %v5083_v7 = vsel %vm2066_vm12, %v5080_v20, %v5082_v46  ;;  %v4989_v17 = vsel %vm1971_vm13, %v4986_v5, %v4988_v38  ;;  %vm11188_vm5 = vmmov %vm11187_vm4 }
 0x713   :  { %v7886_v15 = vpack.i.bf16 %v5177_v62, %v5175_v45  ;;  %v7881_v41 = vpack.i.bf16 %v5083_v7, %v5081_v31  ;;  %v7876_v57 = vpack.i.bf16 %v4989_v17, %v4987_v49 }
 0x714   :  { %v4840_v4 = vmax.f32 %v4798_v32, 0.0 }
 0x715   :  { %7887 = vrot.lane.b32.xlu0 %v7886_v15, %s7987_s23  ;;  %7882 = vrot.lane.b32.xlu1 %v7881_v41, %s7988_s24 }
 0x716   :  { %4878 = vst.msk [vmem:[#allocation3 + $0x118] sm:$0xff] %vm11180_vm6, %v4840_v4  ;;  %7877 = vrot.lane.b32.xlu2 %v7876_v57, %s7989_s25  ;;  %vm11189_vm6 = vcmask 1044480  }
 0x719   :  { %v4800_v2 = vpop.f32.mrf.mxu3 }
 0x71a   :  { %v4801_v28 = vadd.f32 %v10470_v10, %v4800_v2 }
 0x71c   :  { %v4841_v58 = vmax.f32 %v4801_v28, 0.0 }
 0x71d   :  { %v4898_v19 = vld [vmem:[#allocation3 + $0x110] ss:$2 sm:$0xff]  ;;  %v4917_v26 = vld [vmem:[#allocation3 + $0x111] ss:$2 sm:$0xff] }
 0x71e   :  { %4879 = vst.msk [vmem:[#allocation3 + $0x120] sm:$0xff] %vm11181_vm8, %v4841_v58  ;;  %v10768_v63 = vmax.f32 %v4898_v19, %v4917_v26  ;;  %vm11190_vm8 = vmmov %vm11189_vm6  ;;  %v3045_v58 = vld [vmem:[%s11100_s10] sm:$0x1] }
 0x720   :  { %v5178_v24 = vrot.slane %v10768_v63, 3  ;;  %v5084_v44 = vrot.slane %v10768_v63, 2  ;;  %v4990_v27 = vrot.slane %v10768_v63, 1 }
 0x721   :  { %v4802_v3 = vpop.f32.mrf.mxu3  ;;  %v7843_v11 = vpop.permute.xlu0 %7842 }
 0x722   :  { %v4803_v6 = vadd.f32 %v10470_v10, %v4802_v3  ;;  %v7845_v33 = vunpack.i.h.bf16 %v7843_v11  ;;  %v7844_v29 = vunpack.i.l.bf16 %v7843_v11  ;;  %v7838_v1 = vpop.permute.xlu1 %7837  ;;  %v5179_v13 = vsel %vm11189_vm6, %v5176_v40, %v5178_v24  ;;  %vm11195_vm6 = vmmov %vm11183_vm11 }
 0x723   :  { %v7840_v34 = vunpack.i.h.bf16 %v7838_v1  ;;  %v7839_v0 = vunpack.i.l.bf16 %v7838_v1  ;;  %v5085_v30 = vsel %vm2066_vm12, %v5082_v46, %v5084_v44  ;;  %v4991_v14 = vsel %vm1971_vm13, %v4988_v38, %v4990_v27 }
 0x724   :  { %v4842_v48 = vmax.f32 %v4803_v6, 0.0 }
 0x725   :  { %v5266_v18 = vsel %vm11184_vm1, %v5247_v39, %v7839_v0  ;;  %v5267_v52 = vsel %vm11185_vm2, %v5248_v9, %v7840_v34  ;;  %vm11192_vm2 = vmmov %vm11184_vm1 }
 0x726   :  { %4880 = vst.msk [vmem:[#allocation3 + $0x128] sm:$0xf] %vm11186_vm3, %v4842_v48  ;;  %v5285_v10 = vsel %vm11187_vm4, %v5266_v18, %v7844_v29  ;;  %v5286_v16 = vsel %vm11188_vm5, %v5267_v52, %v7845_v33  ;;  %vm11193_vm3 = vmmov %vm11187_vm4  ;;  %vm3074_vm5 = vcmask 8192  }
 0x727   :  { %v5300_v35 = vpack.c.bf16 %v5286_v16, %v5285_v10  ;;  %vm11194_vm4 = vmmov %vm11193_vm3 }
 0x729   :  { %5402 = vmatmul.bf16.gmra.mxu2 %v5300_v35 }
 0x72a   :  { %v7848_v40 = vpop.permute.xlu2 %7847 }
 0x72b   :  { %v7850_v46 = vunpack.i.h.bf16 %v7848_v40  ;;  %v7849_v38 = vunpack.i.l.bf16 %v7848_v40 }
 0x72d   :  { %v4899_v43 = vld [vmem:[#allocation3 + $0x120] ss:$2 sm:$0x3f]  ;;  %v4918_v54 = vld [vmem:[#allocation3 + $0x121] ss:$2 sm:$0x3f]  ;;  %v5250_v17 = vsel %vm11191_vm14, %v10615_v50, %v7850_v46  ;;  %v5249_v15 = vsel %vm11183_vm11, %v10564_v22, %v7849_v38  ;;  %vm11197_vm14 = vmmov %vm11184_vm1 }
 0x72e   :  { %v10772_v12 = vmax.f32 %v4899_v43, %v4918_v54  ;;  %vm11198_vm11 = vmmov %vm11184_vm1 }
 0x730   :  { %v5180_v42 = vrot.slane %v10772_v12, 3  ;;  %v5086_v36 = vrot.slane %v10772_v12, 2  ;;  %v4992_v51 = vrot.slane %v10772_v12, 1 }
 0x732   :  { %v5181_v37 = vsel %vm11190_vm8, %v5178_v24, %v5180_v42  ;;  %v5087_v8 = vsel %vm2066_vm12, %v5084_v44, %v5086_v36  ;;  %v4993_v21 = vsel %vm1971_vm13, %v4990_v27, %v4992_v51  ;;  %vm11196_vm8 = vmmov %vm11195_vm6 }
 0x733   :  { %v7901_v20 = vpack.i.bf16 %v5181_v37, %v5179_v13  ;;  %v7896_v5 = vpack.i.bf16 %v5087_v8, %v5085_v30  ;;  %v7891_v61 = vpack.i.bf16 %v4993_v21, %v4991_v14 }
 0x735   :  { %7902 = vrot.lane.b32.xlu0 %v7901_v20, %s7987_s23  ;;  %7897 = vrot.lane.b32.xlu1 %v7896_v5, %s7988_s24 }
 0x736   :  { %7892 = vrot.lane.b32.xlu2 %v7891_v61, %s7989_s25 }
 0x73d   :  { %5218 = vrot.lane.b32.xlu0 %v5180_v42, %s7987_s23  ;;  %5124 = vrot.lane.b32.xlu1 %v5086_v36, %s7988_s24 }
 0x73e   :  { %5030 = vrot.lane.b32.xlu2 %v4992_v51, %s7989_s25 }
 0x741   :  { %v7858_v45 = vpop.permute.xlu0 %7857  ;;  %v7853_v31 = vpop.permute.xlu1 %7852 }
 0x742   :  { %v7860_v49 = vunpack.i.h.bf16 %v7858_v45  ;;  %v7859_v32 = vunpack.i.l.bf16 %v7858_v45  ;;  %v7855_v62 = vunpack.i.h.bf16 %v7853_v31  ;;  %v7854_v7 = vunpack.i.l.bf16 %v7853_v31 }
 0x744   :  { %v5268_v41 = vsel %vm11184_vm1, %v5249_v15, %v7854_v7  ;;  %v5269_v57 = vsel %vm11192_vm2, %v5250_v17, %v7855_v62  ;;  %vm11199_vm1 = vmmov %vm11193_vm3 }
 0x745   :  { %v5287_v4 = vsel %vm11193_vm3, %v5268_v41, %v7859_v32  ;;  %v5288_v2 = vsel %vm11194_vm4, %v5269_v57, %v7860_v49  ;;  %vm11200_vm2 = vmmov %vm11199_vm1 }
 0x746   :  { %v5301_v28 = vpack.c.bf16 %v5288_v2, %v5287_v4  ;;  %vm11201_vm3 = vmmov %vm11195_vm6 }
 0x747   :  { %vm11202_vm4 = vmmov %vm11201_vm3 }
 0x748   :  { %5407 = vmatmul.bf16.gmra.mxu2 %v5301_v28 }
 0x74e   :  { %v3070_v60 = vpop.f32.mrf.mxu2 }
 0x74f   :  { %v3071_v50 = vadd.f32 %v3070_v60, %v3045_v58 }
 0x750   :  { %v7863_v6 = vpop.permute.xlu2 %7862 }
 0x751   :  { %3075 = vst.msk [vmem:[#allocation6] sm:$0x1] %vm3074_vm5, %v3071_v50  ;;  %v7865_v33 = vunpack.i.h.bf16 %v7863_v6  ;;  %v7864_v29 = vunpack.i.l.bf16 %v7863_v6 }
 0x753   :  { %v5252_v19 = vsel %vm11195_vm6, %v10672_v47, %v7865_v33  ;;  %v5251_v26 = vsel %vm11196_vm8, %v10622_v23, %v7864_v29  ;;  %vm11203_vm6 = vmmov %vm11198_vm11 }
 0x754   :  { %vm11204_vm8 = vmmov %vm11203_vm6 }
 0x756   :  { %v3072_v22 = vpop.f32.mrf.mxu2 }
 0x75e   :  { %v5383_v56 = vpop.f32.mrf.mxu2 }
 0x75f   :  { %v5384_v3 = vadd.f32 %v10805_v55, %v5383_v56 }
 0x761   :  { %v5432_v11 = vmax.f32 %v5384_v3, 0.0 }
 0x763   :  { %5451 = vst.msk [vmem:[#allocation4] sm:$0xff] %vm2470_vm0, %v5432_v11 }
 0x766   :  { %v5385_v1 = vpop.f32.mrf.mxu2 }
 0x767   :  { %v5386_v34 = vadd.f32 %v10805_v55, %v5385_v1  ;;  %v7873_v0 = vpop.permute.xlu0 %7872  ;;  %v7868_v9 = vpop.permute.xlu1 %7867 }
 0x768   :  { %v7875_v39 = vunpack.i.h.bf16 %v7873_v0  ;;  %v7874_v48 = vunpack.i.l.bf16 %v7873_v0  ;;  %v7870_v18 = vunpack.i.h.bf16 %v7868_v9  ;;  %v7869_v52 = vunpack.i.l.bf16 %v7868_v9 }
 0x769   :  { %v5433_v10 = vmax.f32 %v5386_v34, 0.0 }
 0x76a   :  { %v5270_v16 = vsel %vm11197_vm14, %v5251_v26, %v7869_v52  ;;  %v5271_v35 = vsel %vm11198_vm11, %v5252_v19, %v7870_v18  ;;  %vm11205_vm14 = vmmov %vm11199_vm1 }
 0x76b   :  { %5452 = vst.msk [vmem:[#allocation4 + $0x8] sm:$0xff] %vm2470_vm0, %v5433_v10  ;;  %v5289_v24 = vsel %vm11199_vm1, %v5270_v16, %v7874_v48  ;;  %v5290_v44 = vsel %vm11200_vm2, %v5271_v35, %v7875_v39  ;;  %vm11206_vm11 = vmmov %vm11199_vm1 }
 0x76c   :  { %v5302_v43 = vpack.c.bf16 %v5290_v44, %v5289_v24  ;;  %vm11207_vm1 = vmmov %vm11201_vm3 }
 0x76d   :  { %vm11208_vm2 = vmmov %vm11207_vm1 }
 0x76e   :  { %v5388_v54 = vpop.f32.mrf.mxu2  ;;  %5412 = vmatmul.bf16.gmra.mxu2 %v5302_v43 }
 0x76f   :  { %v5389_v27 = vadd.f32 %v10805_v55, %v5388_v54 }
 0x770   :  { %v7878_v37 = vpop.permute.xlu2 %7877 }
 0x771   :  { %v5434_v47 = vmax.f32 %v5389_v27, 0.0  ;;  %v7880_v8 = vunpack.i.h.bf16 %v7878_v37  ;;  %v7879_v14 = vunpack.i.l.bf16 %v7878_v37 }
 0x772   :  { %v5470_v2 = vld [vmem:[#allocation4] ss:$2 sm:$0xff]  ;;  %v5480_v28 = vld [vmem:[#allocation4 + $0x1] ss:$2 sm:$0xff] }
 0x773   :  { %5453 = vst.msk [vmem:[#allocation4 + $0x10] sm:$0xff] %vm2470_vm0, %v5434_v47  ;;  %v5254_v31 = vsel %vm11201_vm3, %v10727_v59, %v7880_v8  ;;  %v5253_v49 = vsel %vm11202_vm4, %v10679_v25, %v7879_v14  ;;  %v10838_v60 = vmax.f32 %v5470_v2, %v5480_v28  ;;  %vm11209_vm3 = vmmov %vm11203_vm6 }
 0x774   :  { %vm11210_vm4 = vmmov %vm11209_vm3 }
 0x775   :  { %v5554_v33 = vrot.slane %v10838_v60, 2  ;;  %v5509_v1 = vrot.slane %v10838_v60, 1 }
 0x776   :  { %v5390_v23 = vpop.f32.mrf.mxu2 }
 0x777   :  { %v5391_v42 = vadd.f32 %v10805_v55, %v5390_v23 }
 0x779   :  { %v5435_v36 = vmax.f32 %v5391_v42, 0.0 }
 0x77b   :  { %5454 = vst.msk [vmem:[#allocation4 + $0x18] sm:$0xff] %vm2470_vm0, %v5435_v36 }
 0x77e   :  { %v5393_v51 = vpop.f32.mrf.mxu2 }
 0x77f   :  { %v5394_v13 = vadd.f32 %v10805_v55, %v5393_v51 }
 0x781   :  { %v5436_v30 = vmax.f32 %v5394_v13, 0.0 }
 0x782   :  { %v5471_v41 = vld [vmem:[#allocation4 + $0x10] ss:$2 sm:$0xff]  ;;  %v5481_v57 = vld [vmem:[#allocation4 + $0x11] ss:$2 sm:$0xff] }
 0x783   :  { %5455 = vst.msk [vmem:[#allocation4 + $0x20] sm:$0xff] %vm2470_vm0, %v5436_v30  ;;  %v10835_v58 = vmax.f32 %v5471_v41, %v5481_v57 }
 0x785   :  { %v5555_v3 = vrot.slane %v10835_v58, 2  ;;  %v5510_v6 = vrot.slane %v10835_v58, 1 }
 0x786   :  { %v5395_v21 = vpop.f32.mrf.mxu2 }
 0x787   :  { %v5396_v20 = vadd.f32 %v10805_v55, %v5395_v21  ;;  %v7888_v5 = vpop.permute.xlu0 %7887  ;;  %v7883_v61 = vpop.permute.xlu1 %7882  ;;  %v5556_v9 = vsel %vm2066_vm12, %v5554_v33, %v5555_v3  ;;  %v5511_v18 = vsel %vm1971_vm13, %v5509_v1, %v5510_v6 }
 0x788   :  { %v7890_v40 = vunpack.i.h.bf16 %v7888_v5  ;;  %v7889_v46 = vunpack.i.l.bf16 %v7888_v5  ;;  %v7885_v38 = vunpack.i.h.bf16 %v7883_v61  ;;  %v7884_v45 = vunpack.i.l.bf16 %v7883_v61 }
 0x789   :  { %v5437_v32 = vmax.f32 %v5396_v20, 0.0 }
 0x78a   :  { %v5272_v62 = vsel %vm11203_vm6, %v5253_v49, %v7884_v45  ;;  %v5273_v7 = vsel %vm11204_vm8, %v5254_v31, %v7885_v38  ;;  %vm11211_vm6 = vmmov %vm11206_vm11 }
 0x78b   :  { %5456 = vst.msk [vmem:[#allocation4 + $0x28] sm:$0xff] %vm2470_vm0, %v5437_v32  ;;  %v5291_v17 = vsel %vm11205_vm14, %v5272_v62, %v7889_v46  ;;  %v5292_v15 = vsel %vm11206_vm11, %v5273_v7, %v7890_v40  ;;  %vm11212_vm8 = vmmov %vm11211_vm6 }
 0x78c   :  { %v5303_v4 = vpack.c.bf16 %v5292_v15, %v5291_v17  ;;  %vm11213_vm14 = vmmov %vm11207_vm1 }
 0x78d   :  { %vm11214_vm11 = vmmov %vm11209_vm3 }
 0x78e   :  { %v5398_v59 = vpop.f32.mrf.mxu2  ;;  %5417 = vmatmul.bf16.gmra.mxu2 %v5303_v4 }
 0x78f   :  { %v5399_v25 = vadd.f32 %v10805_v55, %v5398_v59 }
 0x790   :  { %v7893_v16 = vpop.permute.xlu2 %7892 }
 0x791   :  { %v5438_v50 = vmax.f32 %v5399_v25, 0.0  ;;  %v7895_v35 = vunpack.i.h.bf16 %v7893_v16  ;;  %v7894_v24 = vunpack.i.l.bf16 %v7893_v16 }
 0x792   :  { %v5472_v22 = vld [vmem:[#allocation4 + $0x20] ss:$2 sm:$0xff]  ;;  %v5482_v56 = vld [vmem:[#allocation4 + $0x21] ss:$2 sm:$0xff] }
 0x793   :  { %5457 = vst.msk [vmem:[#allocation4 + $0x30] sm:$0xff] %vm2470_vm0, %v5438_v50  ;;  %v10842_v11 = vmax.f32 %v5472_v22, %v5482_v56  ;;  %v5256_v42 = vsel %vm11207_vm1, %v10768_v63, %v7895_v35  ;;  %v5255_v36 = vsel %vm11208_vm2, %v10734_v53, %v7894_v24  ;;  %vm11215_vm1 = vmmov %vm11211_vm6  ;;  %vm11216_vm2 = vcmask 130048  }
 0x795   :  { %v5557_v29 = vrot.slane %v10842_v11, 2  ;;  %v5512_v34 = vrot.slane %v10842_v11, 1 }
 0x796   :  { %v5400_v0 = vpop.f32.mrf.mxu2 }
 0x797   :  { %v5401_v39 = vadd.f32 %v10805_v55, %v5400_v0  ;;  %v5558_v48 = vsel %vm2066_vm12, %v5555_v3, %v5557_v29  ;;  %v5513_v52 = vsel %vm1971_vm13, %v5510_v6, %v5512_v34 }
 0x798   :  { %v7911_v19 = vpack.i.bf16 %v5558_v48, %v5556_v9  ;;  %v7906_v26 = vpack.i.bf16 %v5513_v52, %v5511_v18  ;;  %v5031_v63 = vpop.permute.xlu2 %5030  ;;  %v6415_v18 = vld [vmem:[%s11095_s5] sm:$0xff] }
 0x799   :  { %v5439_v10 = vmax.f32 %v5401_v39, 0.0  ;;  %v5257_v53 = vsel %vm11213_vm14, %v10772_v12, %v5031_v63 }
 0x79a   :  { %7912 = vrot.lane.b32.xlu1 %v7911_v19, %s7990_s26  ;;  %7907 = vrot.lane.b32.xlu2 %v7906_v26, %s7991_s27 }
 0x79b   :  { %5458 = vst.msk [vmem:[#allocation4 + $0x38] sm:$0xff] %vm2470_vm0, %v5439_v10 }
 0x7a2   :  { %v5473_v49 = vld [vmem:[#allocation4 + $0x30] ss:$2 sm:$0xff]  ;;  %v5483_v32 = vld [vmem:[#allocation4 + $0x31] ss:$2 sm:$0xff] }
 0x7a3   :  { %v10873_v7 = vmax.f32 %v5473_v49, %v5483_v32 }
 0x7a5   :  { %v5514_v12 = vrot.slane %v10873_v7, 1  ;;  %v5559_v57 = vrot.slane %v10873_v7, 2 }
 0x7a7   :  { %v7903_v44 = vpop.permute.xlu0 %7902  ;;  %v7898_v43 = vpop.permute.xlu1 %7897  ;;  %v5515_v28 = vsel %vm1971_vm13, %v5512_v34, %v5514_v12  ;;  %v5560_v25 = vsel %vm2066_vm12, %v5557_v29, %v5559_v57  ;;  %v5625_v29 = vld [vmem:[%s11095_s5 + $0x8] sm:$0xf]  ;;  %s7999_s5 = smov [#allocation6]  }
 0x7a8   :  { %v7905_v54 = vunpack.i.h.bf16 %v7903_v44  ;;  %v7904_v27 = vunpack.i.l.bf16 %v7903_v44  ;;  %v7900_v47 = vunpack.i.h.bf16 %v7898_v43  ;;  %v7899_v23 = vunpack.i.l.bf16 %v7898_v43 }
 0x7a9   :  { %v5635_v9 = vunpack.c.l.b16 %v5625_v29 }
 0x7aa   :  { %v5274_v51 = vsel %vm11209_vm3, %v5255_v36, %v7899_v23  ;;  %v5275_v13 = vsel %vm11210_vm4, %v5256_v42, %v7900_v47  ;;  %vm11217_vm3 = vmmov %vm11216_vm2  ;;  %vm11218_vm4 = vcmask 195584  }
 0x7ab   :  { %v5293_v30 = vsel %vm11211_vm6, %v5274_v51, %v7904_v27  ;;  %v5294_v37 = vsel %vm11212_vm8, %v5275_v13, %v7905_v54  ;;  %v5637_v39 = vpack.c.b16 %v5635_v9, %v5635_v9  ;;  %vm11219_vm6 = vmmov %vm11216_vm2 }
 0x7ac   :  { %v5403_v8 = vpop.f32.mrf.mxu2  ;;  %v5304_v14 = vpack.c.bf16 %v5294_v37, %v5293_v30  ;;  %vm11220_vm8 = vmmov %vm11216_vm2 }
 0x7ad   :  { %v5404_v21 = vadd.f32 %v10805_v55, %v5403_v8  ;;  %v5655_v48 = vsel %vm2696_vm15, %v5637_v39, 0  ;;  %vm11221_vm14 = vmmov %vm11218_vm4 }
 0x7ae   :  { %5422 = vmatmul.bf16.gmra.mxu2 %v5304_v14  ;;  %5663 = vmatpush.bf16.msra.mxu1 %v5655_v48 }
 0x7af   :  { %v5440_v20 = vmax.f32 %v5404_v21, 0.0  ;;  %v5125_v5 = vpop.permute.xlu1 %5124  ;;  %v5219_v46 = vpop.permute.xlu0 %5218 }
 0x7b0   :  { %v5276_v38 = vsel %vm11214_vm11, %v5257_v53, %v5125_v5  ;;  %vm11222_vm11 = vcmask 59392  }
 0x7b1   :  { %5459 = vst.msk [vmem:[#allocation4 + $0x40] sm:$0xff] %vm2470_vm0, %v5440_v20  ;;  %v5295_v31 = vsel %vm11215_vm1, %v5276_v38, %v5219_v46  ;;  %vm11224_vm1 = vmmov %vm11216_vm2 }
 0x7b2   :  { %v5305_v62 = vpack.c.bf16 %v5295_v31, %v5295_v31  ;;  %5664 = vmatpush.bf16.msra.mxu1 %v6415_v18 }
 0x7b4   :  { %v5405_v61 = vpop.f32.mrf.mxu2 }
 0x7b5   :  { %v5406_v40 = vadd.f32 %v10805_v55, %v5405_v61 }
 0x7b7   :  { %v5441_v45 = vmax.f32 %v5406_v40, 0.0 }
 0x7b9   :  { %5460 = vst.msk [vmem:[#allocation4 + $0x48] sm:$0xff] %vm2470_vm0, %v5441_v45 }
 0x7be   :  { %5427 = vmatmul.bf16.gmra.mxu2 %v5305_v62 }
 0x7c0   :  { %v5474_v17 = vld [vmem:[#allocation4 + $0x40] ss:$2 sm:$0xff]  ;;  %v5484_v15 = vld [vmem:[#allocation4 + $0x41] ss:$2 sm:$0xff] }
 0x7c1   :  { %v10875_v41 = vmax.f32 %v5474_v17, %v5484_v15 }
 0x7c3   :  { %v5516_v4 = vrot.slane %v10875_v41, 1  ;;  %v5561_v2 = vrot.slane %v10875_v41, 2 }
 0x7c5   :  { %v5517_v59 = vsel %vm1971_vm13, %v5514_v12, %v5516_v4  ;;  %v5562_v50 = vsel %vm2066_vm12, %v5559_v57, %v5561_v2 }
 0x7c6   :  { %v7916_v22 = vpack.i.bf16 %v5517_v59, %v5515_v28  ;;  %v7921_v56 = vpack.i.bf16 %v5562_v50, %v5560_v25 }
 0x7c8   :  { %7917 = vrot.lane.b32.xlu0 %v7916_v22, %s7991_s27  ;;  %7922 = vrot.lane.b32.xlu2 %v7921_v56, %s7990_s26 }
 0x7cb   :  { %v5408_v3 = vpop.f32.mrf.mxu2 }
 0x7cc   :  { %v5409_v6 = vadd.f32 %v10805_v55, %v5408_v3 }
 0x7ce   :  { %v5442_v33 = vmax.f32 %v5409_v6, 0.0 }
 0x7d0   :  { %5461 = vst.msk [vmem:[#allocation4 + $0x50] sm:$0xff] %vm2470_vm0, %v5442_v33 }
 0x7d3   :  { %v5410_v1 = vpop.f32.mrf.mxu2 }
 0x7d4   :  { %v5411_v34 = vadd.f32 %v10805_v55, %v5410_v1 }
 0x7d6   :  { %v5443_v0 = vmax.f32 %v5411_v34, 0.0 }
 0x7d8   :  { %5462 = vst.msk [vmem:[#allocation4 + $0x58] sm:$0xff] %vm2470_vm0, %v5443_v0 }
 0x7df   :  { %v5475_v24 = vld [vmem:[#allocation4 + $0x50] ss:$2 sm:$0xff]  ;;  %v5485_v44 = vld [vmem:[#allocation4 + $0x51] ss:$2 sm:$0xff] }
 0x7e0   :  { %v10902_v43 = vmax.f32 %v5475_v24, %v5485_v44 }
 0x7e2   :  { %v5563_v47 = vrot.slane %v10902_v43, 2  ;;  %v5518_v23 = vrot.slane %v10902_v43, 1 }
 0x7e4   :  { %v5564_v30 = vsel %vm2066_vm12, %v5561_v2, %v5563_v47  ;;  %v5519_v37 = vsel %vm1971_vm13, %v5516_v4, %v5518_v23 }
 0x7f1   :  { %v5413_v52 = vpop.f32.mrf.mxu2 }
 0x7f2   :  { %v5414_v19 = vadd.f32 %v10805_v55, %v5413_v52 }
 0x7f4   :  { %v5444_v26 = vmax.f32 %v5414_v19, 0.0  ;;  %v7908_v36 = vpop.permute.xlu2 %7907 }
 0x7f5   :  { %v7910_v8 = vunpack.i.h.bf16 %v7908_v36  ;;  %v7909_v14 = vunpack.i.l.bf16 %v7908_v36 }
 0x7f6   :  { %5463 = vst.msk [vmem:[#allocation4 + $0x60] sm:$0xff] %vm2470_vm0, %v5444_v26 }
 0x7f7   :  { %v5601_v46 = vsel %vm2470_vm0, %v10835_v58, %v7910_v8  ;;  %v5600_v38 = vsel %vm2470_vm0, %v10838_v60, %v7909_v14 }
 0x7f9   :  { %v5415_v10 = vpop.f32.mrf.mxu2 }
 0x7fa   :  { %v5416_v16 = vadd.f32 %v10805_v55, %v5415_v10 }
 0x7fc   :  { %v5445_v35 = vmax.f32 %v5416_v16, 0.0 }
 0x7fe   :  { %5464 = vst.msk [vmem:[#allocation4 + $0x68] sm:$0xff] %vm2470_vm0, %v5445_v35 }
 0x805   :  { %v5476_v54 = vld [vmem:[#allocation4 + $0x60] ss:$2 sm:$0xff]  ;;  %v5486_v27 = vld [vmem:[#allocation4 + $0x61] ss:$2 sm:$0xff] }
 0x806   :  { %v10906_v42 = vmax.f32 %v5476_v54, %v5486_v27 }
 0x808   :  { %v5565_v51 = vrot.slane %v10906_v42, 2  ;;  %v5520_v13 = vrot.slane %v10906_v42, 1 }
 0x80a   :  { %v5566_v21 = vsel %vm2066_vm12, %v5563_v47, %v5565_v51  ;;  %v5521_v20 = vsel %vm1971_vm13, %v5518_v23, %v5520_v13 }
 0x80b   :  { %v7931_v63 = vpack.i.bf16 %v5566_v21, %v5564_v30  ;;  %v7926_v5 = vpack.i.bf16 %v5521_v20, %v5519_v37 }
 0x80c   :  { %v7913_v61 = vpop.permute.xlu1 %7912 }
 0x80d   :  { %v7915_v53 = vunpack.i.h.bf16 %v7913_v61  ;;  %v7914_v40 = vunpack.i.l.bf16 %v7913_v61  ;;  %7932 = vrot.lane.b32.xlu0 %v7931_v63, %s7990_s26  ;;  %7927 = vrot.lane.b32.xlu1 %v7926_v5, %s7991_s27 }
 0x80f   :  { %v5609_v45 = vsel %vm11216_vm2, %v5600_v38, %v7914_v40  ;;  %v5610_v31 = vsel %vm11217_vm3, %v5601_v46, %v7915_v53  ;;  %vm11227_vm3 = vmmov %vm11224_vm1 }
 0x810   :  { %v5618_v49 = vpack.c.bf16 %v5610_v31, %v5609_v45  ;;  %v10971_v31 = vld [vmem:[%s11096_s6] ss:$0 sm:$0xff] }
 0x811   :  { %v5418_v32 = vpop.f32.mrf.mxu2 }
 0x812   :  { %v5419_v62 = vadd.f32 %v10805_v55, %v5418_v32  ;;  %6290 = vmatmul.msk.bf16.vlgmr.msra.gmra.mxu1 %vm11218_vm4, %v5618_v49 }
 0x814   :  { %v5446_v17 = vmax.f32 %v5419_v62, 0.0 }
 0x816   :  { %5465 = vst.msk [vmem:[#allocation4 + $0x70] sm:$0xff] %vm2470_vm0, %v5446_v17 }
 0x819   :  { %v5420_v15 = vpop.f32.mrf.mxu2 }
 0x81a   :  { %v5421_v12 = vadd.f32 %v10805_v55, %v5420_v15 }
 0x81c   :  { %v5447_v58 = vmax.f32 %v5421_v12, 0.0 }
 0x81e   :  { %5466 = vst.msk [vmem:[#allocation4 + $0x78] sm:$0xff] %vm2470_vm0, %v5447_v58 }
 0x822   :  { %v7923_v2 = vpop.permute.xlu2 %7922 }
 0x823   :  { %v7925_v56 = vunpack.i.h.bf16 %v7923_v2  ;;  %v7924_v3 = vunpack.i.l.bf16 %v7923_v2 }
 0x825   :  { %v5477_v9 = vld [vmem:[#allocation4 + $0x70] ss:$2 sm:$0xff]  ;;  %v5487_v39 = vld [vmem:[#allocation4 + $0x71] ss:$2 sm:$0xff] }
 0x826   :  { %v5497_v52 = vmax.f32 %v5477_v9, %v5487_v39 }
 0x828   :  { %v5567_v10 = vrot.slane %v5497_v52, 2  ;;  %v5522_v16 = vrot.slane %v5497_v52, 1 }
 0x82a   :  { %v5523_v27 = vsel %vm1971_vm13, %v5520_v13, %v5522_v16 }
 0x831   :  { %v5423_v60 = vpop.f32.mrf.mxu2 }
 0x832   :  { %v5424_v57 = vadd.f32 %v10805_v55, %v5423_v60 }
 0x834   :  { %v5448_v4 = vmax.f32 %v5424_v57, 0.0 }
 0x836   :  { %5467 = vst.msk [vmem:[#allocation4 + $0x80] sm:$0xff] %vm2470_vm0, %v5448_v4 }
 0x839   :  { %v5425_v28 = vpop.f32.mrf.mxu2 }
 0x83a   :  { %v5426_v59 = vadd.f32 %v10805_v55, %v5425_v28  ;;  %v7918_v25 = vpop.permute.xlu0 %7917 }
 0x83b   :  { %v7920_v50 = vunpack.i.h.bf16 %v7918_v25  ;;  %v7919_v22 = vunpack.i.l.bf16 %v7918_v25 }
 0x83c   :  { %v5449_v6 = vmax.f32 %v5426_v59, 0.0 }
 0x83d   :  { %v5603_v33 = vsel %vm2470_vm0, %v10873_v7, %v7920_v50  ;;  %v5602_v1 = vsel %vm2470_vm0, %v10842_v11, %v7919_v22 }
 0x83e   :  { %5468 = vst.msk [vmem:[#allocation4 + $0x88] sm:$0xff] %vm2470_vm0, %v5449_v6  ;;  %v5611_v34 = vsel %vm11219_vm6, %v5602_v1, %v7924_v3  ;;  %v5612_v0 = vsel %vm11220_vm8, %v5603_v33, %v7925_v56  ;;  %vm11228_vm6 = vmmov %vm11224_vm1 }
 0x83f   :  { %v5619_v29 = vpack.c.bf16 %v5612_v0, %v5611_v34  ;;  %vm11229_vm8 = vmmov %vm11218_vm4 }
 0x841   :  { %6291 = vmatmul.msk.bf16.gmra.mxu1 %vm11221_vm14, %v5619_v29  ;;  %v5428_v48 = vpop.f32.mrf.mxu2  ;;  %vm11230_vm14 = vcmask 63488  }
 0x842   :  { %v5429_v18 = vadd.f32 %v10805_v55, %v5428_v48  ;;  %v5568_v55 = vsel %vm2066_vm12, %v5565_v51, %v5567_v10 }
 0x844   :  { %v5450_v19 = vmax.f32 %v5429_v18, 0.0 }
 0x845   :  { %v5478_v7 = vld [vmem:[#allocation4 + $0x80] ss:$2 sm:$0xff]  ;;  %v5488_v26 = vld [vmem:[#allocation4 + $0x81] ss:$2 sm:$0xff] }
 0x846   :  { %5469 = vst.msk [vmem:[#allocation4 + $0x90] sm:$0x7] %vm11222_vm11, %v5450_v19  ;;  %v10944_v11 = vmax.f32 %v5478_v7, %v5488_v26  ;;  %vm11234_vm11 = vcmask 670720  }
 0x848   :  { %v5524_v35 = vrot.slane %v10944_v11, 1  ;;  %v5569_v24 = vrot.slane %v10944_v11, 2 }
 0x849   :  { %v5430_v44 = vpop.f32.mrf.mxu2 }
 0x84a   :  { %5542 = vrot.lane.b32.xlu0 %v5524_v35, %s7991_s27  ;;  %v5570_v54 = vsel %vm2066_vm12, %v5567_v10, %v5569_v24  ;;  %v5525_v47 = vsel %vm1971_vm13, %v5522_v16, %v5524_v35  ;;  %vm11223_vm13 = vmmov %vm11216_vm2 }
 0x84b   :  { %v7941_v23 = vpack.i.bf16 %v5570_v54, %v5568_v55  ;;  %v7936_v36 = vpack.i.bf16 %v5525_v47, %v5523_v27  ;;  %vm11226_vm2 = vmmov %vm11224_vm1  ;;  %v6431_v27 = vld [vmem:[%s11097_s7 + $0x78] sm:$0xff] }
 0x84c   :  { %5954 = vmatpush.bf16.msra.mxu2 %v6431_v27 }
 0x84d   :  { %7942 = vrot.lane.b32.xlu1 %v7941_v23, %s7990_s26  ;;  %7937 = vrot.lane.b32.xlu2 %v7936_v36, %s7991_s27  ;;  %v5479_v30 = vld [vmem:[#allocation4 + $0x90] ss:$2 sm:$0x1]  ;;  %v5489_v37 = vld [vmem:[#allocation4 + $0x91] ss:$2 sm:$0x1] }
 0x84e   :  { %v5499_v8 = vmax.f32 %v5479_v30, %v5489_v37 }
 0x850   :  { %v5571_v14 = vrot.slane %v5499_v8, 2 }
 0x852   :  { %v5572_v51 = vsel %vm2066_vm12, %v5569_v24, %v5571_v14  ;;  %vm11225_vm12 = vmmov %vm11218_vm4 }
 0x855   :  { %5589 = vrot.lane.b32.xlu2 %v5572_v51, %s7990_s26 }
 0x87f   :  { %v7933_v21 = vpop.permute.xlu0 %7932  ;;  %v7928_v20 = vpop.permute.xlu1 %7927 }
 0x880   :  { %v7935_v63 = vunpack.i.h.bf16 %v7933_v21  ;;  %v7934_v13 = vunpack.i.l.bf16 %v7933_v21  ;;  %v7930_v5 = vunpack.i.h.bf16 %v7928_v20  ;;  %v7929_v61 = vunpack.i.l.bf16 %v7928_v20 }
 0x882   :  { %v5605_v53 = vsel %vm2470_vm0, %v10902_v43, %v7930_v5  ;;  %v5604_v40 = vsel %vm2470_vm0, %v10875_v41, %v7929_v61 }
 0x883   :  { %v5613_v46 = vsel %vm11223_vm13, %v5604_v40, %v7934_v13  ;;  %v5614_v38 = vsel %vm11224_vm1, %v5605_v53, %v7935_v63  ;;  %vm11235_vm13 = vcmask 957440  }
 0x884   :  { %v5620_v45 = vpack.c.bf16 %v5614_v38, %v5613_v46  ;;  %v6430_v46 = vld [vmem:[%s11097_s7 + $0x70] sm:$0xff]  ;;  %v6429_v38 = vld [vmem:[%s11097_s7 + $0x68] sm:$0xff] }
 0x885   :  { %5955 = vmatpush.bf16.msra.mxu2 %v6430_v46 }
 0x886   :  { %6292 = vmatmul.msk.bf16.gmra.mxu1 %vm11225_vm12, %v5620_v45  ;;  %v6428_v45 = vld [vmem:[%s11097_s7 + $0x60] sm:$0xff] }
 0x889   :  { %5956 = vmatpush.bf16.msra.mxu2 %v6429_v38 }
 0x88d   :  { %5957 = vmatpush.bf16.msra.mxu2 %v6428_v45 }
 0x88f   :  { %v5666_v49 = vpop.f32.mrf.mxu1 }
 0x890   :  { %v5667_v32 = vadd.f32 %v10971_v31, %v5666_v49  ;;  %v6427_v49 = vld [vmem:[%s11097_s7 + $0x58] sm:$0xff] }
 0x891   :  { %5958 = vmatpush.bf16.msra.mxu2 %v6427_v49 }
 0x892   :  { %v5690_v62 = vmax.f32 %v5667_v32, 0.0  ;;  %v6422_v32 = vld [vmem:[%s11097_s7 + $0x30] sm:$0xff] }
 0x894   :  { %5699 = vst.msk [vmem:[#allocation5] sm:$0xff] %vm2470_vm0, %v5690_v62 }
 0x897   :  { %v5668_v43 = vpop.f32.mrf.mxu1 }
 0x898   :  { %v5669_v41 = vadd.f32 %v10971_v31, %v5668_v43 }
 0x89a   :  { %v5691_v17 = vmax.f32 %v5669_v41, 0.0 }
 0x89c   :  { %5700 = vst.msk [vmem:[#allocation5 + $0x8] sm:$0xff] %vm2470_vm0, %v5691_v17  ;;  %v6421_v17 = vld [vmem:[%s11097_s7 + $0x28] sm:$0xff] }
 0x8a3   :  { %v5708_v15 = vld [vmem:[#allocation5] ss:$2 sm:$0xff]  ;;  %v5713_v12 = vld [vmem:[#allocation5 + $0x1] ss:$2 sm:$0xff] }
 0x8a4   :  { %v5718_v58 = vmax.f32 %v5708_v15, %v5713_v12  ;;  %v6426_v15 = vld [vmem:[%s11097_s7 + $0x50] sm:$0xff]  ;;  %v6420_v12 = vld [vmem:[%s11097_s7 + $0x20] sm:$0xff] }
 0x8a5   :  { %5959 = vmatpush.bf16.msra.mxu2 %v6426_v15 }
 0x8a6   :  { %5723 = vxpose.xlu1.b32.start [1/5] (short) (narrow) %v5718_v58, 8 }
 0x8a7   :  { %v7938_v60 = vpop.permute.xlu2 %7937 }
 0x8a8   :  { %v7940_v57 = vunpack.i.h.bf16 %v7938_v60  ;;  %v7939_v4 = vunpack.i.l.bf16 %v7938_v60 }
 0x8aa   :  { %v5607_v22 = vsel %vm2470_vm0, %v5497_v52, %v7940_v57  ;;  %v5606_v56 = vsel %vm2470_vm0, %v10906_v42, %v7939_v4 }
 0x8af   :  { %v5590_v39 = vpop.permute.xlu2 %5589 }
 0x8bc   :  { %v5543_v9 = vpop.permute.xlu0 %5542 }
 0x8bd   :  { %v5608_v42 = vsel %vm2470_vm0, %v10944_v11, %v5543_v9 }
 0x8be   :  { %v5671_v2 = vpop.f32.mrf.mxu1  ;;  %v5617_v48 = vsel %vm11228_vm6, %v5608_v42, %v5590_v39 }
 0x8bf   :  { %v5672_v28 = vadd.f32 %v10971_v31, %v5671_v2  ;;  %v7943_v59 = vpop.permute.xlu1 %7942  ;;  %v5622_v19 = vpack.c.bf16 %v5617_v48, %v5617_v48 }
 0x8c0   :  { %v7945_v25 = vunpack.i.h.bf16 %v7943_v59  ;;  %v7944_v50 = vunpack.i.l.bf16 %v7943_v59  ;;  %v6425_v59 = vld [vmem:[%s11097_s7 + $0x48] sm:$0xff] }
 0x8c1   :  { %v5692_v3 = vmax.f32 %v5672_v28, 0.0  ;;  %v6419_v28 = vld [vmem:[%s11097_s7 + $0x18] sm:$0xff]  ;;  %5960 = vmatpush.bf16.msra.mxu2 %v6425_v59 }
 0x8c2   :  { %v5615_v6 = vsel %vm11226_vm2, %v5606_v56, %v7944_v50  ;;  %v5616_v33 = vsel %vm11227_vm3, %v5607_v22, %v7945_v25  ;;  %v6418_v25 = vld [vmem:[%s11097_s7 + $0x10] sm:$0xff]  ;;  %v6417_v50 = vld [vmem:[%s11097_s7 + $0x8] sm:$0xff]  ;;  %v6424_v22 = vld [vmem:[%s11097_s7 + $0x40] sm:$0xff] }
 0x8c3   :  { %5701 = vst.msk [vmem:[#allocation5 + $0x10] sm:$0xff] %vm2470_vm0, %v5692_v3  ;;  %v5621_v1 = vpack.c.bf16 %v5616_v33, %v5615_v6  ;;  %v6416_v56 = vld [vmem:[%s11097_s7] sm:$0xff]  ;;  %v5828_v3 = vld [vmem:[%s11097_s7 + $0x88] sm:$0xf] }
 0x8c4   :  { %v5899_v6 = vunpack.c.l.b16 %v5828_v3 }
 0x8c5   :  { %6293 = vmatmul.msk.bf16.gmra.mxu1 %vm11218_vm4, %v5621_v1  ;;  %5961 = vmatpush.bf16.msra.mxu2 %v6424_v22 }
 0x8c6   :  { %v5673_v34 = vpop.f32.mrf.mxu1  ;;  %v5917_v33 = vpack.c.b16 %v5899_v6, %v5899_v6 }
 0x8c7   :  { %v5674_v0 = vadd.f32 %v10971_v31, %v5673_v34  ;;  %v6432_v34 = vld [vmem:[%s11097_s7 + $0x80] sm:$0xff] }
 0x8c8   :  { %v5939_v1 = vsel %vm2696_vm15, %v5917_v33, 0  ;;  %vm11232_vm15 = vcmask 97280  }
 0x8c9   :  { %v5693_v29 = vmax.f32 %v5674_v0, 0.0 }
 0x8cb   :  { %5702 = vst.msk [vmem:[#allocation5 + $0x18] sm:$0xff] %vm2470_vm0, %v5693_v29 }
 0x8d2   :  { %v5709_v18 = vld [vmem:[#allocation5 + $0x10] ss:$2 sm:$0xff]  ;;  %v5714_v52 = vld [vmem:[#allocation5 + $0x11] ss:$2 sm:$0xff] }
 0x8d3   :  { %v5719_v7 = vmax.f32 %v5709_v18, %v5714_v52 }
 0x8d5   :  { %5724 = vxpose.xlu1.b32.cont [2/5] (short) (narrow) %v5719_v7, 8  ;;  %6294 = vmatmul.msk.bf16.gmra.mxu1 %vm11229_vm8, %v5622_v19 }
 0x903   :  { %v5676_v26 = vpop.f32.mrf.mxu1 }
 0x904   :  { %v5677_v10 = vadd.f32 %v10971_v31, %v5676_v26 }
 0x906   :  { %v5694_v16 = vmax.f32 %v5677_v10, 0.0 }
 0x908   :  { %5703 = vst.msk [vmem:[#allocation5 + $0x20] sm:$0xff] %vm2470_vm0, %v5694_v16 }
 0x90b   :  { %v5678_v35 = vpop.f32.mrf.mxu1 }
 0x90c   :  { %v5679_v24 = vadd.f32 %v10971_v31, %v5678_v35 }
 0x90e   :  { %v5695_v11 = vmax.f32 %v5679_v24, 0.0 }
 0x910   :  { %5704 = vst.msk [vmem:[#allocation5 + $0x28] sm:$0xff] %vm2470_vm0, %v5695_v11 }
 0x917   :  { %v5710_v44 = vld [vmem:[#allocation5 + $0x20] ss:$2 sm:$0xff]  ;;  %v5715_v55 = vld [vmem:[#allocation5 + $0x21] ss:$2 sm:$0xff] }
 0x918   :  { %v5720_v54 = vmax.f32 %v5710_v44, %v5715_v55  ;;  %v6434_v55 = vld [vmem:[%s11099_s9 + $0x8] sm:$0xff] }
 0x919   :  { %6008 = vmatpush.bf16.msrb.mxu2 %v6434_v55 }
 0x91a   :  { %5725 = vxpose.xlu1.b32.cont [3/5] (short) (narrow) %v5720_v54, 8  ;;  %v6433_v54 = vld [vmem:[%s11099_s9] sm:$0xff]  ;;  %s6021_s9 = sshll.u32 %s7999_s5, 4  ;;  %s6022_s9 = int_to_ptr.vmem [resolvable:$true] %s6021_s9 }
 0x91d   :  { %6009 = vmatpush.bf16.msrb.mxu2 %v6433_v54 }
 0x942   :  { %v5681_v47 = vpop.f32.mrf.mxu1 }
 0x943   :  { %v5682_v23 = vadd.f32 %v10971_v31, %v5681_v47 }
 0x945   :  { %v5696_v36 = vmax.f32 %v5682_v23, 0.0 }
 0x947   :  { %5705 = vst.msk [vmem:[#allocation5 + $0x30] sm:$0xff] %vm2470_vm0, %v5696_v36  ;;  %v5829_v36 = vld [vmem:[%s11098_s8] sm:$0x1]  ;;  %s6023_s8 = sshll.u32 %s11101_s11, 4  ;;  %s6024_s8 = int_to_ptr.hbm [resolvable:$true] %s6023_s8 }
 0x94a   :  { %v5683_v30 = vpop.f32.mrf.mxu1 }
 0x94b   :  { %v5684_v37 = vadd.f32 %v10971_v31, %v5683_v30 }
 0x94d   :  { %v5697_v8 = vmax.f32 %v5684_v37, 0.0 }
 0x94f   :  { %5706 = vst.msk [vmem:[#allocation5 + $0x38] sm:$0xff] %vm2470_vm0, %v5697_v8  ;;  %vm11233_vm0 = vcmask 384000  }
 0x952   :  { %v5686_v14 = vpop.f32.mrf.mxu1 }
 0x953   :  { %v5687_v51 = vadd.f32 %v10971_v31, %v5686_v14  ;;  %v6423_v31 = vld [vmem:[%s11097_s7 + $0x38] sm:$0xff] }
 0x954   :  { %5941 = vmatpush.bf16.msrb.mxu1 %v6423_v31 }
 0x955   :  { %v5698_v21 = vmax.f32 %v5687_v51, 0.0 }
 0x956   :  { %v5711_v20 = vld [vmem:[#allocation5 + $0x30] ss:$2 sm:$0xff]  ;;  %v5716_v63 = vld [vmem:[#allocation5 + $0x31] ss:$2 sm:$0xff] }
 0x957   :  { %5707 = vst.msk [vmem:[#allocation5 + $0x40] sm:$0x7f] %vm11230_vm14, %v5698_v21  ;;  %v5721_v13 = vmax.f32 %v5711_v20, %v5716_v63 }
 0x958   :  { %5942 = vmatpush.bf16.msrb.mxu1 %v6422_v32 }
 0x959   :  { %5726 = vxpose.xlu1.b32.cont [4/5] (short) (narrow) %v5721_v13, 8  ;;  %v5986_v13 = vld [vmem:[%s11100_s10] sm:$0x1] }
 0x95a   :  { %v5688_v5 = vpop.f32.mrf.mxu1 }
 0x95c   :  { %5943 = vmatpush.bf16.msrb.mxu1 %v6421_v17 }
 0x95e   :  { %v5712_v61 = vld [vmem:[#allocation5 + $0x40] ss:$2 sm:$0x7]  ;;  %v5717_v53 = vld [vmem:[#allocation5 + $0x41] ss:$2 sm:$0x7] }
 0x95f   :  { %v5722_v40 = vmax.f32 %v5712_v61, %v5717_v53 }
 0x960   :  { %5944 = vmatpush.bf16.msrb.mxu1 %v6420_v12 }
 0x961   :  { %5727 = vxpose.xlu1.b32.end [5/5] (short) (narrow) %v5722_v40, 8 }
 0x964   :  { %5945 = vmatpush.bf16.msrb.mxu1 %v6419_v28 }
 0x968   :  { %5946 = vmatpush.bf16.msrb.mxu1 %v6418_v25 }
 0x96c   :  { %5947 = vmatpush.bf16.msrb.mxu1 %v6417_v50 }
 0x970   :  { %5948 = vmatpush.bf16.msrb.mxu1 %v6416_v56 }
 0x974   :  { %5973 = vmatpush.bf16.msra.mxu1 %v5939_v1 }
 0x978   :  { %5974 = vmatpush.bf16.msra.mxu1 %v6432_v34 }
 0x9e5   :  { %v5739_v62 = vpop.trf.xlu1 }
 0x9e6   :  { %v5760_v43 = vrot.slane %v5739_v62, 2  ;;  %v5756_v41 = vrot.slane %v5739_v62, 1  ;;  %v5768_v58 = vrot.slane %v5739_v62, 4  ;;  %v5764_v60 = vrot.slane %v5739_v62, 3 }
 0x9e7   :  { %v5776_v57 = vrot.slane %v5739_v62, 6  ;;  %v5772_v4 = vrot.slane %v5739_v62, 5  ;;  %v5780_v2 = vrot.slane %v5739_v62, 7 }
 0x9e8   :  { %5761 = vrot.lane.b32.xlu2 %v5760_v43, %s7994_s14  ;;  %5757 = vrot.lane.b32.xlu0 %v5756_v41, %s7998_s22  ;;  %s11231_s14 = smov 117  }
 0x9f0   :  { %5769 = vrot.lane.b32.xlu2 %v5768_v58, %s7995_s15  ;;  %5765 = vrot.lane.b32.xlu0 %v5764_v60, %s7996_s1 }
 0x9f8   :  { %5777 = vrot.lane.b32.xlu2 %v5776_v57, %s7993_s13  ;;  %5773 = vrot.lane.b32.xlu0 %v5772_v4, %s7997_s16 }
 0xa00   :  { %5781 = vrot.lane.b32.xlu0 %v5780_v2, %s11231_s14 }
 0xa42   :  { %v5762_v29 = vpop.permute.xlu2 %5761 }
 0xa4a   :  { %v5770_v52 = vpop.permute.xlu2 %5769 }
 0xa52   :  { %v5778_v10 = vpop.permute.xlu2 %5777 }
 0xa5a   :  { %v5758_v0 = vpop.permute.xlu0 %5757 }
 0xa5b   :  { %v5784_v9 = vsel %vm1532_vm7, %v5739_v62, %v5758_v0  ;;  %vm11236_vm7 = vmmov %vm11218_vm4 }
 0xa5c   :  { %v5785_v42 = vsel %vm2838_vm9, %v5784_v9, %v5762_v29  ;;  %vm11237_vm9 = vcmask 261120  }
 0xa62   :  { %v5766_v39 = vpop.permute.xlu0 %5765 }
 0xa63   :  { %v5786_v48 = vsel %vm2840_vm10, %v5785_v42, %v5766_v39  ;;  %v5787_v7 = vsel %vm11232_vm15, %v5766_v39, %v5770_v52 }
 0xa64   :  { %v5791_v18 = vpack.c.bf16 %v5786_v48, %v5786_v48 }
 0xa66   :  { %5949 = vmatmul.bf16.vlgmr.msrb.gmra.mxu1 %v5791_v18 }
 0xa6a   :  { %v5774_v19 = vpop.permute.xlu0 %5773 }
 0xa6b   :  { %v5788_v26 = vsel %vm11233_vm0, %v5787_v7, %v5774_v19 }
 0xa6c   :  { %v5789_v16 = vsel %vm11234_vm11, %v5788_v26, %v5778_v10 }
 0xa72   :  { %v5782_v35 = vpop.permute.xlu0 %5781 }
 0xa73   :  { %v5790_v24 = vsel %vm11235_vm13, %v5789_v16, %v5782_v35  ;;  %v5793_v11 = vpack.c.bf16 %v5782_v35, %v5782_v35 }
 0xa74   :  { %v5792_v44 = vpack.c.bf16 %v5790_v24, %v5790_v24 }
 0xa76   :  { %5962 = vmatmul.bf16.vlgmr.msra.gmra.mxu2 %v5792_v44  ;;  %6363 = vmatmul.msk.bf16.vlgmr.msra.gmra.mxu1 %vm11236_vm7, %v5793_v11 }
 0xae3   :  { %v5950_v27 = vpop.f32.mrf.mxu1 }
 0xae4   :  { %v5951_v30 = vadd.f32 %v5950_v27, %v5829_v36 }
 0xaeb   :  { %v5952_v47 = vpop.f32.mrf.mxu1 }
 0xaf3   :  { %v5976_v23 = vpop.f32.mrf.mxu1 }
 0xaf9   :  { %v5963_v37 = vpop.f32.mrf.mxu2 }
 0xafa   :  { %v5964_v8 = vadd.f32 %v5963_v37, %v5951_v30 }
 0xafb   :  { %v5978_v14 = vpop.f32.mrf.mxu1 }
 0xafc   :  { %v5977_v51 = vadd.f32 %v5976_v23, %v5964_v8 }
 0xafe   :  { %v5980_v21 = vmax.f32 %v5977_v51, 0.0 }
 0xb00   :  { %v5981_v20 = vpack.c.bf16 %v5980_v21, %v5980_v21 }
 0xb01   :  { %v5965_v63 = vpop.f32.mrf.mxu2 }
 0xb02   :  { %6372 = vmatmul.msk.bf16.vlgmr.msrb.gmra.mxu2 %vm11237_vm9, %v5981_v20 }
 0xb85   :  { %v6011_v5 = vpop.f32.mrf.mxu2 }
 0xb86   :  { %v6012_v61 = vadd.f32 %v6011_v5, %v5986_v13 }
 0xb88   :  { %6016 = vst.msk [vmem:[#allocation6 + $0x1] sm:$0x1] %vm3074_vm5, %v6012_v61 }
 0xb89   :  { %6029 = dma.vmem_to_hbm [thread:$0]  %s6022_s9, 32, %s6024_s8, [#allocation7], %s7990_s26, %s7990_s26, %s8000_s12  }
 0xb8d   :  { %v6013_v53 = vpop.f32.mrf.mxu2 }
 0xb8e   :  { %7978 = dma.done.wait [#allocation7], 32  }
 0xb8f   :  { %7979 = vsyncadd [#allocation7], 4294967264 }
 0xb90   :  { %6034 = vsyncpa [#allocation7], 1 }

</bundles_post_ra>
